<compile_context>
chip_gen: v7x
topology: tpu7x:2x2x1
jax: 0.10.0
libtpu: 0.0.40
codegen_flags: <defaults>
</compile_context>

<pallas_src>
import functools

import jax
import jax.numpy as jnp
import numpy as np
from jax.experimental import pallas as pl
from jax.experimental.pallas import tpu as pltpu


# ----------------------------------------------------------------------------
# Pallas kernel 1: 1x1 conv as matmul + bias (BN scale folded into W) + SiLU
# ----------------------------------------------------------------------------
def _mm_bias_silu_kernel(x_ref, w_ref, b_ref, o_ref):
    y = jnp.dot(x_ref[...], w_ref[...], preferred_element_type=jnp.float32)
    y = y + b_ref[...]
    y = y * jax.nn.sigmoid(y)                                # SiLU
    o_ref[...] = y.astype(o_ref.dtype)


def matmul_bias_silu(x2d, wmat, bias, out_dtype=jnp.bfloat16, tm_max=512):
    n, cin = x2d.shape
    cout = wmat.shape[1]
    tm = n if n <= tm_max else tm_max            # big tiles; ragged last tile OK
    return pl.pallas_call(
        _mm_bias_silu_kernel,
        out_shape=jax.ShapeDtypeStruct((n, cout), out_dtype),
        grid=(pl.cdiv(n, tm),),
        in_specs=[
            pl.BlockSpec((tm, cin), lambda i: (i, 0)),
            pl.BlockSpec((cin, cout), lambda i: (0, 0)),
            pl.BlockSpec((1, cout), lambda i: (0, 0)),
        ],
        out_specs=pl.BlockSpec((tm, cout), lambda i: (i, 0)),
        compiler_params=pltpu.CompilerParams(dimension_semantics=("parallel",)),
    )(x2d, wmat, bias)


# ----------------------------------------------------------------------------
# Pallas kernel 2: cv2 -- two accumulated matmuls (replaces torch.cat) + SiLU
# ----------------------------------------------------------------------------
def _dual_mm_bias_silu_kernel(a_ref, b_ref, wa_ref, wb_ref, bias_ref, o_ref):
    y = jnp.dot(a_ref[...], wa_ref[...], preferred_element_type=jnp.float32)
    y = y + jnp.dot(b_ref[...], wb_ref[...], preferred_element_type=jnp.float32)
    y = y + bias_ref[...]
    y = y * jax.nn.sigmoid(y)
    o_ref[...] = y.astype(o_ref.dtype)


def dual_matmul_bias_silu(a2d, b2d, wa, wb, bias, out_dtype=jnp.float32,
                          tm_max=512):
    n, ca = a2d.shape
    cb = b2d.shape[1]
    cout = wa.shape[1]
    tm = n if n <= tm_max else tm_max
    return pl.pallas_call(
        _dual_mm_bias_silu_kernel,
        out_shape=jax.ShapeDtypeStruct((n, cout), out_dtype),
        grid=(pl.cdiv(n, tm),),
        in_specs=[
            pl.BlockSpec((tm, ca), lambda i: (i, 0)),
            pl.BlockSpec((tm, cb), lambda i: (i, 0)),
            pl.BlockSpec((ca, cout), lambda i: (0, 0)),
            pl.BlockSpec((cb, cout), lambda i: (0, 0)),
            pl.BlockSpec((1, cout), lambda i: (0, 0)),
        ],
        out_specs=pl.BlockSpec((tm, cout), lambda i: (i, 0)),
        compiler_params=pltpu.CompilerParams(dimension_semantics=("parallel",)),
    )(a2d, b2d, wa, wb, bias)


# ----------------------------------------------------------------------------
# Pallas kernel 3: fully fused RFAConv
#   attention path: avg-pool(3x3,p=1) -> grouped 1x1 -> softmax over 9 taps
#   feature path  : grouped depthwise 3x3 -> folded BN -> ReLU
#   weighted data : feature * attention, kept lane-dense as (rows, 9*C)
#   rearrange + Conv(c, cout, k=3, s=3) == (rows, 9*C) @ (9*C, cout) matmul
#   -> folded BN + SiLU.  All intermediates stay in VMEM/vregs.
# ----------------------------------------------------------------------------
def _rfa_fused_kernel(tH, W, C, xp_ref, wp_ref, wf_ref, gs_ref, gb_ref,
                      wm_ref, cb_ref, o_ref):
    t = pl.program_id(1)
    row0 = pl.multiple_of(t * tH, tH)

    # padded input window for this H tile: (tH+2, W+2, C), f32 compute
    xp = xp_ref[pl.ds(row0, tH + 2), :, :].astype(jnp.float32)

    # weight refs loaded once (hoisted out of the unrolled tap loops)
    wp = wp_ref[...]          # (9, 1, C)    get_weight grouped 1x1
    wf = wf_ref[...]          # (9, 9, 1, C) generate_feature grouped 3x3
    gs = gs_ref[...]          # (9, 1, C)    folded BN scale
    gb = gb_ref[...]          # (9, 1, C)    folded BN bias

    # TODO(synk): the 9 shifted windows use sublane shifts on the W axis; a
    # (H, W*C) lane-major layout + pltpu.roll would offload them to the XLU.
    wins = [xp[dy:dy + tH, dx:dx + W, :] for dy in range(3) for dx in range(3)]

    # AvgPool2d(k=3, s=1, p=1), count_include_pad=True  -> always /9
    acc = wins[0]
    for wnd in wins[1:]:
        acc = acc + wnd
    avg = acc * (1.0 / 9.0)                                  # (tH, W, C)

    # grouped 1x1 conv -> per-channel logits, softmax over the 9 taps
    logits = [avg * wp[k] for k in range(9)]
    mx = logits[0]
    for lg in logits[1:]:
        mx = jnp.maximum(mx, lg)
    exps = [jnp.exp(lg - mx) for lg in logits]
    den = exps[0]
    for e in exps[1:]:
        den = den + e
    inv = pl.reciprocal(den, approx=True)

    # depthwise 3x3 -> BN -> ReLU, weight by softmax; keep 9*C on lanes
    parts = []
    for k in range(9):
        feat = wins[0] * wf[k, 0]
        for tt in range(1, 9):
            feat = feat + wins[tt] * wf[k, tt]
        feat = jnp.maximum(feat * gs[k] + gb[k], 0.0)
        parts.append(feat * (exps[k] * inv))
    wd = jnp.concatenate(parts, axis=-1)                     # (tH, W, 9*C)

    # rearrange + 3x3/stride-3 conv == matmul over (k, c) columns (k*C + c)
    wd2d = wd.reshape(tH * W, 9 * C).astype(jnp.bfloat16)
    y = jnp.dot(wd2d, wm_ref[...], preferred_element_type=jnp.float32)
    y = y + cb_ref[...]
    y = y * jax.nn.sigmoid(y)                                # SiLU
    o_ref[...] = y.reshape(tH, W, -1).astype(o_ref.dtype)


def _pick_h_tile(H, W, C, budget_bytes=2 << 20):
    """Largest divisor of H whose 9x-expanded f32 tile fits the VMEM budget."""
    for th in range(H, 0, -1):
        if H % th == 0 and th * W * 9 * C * 4 <= budget_bytes:
            return th
    return 1


def rfaconv_fused(x_nhwc, p):
    B, H, W, C = x_nhwc.shape
    cout = p["wconv_mat"].shape[1]
    # TODO(synk): the zero pad could move into the kernel (VMEM staging) to
    # drop one HBM round-trip of the activation.
    xp = jnp.pad(x_nhwc, ((0, 0), (1, 1), (1, 1), (0, 0)))
    tH = _pick_h_tile(H, W, C)
    return pl.pallas_call(
        functools.partial(_rfa_fused_kernel, tH, W, C),
        out_shape=jax.ShapeDtypeStruct((B, H, W, cout), jnp.bfloat16),
        grid=(B, H // tH),
        in_specs=[
            pl.BlockSpec((None, H + 2, W + 2, C), lambda b, t: (b, 0, 0, 0)),
            pl.BlockSpec((9, 1, C), lambda b, t: (0, 0, 0)),
            pl.BlockSpec((9, 9, 1, C), lambda b, t: (0, 0, 0, 0)),
            pl.BlockSpec((9, 1, C), lambda b, t: (0, 0, 0)),
            pl.BlockSpec((9, 1, C), lambda b, t: (0, 0, 0)),
            pl.BlockSpec((9 * C, cout), lambda b, t: (0, 0)),
            pl.BlockSpec((1, cout), lambda b, t: (0, 0)),
        ],
        out_specs=pl.BlockSpec((None, tH, W, cout), lambda b, t: (b, t, 0, 0)),
        compiler_params=pltpu.CompilerParams(
            dimension_semantics=("parallel", "parallel")),
    )(xp, p["wpool_k"], p["wfeat_k"], p["gf_bn_s_k"], p["gf_bn_b_k"],
      p["wconv_mat"], p["conv_bias"])


# ----------------------------------------------------------------------------
# Module forward (glue in plain JAX, hot paths in the three Pallas kernels)
# ----------------------------------------------------------------------------
def a2c2f_rfaconv_forward(x_nchw, params):
    B, C1, H, W = x_nchw.shape
    N = B * H * W
    x2d = jnp.transpose(x_nchw, (0, 2, 3, 1)).reshape(N, C1).astype(jnp.bfloat16)
    # cv1: 1x1 conv + (folded) BN + SiLU
    y0 = matmul_bias_silu(x2d, params["cv1_wmat"], params["cv1_bias"])
    # m[0] = Sequential(RFAConv, RFAConv), each fully fused
    cur = y0.reshape(B, H, W, -1)
    for key in ("rfa0", "rfa1"):
        cur = rfaconv_fused(cur, params[key])
    # cv2 on torch.cat((y0, m_out), 1) == two accumulated matmuls
    out2d = dual_matmul_bias_silu(y0, cur.reshape(N, -1),
                                  params["cv2_wmat_a"], params["cv2_wmat_b"],
                                  params["cv2_bias"], out_dtype=jnp.float32)
    c2 = params["cv2_wmat_a"].shape[1]
    # gamma is None (residual=False): no residual add
    return out2d.reshape(B, H, W, c2).transpose(0, 3, 1, 2)


# ----------------------------------------------------------------------------
# Deterministic parameter construction (torch layouts + kernel layouts)
# ----------------------------------------------------------------------------
def conv_w(key, shape):
    fan_in = int(np.prod(shape[1:]))
    return ((2.0 / fan_in) ** 0.5) * jax.random.normal(key, shape, jnp.float32)


def fold_bn(key, c, eps=1e-5):
    k1, k2, k3, k4 = jax.random.split(key, 4)
    gamma = 1.0 + 0.1 * jax.random.normal(k1, (c,), jnp.float32)
    beta = 0.1 * jax.random.normal(k2, (c,), jnp.float32)
    mean = 0.1 * jax.random.normal(k3, (c,), jnp.float32)
    var = jax.random.uniform(k4, (c,), jnp.float32, 0.5, 1.5)
    scale = gamma / jnp.sqrt(var + eps)
    bias = beta - mean * scale
    return scale, bias


def make_rfa_params(key, c):
    ks = jax.random.split(key, 5)
    wpool = conv_w(ks[0], (c * 9, 1, 1, 1))     # get_weight: grouped 1x1
    wfeat = conv_w(ks[1], (c * 9, 1, 3, 3))     # generate_feature: grouped 3x3
    gf_s, gf_b = fold_bn(ks[2], c * 9)
    wconv = conv_w(ks[3], (c, c, 3, 3))         # Conv(c, c, k=3, s=3, p=0)
    cv_s, cv_b = fold_bn(ks[4], c)
    torch_p = dict(wpool=wpool, wfeat=wfeat, gf_bn_s=gf_s, gf_bn_b=gf_b,
                   wconv=wconv, conv_bn_s=cv_s, conv_bn_b=cv_b)
    # kernel layouts: leading axis k (softmax tap), channel last, BN folded
    wpool_k = wpool[:, 0, 0, 0].reshape(c, 9).T.reshape(9, 1, c)
    wfeat_k = wfeat[:, 0].reshape(c, 9, 9).transpose(1, 2, 0).reshape(9, 9, 1, c)
    gf_s_k = gf_s.reshape(c, 9).T.reshape(9, 1, c)
    gf_b_k = gf_b.reshape(c, 9).T.reshape(9, 1, c)
    wconv_mat = wconv.reshape(c, c, 9).transpose(2, 1, 0).reshape(9 * c, c)
    wconv_mat = (wconv_mat * cv_s[None, :]).astype(jnp.bfloat16)  # fold BN scale
    pallas_p = dict(wpool_k=wpool_k, wfeat_k=wfeat_k, gf_bn_s_k=gf_s_k,
                    gf_bn_b_k=gf_b_k, wconv_mat=wconv_mat,
                    conv_bias=cv_b.reshape(1, c))
    return torch_p, pallas_p


# ----------------------------------------------------------------------------
# Pure-JAX reference with PyTorch semantics (NCHW, lax.conv) for validation
# ----------------------------------------------------------------------------
def _conv2d(x, w, stride=1, padding=0, groups=1):
    return jax.lax.conv_general_dilated(
        x, w, (stride, stride), [(padding, padding), (padding, padding)],
        dimension_numbers=("NCHW", "OIHW", "NCHW"),
        feature_group_count=groups, precision=jax.lax.Precision.HIGHEST)


def _bn(x, s, b):
    return x * s[None, :, None, None] + b[None, :, None, None]


def _silu(x):
    return x * jax.nn.sigmoid(x)


def rfaconv_ref(x, p):
    b, c, H, W = x.shape
    pooled = jax.lax.reduce_window(
        x, 0.0, jax.lax.add, (1, 1, 3, 3), (1, 1, 1, 1),
        [(0, 0), (0, 0), (1, 1), (1, 1)]) / 9.0
    weight = _conv2d(pooled, p["wpool"], groups=c)
    weighted = jax.nn.softmax(weight.reshape(b, c, 9, H, W), axis=2)
    feat = _conv2d(x, p["wfeat"], padding=1, groups=c)
    feat = jnp.maximum(_bn(feat, p["gf_bn_s"], p["gf_bn_b"]), 0.0)
    wd = feat.reshape(b, c, 9, H, W) * weighted
    conv_data = wd.reshape(b, c, 3, 3, H, W).transpose(0, 1, 4, 2, 5, 3)
    conv_data = conv_data.reshape(b, c, 3 * H, 3 * W)
    y = _conv2d(conv_data, p["wconv"], stride=3)
    return _silu(_bn(y, p["conv_bn_s"], p["conv_bn_b"]))


def a2c2f_ref(x, tp):
    y0 = _silu(_bn(_conv2d(x, tp["cv1_w"]), tp["cv1_bn_s"], tp["cv1_bn_b"]))
    y1 = rfaconv_ref(y0, tp["rfa0"])
    y1 = rfaconv_ref(y1, tp["rfa1"])
    cat = jnp.concatenate([y0, y1], axis=1)
    return _silu(_bn(_conv2d(cat, tp["cv2_w"]), tp["cv2_bn_s"], tp["cv2_bn_b"]))


# ----------------------------------------------------------------------------
if __name__ == "__main__":
    B, C1, H, W = 2, 32, 8, 8
    C2 = 64
    c_ = int(C2 * 0.5)          # 32, satisfies the %32 assertion

    key = jax.random.PRNGKey(0)
    keys = jax.random.split(key, 8)
    x = jax.random.normal(keys[0], (B, C1, H, W), jnp.float32)

    cv1_w = conv_w(keys[1], (c_, C1, 1, 1))
    cv1_s, cv1_b = fold_bn(keys[2], c_)
    rfa0_t, rfa0_p = make_rfa_params(keys[3], c_)
    rfa1_t, rfa1_p = make_rfa_params(keys[4], c_)
    cv2_w = conv_w(keys[5], (C2, 2 * c_, 1, 1))
    cv2_s, cv2_b = fold_bn(keys[6], C2)

    cv2_full = cv2_w[:, :, 0, 0].T * cv2_s[None, :]          # (2c_, C2), BN folded
    params = dict(
        cv1_wmat=(cv1_w[:, :, 0, 0].T * cv1_s[None, :]).astype(jnp.bfloat16),
        cv1_bias=cv1_b.reshape(1, c_),
        rfa0=rfa0_p, rfa1=rfa1_p,
        cv2_wmat_a=cv2_full[:c_].astype(jnp.bfloat16),
        cv2_wmat_b=cv2_full[c_:].astype(jnp.bfloat16),
        cv2_bias=cv2_b.reshape(1, C2),
    )

    fwd = jax.jit(a2c2f_rfaconv_forward)
    out = jax.block_until_ready(fwd(x, params))
    assert out.shape == (B, C2, H, W) and out.dtype == jnp.float32

    torch_params = dict(cv1_w=cv1_w, cv1_bn_s=cv1_s, cv1_bn_b=cv1_b,
                        rfa0=rfa0_t, rfa1=rfa1_t,
                        cv2_w=cv2_w, cv2_bn_s=cv2_s, cv2_bn_b=cv2_b)
    ref = jax.block_until_ready(a2c2f_ref(x, torch_params))
    # bf16 activations/weights (f32 accumulation) vs f32 HIGHEST-precision ref
    np.testing.assert_allclose(np.asarray(out), np.asarray(ref),
                               rtol=5e-2, atol=5e-2)
    print("KERNEL_OK")
</pallas_src>

<mosaic_0001>
module attributes {stable_mosaic.version = 11 : i64} {
  func.func @_mm_bias_silu_kernel(%arg0: i32, %arg1: memref<128x32xbf16, #tpu.memory_space<vmem>>, %arg2: memref<32x32xbf16, #tpu.memory_space<vmem>>, %arg3: memref<1x32xf32, #tpu.memory_space<vmem>>, %arg4: memref<128x32xbf16, #tpu.memory_space<vmem>>) attributes {dimension_semantics = [#tpu.dimension_semantics<parallel>], iteration_bounds = array<i64: 1>, scalar_prefetch = 0 : i64, scratch_operands = 0 : i64, tpu.core_type = #tpu.core_type<tc>, window_params = [{transform_indices = @transform_0, window_bounds = array<i64: 128, 32>}, {pipeline_mode = #tpu.pipeline_mode<synchronous>, transform_indices = @transform_1, window_bounds = array<i64: 32, 32>}, {pipeline_mode = #tpu.pipeline_mode<synchronous>, transform_indices = @transform_2, window_bounds = array<i64: 1, 32>}, {transform_indices = @transform_3, window_bounds = array<i64: 128, 32>}]} {
    %c0 = arith.constant 0 : index
    %c0_0 = arith.constant 0 : index
    %0 = vector.load %arg1[%c0, %c0_0] : memref<128x32xbf16, #tpu.memory_space<vmem>>, vector<128x32xbf16>
    %c0_1 = arith.constant 0 : index
    %c0_2 = arith.constant 0 : index
    %1 = vector.load %arg2[%c0_1, %c0_2] : memref<32x32xbf16, #tpu.memory_space<vmem>>, vector<32x32xbf16>
    %cst = arith.constant dense<0.000000e+00> : vector<128x32xf32>
    %2 = tpu.matmul %0, %1, %cst {dimension_numbers = #tpu.dot_dimension_numbers<[1], [0], [0], [1], [0, 0, 1, 1], [], []>} : vector<128x32xbf16>, vector<32x32xbf16>, vector<128x32xf32> -> vector<128x32xf32>
    %c0_3 = arith.constant 0 : index
    %c0_4 = arith.constant 0 : index
    %3 = vector.load %arg3[%c0_3, %c0_4] : memref<1x32xf32, #tpu.memory_space<vmem>>, vector<1x32xf32>
    %4 = vector.broadcast %3 : vector<1x32xf32> to vector<128x32xf32>
    %5 = arith.addf %2, %4 : vector<128x32xf32>
    %6 = arith.negf %5 : vector<128x32xf32>
    %7 = math.exp %6 : vector<128x32xf32>
    %cst_5 = arith.constant 1.000000e+00 : f32
    %8 = vector.broadcast %cst_5 : f32 to vector<128x32xf32>
    %9 = arith.addf %8, %7 : vector<128x32xf32>
    %10 = arith.divf %8, %9 : vector<128x32xf32>
    %11 = arith.mulf %5, %10 : vector<128x32xf32>
    %12 = arith.truncf %11 : vector<128x32xf32> to vector<128x32xbf16>
    %c0_6 = arith.constant 0 : index
    %c0_7 = arith.constant 0 : index
    %13 = vector.load %arg4[%c0_6, %c0_7] : memref<128x32xbf16, #tpu.memory_space<vmem>>, vector<128x32xbf16>
    tpu.vector_store %arg4[%c0_6, %c0_7], %12 {strides = array<i32>} : memref<128x32xbf16, #tpu.memory_space<vmem>>, vector<128x32xbf16>,
    return
  }
  func.func @transform_0(%arg0: i32) -> (i32, i32) {
    %c0_i32 = arith.constant 0 : i32
    %c0_i32_0 = arith.constant 0 : i32
    return %arg0, %c0_i32 : i32, i32
  }
  func.func @transform_1(%arg0: i32) -> (i32, i32) {
    %c0_i32 = arith.constant 0 : i32
    %c0_i32_0 = arith.constant 0 : i32
    %c0_i32_1 = arith.constant 0 : i32
    return %c0_i32, %c0_i32_0 : i32, i32
  }
  func.func @transform_2(%arg0: i32) -> (i32, i32) {
    %c0_i32 = arith.constant 0 : i32
    %c0_i32_0 = arith.constant 0 : i32
    %c0_i32_1 = arith.constant 0 : i32
    return %c0_i32, %c0_i32_0 : i32, i32
  }
  func.func @transform_3(%arg0: i32) -> (i32, i32) {
    %c0_i32 = arith.constant 0 : i32
    %c0_i32_0 = arith.constant 0 : i32
    return %arg0, %c0_i32 : i32, i32
  }
}

module attributes {stable_mosaic.version = 11 : i64} {
  func.func @_dual_mm_bias_silu_kernel(%arg0: i32, %arg1: memref<128x32xbf16, #tpu.memory_space<vmem>>, %arg2: memref<128x32xbf16, #tpu.memory_space<vmem>>, %arg3: memref<32x64xbf16, #tpu.memory_space<vmem>>, %arg4: memref<32x64xbf16, #tpu.memory_space<vmem>>, %arg5: memref<1x64xf32, #tpu.memory_space<vmem>>, %arg6: memref<128x64xf32, #tpu.memory_space<vmem>>) attributes {dimension_semantics = [#tpu.dimension_semantics<parallel>], iteration_bounds = array<i64: 1>, scalar_prefetch = 0 : i64, scratch_operands = 0 : i64, tpu.core_type = #tpu.core_type<tc>, window_params = [{transform_indices = @transform_0, window_bounds = array<i64: 128, 32>}, {transform_indices = @transform_1, window_bounds = array<i64: 128, 32>}, {pipeline_mode = #tpu.pipeline_mode<synchronous>, transform_indices = @transform_2, window_bounds = array<i64: 32, 64>}, {pipeline_mode = #tpu.pipeline_mode<synchronous>, transform_indices = @transform_3, window_bounds = array<i64: 32, 64>}, {pipeline_mode = #tpu.pipeline_mode<synchronous>, transform_indices = @transform_4, window_bounds = array<i64: 1, 64>}, {transform_indices = @transform_5, window_bounds = array<i64: 128, 64>}]} {
    %c0 = arith.constant 0 : index
    %c0_0 = arith.constant 0 : index
    %0 = vector.load %arg1[%c0, %c0_0] : memref<128x32xbf16, #tpu.memory_space<vmem>>, vector<128x32xbf16>
    %c0_1 = arith.constant 0 : index
    %c0_2 = arith.constant 0 : index
    %1 = vector.load %arg3[%c0_1, %c0_2] : memref<32x64xbf16, #tpu.memory_space<vmem>>, vector<32x64xbf16>
    %cst = arith.constant dense<0.000000e+00> : vector<128x64xf32>
    %2 = tpu.matmul %0, %1, %cst {dimension_numbers = #tpu.dot_dimension_numbers<[1], [0], [0], [1], [0, 0, 1, 1], [], []>} : vector<128x32xbf16>, vector<32x64xbf16>, vector<128x64xf32> -> vector<128x64xf32>
    %c0_3 = arith.constant 0 : index
    %c0_4 = arith.constant 0 : index
    %3 = vector.load %arg2[%c0_3, %c0_4] : memref<128x32xbf16, #tpu.memory_space<vmem>>, vector<128x32xbf16>
    %c0_5 = arith.constant 0 : index
    %c0_6 = arith.constant 0 : index
    %4 = vector.load %arg4[%c0_5, %c0_6] : memref<32x64xbf16, #tpu.memory_space<vmem>>, vector<32x64xbf16>
    %cst_7 = arith.constant dense<0.000000e+00> : vector<128x64xf32>
    %5 = tpu.matmul %3, %4, %cst_7 {dimension_numbers = #tpu.dot_dimension_numbers<[1], [0], [0], [1], [0, 0, 1, 1], [], []>} : vector<128x32xbf16>, vector<32x64xbf16>, vector<128x64xf32> -> vector<128x64xf32>
    %6 = arith.addf %2, %5 : vector<128x64xf32>
    %c0_8 = arith.constant 0 : index
    %c0_9 = arith.constant 0 : index
    %7 = vector.load %arg5[%c0_8, %c0_9] : memref<1x64xf32, #tpu.memory_space<vmem>>, vector<1x64xf32>
    %8 = vector.broadcast %7 : vector<1x64xf32> to vector<128x64xf32>
    %9 = arith.addf %6, %8 : vector<128x64xf32>
    %10 = arith.negf %9 : vector<128x64xf32>
    %11 = math.exp %10 : vector<128x64xf32>
    %cst_10 = arith.constant 1.000000e+00 : f32
    %12 = vector.broadcast %cst_10 : f32 to vector<128x64xf32>
    %13 = arith.addf %12, %11 : vector<128x64xf32>
    %14 = arith.divf %12, %13 : vector<128x64xf32>
    %15 = arith.mulf %9, %14 : vector<128x64xf32>
    %c0_11 = arith.constant 0 : index
    %c0_12 = arith.constant 0 : index
    %16 = vector.load %arg6[%c0_11, %c0_12] : memref<128x64xf32, #tpu.memory_space<vmem>>, vector<128x64xf32>
    tpu.vector_store %arg6[%c0_11, %c0_12], %15 {strides = array<i32>} : memref<128x64xf32, #tpu.memory_space<vmem>>, vector<128x64xf32>,
    return
  }
  func.func @transform_0(%arg0: i32) -> (i32, i32) {
    %c0_i32 = arith.constant 0 : i32
    %c0_i32_0 = arith.constant 0 : i32
    return %arg0, %c0_i32 : i32, i32
  }
  func.func @transform_1(%arg0: i32) -> (i32, i32) {
    %c0_i32 = arith.constant 0 : i32
    %c0_i32_0 = arith.constant 0 : i32
    return %arg0, %c0_i32 : i32, i32
  }
  func.func @transform_2(%arg0: i32) -> (i32, i32) {
    %c0_i32 = arith.constant 0 : i32
    %c0_i32_0 = arith.constant 0 : i32
    %c0_i32_1 = arith.constant 0 : i32
    return %c0_i32, %c0_i32_0 : i32, i32
  }
  func.func @transform_3(%arg0: i32) -> (i32, i32) {
    %c0_i32 = arith.constant 0 : i32
    %c0_i32_0 = arith.constant 0 : i32
    %c0_i32_1 = arith.constant 0 : i32
    return %c0_i32, %c0_i32_0 : i32, i32
  }
  func.func @transform_4(%arg0: i32) -> (i32, i32) {
    %c0_i32 = arith.constant 0 : i32
    %c0_i32_0 = arith.constant 0 : i32
    %c0_i32_1 = arith.constant 0 : i32
    return %c0_i32, %c0_i32_0 : i32, i32
  }
  func.func @transform_5(%arg0: i32) -> (i32, i32) {
    %c0_i32 = arith.constant 0 : i32
    %c0_i32_0 = arith.constant 0 : i32
    return %arg0, %c0_i32 : i32, i32
  }
}

module attributes {stable_mosaic.version = 11 : i64} {
  func.func @_rfa_fused_kernel(%arg0: i32, %arg1: i32, %arg2: memref<1x10x10x32xbf16, #tpu.memory_space<vmem>>, %arg3: memref<9x1x32xf32, #tpu.memory_space<vmem>>, %arg4: memref<9x9x1x32xf32, #tpu.memory_space<vmem>>, %arg5: memref<9x1x32xf32, #tpu.memory_space<vmem>>, %arg6: memref<9x1x32xf32, #tpu.memory_space<vmem>>, %arg7: memref<288x32xbf16, #tpu.memory_space<vmem>>, %arg8: memref<1x32xf32, #tpu.memory_space<vmem>>, %arg9: memref<1x8x8x32xbf16, #tpu.memory_space<vmem>>) attributes {dimension_semantics = [#tpu.dimension_semantics<parallel>, #tpu.dimension_semantics<parallel>], iteration_bounds = array<i64: 2, 1>, scalar_prefetch = 0 : i64, scratch_operands = 0 : i64, tpu.core_type = #tpu.core_type<tc>, window_params = [{transform_indices = @transform_0, window_bounds = array<i64: 1, 10, 10, 32>}, {pipeline_mode = #tpu.pipeline_mode<synchronous>, transform_indices = @transform_1, window_bounds = array<i64: 9, 1, 32>}, {pipeline_mode = #tpu.pipeline_mode<synchronous>, transform_indices = @transform_2, window_bounds = array<i64: 9, 9, 1, 32>}, {pipeline_mode = #tpu.pipeline_mode<synchronous>, transform_indices = @transform_3, window_bounds = array<i64: 9, 1, 32>}, {pipeline_mode = #tpu.pipeline_mode<synchronous>, transform_indices = @transform_4, window_bounds = array<i64: 9, 1, 32>}, {pipeline_mode = #tpu.pipeline_mode<synchronous>, transform_indices = @transform_5, window_bounds = array<i64: 288, 32>}, {pipeline_mode = #tpu.pipeline_mode<synchronous>, transform_indices = @transform_6, window_bounds = array<i64: 1, 32>}, {transform_indices = @transform_7, window_bounds = array<i64: 1, 8, 8, 32>}]} {
    %c8_i32 = arith.constant 8 : i32
    %0 = arith.muli %arg1, %c8_i32 : i32
    %1 = tpu.assume_multiple %0, 8 : i32
    %c0 = arith.constant 0 : index
    %2 = arith.index_cast %1 : i32 to index
    %c0_0 = arith.constant 0 : index
    %c0_1 = arith.constant 0 : index
    %3 = vector.load %arg2[%c0, %2, %c0_0, %c0_1] : memref<1x10x10x32xbf16, #tpu.memory_space<vmem>>, vector<1x10x10x32xbf16>
    %4 = vector.shape_cast %3 : vector<1x10x10x32xbf16> to vector<10x10x32xbf16>
    %5 = arith.extf %4 : vector<10x10x32xbf16> to vector<10x10x32xf32>
    %c0_2 = arith.constant 0 : index
    %c0_3 = arith.constant 0 : index
    %c0_4 = arith.constant 0 : index
    %6 = vector.load %arg3[%c0_2, %c0_3, %c0_4] : memref<9x1x32xf32, #tpu.memory_space<vmem>>, vector<9x1x32xf32>
    %c0_5 = arith.constant 0 : index
    %c0_6 = arith.constant 0 : index
    %c0_7 = arith.constant 0 : index
    %c0_8 = arith.constant 0 : index
    %7 = vector.load %arg4[%c0_5, %c0_6, %c0_7, %c0_8] : memref<9x9x1x32xf32, #tpu.memory_space<vmem>>, vector<9x9x1x32xf32>
    %c0_9 = arith.constant 0 : index
    %c0_10 = arith.constant 0 : index
    %c0_11 = arith.constant 0 : index
    %8 = vector.load %arg5[%c0_9, %c0_10, %c0_11] : memref<9x1x32xf32, #tpu.memory_space<vmem>>, vector<9x1x32xf32>
    %c0_12 = arith.constant 0 : index
    %c0_13 = arith.constant 0 : index
    %c0_14 = arith.constant 0 : index
    %9 = vector.load %arg6[%c0_12, %c0_13, %c0_14] : memref<9x1x32xf32, #tpu.memory_space<vmem>>, vector<9x1x32xf32>
    %10 = vector.extract_strided_slice %5 {offsets = [0, 0, 0], sizes = [8, 8, 32], strides = [1, 1, 1]} : vector<10x10x32xf32> to vector<8x8x32xf32>
    %11 = vector.extract_strided_slice %5 {offsets = [0, 1, 0], sizes = [8, 8, 32], strides = [1, 1, 1]} : vector<10x10x32xf32> to vector<8x8x32xf32>
    %12 = vector.extract_strided_slice %5 {offsets = [0, 2, 0], sizes = [8, 8, 32], strides = [1, 1, 1]} : vector<10x10x32xf32> to vector<8x8x32xf32>
    %13 = vector.extract_strided_slice %5 {offsets = [1, 0, 0], sizes = [8, 8, 32], strides = [1, 1, 1]} : vector<10x10x32xf32> to vector<8x8x32xf32>
    %14 = vector.extract_strided_slice %5 {offsets = [1, 1, 0], sizes = [8, 8, 32], strides = [1, 1, 1]} : vector<10x10x32xf32> to vector<8x8x32xf32>
    %15 = vector.extract_strided_slice %5 {offsets = [1, 2, 0], sizes = [8, 8, 32], strides = [1, 1, 1]} : vector<10x10x32xf32> to vector<8x8x32xf32>
    %16 = vector.extract_strided_slice %5 {offsets = [2, 0, 0], sizes = [8, 8, 32], strides = [1, 1, 1]} : vector<10x10x32xf32> to vector<8x8x32xf32>
    %17 = vector.extract_strided_slice %5 {offsets = [2, 1, 0], sizes = [8, 8, 32], strides = [1, 1, 1]} : vector<10x10x32xf32> to vector<8x8x32xf32>
    %18 = vector.extract_strided_slice %5 {offsets = [2, 2, 0], sizes = [8, 8, 32], strides = [1, 1, 1]} : vector<10x10x32xf32> to vector<8x8x32xf32>
    %19 = arith.addf %10, %11 : vector<8x8x32xf32>
    %20 = arith.addf %19, %12 : vector<8x8x32xf32>
    %21 = arith.addf %20, %13 : vector<8x8x32xf32>
    %22 = arith.addf %21, %14 : vector<8x8x32xf32>
    %23 = arith.addf %22, %15 : vector<8x8x32xf32>
    %24 = arith.addf %23, %16 : vector<8x8x32xf32>
    %25 = arith.addf %24, %17 : vector<8x8x32xf32>
    %26 = arith.addf %25, %18 : vector<8x8x32xf32>
    %cst = arith.constant 0.111111112 : f32
    %27 = vector.broadcast %cst : f32 to vector<8x8x32xf32>
    %28 = arith.mulf %26, %27 : vector<8x8x32xf32>
    %29 = vector.extract_strided_slice %6 {offsets = [0, 0, 0], sizes = [1, 1, 32], strides = [1, 1, 1]} : vector<9x1x32xf32> to vector<1x1x32xf32>
    %30 = vector.shape_cast %29 : vector<1x1x32xf32> to vector<1x32xf32>
    %31 = vector.shape_cast %30 : vector<1x32xf32> to vector<1x1x32xf32>
    %32 = vector.broadcast %31 : vector<1x1x32xf32> to vector<8x8x32xf32>
    %33 = arith.mulf %28, %32 : vector<8x8x32xf32>
    %34 = vector.extract_strided_slice %6 {offsets = [1, 0, 0], sizes = [1, 1, 32], strides = [1, 1, 1]} : vector<9x1x32xf32> to vector<1x1x32xf32>
    %35 = vector.shape_cast %34 : vector<1x1x32xf32> to vector<1x32xf32>
    %36 = vector.shape_cast %35 : vector<1x32xf32> to vector<1x1x32xf32>
    %37 = vector.broadcast %36 : vector<1x1x32xf32> to vector<8x8x32xf32>
    %38 = arith.mulf %28, %37 : vector<8x8x32xf32>
    %39 = vector.extract_strided_slice %6 {offsets = [2, 0, 0], sizes = [1, 1, 32], strides = [1, 1, 1]} : vector<9x1x32xf32> to vector<1x1x32xf32>
    %40 = vector.shape_cast %39 : vector<1x1x32xf32> to vector<1x32xf32>
    %41 = vector.shape_cast %40 : vector<1x32xf32> to vector<1x1x32xf32>
    %42 = vector.broadcast %41 : vector<1x1x32xf32> to vector<8x8x32xf32>
    %43 = arith.mulf %28, %42 : vector<8x8x32xf32>
    %44 = vector.extract_strided_slice %6 {offsets = [3, 0, 0], sizes = [1, 1, 32], strides = [1, 1, 1]} : vector<9x1x32xf32> to vector<1x1x32xf32>
    %45 = vector.shape_cast %44 : vector<1x1x32xf32> to vector<1x32xf32>
    %46 = vector.shape_cast %45 : vector<1x32xf32> to vector<1x1x32xf32>
    %47 = vector.broadcast %46 : vector<1x1x32xf32> to vector<8x8x32xf32>
    %48 = arith.mulf %28, %47 : vector<8x8x32xf32>
    %49 = vector.extract_strided_slice %6 {offsets = [4, 0, 0], sizes = [1, 1, 32], strides = [1, 1, 1]} : vector<9x1x32xf32> to vector<1x1x32xf32>
    %50 = vector.shape_cast %49 : vector<1x1x32xf32> to vector<1x32xf32>
    %51 = vector.shape_cast %50 : vector<1x32xf32> to vector<1x1x32xf32>
    %52 = vector.broadcast %51 : vector<1x1x32xf32> to vector<8x8x32xf32>
    %53 = arith.mulf %28, %52 : vector<8x8x32xf32>
    %54 = vector.extract_strided_slice %6 {offsets = [5, 0, 0], sizes = [1, 1, 32], strides = [1, 1, 1]} : vector<9x1x32xf32> to vector<1x1x32xf32>
    %55 = vector.shape_cast %54 : vector<1x1x32xf32> to vector<1x32xf32>
    %56 = vector.shape_cast %55 : vector<1x32xf32> to vector<1x1x32xf32>
    %57 = vector.broadcast %56 : vector<1x1x32xf32> to vector<8x8x32xf32>
    %58 = arith.mulf %28, %57 : vector<8x8x32xf32>
    %59 = vector.extract_strided_slice %6 {offsets = [6, 0, 0], sizes = [1, 1, 32], strides = [1, 1, 1]} : vector<9x1x32xf32> to vector<1x1x32xf32>
    %60 = vector.shape_cast %59 : vector<1x1x32xf32> to vector<1x32xf32>
    %61 = vector.shape_cast %60 : vector<1x32xf32> to vector<1x1x32xf32>
    %62 = vector.broadcast %61 : vector<1x1x32xf32> to vector<8x8x32xf32>
    %63 = arith.mulf %28, %62 : vector<8x8x32xf32>
    %64 = vector.extract_strided_slice %6 {offsets = [7, 0, 0], sizes = [1, 1, 32], strides = [1, 1, 1]} : vector<9x1x32xf32> to vector<1x1x32xf32>
    %65 = vector.shape_cast %64 : vector<1x1x32xf32> to vector<1x32xf32>
    %66 = vector.shape_cast %65 : vector<1x32xf32> to vector<1x1x32xf32>
    %67 = vector.broadcast %66 : vector<1x1x32xf32> to vector<8x8x32xf32>
    %68 = arith.mulf %28, %67 : vector<8x8x32xf32>
    %69 = vector.extract_strided_slice %6 {offsets = [8, 0, 0], sizes = [1, 1, 32], strides = [1, 1, 1]} : vector<9x1x32xf32> to vector<1x1x32xf32>
    %70 = vector.shape_cast %69 : vector<1x1x32xf32> to vector<1x32xf32>
    %71 = vector.shape_cast %70 : vector<1x32xf32> to vector<1x1x32xf32>
    %72 = vector.broadcast %71 : vector<1x1x32xf32> to vector<8x8x32xf32>
    %73 = arith.mulf %28, %72 : vector<8x8x32xf32>
    %74 = arith.maximumf %33, %38 : vector<8x8x32xf32>
    %75 = arith.maximumf %74, %43 : vector<8x8x32xf32>
    %76 = arith.maximumf %75, %48 : vector<8x8x32xf32>
    %77 = arith.maximumf %76, %53 : vector<8x8x32xf32>
    %78 = arith.maximumf %77, %58 : vector<8x8x32xf32>
    %79 = arith.maximumf %78, %63 : vector<8x8x32xf32>
    %80 = arith.maximumf %79, %68 : vector<8x8x32xf32>
    %81 = arith.maximumf %80, %73 : vector<8x8x32xf32>
    %82 = arith.subf %33, %81 : vector<8x8x32xf32>
    %83 = math.exp %82 : vector<8x8x32xf32>
    %84 = arith.subf %38, %81 : vector<8x8x32xf32>
    %85 = math.exp %84 : vector<8x8x32xf32>
    %86 = arith.subf %43, %81 : vector<8x8x32xf32>
    %87 = math.exp %86 : vector<8x8x32xf32>
    %88 = arith.subf %48, %81 : vector<8x8x32xf32>
    %89 = math.exp %88 : vector<8x8x32xf32>
    %90 = arith.subf %53, %81 : vector<8x8x32xf32>
    %91 = math.exp %90 : vector<8x8x32xf32>
    %92 = arith.subf %58, %81 : vector<8x8x32xf32>
    %93 = math.exp %92 : vector<8x8x32xf32>
    %94 = arith.subf %63, %81 : vector<8x8x32xf32>
    %95 = math.exp %94 : vector<8x8x32xf32>
    %96 = arith.subf %68, %81 : vector<8x8x32xf32>
    %97 = math.exp %96 : vector<8x8x32xf32>
    %98 = arith.subf %73, %81 : vector<8x8x32xf32>
    %99 = math.exp %98 : vector<8x8x32xf32>
    %100 = arith.addf %83, %85 : vector<8x8x32xf32>
    %101 = arith.addf %100, %87 : vector<8x8x32xf32>
    %102 = arith.addf %101, %89 : vector<8x8x32xf32>
    %103 = arith.addf %102, %91 : vector<8x8x32xf32>
    %104 = arith.addf %103, %93 : vector<8x8x32xf32>
    %105 = arith.addf %104, %95 : vector<8x8x32xf32>
    %106 = arith.addf %105, %97 : vector<8x8x32xf32>
    %107 = arith.addf %106, %99 : vector<8x8x32xf32>
    %108 = tpu.reciprocal %107 {approx = true} : vector<8x8x32xf32> -> vector<8x8x32xf32>
    %109 = vector.extract_strided_slice %7 {offsets = [0, 0, 0, 0], sizes = [1, 1, 1, 32], strides = [1, 1, 1, 1]} : vector<9x9x1x32xf32> to vector<1x1x1x32xf32>
    %110 = vector.shape_cast %109 : vector<1x1x1x32xf32> to vector<1x32xf32>
    %111 = vector.shape_cast %110 : vector<1x32xf32> to vector<1x1x32xf32>
    %112 = vector.broadcast %111 : vector<1x1x32xf32> to vector<8x8x32xf32>
    %113 = arith.mulf %10, %112 : vector<8x8x32xf32>
    %114 = vector.extract_strided_slice %7 {offsets = [0, 1, 0, 0], sizes = [1, 1, 1, 32], strides = [1, 1, 1, 1]} : vector<9x9x1x32xf32> to vector<1x1x1x32xf32>
    %115 = vector.shape_cast %114 : vector<1x1x1x32xf32> to vector<1x32xf32>
    %116 = vector.shape_cast %115 : vector<1x32xf32> to vector<1x1x32xf32>
    %117 = vector.broadcast %116 : vector<1x1x32xf32> to vector<8x8x32xf32>
    %118 = arith.mulf %11, %117 : vector<8x8x32xf32>
    %119 = arith.addf %113, %118 : vector<8x8x32xf32>
    %120 = vector.extract_strided_slice %7 {offsets = [0, 2, 0, 0], sizes = [1, 1, 1, 32], strides = [1, 1, 1, 1]} : vector<9x9x1x32xf32> to vector<1x1x1x32xf32>
    %121 = vector.shape_cast %120 : vector<1x1x1x32xf32> to vector<1x32xf32>
    %122 = vector.shape_cast %121 : vector<1x32xf32> to vector<1x1x32xf32>
    %123 = vector.broadcast %122 : vector<1x1x32xf32> to vector<8x8x32xf32>
    %124 = arith.mulf %12, %123 : vector<8x8x32xf32>
    %125 = arith.addf %119, %124 : vector<8x8x32xf32>
    %126 = vector.extract_strided_slice %7 {offsets = [0, 3, 0, 0], sizes = [1, 1, 1, 32], strides = [1, 1, 1, 1]} : vector<9x9x1x32xf32> to vector<1x1x1x32xf32>
    %127 = vector.shape_cast %126 : vector<1x1x1x32xf32> to vector<1x32xf32>
    %128 = vector.shape_cast %127 : vector<1x32xf32> to vector<1x1x32xf32>
    %129 = vector.broadcast %128 : vector<1x1x32xf32> to vector<8x8x32xf32>
    %130 = arith.mulf %13, %129 : vector<8x8x32xf32>
    %131 = arith.addf %125, %130 : vector<8x8x32xf32>
    %132 = vector.extract_strided_slice %7 {offsets = [0, 4, 0, 0], sizes = [1, 1, 1, 32], strides = [1, 1, 1, 1]} : vector<9x9x1x32xf32> to vector<1x1x1x32xf32>
    %133 = vector.shape_cast %132 : vector<1x1x1x32xf32> to vector<1x32xf32>
    %134 = vector.shape_cast %133 : vector<1x32xf32> to vector<1x1x32xf32>
    %135 = vector.broadcast %134 : vector<1x1x32xf32> to vector<8x8x32xf32>
    %136 = arith.mulf %14, %135 : vector<8x8x32xf32>
    %137 = arith.addf %131, %136 : vector<8x8x32xf32>
    %138 = vector.extract_strided_slice %7 {offsets = [0, 5, 0, 0], sizes = [1, 1, 1, 32], strides = [1, 1, 1, 1]} : vector<9x9x1x32xf32> to vector<1x1x1x32xf32>
    %139 = vector.shape_cast %138 : vector<1x1x1x32xf32> to vector<1x32xf32>
    %140 = vector.shape_cast %139 : vector<1x32xf32> to vector<1x1x32xf32>
    %141 = vector.broadcast %140 : vector<1x1x32xf32> to vector<8x8x32xf32>
    %142 = arith.mulf %15, %141 : vector<8x8x32xf32>
    %143 = arith.addf %137, %142 : vector<8x8x32xf32>
    %144 = vector.extract_strided_slice %7 {offsets = [0, 6, 0, 0], sizes = [1, 1, 1, 32], strides = [1, 1, 1, 1]} : vector<9x9x1x32xf32> to vector<1x1x1x32xf32>
    %145 = vector.shape_cast %144 : vector<1x1x1x32xf32> to vector<1x32xf32>
    %146 = vector.shape_cast %145 : vector<1x32xf32> to vector<1x1x32xf32>
    %147 = vector.broadcast %146 : vector<1x1x32xf32> to vector<8x8x32xf32>
    %148 = arith.mulf %16, %147 : vector<8x8x32xf32>
    %149 = arith.addf %143, %148 : vector<8x8x32xf32>
    %150 = vector.extract_strided_slice %7 {offsets = [0, 7, 0, 0], sizes = [1, 1, 1, 32], strides = [1, 1, 1, 1]} : vector<9x9x1x32xf32> to vector<1x1x1x32xf32>
    %151 = vector.shape_cast %150 : vector<1x1x1x32xf32> to vector<1x32xf32>
    %152 = vector.shape_cast %151 : vector<1x32xf32> to vector<1x1x32xf32>
    %153 = vector.broadcast %152 : vector<1x1x32xf32> to vector<8x8x32xf32>
    %154 = arith.mulf %17, %153 : vector<8x8x32xf32>
    %155 = arith.addf %149, %154 : vector<8x8x32xf32>
    %156 = vector.extract_strided_slice %7 {offsets = [0, 8, 0, 0], sizes = [1, 1, 1, 32], strides = [1, 1, 1, 1]} : vector<9x9x1x32xf32> to vector<1x1x1x32xf32>
    %157 = vector.shape_cast %156 : vector<1x1x1x32xf32> to vector<1x32xf32>
    %158 = vector.shape_cast %157 : vector<1x32xf32> to vector<1x1x32xf32>
    %159 = vector.broadcast %158 : vector<1x1x32xf32> to vector<8x8x32xf32>
    %160 = arith.mulf %18, %159 : vector<8x8x32xf32>
    %161 = arith.addf %155, %160 : vector<8x8x32xf32>
    %162 = vector.extract_strided_slice %8 {offsets = [0, 0, 0], sizes = [1, 1, 32], strides = [1, 1, 1]} : vector<9x1x32xf32> to vector<1x1x32xf32>
    %163 = vector.shape_cast %162 : vector<1x1x32xf32> to vector<1x32xf32>
    %164 = vector.shape_cast %163 : vector<1x32xf32> to vector<1x1x32xf32>
    %165 = vector.broadcast %164 : vector<1x1x32xf32> to vector<8x8x32xf32>
    %166 = arith.mulf %161, %165 : vector<8x8x32xf32>
    %167 = vector.extract_strided_slice %9 {offsets = [0, 0, 0], sizes = [1, 1, 32], strides = [1, 1, 1]} : vector<9x1x32xf32> to vector<1x1x32xf32>
    %168 = vector.shape_cast %167 : vector<1x1x32xf32> to vector<1x32xf32>
    %169 = vector.shape_cast %168 : vector<1x32xf32> to vector<1x1x32xf32>
    %170 = vector.broadcast %169 : vector<1x1x32xf32> to vector<8x8x32xf32>
    %171 = arith.addf %166, %170 : vector<8x8x32xf32>
    %cst_15 = arith.constant 0.000000e+00 : f32
    %172 = vector.broadcast %cst_15 : f32 to vector<8x8x32xf32>
    %173 = arith.maximumf %171, %172 : vector<8x8x32xf32>
    %174 = arith.mulf %83, %108 : vector<8x8x32xf32>
    %175 = arith.mulf %173, %174 : vector<8x8x32xf32>
    %176 = vector.extract_strided_slice %7 {offsets = [1, 0, 0, 0], sizes = [1, 1, 1, 32], strides = [1, 1, 1, 1]} : vector<9x9x1x32xf32> to vector<1x1x1x32xf32>
    %177 = vector.shape_cast %176 : vector<1x1x1x32xf32> to vector<1x32xf32>
    %178 = vector.shape_cast %177 : vector<1x32xf32> to vector<1x1x32xf32>
    %179 = vector.broadcast %178 : vector<1x1x32xf32> to vector<8x8x32xf32>
    %180 = arith.mulf %10, %179 : vector<8x8x32xf32>
    %181 = vector.extract_strided_slice %7 {offsets = [1, 1, 0, 0], sizes = [1, 1, 1, 32], strides = [1, 1, 1, 1]} : vector<9x9x1x32xf32> to vector<1x1x1x32xf32>
    %182 = vector.shape_cast %181 : vector<1x1x1x32xf32> to vector<1x32xf32>
    %183 = vector.shape_cast %182 : vector<1x32xf32> to vector<1x1x32xf32>
    %184 = vector.broadcast %183 : vector<1x1x32xf32> to vector<8x8x32xf32>
    %185 = arith.mulf %11, %184 : vector<8x8x32xf32>
    %186 = arith.addf %180, %185 : vector<8x8x32xf32>
    %187 = vector.extract_strided_slice %7 {offsets = [1, 2, 0, 0], sizes = [1, 1, 1, 32], strides = [1, 1, 1, 1]} : vector<9x9x1x32xf32> to vector<1x1x1x32xf32>
    %188 = vector.shape_cast %187 : vector<1x1x1x32xf32> to vector<1x32xf32>
    %189 = vector.shape_cast %188 : vector<1x32xf32> to vector<1x1x32xf32>
    %190 = vector.broadcast %189 : vector<1x1x32xf32> to vector<8x8x32xf32>
    %191 = arith.mulf %12, %190 : vector<8x8x32xf32>
    %192 = arith.addf %186, %191 : vector<8x8x32xf32>
    %193 = vector.extract_strided_slice %7 {offsets = [1, 3, 0, 0], sizes = [1, 1, 1, 32], strides = [1, 1, 1, 1]} : vector<9x9x1x32xf32> to vector<1x1x1x32xf32>
    %194 = vector.shape_cast %193 : vector<1x1x1x32xf32> to vector<1x32xf32>
    %195 = vector.shape_cast %194 : vector<1x32xf32> to vector<1x1x32xf32>
    %196 = vector.broadcast %195 : vector<1x1x32xf32> to vector<8x8x32xf32>
    %197 = arith.mulf %13, %196 : vector<8x8x32xf32>
    %198 = arith.addf %192, %197 : vector<8x8x32xf32>
    %199 = vector.extract_strided_slice %7 {offsets = [1, 4, 0, 0], sizes = [1, 1, 1, 32], strides = [1, 1, 1, 1]} : vector<9x9x1x32xf32> to vector<1x1x1x32xf32>
    %200 = vector.shape_cast %199 : vector<1x1x1x32xf32> to vector<1x32xf32>
    %201 = vector.shape_cast %200 : vector<1x32xf32> to vector<1x1x32xf32>
    %202 = vector.broadcast %201 : vector<1x1x32xf32> to vector<8x8x32xf32>
    %203 = arith.mulf %14, %202 : vector<8x8x32xf32>
    %204 = arith.addf %198, %203 : vector<8x8x32xf32>
    %205 = vector.extract_strided_slice %7 {offsets = [1, 5, 0, 0], sizes = [1, 1, 1, 32], strides = [1, 1, 1, 1]} : vector<9x9x1x32xf32> to vector<1x1x1x32xf32>
    %206 = vector.shape_cast %205 : vector<1x1x1x32xf32> to vector<1x32xf32>
    %207 = vector.shape_cast %206 : vector<1x32xf32> to vector<1x1x32xf32>
    %208 = vector.broadcast %207 : vector<1x1x32xf32> to vector<8x8x32xf32>
    %209 = arith.mulf %15, %208 : vector<8x8x32xf32>
    %210 = arith.addf %204, %209 : vector<8x8x32xf32>
    %211 = vector.extract_strided_slice %7 {offsets = [1, 6, 0, 0], sizes = [1, 1, 1, 32], strides = [1, 1, 1, 1]} : vector<9x9x1x32xf32> to vector<1x1x1x32xf32>
    %212 = vector.shape_cast %211 : vector<1x1x1x32xf32> to vector<1x32xf32>
    %213 = vector.shape_cast %212 : vector<1x32xf32> to vector<1x1x32xf32>
    %214 = vector.broadcast %213 : vector<1x1x32xf32> to vector<8x8x32xf32>
    %215 = arith.mulf %16, %214 : vector<8x8x32xf32>
    %216 = arith.addf %210, %215 : vector<8x8x32xf32>
    %217 = vector.extract_strided_slice %7 {offsets = [1, 7, 0, 0], sizes = [1, 1, 1, 32], strides = [1, 1, 1, 1]} : vector<9x9x1x32xf32> to vector<1x1x1x32xf32>
    %218 = vector.shape_cast %217 : vector<1x1x1x32xf32> to vector<1x32xf32>
    %219 = vector.shape_cast %218 : vector<1x32xf32> to vector<1x1x32xf32>
    %220 = vector.broadcast %219 : vector<1x1x32xf32> to vector<8x8x32xf32>
    %221 = arith.mulf %17, %220 : vector<8x8x32xf32>
    %222 = arith.addf %216, %221 : vector<8x8x32xf32>
    %223 = vector.extract_strided_slice %7 {offsets = [1, 8, 0, 0], sizes = [1, 1, 1, 32], strides = [1, 1, 1, 1]} : vector<9x9x1x32xf32> to vector<1x1x1x32xf32>
    %224 = vector.shape_cast %223 : vector<1x1x1x32xf32> to vector<1x32xf32>
    %225 = vector.shape_cast %224 : vector<1x32xf32> to vector<1x1x32xf32>
    %226 = vector.broadcast %225 : vector<1x1x32xf32> to vector<8x8x32xf32>
    %227 = arith.mulf %18, %226 : vector<8x8x32xf32>
    %228 = arith.addf %222, %227 : vector<8x8x32xf32>
    %229 = vector.extract_strided_slice %8 {offsets = [1, 0, 0], sizes = [1, 1, 32], strides = [1, 1, 1]} : vector<9x1x32xf32> to vector<1x1x32xf32>
    %230 = vector.shape_cast %229 : vector<1x1x32xf32> to vector<1x32xf32>
    %231 = vector.shape_cast %230 : vector<1x32xf32> to vector<1x1x32xf32>
    %232 = vector.broadcast %231 : vector<1x1x32xf32> to vector<8x8x32xf32>
    %233 = arith.mulf %228, %232 : vector<8x8x32xf32>
    %234 = vector.extract_strided_slice %9 {offsets = [1, 0, 0], sizes = [1, 1, 32], strides = [1, 1, 1]} : vector<9x1x32xf32> to vector<1x1x32xf32>
    %235 = vector.shape_cast %234 : vector<1x1x32xf32> to vector<1x32xf32>
    %236 = vector.shape_cast %235 : vector<1x32xf32> to vector<1x1x32xf32>
    %237 = vector.broadcast %236 : vector<1x1x32xf32> to vector<8x8x32xf32>
    %238 = arith.addf %233, %237 : vector<8x8x32xf32>
    %cst_16 = arith.constant 0.000000e+00 : f32
    %239 = vector.broadcast %cst_16 : f32 to vector<8x8x32xf32>
    %240 = arith.maximumf %238, %239 : vector<8x8x32xf32>
    %241 = arith.mulf %85, %108 : vector<8x8x32xf32>
    %242 = arith.mulf %240, %241 : vector<8x8x32xf32>
    %243 = vector.extract_strided_slice %7 {offsets = [2, 0, 0, 0], sizes = [1, 1, 1, 32], strides = [1, 1, 1, 1]} : vector<9x9x1x32xf32> to vector<1x1x1x32xf32>
    %244 = vector.shape_cast %243 : vector<1x1x1x32xf32> to vector<1x32xf32>
    %245 = vector.shape_cast %244 : vector<1x32xf32> to vector<1x1x32xf32>
    %246 = vector.broadcast %245 : vector<1x1x32xf32> to vector<8x8x32xf32>
    %247 = arith.mulf %10, %246 : vector<8x8x32xf32>
    %248 = vector.extract_strided_slice %7 {offsets = [2, 1, 0, 0], sizes = [1, 1, 1, 32], strides = [1, 1, 1, 1]} : vector<9x9x1x32xf32> to vector<1x1x1x32xf32>
    %249 = vector.shape_cast %248 : vector<1x1x1x32xf32> to vector<1x32xf32>
    %250 = vector.shape_cast %249 : vector<1x32xf32> to vector<1x1x32xf32>
    %251 = vector.broadcast %250 : vector<1x1x32xf32> to vector<8x8x32xf32>
    %252 = arith.mulf %11, %251 : vector<8x8x32xf32>
    %253 = arith.addf %247, %252 : vector<8x8x32xf32>
    %254 = vector.extract_strided_slice %7 {offsets = [2, 2, 0, 0], sizes = [1, 1, 1, 32], strides = [1, 1, 1, 1]} : vector<9x9x1x32xf32> to vector<1x1x1x32xf32>
    %255 = vector.shape_cast %254 : vector<1x1x1x32xf32> to vector<1x32xf32>
    %256 = vector.shape_cast %255 : vector<1x32xf32> to vector<1x1x32xf32>
    %257 = vector.broadcast %256 : vector<1x1x32xf32> to vector<8x8x32xf32>
    %258 = arith.mulf %12, %257 : vector<8x8x32xf32>
    %259 = arith.addf %253, %258 : vector<8x8x32xf32>
    %260 = vector.extract_strided_slice %7 {offsets = [2, 3, 0, 0], sizes = [1, 1, 1, 32], strides = [1, 1, 1, 1]} : vector<9x9x1x32xf32> to vector<1x1x1x32xf32>
    %261 = vector.shape_cast %260 : vector<1x1x1x32xf32> to vector<1x32xf32>
    %262 = vector.shape_cast %261 : vector<1x32xf32> to vector<1x1x32xf32>
    %263 = vector.broadcast %262 : vector<1x1x32xf32> to vector<8x8x32xf32>
    %264 = arith.mulf %13, %263 : vector<8x8x32xf32>
    %265 = arith.addf %259, %264 : vector<8x8x32xf32>
    %266 = vector.extract_strided_slice %7 {offsets = [2, 4, 0, 0], sizes = [1, 1, 1, 32], strides = [1, 1, 1, 1]} : vector<9x9x1x32xf32> to vector<1x1x1x32xf32>
    %267 = vector.shape_cast %266 : vector<1x1x1x32xf32> to vector<1x32xf32>
    %268 = vector.shape_cast %267 : vector<1x32xf32> to vector<1x1x32xf32>
    %269 = vector.broadcast %268 : vector<1x1x32xf32> to vector<8x8x32xf32>
    %270 = arith.mulf %14, %269 : vector<8x8x32xf32>
    %271 = arith.addf %265, %270 : vector<8x8x32xf32>
    %272 = vector.extract_strided_slice %7 {offsets = [2, 5, 0, 0], sizes = [1, 1, 1, 32], strides = [1, 1, 1, 1]} : vector<9x9x1x32xf32> to vector<1x1x1x32xf32>
    %273 = vector.shape_cast %272 : vector<1x1x1x32xf32> to vector<1x32xf32>
    %274 = vector.shape_cast %273 : vector<1x32xf32> to vector<1x1x32xf32>
    %275 = vector.broadcast %274 : vector<1x1x32xf32> to vector<8x8x32xf32>
    %276 = arith.mulf %15, %275 : vector<8x8x32xf32>
    %277 = arith.addf %271, %276 : vector<8x8x32xf32>
    %278 = vector.extract_strided_slice %7 {offsets = [2, 6, 0, 0], sizes = [1, 1, 1, 32], strides = [1, 1, 1, 1]} : vector<9x9x1x32xf32> to vector<1x1x1x32xf32>
    %279 = vector.shape_cast %278 : vector<1x1x1x32xf32> to vector<1x32xf32>
    %280 = vector.shape_cast %279 : vector<1x32xf32> to vector<1x1x32xf32>
    %281 = vector.broadcast %280 : vector<1x1x32xf32> to vector<8x8x32xf32>
    %282 = arith.mulf %16, %281 : vector<8x8x32xf32>
    %283 = arith.addf %277, %282 : vector<8x8x32xf32>
    %284 = vector.extract_strided_slice %7 {offsets = [2, 7, 0, 0], sizes = [1, 1, 1, 32], strides = [1, 1, 1, 1]} : vector<9x9x1x32xf32> to vector<1x1x1x32xf32>
    %285 = vector.shape_cast %284 : vector<1x1x1x32xf32> to vector<1x32xf32>
    %286 = vector.shape_cast %285 : vector<1x32xf32> to vector<1x1x32xf32>
    %287 = vector.broadcast %286 : vector<1x1x32xf32> to vector<8x8x32xf32>
    %288 = arith.mulf %17, %287 : vector<8x8x32xf32>
    %289 = arith.addf %283, %288 : vector<8x8x32xf32>
    %290 = vector.extract_strided_slice %7 {offsets = [2, 8, 0, 0], sizes = [1, 1, 1, 32], strides = [1, 1, 1, 1]} : vector<9x9x1x32xf32> to vector<1x1x1x32xf32>
    %291 = vector.shape_cast %290 : vector<1x1x1x32xf32> to vector<1x32xf32>
    %292 = vector.shape_cast %291 : vector<1x32xf32> to vector<1x1x32xf32>
    %293 = vector.broadcast %292 : vector<1x1x32xf32> to vector<8x8x32xf32>
    %294 = arith.mulf %18, %293 : vector<8x8x32xf32>
    %295 = arith.addf %289, %294 : vector<8x8x32xf32>
    %296 = vector.extract_strided_slice %8 {offsets = [2, 0, 0], sizes = [1, 1, 32], strides = [1, 1, 1]} : vector<9x1x32xf32> to vector<1x1x32xf32>
    %297 = vector.shape_cast %296 : vector<1x1x32xf32> to vector<1x32xf32>
    %298 = vector.shape_cast %297 : vector<1x32xf32> to vector<1x1x32xf32>
    %299 = vector.broadcast %298 : vector<1x1x32xf32> to vector<8x8x32xf32>
    %300 = arith.mulf %295, %299 : vector<8x8x32xf32>
    %301 = vector.extract_strided_slice %9 {offsets = [2, 0, 0], sizes = [1, 1, 32], strides = [1, 1, 1]} : vector<9x1x32xf32> to vector<1x1x32xf32>
    %302 = vector.shape_cast %301 : vector<1x1x32xf32> to vector<1x32xf32>
    %303 = vector.shape_cast %302 : vector<1x32xf32> to vector<1x1x32xf32>
    %304 = vector.broadcast %303 : vector<1x1x32xf32> to vector<8x8x32xf32>
    %305 = arith.addf %300, %304 : vector<8x8x32xf32>
    %cst_17 = arith.constant 0.000000e+00 : f32
    %306 = vector.broadcast %cst_17 : f32 to vector<8x8x32xf32>
    %307 = arith.maximumf %305, %306 : vector<8x8x32xf32>
    %308 = arith.mulf %87, %108 : vector<8x8x32xf32>
    %309 = arith.mulf %307, %308 : vector<8x8x32xf32>
    %310 = vector.extract_strided_slice %7 {offsets = [3, 0, 0, 0], sizes = [1, 1, 1, 32], strides = [1, 1, 1, 1]} : vector<9x9x1x32xf32> to vector<1x1x1x32xf32>
    %311 = vector.shape_cast %310 : vector<1x1x1x32xf32> to vector<1x32xf32>
    %312 = vector.shape_cast %311 : vector<1x32xf32> to vector<1x1x32xf32>
    %313 = vector.broadcast %312 : vector<1x1x32xf32> to vector<8x8x32xf32>
    %314 = arith.mulf %10, %313 : vector<8x8x32xf32>
    %315 = vector.extract_strided_slice %7 {offsets = [3, 1, 0, 0], sizes = [1, 1, 1, 32], strides = [1, 1, 1, 1]} : vector<9x9x1x32xf32> to vector<1x1x1x32xf32>
    %316 = vector.shape_cast %315 : vector<1x1x1x32xf32> to vector<1x32xf32>
    %317 = vector.shape_cast %316 : vector<1x32xf32> to vector<1x1x32xf32>
    %318 = vector.broadcast %317 : vector<1x1x32xf32> to vector<8x8x32xf32>
    %319 = arith.mulf %11, %318 : vector<8x8x32xf32>
    %320 = arith.addf %314, %319 : vector<8x8x32xf32>
    %321 = vector.extract_strided_slice %7 {offsets = [3, 2, 0, 0], sizes = [1, 1, 1, 32], strides = [1, 1, 1, 1]} : vector<9x9x1x32xf32> to vector<1x1x1x32xf32>
    %322 = vector.shape_cast %321 : vector<1x1x1x32xf32> to vector<1x32xf32>
    %323 = vector.shape_cast %322 : vector<1x32xf32> to vector<1x1x32xf32>
    %324 = vector.broadcast %323 : vector<1x1x32xf32> to vector<8x8x32xf32>
    %325 = arith.mulf %12, %324 : vector<8x8x32xf32>
    %326 = arith.addf %320, %325 : vector<8x8x32xf32>
    %327 = vector.extract_strided_slice %7 {offsets = [3, 3, 0, 0], sizes = [1, 1, 1, 32], strides = [1, 1, 1, 1]} : vector<9x9x1x32xf32> to vector<1x1x1x32xf32>
    %328 = vector.shape_cast %327 : vector<1x1x1x32xf32> to vector<1x32xf32>
    %329 = vector.shape_cast %328 : vector<1x32xf32> to vector<1x1x32xf32>
    %330 = vector.broadcast %329 : vector<1x1x32xf32> to vector<8x8x32xf32>
    %331 = arith.mulf %13, %330 : vector<8x8x32xf32>
    %332 = arith.addf %326, %331 : vector<8x8x32xf32>
    %333 = vector.extract_strided_slice %7 {offsets = [3, 4, 0, 0], sizes = [1, 1, 1, 32], strides = [1, 1, 1, 1]} : vector<9x9x1x32xf32> to vector<1x1x1x32xf32>
    %334 = vector.shape_cast %333 : vector<1x1x1x32xf32> to vector<1x32xf32>
    %335 = vector.shape_cast %334 : vector<1x32xf32> to vector<1x1x32xf32>
    %336 = vector.broadcast %335 : vector<1x1x32xf32> to vector<8x8x32xf32>
    %337 = arith.mulf %14, %336 : vector<8x8x32xf32>
    %338 = arith.addf %332, %337 : vector<8x8x32xf32>
    %339 = vector.extract_strided_slice %7 {offsets = [3, 5, 0, 0], sizes = [1, 1, 1, 32], strides = [1, 1, 1, 1]} : vector<9x9x1x32xf32> to vector<1x1x1x32xf32>
    %340 = vector.shape_cast %339 : vector<1x1x1x32xf32> to vector<1x32xf32>
    %341 = vector.shape_cast %340 : vector<1x32xf32> to vector<1x1x32xf32>
    %342 = vector.broadcast %341 : vector<1x1x32xf32> to vector<8x8x32xf32>
    %343 = arith.mulf %15, %342 : vector<8x8x32xf32>
    %344 = arith.addf %338, %343 : vector<8x8x32xf32>
    %345 = vector.extract_strided_slice %7 {offsets = [3, 6, 0, 0], sizes = [1, 1, 1, 32], strides = [1, 1, 1, 1]} : vector<9x9x1x32xf32> to vector<1x1x1x32xf32>
    %346 = vector.shape_cast %345 : vector<1x1x1x32xf32> to vector<1x32xf32>
    %347 = vector.shape_cast %346 : vector<1x32xf32> to vector<1x1x32xf32>
    %348 = vector.broadcast %347 : vector<1x1x32xf32> to vector<8x8x32xf32>
    %349 = arith.mulf %16, %348 : vector<8x8x32xf32>
    %350 = arith.addf %344, %349 : vector<8x8x32xf32>
    %351 = vector.extract_strided_slice %7 {offsets = [3, 7, 0, 0], sizes = [1, 1, 1, 32], strides = [1, 1, 1, 1]} : vector<9x9x1x32xf32> to vector<1x1x1x32xf32>
    %352 = vector.shape_cast %351 : vector<1x1x1x32xf32> to vector<1x32xf32>
    %353 = vector.shape_cast %352 : vector<1x32xf32> to vector<1x1x32xf32>
    %354 = vector.broadcast %353 : vector<1x1x32xf32> to vector<8x8x32xf32>
    %355 = arith.mulf %17, %354 : vector<8x8x32xf32>
    %356 = arith.addf %350, %355 : vector<8x8x32xf32>
    %357 = vector.extract_strided_slice %7 {offsets = [3, 8, 0, 0], sizes = [1, 1, 1, 32], strides = [1, 1, 1, 1]} : vector<9x9x1x32xf32> to vector<1x1x1x32xf32>
    %358 = vector.shape_cast %357 : vector<1x1x1x32xf32> to vector<1x32xf32>
    %359 = vector.shape_cast %358 : vector<1x32xf32> to vector<1x1x32xf32>
    %360 = vector.broadcast %359 : vector<1x1x32xf32> to vector<8x8x32xf32>
    %361 = arith.mulf %18, %360 : vector<8x8x32xf32>
    %362 = arith.addf %356, %361 : vector<8x8x32xf32>
    %363 = vector.extract_strided_slice %8 {offsets = [3, 0, 0], sizes = [1, 1, 32], strides = [1, 1, 1]} : vector<9x1x32xf32> to vector<1x1x32xf32>
    %364 = vector.shape_cast %363 : vector<1x1x32xf32> to vector<1x32xf32>
    %365 = vector.shape_cast %364 : vector<1x32xf32> to vector<1x1x32xf32>
    %366 = vector.broadcast %365 : vector<1x1x32xf32> to vector<8x8x32xf32>
    %367 = arith.mulf %362, %366 : vector<8x8x32xf32>
    %368 = vector.extract_strided_slice %9 {offsets = [3, 0, 0], sizes = [1, 1, 32], strides = [1, 1, 1]} : vector<9x1x32xf32> to vector<1x1x32xf32>
    %369 = vector.shape_cast %368 : vector<1x1x32xf32> to vector<1x32xf32>
    %370 = vector.shape_cast %369 : vector<1x32xf32> to vector<1x1x32xf32>
    %371 = vector.broadcast %370 : vector<1x1x32xf32> to vector<8x8x32xf32>
    %372 = arith.addf %367, %371 : vector<8x8x32xf32>
    %cst_18 = arith.constant 0.000000e+00 : f32
    %373 = vector.broadcast %cst_18 : f32 to vector<8x8x32xf32>
    %374 = arith.maximumf %372, %373 : vector<8x8x32xf32>
    %375 = arith.mulf %89, %108 : vector<8x8x32xf32>
    %376 = arith.mulf %374, %375 : vector<8x8x32xf32>
    %377 = vector.extract_strided_slice %7 {offsets = [4, 0, 0, 0], sizes = [1, 1, 1, 32], strides = [1, 1, 1, 1]} : vector<9x9x1x32xf32> to vector<1x1x1x32xf32>
    %378 = vector.shape_cast %377 : vector<1x1x1x32xf32> to vector<1x32xf32>
    %379 = vector.shape_cast %378 : vector<1x32xf32> to vector<1x1x32xf32>
    %380 = vector.broadcast %379 : vector<1x1x32xf32> to vector<8x8x32xf32>
    %381 = arith.mulf %10, %380 : vector<8x8x32xf32>
    %382 = vector.extract_strided_slice %7 {offsets = [4, 1, 0, 0], sizes = [1, 1, 1, 32], strides = [1, 1, 1, 1]} : vector<9x9x1x32xf32> to vector<1x1x1x32xf32>
    %383 = vector.shape_cast %382 : vector<1x1x1x32xf32> to vector<1x32xf32>
    %384 = vector.shape_cast %383 : vector<1x32xf32> to vector<1x1x32xf32>
    %385 = vector.broadcast %384 : vector<1x1x32xf32> to vector<8x8x32xf32>
    %386 = arith.mulf %11, %385 : vector<8x8x32xf32>
    %387 = arith.addf %381, %386 : vector<8x8x32xf32>
    %388 = vector.extract_strided_slice %7 {offsets = [4, 2, 0, 0], sizes = [1, 1, 1, 32], strides = [1, 1, 1, 1]} : vector<9x9x1x32xf32> to vector<1x1x1x32xf32>
    %389 = vector.shape_cast %388 : vector<1x1x1x32xf32> to vector<1x32xf32>
    %390 = vector.shape_cast %389 : vector<1x32xf32> to vector<1x1x32xf32>
    %391 = vector.broadcast %390 : vector<1x1x32xf32> to vector<8x8x32xf32>
    %392 = arith.mulf %12, %391 : vector<8x8x32xf32>
    %393 = arith.addf %387, %392 : vector<8x8x32xf32>
    %394 = vector.extract_strided_slice %7 {offsets = [4, 3, 0, 0], sizes = [1, 1, 1, 32], strides = [1, 1, 1, 1]} : vector<9x9x1x32xf32> to vector<1x1x1x32xf32>
    %395 = vector.shape_cast %394 : vector<1x1x1x32xf32> to vector<1x32xf32>
    %396 = vector.shape_cast %395 : vector<1x32xf32> to vector<1x1x32xf32>
    %397 = vector.broadcast %396 : vector<1x1x32xf32> to vector<8x8x32xf32>
    %398 = arith.mulf %13, %397 : vector<8x8x32xf32>
    %399 = arith.addf %393, %398 : vector<8x8x32xf32>
    %400 = vector.extract_strided_slice %7 {offsets = [4, 4, 0, 0], sizes = [1, 1, 1, 32], strides = [1, 1, 1, 1]} : vector<9x9x1x32xf32> to vector<1x1x1x32xf32>
    %401 = vector.shape_cast %400 : vector<1x1x1x32xf32> to vector<1x32xf32>
    %402 = vector.shape_cast %401 : vector<1x32xf32> to vector<1x1x32xf32>
    %403 = vector.broadcast %402 : vector<1x1x32xf32> to vector<8x8x32xf32>
    %404 = arith.mulf %14, %403 : vector<8x8x32xf32>
    %405 = arith.addf %399, %404 : vector<8x8x32xf32>
    %406 = vector.extract_strided_slice %7 {offsets = [4, 5, 0, 0], sizes = [1, 1, 1, 32], strides = [1, 1, 1, 1]} : vector<9x9x1x32xf32> to vector<1x1x1x32xf32>
    %407 = vector.shape_cast %406 : vector<1x1x1x32xf32> to vector<1x32xf32>
    %408 = vector.shape_cast %407 : vector<1x32xf32> to vector<1x1x32xf32>
    %409 = vector.broadcast %408 : vector<1x1x32xf32> to vector<8x8x32xf32>
    %410 = arith.mulf %15, %409 : vector<8x8x32xf32>
    %411 = arith.addf %405, %410 : vector<8x8x32xf32>
    %412 = vector.extract_strided_slice %7 {offsets = [4, 6, 0, 0], sizes = [1, 1, 1, 32], strides = [1, 1, 1, 1]} : vector<9x9x1x32xf32> to vector<1x1x1x32xf32>
    %413 = vector.shape_cast %412 : vector<1x1x1x32xf32> to vector<1x32xf32>
    %414 = vector.shape_cast %413 : vector<1x32xf32> to vector<1x1x32xf32>
    %415 = vector.broadcast %414 : vector<1x1x32xf32> to vector<8x8x32xf32>
    %416 = arith.mulf %16, %415 : vector<8x8x32xf32>
    %417 = arith.addf %411, %416 : vector<8x8x32xf32>
    %418 = vector.extract_strided_slice %7 {offsets = [4, 7, 0, 0], sizes = [1, 1, 1, 32], strides = [1, 1, 1, 1]} : vector<9x9x1x32xf32> to vector<1x1x1x32xf32>
    %419 = vector.shape_cast %418 : vector<1x1x1x32xf32> to vector<1x32xf32>
    %420 = vector.shape_cast %419 : vector<1x32xf32> to vector<1x1x32xf32>
    %421 = vector.broadcast %420 : vector<1x1x32xf32> to vector<8x8x32xf32>
    %422 = arith.mulf %17, %421 : vector<8x8x32xf32>
    %423 = arith.addf %417, %422 : vector<8x8x32xf32>
    %424 = vector.extract_strided_slice %7 {offsets = [4, 8, 0, 0], sizes = [1, 1, 1, 32], strides = [1, 1, 1, 1]} : vector<9x9x1x32xf32> to vector<1x1x1x32xf32>
    %425 = vector.shape_cast %424 : vector<1x1x1x32xf32> to vector<1x32xf32>
    %426 = vector.shape_cast %425 : vector<1x32xf32> to vector<1x1x32xf32>
    %427 = vector.broadcast %426 : vector<1x1x32xf32> to vector<8x8x32xf32>
    %428 = arith.mulf %18, %427 : vector<8x8x32xf32>
    %429 = arith.addf %423, %428 : vector<8x8x32xf32>
    %430 = vector.extract_strided_slice %8 {offsets = [4, 0, 0], sizes = [1, 1, 32], strides = [1, 1, 1]} : vector<9x1x32xf32> to vector<1x1x32xf32>
    %431 = vector.shape_cast %430 : vector<1x1x32xf32> to vector<1x32xf32>
    %432 = vector.shape_cast %431 : vector<1x32xf32> to vector<1x1x32xf32>
    %433 = vector.broadcast %432 : vector<1x1x32xf32> to vector<8x8x32xf32>
    %434 = arith.mulf %429, %433 : vector<8x8x32xf32>
    %435 = vector.extract_strided_slice %9 {offsets = [4, 0, 0], sizes = [1, 1, 32], strides = [1, 1, 1]} : vector<9x1x32xf32> to vector<1x1x32xf32>
    %436 = vector.shape_cast %435 : vector<1x1x32xf32> to vector<1x32xf32>
    %437 = vector.shape_cast %436 : vector<1x32xf32> to vector<1x1x32xf32>
    %438 = vector.broadcast %437 : vector<1x1x32xf32> to vector<8x8x32xf32>
    %439 = arith.addf %434, %438 : vector<8x8x32xf32>
    %cst_19 = arith.constant 0.000000e+00 : f32
    %440 = vector.broadcast %cst_19 : f32 to vector<8x8x32xf32>
    %441 = arith.maximumf %439, %440 : vector<8x8x32xf32>
    %442 = arith.mulf %91, %108 : vector<8x8x32xf32>
    %443 = arith.mulf %441, %442 : vector<8x8x32xf32>
    %444 = vector.extract_strided_slice %7 {offsets = [5, 0, 0, 0], sizes = [1, 1, 1, 32], strides = [1, 1, 1, 1]} : vector<9x9x1x32xf32> to vector<1x1x1x32xf32>
    %445 = vector.shape_cast %444 : vector<1x1x1x32xf32> to vector<1x32xf32>
    %446 = vector.shape_cast %445 : vector<1x32xf32> to vector<1x1x32xf32>
    %447 = vector.broadcast %446 : vector<1x1x32xf32> to vector<8x8x32xf32>
    %448 = arith.mulf %10, %447 : vector<8x8x32xf32>
    %449 = vector.extract_strided_slice %7 {offsets = [5, 1, 0, 0], sizes = [1, 1, 1, 32], strides = [1, 1, 1, 1]} : vector<9x9x1x32xf32> to vector<1x1x1x32xf32>
    %450 = vector.shape_cast %449 : vector<1x1x1x32xf32> to vector<1x32xf32>
    %451 = vector.shape_cast %450 : vector<1x32xf32> to vector<1x1x32xf32>
    %452 = vector.broadcast %451 : vector<1x1x32xf32> to vector<8x8x32xf32>
    %453 = arith.mulf %11, %452 : vector<8x8x32xf32>
    %454 = arith.addf %448, %453 : vector<8x8x32xf32>
    %455 = vector.extract_strided_slice %7 {offsets = [5, 2, 0, 0], sizes = [1, 1, 1, 32], strides = [1, 1, 1, 1]} : vector<9x9x1x32xf32> to vector<1x1x1x32xf32>
    %456 = vector.shape_cast %455 : vector<1x1x1x32xf32> to vector<1x32xf32>
    %457 = vector.shape_cast %456 : vector<1x32xf32> to vector<1x1x32xf32>
    %458 = vector.broadcast %457 : vector<1x1x32xf32> to vector<8x8x32xf32>
    %459 = arith.mulf %12, %458 : vector<8x8x32xf32>
    %460 = arith.addf %454, %459 : vector<8x8x32xf32>
    %461 = vector.extract_strided_slice %7 {offsets = [5, 3, 0, 0], sizes = [1, 1, 1, 32], strides = [1, 1, 1, 1]} : vector<9x9x1x32xf32> to vector<1x1x1x32xf32>
    %462 = vector.shape_cast %461 : vector<1x1x1x32xf32> to vector<1x32xf32>
    %463 = vector.shape_cast %462 : vector<1x32xf32> to vector<1x1x32xf32>
    %464 = vector.broadcast %463 : vector<1x1x32xf32> to vector<8x8x32xf32>
    %465 = arith.mulf %13, %464 : vector<8x8x32xf32>
    %466 = arith.addf %460, %465 : vector<8x8x32xf32>
    %467 = vector.extract_strided_slice %7 {offsets = [5, 4, 0, 0], sizes = [1, 1, 1, 32], strides = [1, 1, 1, 1]} : vector<9x9x1x32xf32> to vector<1x1x1x32xf32>
    %468 = vector.shape_cast %467 : vector<1x1x1x32xf32> to vector<1x32xf32>
    %469 = vector.shape_cast %468 : vector<1x32xf32> to vector<1x1x32xf32>
    %470 = vector.broadcast %469 : vector<1x1x32xf32> to vector<8x8x32xf32>
    %471 = arith.mulf %14, %470 : vector<8x8x32xf32>
    %472 = arith.addf %466, %471 : vector<8x8x32xf32>
    %473 = vector.extract_strided_slice %7 {offsets = [5, 5, 0, 0], sizes = [1, 1, 1, 32], strides = [1, 1, 1, 1]} : vector<9x9x1x32xf32> to vector<1x1x1x32xf32>
    %474 = vector.shape_cast %473 : vector<1x1x1x32xf32> to vector<1x32xf32>
    %475 = vector.shape_cast %474 : vector<1x32xf32> to vector<1x1x32xf32>
    %476 = vector.broadcast %475 : vector<1x1x32xf32> to vector<8x8x32xf32>
    %477 = arith.mulf %15, %476 : vector<8x8x32xf32>
    %478 = arith.addf %472, %477 : vector<8x8x32xf32>
    %479 = vector.extract_strided_slice %7 {offsets = [5, 6, 0, 0], sizes = [1, 1, 1, 32], strides = [1, 1, 1, 1]} : vector<9x9x1x32xf32> to vector<1x1x1x32xf32>
    %480 = vector.shape_cast %479 : vector<1x1x1x32xf32> to vector<1x32xf32>
    %481 = vector.shape_cast %480 : vector<1x32xf32> to vector<1x1x32xf32>
    %482 = vector.broadcast %481 : vector<1x1x32xf32> to vector<8x8x32xf32>
    %483 = arith.mulf %16, %482 : vector<8x8x32xf32>
    %484 = arith.addf %478, %483 : vector<8x8x32xf32>
    %485 = vector.extract_strided_slice %7 {offsets = [5, 7, 0, 0], sizes = [1, 1, 1, 32], strides = [1, 1, 1, 1]} : vector<9x9x1x32xf32> to vector<1x1x1x32xf32>
    %486 = vector.shape_cast %485 : vector<1x1x1x32xf32> to vector<1x32xf32>
    %487 = vector.shape_cast %486 : vector<1x32xf32> to vector<1x1x32xf32>
    %488 = vector.broadcast %487 : vector<1x1x32xf32> to vector<8x8x32xf32>
    %489 = arith.mulf %17, %488 : vector<8x8x32xf32>
    %490 = arith.addf %484, %489 : vector<8x8x32xf32>
    %491 = vector.extract_strided_slice %7 {offsets = [5, 8, 0, 0], sizes = [1, 1, 1, 32], strides = [1, 1, 1, 1]} : vector<9x9x1x32xf32> to vector<1x1x1x32xf32>
    %492 = vector.shape_cast %491 : vector<1x1x1x32xf32> to vector<1x32xf32>
    %493 = vector.shape_cast %492 : vector<1x32xf32> to vector<1x1x32xf32>
    %494 = vector.broadcast %493 : vector<1x1x32xf32> to vector<8x8x32xf32>
    %495 = arith.mulf %18, %494 : vector<8x8x32xf32>
    %496 = arith.addf %490, %495 : vector<8x8x32xf32>
    %497 = vector.extract_strided_slice %8 {offsets = [5, 0, 0], sizes = [1, 1, 32], strides = [1, 1, 1]} : vector<9x1x32xf32> to vector<1x1x32xf32>
    %498 = vector.shape_cast %497 : vector<1x1x32xf32> to vector<1x32xf32>
    %499 = vector.shape_cast %498 : vector<1x32xf32> to vector<1x1x32xf32>
    %500 = vector.broadcast %499 : vector<1x1x32xf32> to vector<8x8x32xf32>
    %501 = arith.mulf %496, %500 : vector<8x8x32xf32>
    %502 = vector.extract_strided_slice %9 {offsets = [5, 0, 0], sizes = [1, 1, 32], strides = [1, 1, 1]} : vector<9x1x32xf32> to vector<1x1x32xf32>
    %503 = vector.shape_cast %502 : vector<1x1x32xf32> to vector<1x32xf32>
    %504 = vector.shape_cast %503 : vector<1x32xf32> to vector<1x1x32xf32>
    %505 = vector.broadcast %504 : vector<1x1x32xf32> to vector<8x8x32xf32>
    %506 = arith.addf %501, %505 : vector<8x8x32xf32>
    %cst_20 = arith.constant 0.000000e+00 : f32
    %507 = vector.broadcast %cst_20 : f32 to vector<8x8x32xf32>
    %508 = arith.maximumf %506, %507 : vector<8x8x32xf32>
    %509 = arith.mulf %93, %108 : vector<8x8x32xf32>
    %510 = arith.mulf %508, %509 : vector<8x8x32xf32>
    %511 = vector.extract_strided_slice %7 {offsets = [6, 0, 0, 0], sizes = [1, 1, 1, 32], strides = [1, 1, 1, 1]} : vector<9x9x1x32xf32> to vector<1x1x1x32xf32>
    %512 = vector.shape_cast %511 : vector<1x1x1x32xf32> to vector<1x32xf32>
    %513 = vector.shape_cast %512 : vector<1x32xf32> to vector<1x1x32xf32>
    %514 = vector.broadcast %513 : vector<1x1x32xf32> to vector<8x8x32xf32>
    %515 = arith.mulf %10, %514 : vector<8x8x32xf32>
    %516 = vector.extract_strided_slice %7 {offsets = [6, 1, 0, 0], sizes = [1, 1, 1, 32], strides = [1, 1, 1, 1]} : vector<9x9x1x32xf32> to vector<1x1x1x32xf32>
    %517 = vector.shape_cast %516 : vector<1x1x1x32xf32> to vector<1x32xf32>
    %518 = vector.shape_cast %517 : vector<1x32xf32> to vector<1x1x32xf32>
    %519 = vector.broadcast %518 : vector<1x1x32xf32> to vector<8x8x32xf32>
    %520 = arith.mulf %11, %519 : vector<8x8x32xf32>
    %521 = arith.addf %515, %520 : vector<8x8x32xf32>
    %522 = vector.extract_strided_slice %7 {offsets = [6, 2, 0, 0], sizes = [1, 1, 1, 32], strides = [1, 1, 1, 1]} : vector<9x9x1x32xf32> to vector<1x1x1x32xf32>
    %523 = vector.shape_cast %522 : vector<1x1x1x32xf32> to vector<1x32xf32>
    %524 = vector.shape_cast %523 : vector<1x32xf32> to vector<1x1x32xf32>
    %525 = vector.broadcast %524 : vector<1x1x32xf32> to vector<8x8x32xf32>
    %526 = arith.mulf %12, %525 : vector<8x8x32xf32>
    %527 = arith.addf %521, %526 : vector<8x8x32xf32>
    %528 = vector.extract_strided_slice %7 {offsets = [6, 3, 0, 0], sizes = [1, 1, 1, 32], strides = [1, 1, 1, 1]} : vector<9x9x1x32xf32> to vector<1x1x1x32xf32>
    %529 = vector.shape_cast %528 : vector<1x1x1x32xf32> to vector<1x32xf32>
    %530 = vector.shape_cast %529 : vector<1x32xf32> to vector<1x1x32xf32>
    %531 = vector.broadcast %530 : vector<1x1x32xf32> to vector<8x8x32xf32>
    %532 = arith.mulf %13, %531 : vector<8x8x32xf32>
    %533 = arith.addf %527, %532 : vector<8x8x32xf32>
    %534 = vector.extract_strided_slice %7 {offsets = [6, 4, 0, 0], sizes = [1, 1, 1, 32], strides = [1, 1, 1, 1]} : vector<9x9x1x32xf32> to vector<1x1x1x32xf32>
    %535 = vector.shape_cast %534 : vector<1x1x1x32xf32> to vector<1x32xf32>
    %536 = vector.shape_cast %535 : vector<1x32xf32> to vector<1x1x32xf32>
    %537 = vector.broadcast %536 : vector<1x1x32xf32> to vector<8x8x32xf32>
    %538 = arith.mulf %14, %537 : vector<8x8x32xf32>
    %539 = arith.addf %533, %538 : vector<8x8x32xf32>
    %540 = vector.extract_strided_slice %7 {offsets = [6, 5, 0, 0], sizes = [1, 1, 1, 32], strides = [1, 1, 1, 1]} : vector<9x9x1x32xf32> to vector<1x1x1x32xf32>
    %541 = vector.shape_cast %540 : vector<1x1x1x32xf32> to vector<1x32xf32>
    %542 = vector.shape_cast %541 : vector<1x32xf32> to vector<1x1x32xf32>
    %543 = vector.broadcast %542 : vector<1x1x32xf32> to vector<8x8x32xf32>
    %544 = arith.mulf %15, %543 : vector<8x8x32xf32>
    %545 = arith.addf %539, %544 : vector<8x8x32xf32>
    %546 = vector.extract_strided_slice %7 {offsets = [6, 6, 0, 0], sizes = [1, 1, 1, 32], strides = [1, 1, 1, 1]} : vector<9x9x1x32xf32> to vector<1x1x1x32xf32>
    %547 = vector.shape_cast %546 : vector<1x1x1x32xf32> to vector<1x32xf32>
    %548 = vector.shape_cast %547 : vector<1x32xf32> to vector<1x1x32xf32>
    %549 = vector.broadcast %548 : vector<1x1x32xf32> to vector<8x8x32xf32>
    %550 = arith.mulf %16, %549 : vector<8x8x32xf32>
    %551 = arith.addf %545, %550 : vector<8x8x32xf32>
    %552 = vector.extract_strided_slice %7 {offsets = [6, 7, 0, 0], sizes = [1, 1, 1, 32], strides = [1, 1, 1, 1]} : vector<9x9x1x32xf32> to vector<1x1x1x32xf32>
    %553 = vector.shape_cast %552 : vector<1x1x1x32xf32> to vector<1x32xf32>
    %554 = vector.shape_cast %553 : vector<1x32xf32> to vector<1x1x32xf32>
    %555 = vector.broadcast %554 : vector<1x1x32xf32> to vector<8x8x32xf32>
    %556 = arith.mulf %17, %555 : vector<8x8x32xf32>
    %557 = arith.addf %551, %556 : vector<8x8x32xf32>
    %558 = vector.extract_strided_slice %7 {offsets = [6, 8, 0, 0], sizes = [1, 1, 1, 32], strides = [1, 1, 1, 1]} : vector<9x9x1x32xf32> to vector<1x1x1x32xf32>
    %559 = vector.shape_cast %558 : vector<1x1x1x32xf32> to vector<1x32xf32>
    %560 = vector.shape_cast %559 : vector<1x32xf32> to vector<1x1x32xf32>
    %561 = vector.broadcast %560 : vector<1x1x32xf32> to vector<8x8x32xf32>
    %562 = arith.mulf %18, %561 : vector<8x8x32xf32>
    %563 = arith.addf %557, %562 : vector<8x8x32xf32>
    %564 = vector.extract_strided_slice %8 {offsets = [6, 0, 0], sizes = [1, 1, 32], strides = [1, 1, 1]} : vector<9x1x32xf32> to vector<1x1x32xf32>
    %565 = vector.shape_cast %564 : vector<1x1x32xf32> to vector<1x32xf32>
    %566 = vector.shape_cast %565 : vector<1x32xf32> to vector<1x1x32xf32>
    %567 = vector.broadcast %566 : vector<1x1x32xf32> to vector<8x8x32xf32>
    %568 = arith.mulf %563, %567 : vector<8x8x32xf32>
    %569 = vector.extract_strided_slice %9 {offsets = [6, 0, 0], sizes = [1, 1, 32], strides = [1, 1, 1]} : vector<9x1x32xf32> to vector<1x1x32xf32>
    %570 = vector.shape_cast %569 : vector<1x1x32xf32> to vector<1x32xf32>
    %571 = vector.shape_cast %570 : vector<1x32xf32> to vector<1x1x32xf32>
    %572 = vector.broadcast %571 : vector<1x1x32xf32> to vector<8x8x32xf32>
    %573 = arith.addf %568, %572 : vector<8x8x32xf32>
    %cst_21 = arith.constant 0.000000e+00 : f32
    %574 = vector.broadcast %cst_21 : f32 to vector<8x8x32xf32>
    %575 = arith.maximumf %573, %574 : vector<8x8x32xf32>
    %576 = arith.mulf %95, %108 : vector<8x8x32xf32>
    %577 = arith.mulf %575, %576 : vector<8x8x32xf32>
    %578 = vector.extract_strided_slice %7 {offsets = [7, 0, 0, 0], sizes = [1, 1, 1, 32], strides = [1, 1, 1, 1]} : vector<9x9x1x32xf32> to vector<1x1x1x32xf32>
    %579 = vector.shape_cast %578 : vector<1x1x1x32xf32> to vector<1x32xf32>
    %580 = vector.shape_cast %579 : vector<1x32xf32> to vector<1x1x32xf32>
    %581 = vector.broadcast %580 : vector<1x1x32xf32> to vector<8x8x32xf32>
    %582 = arith.mulf %10, %581 : vector<8x8x32xf32>
    %583 = vector.extract_strided_slice %7 {offsets = [7, 1, 0, 0], sizes = [1, 1, 1, 32], strides = [1, 1, 1, 1]} : vector<9x9x1x32xf32> to vector<1x1x1x32xf32>
    %584 = vector.shape_cast %583 : vector<1x1x1x32xf32> to vector<1x32xf32>
    %585 = vector.shape_cast %584 : vector<1x32xf32> to vector<1x1x32xf32>
    %586 = vector.broadcast %585 : vector<1x1x32xf32> to vector<8x8x32xf32>
    %587 = arith.mulf %11, %586 : vector<8x8x32xf32>
    %588 = arith.addf %582, %587 : vector<8x8x32xf32>
    %589 = vector.extract_strided_slice %7 {offsets = [7, 2, 0, 0], sizes = [1, 1, 1, 32], strides = [1, 1, 1, 1]} : vector<9x9x1x32xf32> to vector<1x1x1x32xf32>
    %590 = vector.shape_cast %589 : vector<1x1x1x32xf32> to vector<1x32xf32>
    %591 = vector.shape_cast %590 : vector<1x32xf32> to vector<1x1x32xf32>
    %592 = vector.broadcast %591 : vector<1x1x32xf32> to vector<8x8x32xf32>
    %593 = arith.mulf %12, %592 : vector<8x8x32xf32>
    %594 = arith.addf %588, %593 : vector<8x8x32xf32>
    %595 = vector.extract_strided_slice %7 {offsets = [7, 3, 0, 0], sizes = [1, 1, 1, 32], strides = [1, 1, 1, 1]} : vector<9x9x1x32xf32> to vector<1x1x1x32xf32>
    %596 = vector.shape_cast %595 : vector<1x1x1x32xf32> to vector<1x32xf32>
    %597 = vector.shape_cast %596 : vector<1x32xf32> to vector<1x1x32xf32>
    %598 = vector.broadcast %597 : vector<1x1x32xf32> to vector<8x8x32xf32>
    %599 = arith.mulf %13, %598 : vector<8x8x32xf32>
    %600 = arith.addf %594, %599 : vector<8x8x32xf32>
    %601 = vector.extract_strided_slice %7 {offsets = [7, 4, 0, 0], sizes = [1, 1, 1, 32], strides = [1, 1, 1, 1]} : vector<9x9x1x32xf32> to vector<1x1x1x32xf32>
    %602 = vector.shape_cast %601 : vector<1x1x1x32xf32> to vector<1x32xf32>
    %603 = vector.shape_cast %602 : vector<1x32xf32> to vector<1x1x32xf32>
    %604 = vector.broadcast %603 : vector<1x1x32xf32> to vector<8x8x32xf32>
    %605 = arith.mulf %14, %604 : vector<8x8x32xf32>
    %606 = arith.addf %600, %605 : vector<8x8x32xf32>
    %607 = vector.extract_strided_slice %7 {offsets = [7, 5, 0, 0], sizes = [1, 1, 1, 32], strides = [1, 1, 1, 1]} : vector<9x9x1x32xf32> to vector<1x1x1x32xf32>
    %608 = vector.shape_cast %607 : vector<1x1x1x32xf32> to vector<1x32xf32>
    %609 = vector.shape_cast %608 : vector<1x32xf32> to vector<1x1x32xf32>
    %610 = vector.broadcast %609 : vector<1x1x32xf32> to vector<8x8x32xf32>
    %611 = arith.mulf %15, %610 : vector<8x8x32xf32>
    %612 = arith.addf %606, %611 : vector<8x8x32xf32>
    %613 = vector.extract_strided_slice %7 {offsets = [7, 6, 0, 0], sizes = [1, 1, 1, 32], strides = [1, 1, 1, 1]} : vector<9x9x1x32xf32> to vector<1x1x1x32xf32>
    %614 = vector.shape_cast %613 : vector<1x1x1x32xf32> to vector<1x32xf32>
    %615 = vector.shape_cast %614 : vector<1x32xf32> to vector<1x1x32xf32>
    %616 = vector.broadcast %615 : vector<1x1x32xf32> to vector<8x8x32xf32>
    %617 = arith.mulf %16, %616 : vector<8x8x32xf32>
    %618 = arith.addf %612, %617 : vector<8x8x32xf32>
    %619 = vector.extract_strided_slice %7 {offsets = [7, 7, 0, 0], sizes = [1, 1, 1, 32], strides = [1, 1, 1, 1]} : vector<9x9x1x32xf32> to vector<1x1x1x32xf32>
    %620 = vector.shape_cast %619 : vector<1x1x1x32xf32> to vector<1x32xf32>
    %621 = vector.shape_cast %620 : vector<1x32xf32> to vector<1x1x32xf32>
    %622 = vector.broadcast %621 : vector<1x1x32xf32> to vector<8x8x32xf32>
    %623 = arith.mulf %17, %622 : vector<8x8x32xf32>
    %624 = arith.addf %618, %623 : vector<8x8x32xf32>
    %625 = vector.extract_strided_slice %7 {offsets = [7, 8, 0, 0], sizes = [1, 1, 1, 32], strides = [1, 1, 1, 1]} : vector<9x9x1x32xf32> to vector<1x1x1x32xf32>
    %626 = vector.shape_cast %625 : vector<1x1x1x32xf32> to vector<1x32xf32>
    %627 = vector.shape_cast %626 : vector<1x32xf32> to vector<1x1x32xf32>
    %628 = vector.broadcast %627 : vector<1x1x32xf32> to vector<8x8x32xf32>
    %629 = arith.mulf %18, %628 : vector<8x8x32xf32>
    %630 = arith.addf %624, %629 : vector<8x8x32xf32>
    %631 = vector.extract_strided_slice %8 {offsets = [7, 0, 0], sizes = [1, 1, 32], strides = [1, 1, 1]} : vector<9x1x32xf32> to vector<1x1x32xf32>
    %632 = vector.shape_cast %631 : vector<1x1x32xf32> to vector<1x32xf32>
    %633 = vector.shape_cast %632 : vector<1x32xf32> to vector<1x1x32xf32>
    %634 = vector.broadcast %633 : vector<1x1x32xf32> to vector<8x8x32xf32>
    %635 = arith.mulf %630, %634 : vector<8x8x32xf32>
    %636 = vector.extract_strided_slice %9 {offsets = [7, 0, 0], sizes = [1, 1, 32], strides = [1, 1, 1]} : vector<9x1x32xf32> to vector<1x1x32xf32>
    %637 = vector.shape_cast %636 : vector<1x1x32xf32> to vector<1x32xf32>
    %638 = vector.shape_cast %637 : vector<1x32xf32> to vector<1x1x32xf32>
    %639 = vector.broadcast %638 : vector<1x1x32xf32> to vector<8x8x32xf32>
    %640 = arith.addf %635, %639 : vector<8x8x32xf32>
    %cst_22 = arith.constant 0.000000e+00 : f32
    %641 = vector.broadcast %cst_22 : f32 to vector<8x8x32xf32>
    %642 = arith.maximumf %640, %641 : vector<8x8x32xf32>
    %643 = arith.mulf %97, %108 : vector<8x8x32xf32>
    %644 = arith.mulf %642, %643 : vector<8x8x32xf32>
    %645 = vector.extract_strided_slice %7 {offsets = [8, 0, 0, 0], sizes = [1, 1, 1, 32], strides = [1, 1, 1, 1]} : vector<9x9x1x32xf32> to vector<1x1x1x32xf32>
    %646 = vector.shape_cast %645 : vector<1x1x1x32xf32> to vector<1x32xf32>
    %647 = vector.shape_cast %646 : vector<1x32xf32> to vector<1x1x32xf32>
    %648 = vector.broadcast %647 : vector<1x1x32xf32> to vector<8x8x32xf32>
    %649 = arith.mulf %10, %648 : vector<8x8x32xf32>
    %650 = vector.extract_strided_slice %7 {offsets = [8, 1, 0, 0], sizes = [1, 1, 1, 32], strides = [1, 1, 1, 1]} : vector<9x9x1x32xf32> to vector<1x1x1x32xf32>
    %651 = vector.shape_cast %650 : vector<1x1x1x32xf32> to vector<1x32xf32>
    %652 = vector.shape_cast %651 : vector<1x32xf32> to vector<1x1x32xf32>
    %653 = vector.broadcast %652 : vector<1x1x32xf32> to vector<8x8x32xf32>
    %654 = arith.mulf %11, %653 : vector<8x8x32xf32>
    %655 = arith.addf %649, %654 : vector<8x8x32xf32>
    %656 = vector.extract_strided_slice %7 {offsets = [8, 2, 0, 0], sizes = [1, 1, 1, 32], strides = [1, 1, 1, 1]} : vector<9x9x1x32xf32> to vector<1x1x1x32xf32>
    %657 = vector.shape_cast %656 : vector<1x1x1x32xf32> to vector<1x32xf32>
    %658 = vector.shape_cast %657 : vector<1x32xf32> to vector<1x1x32xf32>
    %659 = vector.broadcast %658 : vector<1x1x32xf32> to vector<8x8x32xf32>
    %660 = arith.mulf %12, %659 : vector<8x8x32xf32>
    %661 = arith.addf %655, %660 : vector<8x8x32xf32>
    %662 = vector.extract_strided_slice %7 {offsets = [8, 3, 0, 0], sizes = [1, 1, 1, 32], strides = [1, 1, 1, 1]} : vector<9x9x1x32xf32> to vector<1x1x1x32xf32>
    %663 = vector.shape_cast %662 : vector<1x1x1x32xf32> to vector<1x32xf32>
    %664 = vector.shape_cast %663 : vector<1x32xf32> to vector<1x1x32xf32>
    %665 = vector.broadcast %664 : vector<1x1x32xf32> to vector<8x8x32xf32>
    %666 = arith.mulf %13, %665 : vector<8x8x32xf32>
    %667 = arith.addf %661, %666 : vector<8x8x32xf32>
    %668 = vector.extract_strided_slice %7 {offsets = [8, 4, 0, 0], sizes = [1, 1, 1, 32], strides = [1, 1, 1, 1]} : vector<9x9x1x32xf32> to vector<1x1x1x32xf32>
    %669 = vector.shape_cast %668 : vector<1x1x1x32xf32> to vector<1x32xf32>
    %670 = vector.shape_cast %669 : vector<1x32xf32> to vector<1x1x32xf32>
    %671 = vector.broadcast %670 : vector<1x1x32xf32> to vector<8x8x32xf32>
    %672 = arith.mulf %14, %671 : vector<8x8x32xf32>
    %673 = arith.addf %667, %672 : vector<8x8x32xf32>
    %674 = vector.extract_strided_slice %7 {offsets = [8, 5, 0, 0], sizes = [1, 1, 1, 32], strides = [1, 1, 1, 1]} : vector<9x9x1x32xf32> to vector<1x1x1x32xf32>
    %675 = vector.shape_cast %674 : vector<1x1x1x32xf32> to vector<1x32xf32>
    %676 = vector.shape_cast %675 : vector<1x32xf32> to vector<1x1x32xf32>
    %677 = vector.broadcast %676 : vector<1x1x32xf32> to vector<8x8x32xf32>
    %678 = arith.mulf %15, %677 : vector<8x8x32xf32>
    %679 = arith.addf %673, %678 : vector<8x8x32xf32>
    %680 = vector.extract_strided_slice %7 {offsets = [8, 6, 0, 0], sizes = [1, 1, 1, 32], strides = [1, 1, 1, 1]} : vector<9x9x1x32xf32> to vector<1x1x1x32xf32>
    %681 = vector.shape_cast %680 : vector<1x1x1x32xf32> to vector<1x32xf32>
    %682 = vector.shape_cast %681 : vector<1x32xf32> to vector<1x1x32xf32>
    %683 = vector.broadcast %682 : vector<1x1x32xf32> to vector<8x8x32xf32>
    %684 = arith.mulf %16, %683 : vector<8x8x32xf32>
    %685 = arith.addf %679, %684 : vector<8x8x32xf32>
    %686 = vector.extract_strided_slice %7 {offsets = [8, 7, 0, 0], sizes = [1, 1, 1, 32], strides = [1, 1, 1, 1]} : vector<9x9x1x32xf32> to vector<1x1x1x32xf32>
    %687 = vector.shape_cast %686 : vector<1x1x1x32xf32> to vector<1x32xf32>
    %688 = vector.shape_cast %687 : vector<1x32xf32> to vector<1x1x32xf32>
    %689 = vector.broadcast %688 : vector<1x1x32xf32> to vector<8x8x32xf32>
    %690 = arith.mulf %17, %689 : vector<8x8x32xf32>
    %691 = arith.addf %685, %690 : vector<8x8x32xf32>
    %692 = vector.extract_strided_slice %7 {offsets = [8, 8, 0, 0], sizes = [1, 1, 1, 32], strides = [1, 1, 1, 1]} : vector<9x9x1x32xf32> to vector<1x1x1x32xf32>
    %693 = vector.shape_cast %692 : vector<1x1x1x32xf32> to vector<1x32xf32>
    %694 = vector.shape_cast %693 : vector<1x32xf32> to vector<1x1x32xf32>
    %695 = vector.broadcast %694 : vector<1x1x32xf32> to vector<8x8x32xf32>
    %696 = arith.mulf %18, %695 : vector<8x8x32xf32>
    %697 = arith.addf %691, %696 : vector<8x8x32xf32>
    %698 = vector.extract_strided_slice %8 {offsets = [8, 0, 0], sizes = [1, 1, 32], strides = [1, 1, 1]} : vector<9x1x32xf32> to vector<1x1x32xf32>
    %699 = vector.shape_cast %698 : vector<1x1x32xf32> to vector<1x32xf32>
    %700 = vector.shape_cast %699 : vector<1x32xf32> to vector<1x1x32xf32>
    %701 = vector.broadcast %700 : vector<1x1x32xf32> to vector<8x8x32xf32>
    %702 = arith.mulf %697, %701 : vector<8x8x32xf32>
    %703 = vector.extract_strided_slice %9 {offsets = [8, 0, 0], sizes = [1, 1, 32], strides = [1, 1, 1]} : vector<9x1x32xf32> to vector<1x1x32xf32>
    %704 = vector.shape_cast %703 : vector<1x1x32xf32> to vector<1x32xf32>
    %705 = vector.shape_cast %704 : vector<1x32xf32> to vector<1x1x32xf32>
    %706 = vector.broadcast %705 : vector<1x1x32xf32> to vector<8x8x32xf32>
    %707 = arith.addf %702, %706 : vector<8x8x32xf32>
    %cst_23 = arith.constant 0.000000e+00 : f32
    %708 = vector.broadcast %cst_23 : f32 to vector<8x8x32xf32>
    %709 = arith.maximumf %707, %708 : vector<8x8x32xf32>
    %710 = arith.mulf %99, %108 : vector<8x8x32xf32>
    %711 = arith.mulf %709, %710 : vector<8x8x32xf32>
    %712 = tpu.concatenate %175, %242, %309, %376, %443, %510, %577, %644, %711 in 2 : vector<8x8x32xf32>, vector<8x8x32xf32>, vector<8x8x32xf32>, vector<8x8x32xf32>, vector<8x8x32xf32>, vector<8x8x32xf32>, vector<8x8x32xf32>, vector<8x8x32xf32>, vector<8x8x32xf32> -> vector<8x8x288xf32>
    %713 = vector.shape_cast %712 : vector<8x8x288xf32> to vector<64x288xf32>
    %714 = arith.truncf %713 : vector<64x288xf32> to vector<64x288xbf16>
    %c0_24 = arith.constant 0 : index
    %c0_25 = arith.constant 0 : index
    %715 = vector.load %arg7[%c0_24, %c0_25] : memref<288x32xbf16, #tpu.memory_space<vmem>>, vector<288x32xbf16>
    %cst_26 = arith.constant dense<0.000000e+00> : vector<64x32xf32>
    %716 = tpu.matmul %714, %715, %cst_26 {dimension_numbers = #tpu.dot_dimension_numbers<[1], [0], [0], [1], [0, 0, 1, 1], [], []>} : vector<64x288xbf16>, vector<288x32xbf16>, vector<64x32xf32> -> vector<64x32xf32>
    %c0_27 = arith.constant 0 : index
    %c0_28 = arith.constant 0 : index
    %717 = vector.load %arg8[%c0_27, %c0_28] : memref<1x32xf32, #tpu.memory_space<vmem>>, vector<1x32xf32>
    %718 = vector.broadcast %717 : vector<1x32xf32> to vector<64x32xf32>
    %719 = arith.addf %716, %718 : vector<64x32xf32>
    %720 = arith.negf %719 : vector<64x32xf32>
    %721 = math.exp %720 : vector<64x32xf32>
    %cst_29 = arith.constant 1.000000e+00 : f32
    %722 = vector.broadcast %cst_29 : f32 to vector<64x32xf32>
    %723 = arith.addf %722, %721 : vector<64x32xf32>
    %724 = arith.divf %722, %723 : vector<64x32xf32>
    %725 = arith.mulf %719, %724 : vector<64x32xf32>
    %726 = vector.shape_cast %725 : vector<64x32xf32> to vector<8x8x32xf32>
    %727 = arith.truncf %726 : vector<8x8x32xf32> to vector<8x8x32xbf16>
    %c0_30 = arith.constant 0 : index
    %c0_31 = arith.constant 0 : index
    %c0_32 = arith.constant 0 : index
    %c0_33 = arith.constant 0 : index
    %728 = vector.load %arg9[%c0_30, %c0_31, %c0_32, %c0_33] : memref<1x8x8x32xbf16, #tpu.memory_space<vmem>>, vector<1x8x8x32xbf16>
    %729 = vector.shape_cast %728 : vector<1x8x8x32xbf16> to vector<8x8x32xbf16>
    %730 = vector.shape_cast %727 : vector<8x8x32xbf16> to vector<1x8x8x32xbf16>
    tpu.vector_store %arg9[%c0_30, %c0_31, %c0_32, %c0_33], %730 {strides = array<i32>} : memref<1x8x8x32xbf16, #tpu.memory_space<vmem>>, vector<1x8x8x32xbf16>,
    return
  }
  func.func @transform_0(%arg0: i32, %arg1: i32) -> (i32, i32, i32, i32) {
    %c0_i32 = arith.constant 0 : i32
    %c0_i32_0 = arith.constant 0 : i32
    %c0_i32_1 = arith.constant 0 : i32
    %c0_i32_2 = arith.constant 0 : i32
    return %arg0, %c0_i32, %c0_i32_0, %c0_i32_1 : i32, i32, i32, i32
  }
  func.func @transform_1(%arg0: i32, %arg1: i32) -> (i32, i32, i32) {
    %c0_i32 = arith.constant 0 : i32
    %c0_i32_0 = arith.constant 0 : i32
    %c0_i32_1 = arith.constant 0 : i32
    %c0_i32_2 = arith.constant 0 : i32
    return %c0_i32, %c0_i32_0, %c0_i32_1 : i32, i32, i32
  }
  func.func @transform_2(%arg0: i32, %arg1: i32) -> (i32, i32, i32, i32) {
    %c0_i32 = arith.constant 0 : i32
    %c0_i32_0 = arith.constant 0 : i32
    %c0_i32_1 = arith.constant 0 : i32
    %c0_i32_2 = arith.constant 0 : i32
    %c0_i32_3 = arith.constant 0 : i32
    return %c0_i32, %c0_i32_0, %c0_i32_1, %c0_i32_2 : i32, i32, i32, i32
  }
  func.func @transform_3(%arg0: i32, %arg1: i32) -> (i32, i32, i32) {
    %c0_i32 = arith.constant 0 : i32
    %c0_i32_0 = arith.constant 0 : i32
    %c0_i32_1 = arith.constant 0 : i32
    %c0_i32_2 = arith.constant 0 : i32
    return %c0_i32, %c0_i32_0, %c0_i32_1 : i32, i32, i32
  }
  func.func @transform_4(%arg0: i32, %arg1: i32) -> (i32, i32, i32) {
    %c0_i32 = arith.constant 0 : i32
    %c0_i32_0 = arith.constant 0 : i32
    %c0_i32_1 = arith.constant 0 : i32
    %c0_i32_2 = arith.constant 0 : i32
    return %c0_i32, %c0_i32_0, %c0_i32_1 : i32, i32, i32
  }
  func.func @transform_5(%arg0: i32, %arg1: i32) -> (i32, i32) {
    %c0_i32 = arith.constant 0 : i32
    %c0_i32_0 = arith.constant 0 : i32
    %c0_i32_1 = arith.constant 0 : i32
    return %c0_i32, %c0_i32_0 : i32, i32
  }
  func.func @transform_6(%arg0: i32, %arg1: i32) -> (i32, i32) {
    %c0_i32 = arith.constant 0 : i32
    %c0_i32_0 = arith.constant 0 : i32
    %c0_i32_1 = arith.constant 0 : i32
    return %c0_i32, %c0_i32_0 : i32, i32
  }
  func.func @transform_7(%arg0: i32, %arg1: i32) -> (i32, i32, i32, i32) {
    %c0_i32 = arith.constant 0 : i32
    %c0_i32_0 = arith.constant 0 : i32
    %c0_i32_1 = arith.constant 0 : i32
    return %arg0, %arg1, %c0_i32, %c0_i32_0 : i32, i32, i32, i32
  }
}

</mosaic_0001>

<bundles_post_ra>
// kernel: a2c2f_rfaconv_forward.4
= control target key start
LH: loop header
LB: loop body
LE: loop exit
PB: predicated region body
PF: predicated region fallthrough
CT: control target
= control target key end

     0   :  { %vm94_vm0 = vcmask 261120   ;;  %vm392_vm1 = vcmask 257024   ;;  %s795_s1 = inlined_call_operand.vmem [shape: bf16[32,32], index: 1, kind: input, shape index: {}]   ;;  %s796_s0 = inlined_call_operand.vmem [shape: bf16[128,32], index: 0, kind: input, shape index: {}]   ;;  %s797_s2 = inlined_call_operand.vmem [shape: f32[1,32], index: 2, kind: input, shape index: {}]   ;;  %s798_s3 = inlined_call_operand.vmem [shape: bf16[128,32], index: 3, kind: output, shape index: {}]  }
   0x1   :  { %v514_v0 = vld [vmem:[%s795_s1] sm:$0xff]   ;;  %v515_v1 = vld [vmem:[%s795_s1 + $0x8] sm:$0xff]   ;;  %v520_v6 = vld [vmem:[%s796_s0 + $0x10] sm:$0xff]  }
   0x2   :  { %490 = vmatprep.subr.bf16.mxu0 %v514_v0  ;;  %510 = vmatprep.subr.bf16.mxu1 %v514_v0  ;;  %v516_v2 = vld [vmem:[%s796_s0] sm:$0xff]   ;;  %v518_v4 = vld [vmem:[%s796_s0 + $0x8] sm:$0xff]   ;;  %v521_v7 = vld [vmem:[%s796_s0 + $0x30] sm:$0xff]  }
   0x3   :  { %491 = vmatpush3.bf16.msra.mxu0 %v514_v0  ;;  %512 = vmatpush3.bf16.msra.mxu1 %v514_v0  ;;  %v517_v3 = vld [vmem:[%s796_s0 + $0x20] sm:$0xff]   ;;  %v519_v5 = vld [vmem:[%s796_s0 + $0x28] sm:$0xff]   ;;  %v522_v8 = vld [vmem:[%s796_s0 + $0x18] sm:$0xff]  }
   0x4   :  { %492 = vmatprep.subr.bf16.mxu0 %v515_v1  ;;  %511 = vmatprep.subr.bf16.mxu1 %v515_v1  ;;  %v523_v9 = vld [vmem:[%s796_s0 + $0x38] sm:$0xff]   ;;  %v649_v10 = vld [vmem:[%s797_s2] ss:$0 sm:$0xff] }
   0x5   :  { %494 = vmatprep.mubr.msk.bf16.mxu0 %vm94_vm0, %v516_v2  ;;  %502 = vmatprep.mubr.msk.bf16.mxu1 %vm94_vm0, %v517_v3 }
   0x7   :  { %493 = vmatpush3.bf16.msra.mxu0 %v515_v1  ;;  %513 = vmatpush3.bf16.msra.mxu1 %v515_v1 }
   0xa   :  { %495 = vmatmul.mubr.msk.bf16.vlgmr.msra.gmra.mrb[0].mxu0 %vm94_vm0, %v518_v4  ;;  %503 = vmatmul.mubr.msk.bf16.vlgmr.msra.gmra.mrb[0].mxu1 %vm94_vm0, %v519_v5 }
   0xb   :  { %498 = vmatprep.mubr.msk.bf16.mxu0 %vm94_vm0, %v520_v6  ;;  %506 = vmatprep.mubr.msk.bf16.mxu1 %vm94_vm0, %v521_v7 }
  0x12   :  { %499 = vmatmul.mubr.msk.bf16.gmra.mrb[4].mxu0 %vm94_vm0, %v522_v8  ;;  %507 = vmatmul.mubr.msk.bf16.gmra.mrb[4].mxu1 %vm94_vm0, %v523_v9 }
  0xdd   :  { %v496_v11 = vpop.f32.mrb[0].mxu0  ;;  %v504_v12 = vpop.f32.mrb[0].mxu1 }
  0xde   :  { %v652_v13 = vadd.f32 %v496_v11, %v649_v10  ;;  %v655_v14 = vadd.f32 %v504_v12, %v649_v10  ;;  %v153_v15 = vpop.f32.mrb[1].mxu0  ;;  %v185_v16 = vpop.f32.mrb[1].mxu1 }
  0xdf   :  { %v658_v17 = vadd.f32 %v649_v10, %v153_v15  ;;  %v661_v18 = vadd.f32 %v649_v10, %v185_v16  ;;  %v497_v19 = vpop.f32.mrb[2].mxu0  ;;  %v505_v20 = vpop.f32.mrb[2].mxu1 }
  0xe0   :  { %v434_v21 = vmul.f32 -1.442695, %v652_v13  ;;  %v442_v22 = vmul.f32 -1.442695, %v655_v14  ;;  %v666_v23 = vadd.f32 %v497_v19, %v649_v10  ;;  %v669_v24 = vadd.f32 %v505_v20, %v649_v10  ;;  %v156_v25 = vpop.f32.mrb[3].mxu0  ;;  %v188_v26 = vpop.f32.mrb[3].mxu1 }
  0xe1   :  { %v432_v27 = vmul.f32 -1.442695, %v658_v17  ;;  %v440_v28 = vmul.f32 -1.442695, %v661_v18  ;;  %v674_v29 = vadd.f32 %v649_v10, %v156_v25  ;;  %v677_v30 = vadd.f32 %v649_v10, %v188_v26 }
  0xe2   :  { %524 = vpow2.f32 %v434_v21  ;;  %v435_v31 = vmul.f32 -1.442695, %v666_v23  ;;  %v443_v32 = vmul.f32 -1.442695, %v669_v24 }
  0xe3   :  { %526 = vpow2.f32 %v442_v22  ;;  %v433_v33 = vmul.f32 -1.442695, %v674_v29  ;;  %v441_v34 = vmul.f32 -1.442695, %v677_v30 }
  0xe4   :  { %528 = vpow2.f32 %v432_v27 }
  0xe5   :  { %530 = vpow2.f32 %v440_v28  ;;  %v500_v35 = vpop.f32.mrb[4].mxu0  ;;  %v508_v36 = vpop.f32.mrb[4].mxu1 }
  0xe6   :  { %532 = vpow2.f32 %v435_v31  ;;  %v684_v37 = vadd.f32 %v500_v35, %v649_v10  ;;  %v687_v38 = vadd.f32 %v508_v36, %v649_v10  ;;  %v169_v39 = vpop.f32.mrb[5].mxu0  ;;  %v201_v40 = vpop.f32.mrb[5].mxu1 }
  0xe7   :  { %534 = vpow2.f32 %v443_v32  ;;  %v690_v41 = vadd.f32 %v649_v10, %v169_v39  ;;  %v693_v42 = vadd.f32 %v649_v10, %v201_v40  ;;  %v501_v43 = vpop.f32.mrb[6].mxu0  ;;  %v509_v44 = vpop.f32.mrb[6].mxu1 }
  0xe8   :  { %536 = vpow2.f32 %v433_v33  ;;  %v438_v45 = vmul.f32 -1.442695, %v684_v37  ;;  %v446_v46 = vmul.f32 -1.442695, %v687_v38  ;;  %v698_v47 = vadd.f32 %v501_v43, %v649_v10  ;;  %v172_v48 = vpop.f32.mrb[7].mxu0  ;;  %v204_v49 = vpop.f32.mrb[7].mxu1 }
  0xe9   :  { %538 = vpow2.f32 %v441_v34  ;;  %v436_v50 = vmul.f32 -1.442695, %v690_v41  ;;  %v444_v51 = vmul.f32 -1.442695, %v693_v42  ;;  %v704_v6 = vadd.f32 %v509_v44, %v649_v10 }
  0xea   :  { %540 = vpow2.f32 %v438_v45  ;;  %v439_v52 = vmul.f32 -1.442695, %v698_v47  ;;  %v707_v9 = vadd.f32 %v649_v10, %v172_v48  ;;  %v710_v15 = vadd.f32 %v649_v10, %v204_v49 }
  0xeb   :  { %542 = vpow2.f32 %v446_v46  ;;  %v447_v22 = vmul.f32 -1.442695, %v704_v6 }
  0xec   :  { %v525_v53 = vpop.eup %524  ;;  %544 = vpow2.f32 %v436_v50  ;;  %v437_v27 = vmul.f32 -1.442695, %v707_v9  ;;  %v445_v10 = vmul.f32 -1.442695, %v710_v15 }
  0xed   :  { %v527_v54 = vpop.eup %526  ;;  %v266_v55 = vadd.f32 1.0, %v525_v53  ;;  %546 = vpow2.f32 %v444_v51 }
  0xee   :  { %v529_v56 = vpop.eup %528  ;;  %v274_v57 = vadd.f32 1.0, %v527_v54  ;;  %548 = vpow2.f32 %v439_v52 }
  0xef   :  { %v531_v58 = vpop.eup %530  ;;  %550 = vrcp.f32 %v266_v55  ;;  %v264_v59 = vadd.f32 1.0, %v529_v56 }
  0xf0   :  { %v533_v60 = vpop.eup %532  ;;  %552 = vrcp.f32 %v274_v57  ;;  %v272_v61 = vadd.f32 1.0, %v531_v58 }
  0xf1   :  { %v535_v62 = vpop.eup %534  ;;  %554 = vrcp.f32 %v264_v59  ;;  %v267_v63 = vadd.f32 1.0, %v533_v60 }
  0xf2   :  { %v537_v0 = vpop.eup %536  ;;  %556 = vrcp.f32 %v272_v61  ;;  %v275_v1 = vadd.f32 1.0, %v535_v62 }
  0xf3   :  { %v539_v2 = vpop.eup %538  ;;  %558 = vrcp.f32 %v267_v63  ;;  %v265_v3 = vadd.f32 1.0, %v537_v0 }
  0xf4   :  { %v541_v4 = vpop.eup %540  ;;  %560 = vrcp.f32 %v275_v1  ;;  %v273_v5 = vadd.f32 1.0, %v539_v2 }
  0xf5   :  { %v543_v7 = vpop.eup %542  ;;  %562 = vrcp.f32 %v265_v3  ;;  %v270_v8 = vadd.f32 1.0, %v541_v4 }
  0xf6   :  { %v545_v11 = vpop.eup %544  ;;  %564 = vrcp.f32 %v273_v5  ;;  %v278_v12 = vadd.f32 1.0, %v543_v7 }
  0xf7   :  { %v547_v16 = vpop.eup %546  ;;  %566 = vrcp.f32 %v270_v8  ;;  %v268_v19 = vadd.f32 1.0, %v545_v11 }
  0xf8   :  { %v549_v20 = vpop.eup %548  ;;  %568 = vrcp.f32 %v278_v12  ;;  %v276_v21 = vadd.f32 1.0, %v547_v16 }
  0xf9   :  { %v551_v25 = vpop.eup %550  ;;  %570 = vrcp.f32 %v268_v19  ;;  %v271_v26 = vadd.f32 1.0, %v549_v20 }
  0xfa   :  { %v553_v28 = vpop.eup %552  ;;  %v314_v31 = vmul.f32 %v551_v25, %v652_v13  ;;  %572 = vrcp.f32 %v276_v21 }
  0xfb   :  { %v555_v32 = vpop.eup %554  ;;  %v322_v33 = vmul.f32 %v553_v28, %v655_v14  ;;  %574 = vrcp.f32 %v271_v26 }
  0xfc   :  { %v557_v34 = vpop.eup %556  ;;  %v466_v35 = vpack.c.bf16 %v314_v31, %v314_v31  ;;  %v312_v36 = vmul.f32 %v555_v32, %v658_v17  ;;  %576 = vpow2.f32 %v447_v22 }
  0xfd   :  { %v559_v39 = vpop.eup %558  ;;  %v474_v40 = vpack.c.bf16 %v322_v33, %v322_v33  ;;  %v320_v43 = vmul.f32 %v557_v34, %v661_v18  ;;  %578 = vpow2.f32 %v437_v27 }
  0xfe   :  { %v561_v44 = vpop.eup %560  ;;  %395 = vst.msk [vmem:[%s798_s3 + $0x8] sm:$0xf] %vm392_vm1, %v466_v35  ;;  %v464_v13 = vpack.c.bf16 %v312_v36, %v312_v36  ;;  %v315_v14 = vmul.f32 %v559_v39, %v666_v23  ;;  %580 = vpow2.f32 %v445_v10 }
  0xff   :  { %v563_v45 = vpop.eup %562  ;;  %403 = vst.msk [vmem:[%s798_s3 + $0x28] sm:$0xf] %vm392_vm1, %v474_v40  ;;  %v472_v17 = vpack.c.bf16 %v320_v43, %v320_v43  ;;  %v323_v18 = vmul.f32 %v561_v44, %v669_v24 }
 0x100   :  { %v565_v46 = vpop.eup %564  ;;  %393 = vst.msk [vmem:[%s798_s3] sm:$0xf] %vm392_vm1, %v464_v13  ;;  %v467_v48 = vpack.c.bf16 %v315_v14, %v315_v14  ;;  %v313_v49 = vmul.f32 %v563_v45, %v674_v29 }
 0x101   :  { %v567_v23 = vpop.eup %566  ;;  %401 = vst.msk [vmem:[%s798_s3 + $0x20] sm:$0xf] %vm392_vm1, %v472_v17  ;;  %v475_v50 = vpack.c.bf16 %v323_v18, %v323_v18  ;;  %v321_v51 = vmul.f32 %v565_v46, %v677_v30 }
 0x102   :  { %v569_v52 = vpop.eup %568  ;;  %396 = vst.msk [vmem:[%s798_s3 + $0xc] sm:$0xf] %vm392_vm1, %v467_v48  ;;  %v465_v24 = vpack.c.bf16 %v313_v49, %v313_v49  ;;  %v318_v53 = vmul.f32 %v567_v23, %v684_v37 }
 0x103   :  { %v571_v54 = vpop.eup %570  ;;  %404 = vst.msk [vmem:[%s798_s3 + $0x2c] sm:$0xf] %vm392_vm1, %v475_v50  ;;  %v473_v29 = vpack.c.bf16 %v321_v51, %v321_v51  ;;  %v326_v55 = vmul.f32 %v569_v52, %v687_v38 }
 0x104   :  { %v573_v56 = vpop.eup %572  ;;  %394 = vst.msk [vmem:[%s798_s3 + $0x4] sm:$0xf] %vm392_vm1, %v465_v24  ;;  %v470_v30 = vpack.c.bf16 %v318_v53, %v318_v53  ;;  %v316_v57 = vmul.f32 %v571_v54, %v690_v41 }
 0x105   :  { %v575_v58 = vpop.eup %574  ;;  %402 = vst.msk [vmem:[%s798_s3 + $0x24] sm:$0xf] %vm392_vm1, %v473_v29  ;;  %v478_v37 = vpack.c.bf16 %v326_v55, %v326_v55  ;;  %v324_v59 = vmul.f32 %v573_v56, %v693_v42 }
 0x106   :  { %v577_v60 = vpop.eup %576  ;;  %399 = vst.msk [vmem:[%s798_s3 + $0x18] sm:$0xf] %vm392_vm1, %v470_v30  ;;  %v468_v38 = vpack.c.bf16 %v316_v57, %v316_v57  ;;  %v319_v61 = vmul.f32 %v575_v58, %v698_v47 }
 0x107   :  { %v579_v62 = vpop.eup %578  ;;  %407 = vst.msk [vmem:[%s798_s3 + $0x38] sm:$0xf] %vm392_vm1, %v478_v37  ;;  %v476_v41 = vpack.c.bf16 %v324_v59, %v324_v59  ;;  %v279_v63 = vadd.f32 1.0, %v577_v60 }
 0x108   :  { %v581_v0 = vpop.eup %580  ;;  %397 = vst.msk [vmem:[%s798_s3 + $0x10] sm:$0xf] %vm392_vm1, %v468_v38  ;;  %v471_v42 = vpack.c.bf16 %v319_v61, %v319_v61  ;;  %v269_v1 = vadd.f32 1.0, %v579_v62 }
 0x109   :  { %405 = vst.msk [vmem:[%s798_s3 + $0x30] sm:$0xf] %vm392_vm1, %v476_v41  ;;  %582 = vrcp.f32 %v279_v63  ;;  %v277_v47 = vadd.f32 1.0, %v581_v0 }
 0x10a   :  { %400 = vst.msk [vmem:[%s798_s3 + $0x1c] sm:$0xf] %vm392_vm1, %v471_v42  ;;  %584 = vrcp.f32 %v269_v1 }
 0x10b   :  { %586 = vrcp.f32 %v277_v47 }
 0x113   :  { %v583_v2 = vpop.eup %582 }
 0x114   :  { %v585_v3 = vpop.eup %584  ;;  %v327_v4 = vmul.f32 %v583_v2, %v704_v6 }
 0x115   :  { %v587_v5 = vpop.eup %586  ;;  %v317_v7 = vmul.f32 %v585_v3, %v707_v9 }
 0x116   :  { %v479_v8 = vpack.c.bf16 %v327_v4, %v327_v4  ;;  %v325_v11 = vmul.f32 %v587_v5, %v710_v15 }
 0x117   :  { %v469_v12 = vpack.c.bf16 %v317_v7, %v317_v7 }
 0x118   :  { %408 = vst.msk [vmem:[%s798_s3 + $0x3c] sm:$0xf] %vm392_vm1, %v479_v8  ;;  %v477_v16 = vpack.c.bf16 %v325_v11, %v325_v11 }
 0x119   :  { %398 = vst.msk [vmem:[%s798_s3 + $0x14] sm:$0xf] %vm392_vm1, %v469_v12 }
 0x11a   :  { %406 = vst.msk [vmem:[%s798_s3 + $0x34] sm:$0xf] %vm392_vm1, %v477_v16 }

// kernel: a2c2f_rfaconv_forward.7
= control target key start
LH: loop header
LB: loop body
LE: loop exit
PB: predicated region body
PF: predicated region fallthrough
CT: control target
= control target key end

     0   :  { %vm114_vm0 = vcmask 261120   ;;  %s1039_s0 = inlined_call_operand.vmem [shape: bf16[128,32], index: 0, kind: input, shape index: {}]   ;;  %s1040_s1 = inlined_call_operand.vmem [shape: bf16[128,32], index: 1, kind: input, shape index: {}]   ;;  %s1041_s2 = inlined_call_operand.vmem [shape: bf16[32,64], index: 2, kind: input, shape index: {}]   ;;  %s1042_s3 = inlined_call_operand.vmem [shape: bf16[32,64], index: 3, kind: input, shape index: {}]   ;;  %s1043_s4 = inlined_call_operand.vmem [shape: f32[1,64], index: 4, kind: input, shape index: {}]   ;;  %s1044_s5 = inlined_call_operand.hbm [shape: f32[128,64], index: 5, kind: output, shape index: {}]  }
   0x1   :  { %v709_v0 = vld [vmem:[%s1042_s3] sm:$0xff]   ;;  %v711_v2 = vld [vmem:[%s1042_s3 + $0x8] sm:$0xff]   ;;  %v717_v8 = vld [vmem:[%s1040_s1 + $0x10] sm:$0xff]  }
   0x2   :  { %v710_v1 = vld [vmem:[%s1041_s2] sm:$0xff]   ;;  %650 = vmatprep.subr.bf16.mxu1 %v709_v0  ;;  %v712_v3 = vld [vmem:[%s1041_s2 + $0x8] sm:$0xff]   ;;  %v718_v9 = vld [vmem:[%s1039_s0 + $0x10] sm:$0xff]  }
   0x3   :  { %670 = vmatprep.subr.bf16.mxu0 %v710_v1  ;;  %651 = vmatpush3.bf16.msra.mxu1 %v709_v0  ;;  %v713_v4 = vld [vmem:[%s1040_s1] sm:$0xff]   ;;  %v715_v6 = vld [vmem:[%s1040_s1 + $0x8] sm:$0xff]   ;;  %v719_v10 = vld [vmem:[%s1040_s1 + $0x18] sm:$0xff]  }
   0x4   :  { %671 = vmatpush3.bf16.msra.mxu0 %v710_v1  ;;  %652 = vmatprep.subr.bf16.mxu1 %v711_v2  ;;  %v714_v5 = vld [vmem:[%s1039_s0] sm:$0xff]   ;;  %v716_v7 = vld [vmem:[%s1039_s0 + $0x8] sm:$0xff]   ;;  %v720_v11 = vld [vmem:[%s1039_s0 + $0x18] sm:$0xff]  }
   0x5   :  { %672 = vmatprep.subr.bf16.mxu0 %v712_v3  ;;  %654 = vmatprep.mubr.msk.bf16.mxu1 %vm114_vm0, %v713_v4  ;;  %v721_v12 = vld [vmem:[%s1040_s1 + $0x20] sm:$0xff]  }
   0x6   :  { %674 = vmatprep.mubr.msk.bf16.mxu0 %vm114_vm0, %v714_v5  ;;  %v722_v13 = vld [vmem:[%s1039_s0 + $0x20] sm:$0xff]  }
   0x7   :  { %653 = vmatpush3.bf16.msra.mxu1 %v711_v2 }
   0x8   :  { %673 = vmatpush3.bf16.msra.mxu0 %v712_v3 }
   0xa   :  { %655 = vmatmul.mubr.msk.bf16.vlgmr.msra.gmra.mrb[0].mxu1 %vm114_vm0, %v715_v6 }
   0xb   :  { %675 = vmatmul.mubr.msk.bf16.vlgmr.msra.gmra.mrb[0].mxu0 %vm114_vm0, %v716_v7  ;;  %658 = vmatprep.mubr.msk.bf16.mxu1 %vm114_vm0, %v717_v8 }
   0xc   :  { %678 = vmatprep.mubr.msk.bf16.mxu0 %vm114_vm0, %v718_v9 }
  0x12   :  { %659 = vmatmul.mubr.msk.bf16.gmra.mrb[4].mxu1 %vm114_vm0, %v719_v10 }
  0x13   :  { %679 = vmatmul.mubr.msk.bf16.gmra.mrb[4].mxu0 %vm114_vm0, %v720_v11  ;;  %662 = vmatprep.mubr.msk.bf16.mxu1 %vm114_vm0, %v721_v12 }
  0x14   :  { %682 = vmatprep.mubr.msk.bf16.mxu0 %vm114_vm0, %v722_v13 }
  0x15   :  { %10 = vsyncpa [#allocation3], 0  ;;  %v723_v14 = vld [vmem:[%s1040_s1 + $0x28] sm:$0xff]   ;;  %v725_v16 = vld [vmem:[%s1040_s1 + $0x30] sm:$0xff]   ;;  %vm544_vm1 = vcmask 523264  }
  0x16   :  { %v724_v15 = vld [vmem:[%s1039_s0 + $0x28] sm:$0xff]   ;;  %v726_v17 = vld [vmem:[%s1039_s0 + $0x30] sm:$0xff]   ;;  %v727_v18 = vld [vmem:[%s1040_s1 + $0x38] sm:$0xff]  }
  0x17   :  { %v728_v19 = vld [vmem:[%s1039_s0 + $0x38] sm:$0xff]   ;;  %v929_v22 = vld [vmem:[%s1043_s4] ss:$0 sm:$0xff]  ;;  %s817_s0 = smov [#allocation2]  }
  0x18   :  { %s566_s1 = sshll.u32 %s817_s0, 4  ;;  %s567_s1 = int_to_ptr.vmem [resolvable:$true] %s566_s1 }
  0x19   :  { %s793_s4 = scalar_lea.vmem %s567_s1, 2048  ;;  %p798_p1 = scmp.lt.s32.totalorder %s567_s1, %s567_s1 }
  0x1a   :  { %663 = vmatmul.mubr.msk.bf16.gmra.mrb[8].mxu1 %vm114_vm0, %v723_v14  ;;  %p794_p0 = scmp.ne.s32.totalorder %s567_s1, %s793_s4  ;;  %p799_p2 = scmp.lt.s32.totalorder %s793_s4, %s793_s4 }
  0x1b   :  { %683 = vmatmul.mubr.msk.bf16.gmra.mrb[8].mxu0 %vm114_vm0, %v724_v15  ;;  %666 = vmatprep.mubr.msk.bf16.mxu1 %vm114_vm0, %v725_v16 }
  0x1c   :  { %686 = vmatprep.mubr.msk.bf16.mxu0 %vm114_vm0, %v726_v17  ;;  %p800_p3 = por %p799_p2, %p798_p1 }
  0x1e   :  { %p801_p4 = pnand %p800_p3, %p794_p0 }
  0x22   :  { %667 = vmatmul.mubr.msk.bf16.gmra.mrb[12].mxu1 %vm114_vm0, %v727_v18 }
  0x23   :  { %687 = vmatmul.mubr.msk.bf16.gmra.mrb[12].mxu0 %vm114_vm0, %v728_v19 }
  0xdd   :  { %v656_v20 = vpop.f32.mrb[0].mxu1 }
  0xde   :  { %v676_v21 = vpop.f32.mrb[0].mxu0  ;;  %v173_v23 = vpop.f32.mrb[1].mxu1 }
  0xdf   :  { %v355_v24 = vadd.f32 %v676_v21, %v656_v20  ;;  %v346_v25 = vpop.f32.mrb[1].mxu0  ;;  %v657_v26 = vpop.f32.mrb[2].mxu1 }
  0xe0   :  { %v347_v27 = vadd.f32 %v346_v25, %v173_v23  ;;  %v677_v28 = vpop.f32.mrb[2].mxu0  ;;  %v176_v29 = vpop.f32.mrb[3].mxu1 }
  0xe1   :  { %v932_v30 = vadd.f32 %v929_v22, %v355_v24  ;;  %v358_v31 = vadd.f32 %v677_v28, %v657_v26  ;;  %v349_v32 = vpop.f32.mrb[3].mxu0 }
  0xe2   :  { %v935_v33 = vadd.f32 %v929_v22, %v347_v27  ;;  %v350_v34 = vadd.f32 %v349_v32, %v176_v29 }
  0xe3   :  { %v616_v35 = vmul.f32 -1.442695, %v932_v30  ;;  %v939_v36 = vadd.f32 %v929_v22, %v358_v31 }
  0xe4   :  { %v614_v37 = vmul.f32 -1.442695, %v935_v33  ;;  %v943_v38 = vadd.f32 %v929_v22, %v350_v34 }
  0xe5   :  { %729 = vpow2.f32 %v616_v35  ;;  %v617_v39 = vmul.f32 -1.442695, %v939_v36  ;;  %v660_v40 = vpop.f32.mrb[4].mxu1 }
  0xe6   :  { %731 = vpow2.f32 %v614_v37  ;;  %v615_v41 = vmul.f32 -1.442695, %v943_v38  ;;  %v680_v42 = vpop.f32.mrb[4].mxu0  ;;  %v189_v43 = vpop.f32.mrb[5].mxu1 }
  0xe7   :  { %733 = vpow2.f32 %v617_v39  ;;  %v371_v44 = vadd.f32 %v680_v42, %v660_v40  ;;  %v362_v45 = vpop.f32.mrb[5].mxu0  ;;  %v661_v46 = vpop.f32.mrb[6].mxu1 }
  0xe8   :  { %735 = vpow2.f32 %v615_v41  ;;  %v363_v47 = vadd.f32 %v362_v45, %v189_v43  ;;  %v681_v48 = vpop.f32.mrb[6].mxu0  ;;  %v192_v49 = vpop.f32.mrb[7].mxu1 }
  0xe9   :  { %v948_v50 = vadd.f32 %v929_v22, %v371_v44  ;;  %v374_v51 = vadd.f32 %v681_v48, %v661_v46  ;;  %v365_v52 = vpop.f32.mrb[7].mxu0 }
  0xea   :  { %v951_v53 = vadd.f32 %v929_v22, %v363_v47  ;;  %v366_v54 = vadd.f32 %v365_v52, %v192_v49 }
  0xeb   :  { %v620_v55 = vmul.f32 -1.442695, %v948_v50  ;;  %v955_v56 = vadd.f32 %v929_v22, %v374_v51 }
  0xec   :  { %v618_v57 = vmul.f32 -1.442695, %v951_v53  ;;  %v959_v58 = vadd.f32 %v929_v22, %v366_v54 }
  0xed   :  { %737 = vpow2.f32 %v620_v55  ;;  %v621_v59 = vmul.f32 -1.442695, %v955_v56  ;;  %v664_v60 = vpop.f32.mrb[8].mxu1 }
  0xee   :  { %739 = vpow2.f32 %v618_v57  ;;  %v619_v61 = vmul.f32 -1.442695, %v959_v58  ;;  %v684_v62 = vpop.f32.mrb[8].mxu0  ;;  %v205_v63 = vpop.f32.mrb[9].mxu1 }
  0xef   :  { %v730_v0 = vpop.eup %729  ;;  %741 = vpow2.f32 %v621_v59  ;;  %v387_v1 = vadd.f32 %v684_v62, %v664_v60  ;;  %v378_v2 = vpop.f32.mrb[9].mxu0 }
  0xf0   :  { %v665_v3 = vpop.f32.mrb[10].mxu1  ;;  %v732_v4 = vpop.eup %731  ;;  %v482_v5 = vadd.f32 1.0, %v730_v0  ;;  %743 = vpow2.f32 %v619_v61  ;;  %v379_v6 = vadd.f32 %v378_v2, %v205_v63 }
  0xf1   :  { %v685_v7 = vpop.f32.mrb[10].mxu0  ;;  %v208_v8 = vpop.f32.mrb[11].mxu1  ;;  %v480_v10 = vadd.f32 1.0, %v732_v4  ;;  %v964_v11 = vadd.f32 %v929_v22, %v387_v1 }
  0xf2   :  { %v734_v9 = vpop.eup %733  ;;  %v390_v12 = vadd.f32 %v685_v7, %v665_v3  ;;  %v381_v13 = vpop.f32.mrb[11].mxu0  ;;  %745 = vrcp.f32 %v482_v5  ;;  %v967_v16 = vadd.f32 %v929_v22, %v379_v6 }
  0xf3   :  { %v736_v14 = vpop.eup %735  ;;  %v483_v15 = vadd.f32 1.0, %v734_v9  ;;  %v382_v17 = vadd.f32 %v381_v13, %v208_v8  ;;  %747 = vrcp.f32 %v480_v10  ;;  %v624_v19 = vmul.f32 -1.442695, %v964_v11 }
  0xf4   :  { %v481_v18 = vadd.f32 1.0, %v736_v14  ;;  %v971_v20 = vadd.f32 %v929_v22, %v390_v12  ;;  %v622_v21 = vmul.f32 -1.442695, %v967_v16 }
  0xf5   :  { %749 = vrcp.f32 %v483_v15  ;;  %v975_v23 = vadd.f32 %v929_v22, %v382_v17  ;;  %v668_v25 = vpop.f32.mrb[12].mxu1 }
  0xf6   :  { %751 = vrcp.f32 %v481_v18  ;;  %v625_v24 = vmul.f32 -1.442695, %v971_v20  ;;  %v688_v27 = vpop.f32.mrb[12].mxu0  ;;  %v221_v28 = vpop.f32.mrb[13].mxu1 }
  0xf7   :  { %753 = vpow2.f32 %v624_v19  ;;  %v623_v26 = vmul.f32 -1.442695, %v975_v23  ;;  %v738_v29 = vpop.eup %737  ;;  %v403_v31 = vadd.f32 %v688_v27, %v668_v25  ;;  %v394_v32 = vpop.f32.mrb[13].mxu0 }
  0xf8   :  { %755 = vpow2.f32 %v622_v21  ;;  %v669_v34 = vpop.f32.mrb[14].mxu1  ;;  %v740_v35 = vpop.eup %739  ;;  %v486_v37 = vadd.f32 1.0, %v738_v29  ;;  %v395_v39 = vadd.f32 %v394_v32, %v221_v28 }
  0xf9   :  { %757 = vpow2.f32 %v625_v24  ;;  %v689_v40 = vpop.f32.mrb[14].mxu0  ;;  %v224_v41 = vpop.f32.mrb[15].mxu1  ;;  %v484_v43 = vadd.f32 1.0, %v740_v35  ;;  %v980_v44 = vadd.f32 %v929_v22, %v403_v31 }
  0xfa   :  { %v742_v42 = vpop.eup %741  ;;  %759 = vpow2.f32 %v623_v26  ;;  %v406_v45 = vadd.f32 %v689_v40, %v669_v34  ;;  %v397_v46 = vpop.f32.mrb[15].mxu0  ;;  %v983_v49 = vadd.f32 %v929_v22, %v395_v39 }
  0xfb   :  { %v744_v47 = vpop.eup %743  ;;  %761 = vrcp.f32 %v486_v37  ;;  %v487_v48 = vadd.f32 1.0, %v742_v42  ;;  %v398_v51 = vadd.f32 %v397_v46, %v224_v41  ;;  %v628_v54 = vmul.f32 -1.442695, %v980_v44 }
  0xfc   :  { %763 = vrcp.f32 %v484_v43  ;;  %v485_v52 = vadd.f32 1.0, %v744_v47  ;;  %v987_v55 = vadd.f32 %v929_v22, %v406_v45  ;;  %v746_v57 = vpop.eup %745  ;;  %v626_v59 = vmul.f32 -1.442695, %v983_v49 }
  0xfd   :  { %765 = vrcp.f32 %v487_v48  ;;  %v991_v60 = vadd.f32 %v929_v22, %v398_v51  ;;  %v748_v61 = vpop.eup %747  ;;  %v530_v62 = vmul.f32 %v746_v57, %v932_v30 }
  0xfe   :  { %767 = vrcp.f32 %v485_v52  ;;  %v629_v63 = vmul.f32 -1.442695, %v987_v55  ;;  %v528_v1 = vmul.f32 %v748_v61, %v935_v33 }
  0xff   :  { %v750_v0 = vpop.eup %749  ;;  %769 = vpow2.f32 %v628_v54  ;;  %v627_v2 = vmul.f32 -1.442695, %v991_v60  ;;  %547 = vst.msk [vmem:[#allocation2 + $0x10] sm:$0xff] %vm544_vm1, %v530_v62 }
 0x100   :  { %v752_v3 = vpop.eup %751  ;;  %v531_v4 = vmul.f32 %v750_v0, %v939_v36  ;;  %771 = vpow2.f32 %v626_v59  ;;  %545 = vst.msk [vmem:[#allocation2] sm:$0xff] %vm544_vm1, %v528_v1 }
 0x101   :  { %v754_v22 = vpop.eup %753  ;;  %v529_v30 = vmul.f32 %v752_v3, %v943_v38  ;;  %773 = vpow2.f32 %v629_v63 }
 0x102   :  { %v756_v5 = vpop.eup %755  ;;  %548 = vst.msk [vmem:[#allocation2 + $0x18] sm:$0xff] %vm544_vm1, %v531_v4  ;;  %v490_v6 = vadd.f32 1.0, %v754_v22  ;;  %775 = vpow2.f32 %v627_v2 }
 0x103   :  { %v758_v33 = vpop.eup %757  ;;  %546 = vst.msk [vmem:[#allocation2 + $0x8] sm:$0xff] %vm544_vm1, %v529_v30  ;;  %v488_v7 = vadd.f32 1.0, %v756_v5 }
 0x104   :  { %v760_v8 = vpop.eup %759  ;;  %777 = vrcp.f32 %v490_v6  ;;  %v491_v9 = vadd.f32 1.0, %v758_v33 }
 0x105   :  { %v762_v36 = vpop.eup %761  ;;  %779 = vrcp.f32 %v488_v7  ;;  %v489_v10 = vadd.f32 1.0, %v760_v8 }
 0x106   :  { %v764_v12 = vpop.eup %763  ;;  %v534_v13 = vmul.f32 %v762_v36, %v948_v50  ;;  %781 = vrcp.f32 %v491_v9 }
 0x107   :  { %v766_v38 = vpop.eup %765  ;;  %v532_v14 = vmul.f32 %v764_v12, %v951_v53  ;;  %783 = vrcp.f32 %v489_v10 }
 0x108   :  { %v768_v15 = vpop.eup %767  ;;  %551 = vst.msk [vmem:[#allocation2 + $0x30] sm:$0xff] %vm544_vm1, %v534_v13  ;;  %v535_v17 = vmul.f32 %v766_v38, %v955_v56 }
 0x109   :  { %v770_v18 = vpop.eup %769  ;;  %549 = vst.msk [vmem:[#allocation2 + $0x20] sm:$0xff] %vm544_vm1, %v532_v14  ;;  %v533_v19 = vmul.f32 %v768_v15, %v959_v58 }
 0x10a   :  { %v772_v21 = vpop.eup %771  ;;  %552 = vst.msk [vmem:[#allocation2 + $0x38] sm:$0xff] %vm544_vm1, %v535_v17  ;;  %v494_v24 = vadd.f32 1.0, %v770_v18 }
 0x10b   :  { %v774_v50 = vpop.eup %773  ;;  %550 = vst.msk [vmem:[#allocation2 + $0x28] sm:$0xff] %vm544_vm1, %v533_v19  ;;  %v492_v25 = vadd.f32 1.0, %v772_v21 }
 0x10c   :  { %v776_v53 = vpop.eup %775  ;;  %785 = vrcp.f32 %v494_v24  ;;  %v495_v26 = vadd.f32 1.0, %v774_v50 }
 0x10d   :  { %787 = vrcp.f32 %v492_v25  ;;  %v493_v27 = vadd.f32 1.0, %v776_v53 }
 0x10e   :  { %v778_v28 = vpop.eup %777  ;;  %789 = vrcp.f32 %v495_v26 }
 0x10f   :  { %v780_v56 = vpop.eup %779  ;;  %v538_v29 = vmul.f32 %v778_v28, %v964_v11  ;;  %791 = vrcp.f32 %v493_v27 }
 0x110   :  { %v782_v58 = vpop.eup %781  ;;  %v536_v31 = vmul.f32 %v780_v56, %v967_v16 }
 0x111   :  { %v784_v32 = vpop.eup %783  ;;  %555 = vst.msk [vmem:[#allocation2 + $0x50] sm:$0xff] %vm544_vm1, %v538_v29  ;;  %v539_v34 = vmul.f32 %v782_v58, %v971_v20 }
 0x112   :  { %553 = vst.msk [vmem:[#allocation2 + $0x40] sm:$0xff] %vm544_vm1, %v536_v31  ;;  %v537_v35 = vmul.f32 %v784_v32, %v975_v23 }
 0x113   :  { %556 = vst.msk [vmem:[#allocation2 + $0x58] sm:$0xff] %vm544_vm1, %v539_v34 }
 0x114   :  { %554 = vst.msk [vmem:[#allocation2 + $0x48] sm:$0xff] %vm544_vm1, %v537_v35 }
 0x116   :  { %v786_v37 = vpop.eup %785 }
 0x117   :  { %v788_v11 = vpop.eup %787  ;;  %v542_v39 = vmul.f32 %v786_v37, %v980_v44 }
 0x118   :  { %v790_v16 = vpop.eup %789  ;;  %v540_v40 = vmul.f32 %v788_v11, %v983_v49 }
 0x119   :  { %v792_v41 = vpop.eup %791  ;;  %559 = vst.msk [vmem:[#allocation2 + $0x70] sm:$0xff] %vm544_vm1, %v542_v39  ;;  %v543_v20 = vmul.f32 %v790_v16, %v987_v55 }
 0x11a   :  { %557 = vst.msk [vmem:[#allocation2 + $0x60] sm:$0xff] %vm544_vm1, %v540_v40  ;;  %v541_v23 = vmul.f32 %v792_v41, %v991_v60 }
 0x11b   :  { %560 = vst.msk [vmem:[#allocation2 + $0x78] sm:$0xff] %vm544_vm1, %v543_v20 }
 0x11c   :  { %558 = vst.msk [vmem:[#allocation2 + $0x68] sm:$0xff] %vm544_vm1, %v541_v23 }
 0x11d   :  { %804 = shalt.err (!%p801_p4)
}
 0x11e   :  { %s805_s8 = scalar_lea.hbm %s1044_s5, 2048 }
 0x11f   :  { %p806_p5 = scmp.ne.s32.totalorder %s1044_s5, %s805_s8  ;;  %p809_p6 = scmp.lt.u32.totalorder %s805_s8, %s1044_s5 }
 0x121   :  { %p811_p7 = pnand %p809_p6, %p806_p5 }
 0x123   :  { %814 = shalt.err (!%p811_p7)
}
 0x124   :  { %s818_s13 = smov 128   ;;  %s819_s14 = smov 8  }
 0x125   :  { %572 = dma.vmem_to_hbm [thread:$0]  %s567_s1, 2048, %s1044_s5, [#allocation3], %s818_s13, %s818_s13, %s819_s14  }
 0x126   :  { %815 = dma.done.wait [#allocation3], 2048  }
 0x127   :  { %816 = vsyncadd [#allocation3], 4294965248 }
 0x128   :  { %576 = vsyncpa [#allocation3], 1 }

// kernel: a2c2f_rfaconv_forward.5
= control target key start
LH: loop header
LB: loop body
LE: loop exit
PB: predicated region body
PF: predicated region fallthrough
CT: control target
= control target key end

     0   :  { %s7910_s24 = smov 0   ;;  %s7912_s25 = smov 0   ;;  %s12303_s0 = inlined_call_operand.vmem [shape: bf16[2,10,10,32], index: 0, kind: input, shape index: {}]   ;;  %s12304_s1 = inlined_call_operand.vmem [shape: f32[9,1,32], index: 1, kind: input, shape index: {}]   ;;  %s12305_s2 = inlined_call_operand.vmem [shape: f32[9,9,1,32], index: 2, kind: input, shape index: {}]   ;;  %s12306_s3 = inlined_call_operand.vmem [shape: f32[9,1,32], index: 3, kind: input, shape index: {}]   ;;  %s12307_s4 = inlined_call_operand.vmem [shape: f32[9,1,32], index: 4, kind: input, shape index: {}]   ;;  %s12308_s5 = inlined_call_operand.vmem [shape: bf16[288,32], index: 5, kind: input, shape index: {}]   ;;  %s12309_s6 = inlined_call_operand.vmem [shape: f32[1,32], index: 6, kind: input, shape index: {}]   ;;  %s12310_s7 = inlined_call_operand.vmem [shape: bf16[2,8,8,32], index: 7, kind: output, shape index: {}]  }
   0x1   :  { %s7914_s26 = smov 0  }
   0x2 LB: > { %s29_s27 = sadd.s32 1, %s7861_s25  ;;  %p7017_p0 = scmp.ge.s32.totalorder %s7865_s26, 1  ;;  %s7865_s26 = sphi %s7914_s26, %s17_s26   ;;  %s7861_s25 = sphi %s7912_s25, %s12525_s25   ;;  %s7857_s24 = sphi %s7910_s24, %s12524_s24  }
   0x3   : > { %p31_p1 = scmp.ge.s32.totalorder %s29_s27, 2  ;;  %p251_p2 = scmp.lt.s32.totalorder %s7865_s26, 3 }
   0x5   : > { %s12527_s27 = smov (%p31_p1, %s29_s27), 0  ;;  %p252_p3 = pnand %p7017_p0, %p251_p2 }
   0x7   : > { %255 = sbr.rel (%p252_p3) target bundleno = 1282 (0x502), region = 48 }
   0xe   : > { %p287_p4 = scmp.lt.s32.totalorder %s7857_s24, 1  ;;  %vm471_vm0 = vcmask 1046528   ;;  %vm512_vm1 = vcmask 1045504   ;;  %v7096_v46 = vld [vmem:[%s12305_s2 + $0x36] ss:$0 sm:$0xff]  ;;  %s7867_s11 = smov 64  }
   0xf   : > { %v7097_v51 = vld [vmem:[%s12305_s2 + $0x37] ss:$0 sm:$0xff]  ;;  %s7868_s14 = smov 32   ;;  %s7869_s17 = smov 96   ;;  %vm6501_vm2 = vcmask 261120   ;;  %vm6510_vm3 = vcmask 523264  }
  0x10   : > { %s12529_s24 = smov (!%p287_p4, %s7857_s24), 1  ;;  %vm6519_vm4 = vcmask 785408   ;;  %vm6921_vm5 = vcmask 257024  }
  0x11   : > { %s7237_s28 = smul.u32 80, %s12529_s24 }
  0x13   : > { %s7934_s8 = scalar_lea.vmem %s12303_s0, %s7237_s28 }
  0x14   : > { %v307_v0 = vld [vmem:[%s7934_s8] ss:$8 sps:$4 sm:$0xff]   ;;  %v308_v1 = vld [vmem:[%s7934_s8 + $0x4] sm:$0x1]  ;;  %v310_v2 = vld [vmem:[%s7934_s8 + $0xc] sm:$0x1] }
  0x15   : > { %v311_v3 = vld [vmem:[%s7934_s8 + $0x10] ss:$8 sps:$4 sm:$0xff]   ;;  %v312_v4 = vld [vmem:[%s7934_s8 + $0x14] sm:$0x1]  ;;  %v314_v5 = vld [vmem:[%s7934_s8 + $0x1c] sm:$0x1]  ;;  %v7942_v6 = vunpack.c.l.bf16 %v307_v0  ;;  %v7944_v7 = vunpack.c.l.bf16 %v308_v1  ;;  %v7946_v8 = vunpack.c.h.bf16 %v307_v0  ;;  %v7948_v9 = vunpack.c.l.bf16 %v310_v2 }
  0x16   : > { %v315_v10 = vld [vmem:[%s7934_s8 + $0x20] ss:$8 sps:$4 sm:$0xff]   ;;  %v316_v11 = vld [vmem:[%s7934_s8 + $0x24] sm:$0x1]  ;;  %v318_v12 = vld [vmem:[%s7934_s8 + $0x2c] sm:$0x1]  ;;  %v7953_v13 = vunpack.c.l.bf16 %v311_v3  ;;  %v7955_v14 = vunpack.c.l.bf16 %v312_v4  ;;  %v7957_v15 = vunpack.c.h.bf16 %v311_v3  ;;  %v7959_v16 = vunpack.c.l.bf16 %v314_v5 }
  0x17   : > { %12386 = vst [vmem:[#allocation2_spill] sm:$0xff] %v7942_v6  ;;  %12387 = vst [vmem:[#allocation3_spill] sm:$0xff] %v7944_v7  ;;  %v319_v17 = vld [vmem:[%s7934_s8 + $0x30] ss:$8 sps:$4 sm:$0xff]   ;;  %v320_v18 = vld [vmem:[%s7934_s8 + $0x34] sm:$0x1]  ;;  %v7964_v20 = vunpack.c.l.bf16 %v315_v10  ;;  %v7966_v21 = vunpack.c.l.bf16 %v316_v11  ;;  %v7968_v22 = vunpack.c.h.bf16 %v315_v10  ;;  %v7970_v23 = vunpack.c.l.bf16 %v318_v12 }
  0x18   : > { %12388 = vst [vmem:[#allocation4_spill] sm:$0xff] %v7946_v8  ;;  %12389 = vst [vmem:[#allocation5_spill] sm:$0xff] %v7948_v9  ;;  %v322_v19 = vld [vmem:[%s7934_s8 + $0x3c] sm:$0x1]  ;;  %v323_v24 = vld [vmem:[%s7934_s8 + $0x40] ss:$8 sps:$4 sm:$0xff]   ;;  %v7974_v26 = vunpack.c.l.bf16 %v319_v17  ;;  %v7976_v27 = vunpack.c.l.bf16 %v320_v18  ;;  %v7978_v28 = vunpack.c.h.bf16 %v319_v17  ;;  %v4581_v62 = vmul.f32 %v7096_v46, %v7942_v6 }
  0x19   : > { %12390 = vst [vmem:[#allocation6_spill] sm:$0xff] %v7968_v22  ;;  %12391 = vst [vmem:[#allocation7_spill] sm:$0xff] %v7970_v23  ;;  %v324_v25 = vld [vmem:[%s7934_s8 + $0x44] sm:$0x1]  ;;  %v7980_v29 = vunpack.c.l.bf16 %v322_v19  ;;  %v7982_v30 = vunpack.c.l.bf16 %v323_v24  ;;  %v7986_v32 = vunpack.c.h.bf16 %v323_v24  ;;  %v472_v33 = vrot.slane %v7942_v6, 1 }
  0x1a   : > { %12392 = vst [vmem:[#allocation8_spill] sm:$0xff] %v7974_v26  ;;  %12393 = vst [vmem:[#allocation9_spill] sm:$0xff] %v7976_v27  ;;  %v7984_v31 = vunpack.c.l.bf16 %v324_v25  ;;  %v473_v34 = vrot.slane %v7944_v7, 1  ;;  %v475_v35 = vrot.slane %v7946_v8, 1  ;;  %v476_v36 = vrot.slane %v7948_v9, 1 }
  0x1b   : > { %12394 = vst [vmem:[#allocation10_spill] sm:$0xff] %v7978_v28  ;;  %12395 = vst [vmem:[#allocation11_spill] sm:$0xff] %v7980_v29  ;;  %v478_v37 = vrot.slane %v7953_v13, 1  ;;  %v479_v38 = vrot.slane %v7955_v14, 1  ;;  %v481_v39 = vrot.slane %v7957_v15, 1  ;;  %v482_v40 = vrot.slane %v7959_v16, 1 }
  0x1c   : > { %12396 = vst [vmem:[#allocation12_spill] sm:$0xff] %v7982_v30  ;;  %12397 = vst [vmem:[#allocation13_spill] sm:$0xff] %v7984_v31  ;;  %v513_v41 = vrot.slane %v7942_v6, 2  ;;  %v474_v42 = vsel %vm471_vm0, %v472_v33, %v473_v34  ;;  %v477_v43 = vsel %vm471_vm0, %v475_v35, %v476_v36  ;;  %v514_v44 = vrot.slane %v7944_v7, 2  ;;  %v7098_v4 = vld [vmem:[%s12305_s2 + $0x38] ss:$0 sm:$0xff] }
  0x1d   : > { %12398 = vst [vmem:[#allocation14_spill] sm:$0xff] %v7986_v32  ;;  %v516_v45 = vrot.slane %v7946_v8, 2  ;;  %v480_v47 = vsel %vm471_vm0, %v478_v37, %v479_v38  ;;  %v483_v48 = vsel %vm471_vm0, %v481_v39, %v482_v40  ;;  %v504_v49 = vadd.f32 %v474_v42, %v7942_v6  ;;  %v7068_v23 = vld [vmem:[%s12305_s2 + $0x20] ss:$0 sm:$0xff] }
  0x1e   : > { %v505_v50 = vadd.f32 %v477_v43, %v7946_v8  ;;  %v506_v52 = vadd.f32 %v480_v47, %v7953_v13  ;;  %v507_v53 = vadd.f32 %v483_v48, %v7957_v15  ;;  %v515_v54 = vsel %vm512_vm1, %v513_v41, %v514_v44 }
  0x1f   : > { %v517_v55 = vrot.slane %v7948_v9, 2  ;;  %v519_v56 = vrot.slane %v7953_v13, 2  ;;  %v520_v57 = vrot.slane %v7955_v14, 2  ;;  %v522_v58 = vrot.slane %v7957_v15, 2 }
  0x20   : > { %v523_v59 = vrot.slane %v7959_v16, 2  ;;  %v545_v61 = vadd.f32 %v515_v54, %v504_v49  ;;  %v4582_v63 = vmul.f32 %v7096_v46, %v7946_v8  ;;  %v4595_v3 = vmul.f32 %v7097_v51, %v7942_v6 }
  0x21   : > { %v518_v60 = vsel %vm512_vm1, %v516_v45, %v517_v55  ;;  %v521_v0 = vsel %vm512_vm1, %v519_v56, %v520_v57  ;;  %v4596_v12 = vmul.f32 %v7097_v51, %v7944_v7  ;;  %v4597_v18 = vmul.f32 %v7097_v51, %v7946_v8  ;;  %v7099_v45 = vld [vmem:[%s12305_s2 + $0x39] ss:$0 sm:$0xff] }
  0x22   : > { %v524_v1 = vsel %vm512_vm1, %v522_v58, %v523_v59  ;;  %v546_v2 = vadd.f32 %v518_v60, %v505_v50  ;;  %v547_v5 = vadd.f32 %v521_v0, %v506_v52  ;;  %v553_v11 = vadd.f32 %v545_v61, %v7946_v8 }
  0x23   : > { %v548_v10 = vadd.f32 %v524_v1, %v507_v53  ;;  %v4598_v19 = vmul.f32 %v7097_v51, %v7948_v9  ;;  %v4627_v24 = vrot.slane %v4595_v3, 1  ;;  %v4628_v35 = vrot.slane %v4596_v12, 1  ;;  %v7100_v51 = vld [vmem:[%s12305_s2 + $0x3a] ss:$0 sm:$0xff] }
  0x24   : > { %v554_v17 = vadd.f32 %v546_v2, %v7953_v13  ;;  %v555_v25 = vadd.f32 %v547_v5, %v7957_v15  ;;  %v567_v34 = vadd.f32 %v553_v11, %v477_v43  ;;  %v4630_v37 = vrot.slane %v4597_v18, 1  ;;  %v7101_v11 = vld [vmem:[%s12305_s2 + $0x3b] ss:$0 sm:$0xff] }
  0x25   : > { %v8035_v33 = vadd.f32 %v548_v10, %v7964_v20  ;;  %v4631_v38 = vrot.slane %v4598_v19, 1  ;;  %v4673_v39 = vmul.f32 %v7098_v4, %v7942_v6  ;;  %v4629_v42 = vsel %vm471_vm0, %v4627_v24, %v4628_v35  ;;  %v7023_v19 = vld [vmem:[%s12304_s1 + $0x2] ss:$0 sm:$0xff]  ;;  %v7024_v24 = vld [vmem:[%s12304_s1 + $0x3] ss:$0 sm:$0xff] }
  0x26   : > { %v568_v36 = vadd.f32 %v554_v17, %v480_v47  ;;  %v569_v40 = vadd.f32 %v555_v25, %v483_v48  ;;  %v579_v41 = vadd.f32 %v567_v34, %v518_v60  ;;  %v4674_v44 = vmul.f32 %v7098_v4, %v7944_v7 }
  0x27   : > { %12399 = vst [vmem:[#allocation15_spill] sm:$0xff] %v8035_v33  ;;  %v4632_v49 = vsel %vm471_vm0, %v4630_v37, %v4631_v38  ;;  %v4659_v43 = vadd.f32 %v4629_v42, %v4581_v62  ;;  %v4675_v50 = vmul.f32 %v7098_v4, %v7946_v8  ;;  %v4676_v55 = vmul.f32 %v7098_v4, %v7948_v9  ;;  %v7021_v4 = vld [vmem:[%s12304_s1] ss:$0 sm:$0xff] }
  0x28   : > { %v580_v46 = vadd.f32 %v568_v36, %v521_v0  ;;  %v8048_v52 = vadd.f32 %v569_v40, %v524_v1  ;;  %v587_v53 = vadd.f32 %v579_v41, %v7953_v13  ;;  %v4660_v54 = vadd.f32 %v4632_v49, %v4582_v63  ;;  %v7026_v41 = vld [vmem:[%s12304_s1 + $0x5] ss:$0 sm:$0xff]  ;;  %v7028_v49 = vld [vmem:[%s12304_s1 + $0x7] ss:$0 sm:$0xff] }
  0x29   : > { %v4705_v57 = vrot.slane %v4673_v39, 2  ;;  %v4706_v58 = vrot.slane %v4674_v44, 2  ;;  %v4708_v59 = vrot.slane %v4675_v50, 2  ;;  %v4709_v61 = vrot.slane %v4676_v55, 2 }
  0x2a   : > { %12400 = vst [vmem:[#allocation16_spill] sm:$0xff] %v8048_v52  ;;  %v588_v56 = vadd.f32 %v580_v46, %v7957_v15  ;;  %v601_v60 = vadd.f32 %v587_v53, %v480_v47  ;;  %v4751_v62 = vmul.f32 %v7099_v45, %v7946_v8  ;;  %v4752_v2 = vmul.f32 %v7099_v45, %v7953_v13  ;;  %v7022_v47 = vld [vmem:[%s12304_s1 + $0x1] ss:$0 sm:$0xff]  ;;  %v7027_v46 = vld [vmem:[%s12304_s1 + $0x6] ss:$0 sm:$0xff] }
  0x2b   : > { %v4707_v5 = vsel %vm512_vm1, %v4705_v57, %v4706_v58  ;;  %v4773_v10 = vmul.f32 %v7100_v51, %v7946_v8  ;;  %v4774_v63 = vmul.f32 %v7100_v51, %v7948_v9  ;;  %v4775_v18 = vmul.f32 %v7100_v51, %v7953_v13 }
  0x2c   : > { %v602_v3 = vadd.f32 %v588_v56, %v483_v48  ;;  %v613_v12 = vadd.f32 %v601_v60, %v521_v0  ;;  %v4710_v48 = vsel %vm512_vm1, %v4708_v59, %v4709_v61  ;;  %v4737_v17 = vadd.f32 %v4707_v5, %v4659_v43  ;;  %v7025_v0 = vld [vmem:[%s12304_s1 + $0x4] ss:$0 sm:$0xff] }
  0x2d   : > { %v4738_v34 = vadd.f32 %v4710_v48, %v4660_v54  ;;  %v4776_v35 = vmul.f32 %v7100_v51, %v7955_v14  ;;  %v4805_v36 = vrot.slane %v4773_v10, 1  ;;  %v4806_v39 = vrot.slane %v4774_v63, 1  ;;  %v7029_v54 = vld [vmem:[%s12304_s1 + $0x8] ss:$0 sm:$0xff]  ;;  %v7102_v63 = vld [vmem:[%s12305_s2 + $0x3c] ss:$0 sm:$0xff] }
  0x2e   : > { %v614_v25 = vadd.f32 %v602_v3, %v524_v1  ;;  %v621_v37 = vmul.f32 0.11111111, %v613_v12  ;;  %v4759_v38 = vadd.f32 %v4751_v62, %v4737_v17  ;;  %v4808_v40 = vrot.slane %v4775_v18, 1 }
  0x2f   : > { %v4760_v44 = vadd.f32 %v4752_v2, %v4738_v34  ;;  %v4809_v45 = vrot.slane %v4776_v35, 1  ;;  %v4851_v1 = vmul.f32 %v7101_v11, %v7946_v8  ;;  %v4807_v17 = vsel %vm471_vm0, %v4805_v36, %v4806_v39 }
  0x30   : > { %v622_v42 = vmul.f32 0.11111111, %v614_v25  ;;  %v8089_v43 = vmul.f32 %v7021_v4, %v621_v37  ;;  %v8091_v50 = vmul.f32 %v7022_v47, %v621_v37  ;;  %v8093_v51 = vmul.f32 %v7023_v19, %v621_v37  ;;  %v7103_v25 = vld [vmem:[%s12305_s2 + $0x3d] ss:$0 sm:$0xff] }
  0x31   : > { %v8095_v53 = vmul.f32 %v7024_v24, %v621_v37  ;;  %v8108_v59 = vmul.f32 %v7025_v0, %v621_v37  ;;  %v8112_v61 = vmul.f32 %v7026_v41, %v621_v37  ;;  %v8116_v2 = vmul.f32 %v7027_v46, %v621_v37 }
  0x32   : > { %v8100_v55 = vmul.f32 %v7021_v4, %v622_v42  ;;  %v8102_v56 = vmul.f32 %v7022_v47, %v622_v42  ;;  %v8104_v57 = vmul.f32 %v7023_v19, %v622_v42  ;;  %v8106_v58 = vmul.f32 %v7024_v24, %v622_v42 }
  0x33   : > { %v8110_v60 = vmul.f32 %v7025_v0, %v622_v42  ;;  %v8114_v62 = vmul.f32 %v7026_v41, %v622_v42  ;;  %v8118_v3 = vmul.f32 %v7027_v46, %v622_v42  ;;  %v8120_v5 = vmul.f32 %v7028_v49, %v621_v37 }
  0x34   : > { %v8122_v10 = vmul.f32 %v7028_v49, %v622_v42  ;;  %v8127_v4 = vmul.f32 %v7029_v54, %v621_v37  ;;  %v8129_v47 = vmul.f32 %v7029_v54, %v622_v42  ;;  %v755_v12 = vmax.f32 %v8089_v43, %v8091_v50 }
  0x35   : > { %v756_v48 = vmax.f32 %v8100_v55, %v8102_v56  ;;  %v4810_v18 = vsel %vm471_vm0, %v4808_v40, %v4809_v45  ;;  %v4852_v19 = vmul.f32 %v7101_v11, %v7948_v9  ;;  %v4853_v24 = vmul.f32 %v7101_v11, %v7953_v13  ;;  %v7104_v40 = vld [vmem:[%s12305_s2 + $0x3e] ss:$0 sm:$0xff] }
  0x36   : > { %v763_v34 = vmax.f32 %v755_v12, %v8093_v51  ;;  %v4837_v0 = vadd.f32 %v4807_v17, %v4759_v38  ;;  %v4838_v37 = vadd.f32 %v4810_v18, %v4760_v44  ;;  %v4854_v41 = vmul.f32 %v7101_v11, %v7955_v14 }
  0x37   : > { %v764_v35 = vmax.f32 %v756_v48, %v8104_v57  ;;  %v4883_v42 = vrot.slane %v4851_v1, 2  ;;  %v4884_v36 = vrot.slane %v4852_v19, 2  ;;  %v4886_v39 = vrot.slane %v4853_v24, 2 }
  0x38   : > { %v771_v45 = vmax.f32 %v763_v34, %v8095_v53  ;;  %v4929_v49 = vmul.f32 %v7102_v63, %v7953_v13  ;;  %v4930_v54 = vmul.f32 %v7102_v63, %v7957_v15  ;;  %v4887_v44 = vrot.slane %v4854_v41, 2 }
  0x39   : > { %v772_v46 = vmax.f32 %v764_v35, %v8106_v58  ;;  %v4885_v38 = vsel %vm512_vm1, %v4883_v42, %v4884_v36  ;;  %v4951_v11 = vmul.f32 %v7103_v25, %v7953_v13  ;;  %v4952_v1 = vmul.f32 %v7103_v25, %v7955_v14 }
  0x3a   : > { %v779_v12 = vmax.f32 %v771_v45, %v8108_v59  ;;  %v4915_v17 = vadd.f32 %v4885_v38, %v4837_v0  ;;  %v4953_v18 = vmul.f32 %v7103_v25, %v7957_v15  ;;  %v4888_v19 = vsel %vm512_vm1, %v4886_v39, %v4887_v44  ;;  %v7085_v45 = vld [vmem:[%s12305_s2 + $0x2d] ss:$0 sm:$0xff] }
  0x3b   : > { %v780_v48 = vmax.f32 %v772_v46, %v8110_v60  ;;  %v4954_v24 = vmul.f32 %v7103_v25, %v7959_v16  ;;  %v4983_v34 = vrot.slane %v4951_v11, 1  ;;  %v4984_v63 = vrot.slane %v4952_v1, 1  ;;  %v8170_v25 = vld [vmem:[%s12305_s2 + $0x2e] ss:$0 sm:$0xff] }
  0x3c   : > { %v787_v35 = vmax.f32 %v779_v12, %v8112_v61  ;;  %v4916_v42 = vadd.f32 %v4888_v19, %v4838_v37  ;;  %v4937_v36 = vadd.f32 %v4929_v49, %v4915_v17  ;;  %v4986_v46 = vrot.slane %v4953_v18, 1 }
  0x3d   : > { %v788_v41 = vmax.f32 %v780_v48, %v8114_v62  ;;  %v4985_v0 = vsel %vm471_vm0, %v4983_v34, %v4984_v63  ;;  %v4987_v38 = vrot.slane %v4954_v24, 1  ;;  %v5029_v39 = vmul.f32 %v7104_v40, %v7953_v13 }
  0x3e   : > { %v795_v44 = vmax.f32 %v787_v35, %v8116_v2  ;;  %v4938_v49 = vadd.f32 %v4930_v54, %v4916_v42  ;;  %v8174_v11 = vadd.f32 %v4985_v0, %v4937_v36  ;;  %v5030_v12 = vmul.f32 %v7104_v40, %v7955_v14 }
  0x3f   : > { %v796_v37 = vmax.f32 %v788_v41, %v8118_v3  ;;  %v4988_v1 = vsel %vm471_vm0, %v4986_v46, %v4987_v38  ;;  %v5031_v48 = vmul.f32 %v7104_v40, %v7957_v15  ;;  %v5032_v17 = vmul.f32 %v7104_v40, %v7959_v16 }
  0x40   : > { %v803_v18 = vmax.f32 %v795_v44, %v8120_v5  ;;  %v5016_v24 = vadd.f32 %v4988_v1, %v4938_v49  ;;  %v5061_v34 = vrot.slane %v5029_v39, 2  ;;  %v5062_v63 = vrot.slane %v5030_v12, 2 }
  0x41   : > { %v804_v19 = vmax.f32 %v796_v37, %v8122_v10  ;;  %v5064_v35 = vrot.slane %v5031_v48, 2  ;;  %v5065_v41 = vrot.slane %v5032_v17, 2  ;;  %v8183_v54 = vmul.f32 %v7085_v45, %v7942_v6 }
  0x42   : > { %v811_v42 = vmax.f32 %v803_v18, %v8127_v4  ;;  %v8188_v0 = vmul.f32 %v7085_v45, %v7946_v8  ;;  %v8192_v40 = vmul.f32 %v8170_v25, %v7942_v6  ;;  %v5063_v46 = vsel %vm512_vm1, %v5061_v34, %v5062_v63 }
  0x43   : > { %v812_v36 = vmax.f32 %v804_v19, %v8129_v47  ;;  %v5066_v38 = vsel %vm512_vm1, %v5064_v35, %v5065_v41  ;;  %v8198_v39 = vmul.f32 %v8170_v25, %v7944_v7  ;;  %v8202_v44 = vmul.f32 %v8170_v25, %v7946_v8 }
  0x44   : > { %v819_v37 = vsub.f32 %v8089_v43, %v811_v42  ;;  %v843_v49 = vsub.f32 %v8091_v50, %v811_v42  ;;  %v867_v12 = vsub.f32 %v8093_v51, %v811_v42  ;;  %v891_v17 = vsub.f32 %v8095_v53, %v811_v42 }
  0x45   : > { %v820_v45 = vsub.f32 %v8100_v55, %v812_v36  ;;  %v844_v1 = vsub.f32 %v8102_v56, %v812_v36  ;;  %v868_v48 = vsub.f32 %v8104_v57, %v812_v36  ;;  %v892_v18 = vsub.f32 %v8106_v58, %v812_v36 }
  0x46   : > { %v827_v19 = vmul.f32 1.442695, %v819_v37  ;;  %v851_v63 = vmul.f32 1.442695, %v843_v49  ;;  %v915_v35 = vsub.f32 %v8108_v59, %v811_v42  ;;  %v875_v41 = vmul.f32 1.442695, %v867_v12 }
  0x47   : > { %v829_v34 = vmul.f32 1.442695, %v820_v45  ;;  %v853_v43 = vmul.f32 1.442695, %v844_v1  ;;  %v877_v55 = vmul.f32 1.442695, %v868_v48  ;;  %v916_v50 = vsub.f32 %v8110_v60, %v812_v36 }
  0x48   : > { %7403 = vpow2.f32 %v827_v19  ;;  %v899_v56 = vmul.f32 1.442695, %v891_v17  ;;  %v901_v52 = vmul.f32 1.442695, %v892_v18  ;;  %v923_v51 = vmul.f32 1.442695, %v915_v35 }
  0x49   : > { %7405 = vpow2.f32 %v829_v34  ;;  %v925_v57 = vmul.f32 1.442695, %v916_v50  ;;  %v939_v53 = vsub.f32 %v8112_v61, %v811_v42  ;;  %v940_v58 = vsub.f32 %v8114_v62, %v812_v36  ;;  %v7105_v61 = vld [vmem:[%s12306_s3 + $0x6] ss:$0 sm:$0xff]  ;;  %v7087_v19 = vld [vmem:[%s12305_s2 + $0x2f] ss:$0 sm:$0xff] }
  0x4a   : > { %7407 = vpow2.f32 %v851_v63  ;;  %v963_v37 = vsub.f32 %v8116_v2, %v811_v42  ;;  %v964_v59 = vsub.f32 %v8118_v3, %v812_v36  ;;  %v987_v45 = vsub.f32 %v8120_v5, %v811_v42  ;;  %v7106_v5 = vld [vmem:[%s12307_s4 + $0x6] ss:$0 sm:$0xff] }
  0x4b   : > { %7409 = vpow2.f32 %v853_v43  ;;  %v947_v49 = vmul.f32 1.442695, %v939_v53  ;;  %v949_v60 = vmul.f32 1.442695, %v940_v58  ;;  %v988_v1 = vsub.f32 %v8122_v10, %v812_v36 }
  0x4c   : > { %7411 = vpow2.f32 %v875_v41  ;;  %v971_v12 = vmul.f32 1.442695, %v963_v37  ;;  %v973_v48 = vmul.f32 1.442695, %v964_v59  ;;  %v995_v17 = vmul.f32 1.442695, %v987_v45 }
  0x4d   : > { %7413 = vpow2.f32 %v877_v55  ;;  %v997_v62 = vmul.f32 1.442695, %v988_v1  ;;  %v1011_v2 = vsub.f32 %v8127_v4, %v811_v42  ;;  %v1012_v3 = vsub.f32 %v8129_v47, %v812_v36 }
  0x4e   : > { %7415 = vpow2.f32 %v899_v56  ;;  %v5093_v10 = vadd.f32 %v5063_v46, %v8174_v11  ;;  %v5094_v18 = vadd.f32 %v5066_v38, %v5016_v24  ;;  %v4020_v34 = vmul.f32 %v8170_v25, %v7948_v9 }
  0x4f   : > { %7417 = vpow2.f32 %v901_v52  ;;  %v1019_v63 = vmul.f32 1.442695, %v1011_v2  ;;  %v1021_v4 = vmul.f32 1.442695, %v1012_v3  ;;  %v4049_v47 = vrot.slane %v8192_v40, 1 }
  0x50   : > { %7419 = vpow2.f32 %v923_v51  ;;  %v5107_v42 = vmul.f32 %v7105_v61, %v5093_v10  ;;  %v5108_v36 = vmul.f32 %v7105_v61, %v5094_v18  ;;  %v4050_v35 = vrot.slane %v8198_v39, 1 }
  0x51   : > { %7421 = vpow2.f32 %v925_v57  ;;  %v4052_v11 = vrot.slane %v8202_v44, 1  ;;  %v4053_v24 = vrot.slane %v4020_v34, 1  ;;  %v4095_v46 = vmul.f32 %v7087_v19, %v7942_v6 }
  0x52   : > { %v8238_v38 = vpop.eup %7403  ;;  %7423 = vpow2.f32 %v947_v49  ;;  %v8240_v25 = vadd.f32 %v7106_v5, %v5107_v42  ;;  %v8242_v52 = vadd.f32 %v7106_v5, %v5108_v36  ;;  %v4051_v40 = vsel %vm471_vm0, %v4049_v47, %v4050_v35 }
  0x53   : > { %12401 = vst [vmem:[#allocation17_spill] sm:$0xff] %v8238_v38  ;;  %v8245_v43 = vpop.eup %7405  ;;  %7425 = vpow2.f32 %v949_v60  ;;  %v4054_v39 = vsel %vm471_vm0, %v4052_v11, %v4053_v24  ;;  %v4081_v41 = vadd.f32 %v4051_v40, %v8183_v54  ;;  %v4096_v44 = vmul.f32 %v7087_v19, %v7944_v7  ;;  %v7088_v54 = vld [vmem:[%s12305_s2 + $0x30] ss:$0 sm:$0xff] }
  0x54   : > { %12402 = vst [vmem:[#allocation18_spill] sm:$0xff] %v8245_v43  ;;  %v8250_v55 = vpop.eup %7407  ;;  %7427 = vpow2.f32 %v971_v12  ;;  %v4082_v51 = vadd.f32 %v4054_v39, %v8188_v0  ;;  %v4097_v58 = vmul.f32 %v7087_v19, %v7946_v8  ;;  %v4098_v37 = vmul.f32 %v7087_v19, %v7948_v9  ;;  %v7089_v12 = vld [vmem:[%s12305_s2 + $0x31] ss:$0 sm:$0xff] }
  0x55   : > { %v8255_v57 = vpop.eup %7409  ;;  %7429 = vpow2.f32 %v973_v48  ;;  %v1035_v53 = vadd.f32 %v8250_v55, %v8238_v38  ;;  %v4127_v45 = vrot.slane %v4095_v46, 2  ;;  %v4128_v49 = vrot.slane %v4096_v44, 2 }
  0x56   : > { %v8264_v59 = vpop.eup %7411  ;;  %7431 = vpow2.f32 %v995_v17  ;;  %v1036_v0 = vadd.f32 %v8255_v57, %v8245_v43  ;;  %v4130_v48 = vrot.slane %v4097_v58, 2  ;;  %v4131_v61 = vrot.slane %v4098_v37, 2 }
  0x57   : > { %v8268_v60 = vpop.eup %7413  ;;  %7433 = vpow2.f32 %v997_v62  ;;  %v1043_v1 = vadd.f32 %v8264_v59, %v1035_v53  ;;  %v4129_v3 = vsel %vm512_vm1, %v4127_v45, %v4128_v49  ;;  %v4173_v5 = vmul.f32 %v7088_v54, %v7946_v8 }
  0x58   : > { %v8274_v2 = vpop.eup %7415  ;;  %7435 = vpow2.f32 %v1019_v63  ;;  %v1044_v17 = vadd.f32 %v8268_v60, %v1036_v0  ;;  %v4132_v18 = vsel %vm512_vm1, %v4130_v48, %v4131_v61  ;;  %v4159_v19 = vadd.f32 %v4129_v3, %v4081_v41  ;;  %v7090_v63 = vld [vmem:[%s12305_s2 + $0x32] ss:$0 sm:$0xff] }
  0x59   : > { %v8279_v10 = vpop.eup %7417  ;;  %7437 = vpow2.f32 %v1021_v4  ;;  %v1051_v62 = vadd.f32 %v8274_v2, %v1043_v1  ;;  %v4160_v42 = vadd.f32 %v4132_v18, %v4082_v51  ;;  %v4174_v36 = vmul.f32 %v7088_v54, %v7953_v13 }
  0x5a   : > { %v8283_v34 = vpop.eup %7419  ;;  %v1052_v47 = vadd.f32 %v8279_v10, %v1044_v17  ;;  %v4195_v35 = vmul.f32 %v7089_v12, %v7946_v8  ;;  %v4181_v24 = vadd.f32 %v4173_v5, %v4159_v19  ;;  %v4196_v46 = vmul.f32 %v7089_v12, %v7948_v9  ;;  %v7091_v5 = vld [vmem:[%s12305_s2 + $0x33] ss:$0 sm:$0xff] }
  0x5b   : > { %12403 = vst [vmem:[#allocation19_spill] sm:$0xff] %v8283_v34  ;;  %v8291_v11 = vpop.eup %7421  ;;  %v1059_v4 = vadd.f32 %v8283_v34, %v1051_v62  ;;  %v4197_v40 = vmul.f32 %v7089_v12, %v7953_v13  ;;  %v4182_v44 = vadd.f32 %v4174_v36, %v4160_v42  ;;  %v4198_v51 = vmul.f32 %v7089_v12, %v7955_v14  ;;  %v7092_v36 = vld [vmem:[%s12305_s2 + $0x34] ss:$0 sm:$0xff] }
  0x5c   : > { %12404 = vst [vmem:[#allocation20_spill] sm:$0xff] %v8291_v11  ;;  %v8296_v39 = vpop.eup %7423  ;;  %v1060_v41 = vadd.f32 %v8291_v11, %v1052_v47  ;;  %v4227_v53 = vrot.slane %v4195_v35, 1  ;;  %v4228_v37 = vrot.slane %v4196_v46, 1  ;;  %v4273_v45 = vmul.f32 %v7090_v63, %v7946_v8 }
  0x5d   : > { %v8300_v54 = vpop.eup %7425  ;;  %v1067_v58 = vadd.f32 %v8296_v39, %v1059_v4  ;;  %v4230_v0 = vrot.slane %v4197_v40, 1  ;;  %v4231_v48 = vrot.slane %v4198_v51, 1  ;;  %v4274_v61 = vmul.f32 %v7090_v63, %v7948_v9 }
  0x5e   : > { %v8304_v49 = vpop.eup %7427  ;;  %v1068_v1 = vadd.f32 %v8300_v54, %v1060_v41  ;;  %v4275_v17 = vmul.f32 %v7090_v63, %v7953_v13  ;;  %v4229_v62 = vsel %vm471_vm0, %v4227_v53, %v4228_v37  ;;  %v4276_v18 = vmul.f32 %v7090_v63, %v7955_v14 }
  0x5f   : > { %v8309_v3 = vpop.eup %7429  ;;  %v1075_v12 = vadd.f32 %v8304_v49, %v1067_v58  ;;  %v4305_v19 = vrot.slane %v4273_v45, 2  ;;  %v4232_v35 = vsel %vm471_vm0, %v4230_v0, %v4231_v48  ;;  %v4259_v4 = vadd.f32 %v4229_v62, %v4181_v24 }
  0x60   : > { %v8317_v47 = vpop.eup %7431  ;;  %v1076_v42 = vadd.f32 %v8309_v3, %v1068_v1  ;;  %v4306_v46 = vrot.slane %v4274_v61, 2  ;;  %v4260_v51 = vadd.f32 %v4232_v35, %v4182_v44  ;;  %v4308_v53 = vrot.slane %v4275_v17, 2 }
  0x61   : > { %v8324_v40 = vpop.eup %7433  ;;  %v1083_v41 = vadd.f32 %v8317_v47, %v1075_v12  ;;  %v4309_v63 = vrot.slane %v4276_v18, 2  ;;  %v4351_v1 = vmul.f32 %v7091_v5, %v7953_v13  ;;  %v4352_v56 = vmul.f32 %v7091_v5, %v7957_v15  ;;  %v7093_v12 = vld [vmem:[%s12305_s2 + $0x35] ss:$0 sm:$0xff] }
  0x62   : > { %v8327_v58 = vpop.eup %7435  ;;  %v1084_v37 = vadd.f32 %v8324_v40, %v1076_v42  ;;  %v4307_v45 = vsel %vm512_vm1, %v4305_v19, %v4306_v46  ;;  %v4373_v44 = vmul.f32 %v7092_v36, %v7953_v13  ;;  %v4374_v18 = vmul.f32 %v7092_v36, %v7955_v14 }
  0x63   : > { %12405 = vst [vmem:[#allocation21_spill] sm:$0xff] %v8327_v58  ;;  %v8333_v0 = vpop.eup %7437  ;;  %v1091_v24 = vadd.f32 %v8327_v58, %v1083_v41  ;;  %v4310_v48 = vsel %vm512_vm1, %v4308_v53, %v4309_v63  ;;  %v4337_v61 = vadd.f32 %v4307_v45, %v4259_v4  ;;  %v4375_v5 = vmul.f32 %v7092_v36, %v7957_v15  ;;  %v7052_v4 = vld [vmem:[%s12305_s2 + $0x12] ss:$0 sm:$0xff] }
  0x64   : > { %12406 = vst [vmem:[#allocation22_spill] sm:$0xff] %v8333_v0  ;;  %v1092_v17 = vadd.f32 %v8333_v0, %v1084_v37  ;;  %v4338_v62 = vadd.f32 %v4310_v48, %v4260_v51  ;;  %v4376_v42 = vmul.f32 %v7092_v36, %v7959_v16  ;;  %v4405_v35 = vrot.slane %v4373_v44, 1  ;;  %v7053_v36 = vld [vmem:[%s12305_s2 + $0x13] ss:$0 sm:$0xff] }
  0x65   : > { %7439 = vrcp.f32 %v1091_v24  ;;  %v4359_v19 = vadd.f32 %v4351_v1, %v4337_v61  ;;  %v4406_v41 = vrot.slane %v4374_v18, 1  ;;  %v4408_v53 = vrot.slane %v4375_v5, 1  ;;  %v7054_v18 = vld [vmem:[%s12305_s2 + $0x14] ss:$0 sm:$0xff] }
  0x66   : > { %7441 = vrcp.f32 %v1092_v17  ;;  %v4360_v46 = vadd.f32 %v4352_v56, %v4338_v62  ;;  %v4409_v63 = vrot.slane %v4376_v42, 1  ;;  %v4451_v51 = vmul.f32 %v7093_v12, %v7953_v13 }
  0x67   : > { %v4452_v37 = vmul.f32 %v7093_v12, %v7955_v14  ;;  %v4453_v45 = vmul.f32 %v7093_v12, %v7957_v15  ;;  %v4407_v1 = vsel %vm471_vm0, %v4405_v35, %v4406_v41  ;;  %v4454_v24 = vmul.f32 %v7093_v12, %v7959_v16  ;;  %v7094_v12 = vld [vmem:[%s12306_s3 + $0x5] ss:$0 sm:$0xff] }
  0x68   : > { %v2269_v48 = vmul.f32 %v7052_v4, %v7942_v6  ;;  %v2270_v56 = vmul.f32 %v7052_v4, %v7946_v8  ;;  %v4410_v61 = vsel %vm471_vm0, %v4408_v53, %v4409_v63  ;;  %v4437_v44 = vadd.f32 %v4407_v1, %v4359_v19 }
  0x69   : > { %v4483_v17 = vrot.slane %v4451_v51, 2  ;;  %v4484_v62 = vrot.slane %v4452_v37, 2  ;;  %v4438_v5 = vadd.f32 %v4410_v61, %v4360_v46  ;;  %v4486_v42 = vrot.slane %v4453_v45, 2  ;;  %v7095_v45 = vld [vmem:[%s12307_s4 + $0x5] ss:$0 sm:$0xff] }
  0x6a   : > { %v4487_v50 = vrot.slane %v4454_v24, 2  ;;  %v2283_v35 = vmul.f32 %v7053_v36, %v7942_v6  ;;  %v2284_v41 = vmul.f32 %v7053_v36, %v7944_v7  ;;  %v2285_v19 = vmul.f32 %v7053_v36, %v7946_v8 }
  0x6b   : > { %v4485_v4 = vsel %vm512_vm1, %v4483_v17, %v4484_v62  ;;  %v2286_v53 = vmul.f32 %v7053_v36, %v7948_v9  ;;  %v2361_v37 = vmul.f32 %v7054_v18, %v7942_v6  ;;  %v2362_v0 = vmul.f32 %v7054_v18, %v7944_v7 }
  0x6c   : > { %v4488_v63 = vsel %vm512_vm1, %v4486_v42, %v4487_v50  ;;  %v4515_v51 = vadd.f32 %v4485_v4, %v4437_v44  ;;  %v2315_v46 = vrot.slane %v2283_v35, 1  ;;  %v2316_v24 = vrot.slane %v2284_v41, 1 }
  0x6d   : > { %v4516_v1 = vadd.f32 %v4488_v63, %v4438_v5  ;;  %v2318_v61 = vrot.slane %v2285_v19, 1  ;;  %v2319_v17 = vrot.slane %v2286_v53, 1  ;;  %v2363_v58 = vmul.f32 %v7054_v18, %v7946_v8 }
  0x6e   : > { %v4529_v62 = vmul.f32 %v7094_v12, %v4515_v51  ;;  %v2364_v36 = vmul.f32 %v7054_v18, %v7948_v9  ;;  %v2317_v42 = vsel %vm471_vm0, %v2315_v46, %v2316_v24  ;;  %v2393_v4 = vrot.slane %v2361_v37, 2  ;;  %v7055_v18 = vld [vmem:[%s12305_s2 + $0x15] ss:$0 sm:$0xff] }
  0x6f   : > { %v8378_v50 = vpop.eup %7439  ;;  %v4530_v44 = vmul.f32 %v7094_v12, %v4516_v1  ;;  %v2320_v35 = vsel %vm471_vm0, %v2318_v61, %v2319_v17  ;;  %v2347_v53 = vadd.f32 %v2317_v42, %v2269_v48  ;;  %v12409_v37 = vmax.f32 %v8240_v25, 0.0 }
  0x70   : > { %12407 = vst [vmem:[#allocation23_spill] sm:$0xff] %v8378_v50  ;;  %v8382_v11 = vpop.eup %7441  ;;  %v5137_v5 = vmul.f32 %v8378_v50, %v8304_v49  ;;  %v4543_v41 = vadd.f32 %v7095_v45, %v4529_v62  ;;  %v4559_v19 = vmul.f32 %v8378_v50, %v8296_v39  ;;  %v7056_v49 = vld [vmem:[%s12305_s2 + $0x16] ss:$0 sm:$0xff]  ;;  %v2348_v46 = vadd.f32 %v2320_v35, %v2270_v56 }
  0x71   : > { %12408 = vst [vmem:[#allocation24_spill] sm:$0xff] %v8382_v11  ;;  %v5138_v12 = vmul.f32 %v8382_v11, %v8309_v3  ;;  %v4544_v63 = vadd.f32 %v7095_v45, %v4530_v44  ;;  %v4560_v51 = vmul.f32 %v8382_v11, %v8300_v54  ;;  %v2394_v24 = vrot.slane %v2362_v0, 2  ;;  %v7057_v54 = vld [vmem:[%s12305_s2 + $0x17] ss:$0 sm:$0xff] }
  0x72   : > { %v5145_v39 = vmul.f32 %v5137_v5, %v12409_v37  ;;  %v4551_v1 = vmax.f32 %v4543_v41, 0.0  ;;  %v2396_v61 = vrot.slane %v2363_v58, 2  ;;  %v12410_v48 = vmax.f32 %v8242_v52, 0.0 }
  0x73   : > { %v4552_v62 = vmax.f32 %v4544_v63, 0.0  ;;  %v2397_v3 = vrot.slane %v2364_v36, 2  ;;  %v2439_v45 = vmul.f32 %v7055_v18, %v7946_v8  ;;  %v2395_v56 = vsel %vm512_vm1, %v2393_v4, %v2394_v24 }
  0x74   : > { %v5146_v17 = vmul.f32 %v5138_v12, %v12410_v48  ;;  %v4567_v44 = vmul.f32 %v4559_v19, %v4551_v1  ;;  %v2440_v25 = vmul.f32 %v7055_v18, %v7953_v13  ;;  %v2461_v42 = vmul.f32 %v7056_v49, %v7946_v8  ;;  %v7058_v18 = vld [vmem:[%s12305_s2 + $0x18] ss:$0 sm:$0xff] }
  0x75   : > { %v4568_v58 = vmul.f32 %v4560_v51, %v4552_v62  ;;  %v2398_v52 = vsel %vm512_vm1, %v2396_v61, %v2397_v3  ;;  %v2425_v35 = vadd.f32 %v2395_v56, %v2347_v53  ;;  %v2462_v36 = vmul.f32 %v7056_v49, %v7948_v9 }
  0x76   : > { %v7275_v0 = vpack.i.bf16 %v5146_v17, %v5145_v39  ;;  %v2426_v5 = vadd.f32 %v2398_v52, %v2348_v46  ;;  %v2463_v41 = vmul.f32 %v7056_v49, %v7953_v13  ;;  %v2464_v19 = vmul.f32 %v7056_v49, %v7955_v14  ;;  %v7059_v49 = vld [vmem:[%s12305_s2 + $0x19] ss:$0 sm:$0xff]  ;;  %v7060_v17 = vld [vmem:[%s12305_s2 + $0x1a] ss:$0 sm:$0xff] }
  0x77   : > { %v7265_v4 = vpack.i.bf16 %v4568_v58, %v4567_v44  ;;  %v2447_v12 = vadd.f32 %v2439_v45, %v2425_v35  ;;  %v2493_v63 = vrot.slane %v2461_v42, 1  ;;  %v2539_v51 = vmul.f32 %v7057_v54, %v7946_v8 }
  0x78   : > { %7276 = vrot.lane.b32.xlu1 %v7275_v0, %s7867_s11  ;;  %v2448_v53 = vadd.f32 %v2440_v25, %v2426_v5  ;;  %v2494_v46 = vrot.slane %v2462_v36, 1  ;;  %v2496_v37 = vrot.slane %v2463_v41, 1  ;;  %v2497_v39 = vrot.slane %v2464_v19, 1 }
  0x79   : > { %7266 = vrot.lane.b32.xlu0 %v7265_v4, %s7868_s14  ;;  %v2540_v1 = vmul.f32 %v7057_v54, %v7948_v9  ;;  %v2541_v24 = vmul.f32 %v7057_v54, %v7953_v13  ;;  %v2542_v61 = vmul.f32 %v7057_v54, %v7955_v14  ;;  %v2571_v48 = vrot.slane %v2539_v51, 2 }
  0x7a   : > { %v2495_v62 = vsel %vm471_vm0, %v2493_v63, %v2494_v46  ;;  %v2498_v3 = vsel %vm471_vm0, %v2496_v37, %v2497_v39  ;;  %v2617_v45 = vmul.f32 %v7058_v18, %v7953_v13  ;;  %v2618_v44 = vmul.f32 %v7058_v18, %v7957_v15 }
  0x7b   : > { %v2525_v56 = vadd.f32 %v2495_v62, %v2447_v12  ;;  %v2526_v25 = vadd.f32 %v2498_v3, %v2448_v53  ;;  %v2572_v42 = vrot.slane %v2540_v1, 2  ;;  %v2574_v0 = vrot.slane %v2541_v24, 2 }
  0x7c   : > { %v2575_v58 = vrot.slane %v2542_v61, 2  ;;  %v2639_v54 = vmul.f32 %v7059_v49, %v7953_v13  ;;  %v2640_v52 = vmul.f32 %v7059_v49, %v7955_v14  ;;  %v2641_v35 = vmul.f32 %v7059_v49, %v7957_v15  ;;  %v8446_v61 = vld [vmem:[%s12305_s2 + $0x9] ss:$0 sm:$0xff] }
  0x7d   : > { %v2573_v5 = vsel %vm512_vm1, %v2571_v48, %v2572_v42  ;;  %v2642_v36 = vmul.f32 %v7059_v49, %v7959_v16  ;;  %v2717_v41 = vmul.f32 %v7060_v17, %v7953_v13  ;;  %v2718_v19 = vmul.f32 %v7060_v17, %v7955_v14 }
  0x7e   : > { %v2576_v4 = vsel %vm512_vm1, %v2574_v0, %v2575_v58  ;;  %v2603_v18 = vadd.f32 %v2573_v5, %v2525_v56  ;;  %v2671_v12 = vrot.slane %v2639_v54, 1  ;;  %v2672_v63 = vrot.slane %v2640_v52, 1  ;;  %v7061_v58 = vld [vmem:[%s12306_s3 + $0x2] ss:$0 sm:$0xff] }
  0x7f   : > { %v2604_v51 = vadd.f32 %v2576_v4, %v2526_v25  ;;  %v2674_v53 = vrot.slane %v2641_v35, 1  ;;  %v2675_v46 = vrot.slane %v2642_v36, 1  ;;  %v2719_v37 = vmul.f32 %v7060_v17, %v7957_v15  ;;  %v8452_v25 = vld [vmem:[%s12305_s2 + $0xa] ss:$0 sm:$0xff] }
  0x80   : > { %v2625_v39 = vadd.f32 %v2617_v45, %v2603_v18  ;;  %v2673_v1 = vsel %vm471_vm0, %v2671_v12, %v2672_v63  ;;  %v2720_v24 = vmul.f32 %v7060_v17, %v7959_v16  ;;  %v2749_v49 = vrot.slane %v2717_v41, 2 }
  0x81   : > { %v2626_v48 = vadd.f32 %v2618_v44, %v2604_v51  ;;  %v2676_v62 = vsel %vm471_vm0, %v2674_v53, %v2675_v46  ;;  %v2750_v3 = vrot.slane %v2718_v19, 2  ;;  %v2752_v56 = vrot.slane %v2719_v37, 2  ;;  %v8461_v44 = vld [vmem:[%s12305_s2 + $0xb] ss:$0 sm:$0xff]  ;;  %v7062_v19 = vld [vmem:[%s12307_s4 + $0x2] ss:$0 sm:$0xff] }
  0x82   : > { %v2703_v45 = vadd.f32 %v2673_v1, %v2625_v39  ;;  %v2753_v42 = vrot.slane %v2720_v24, 2  ;;  %v2825_v17 = vmul.f32 %v8378_v50, %v8264_v59  ;;  %v2826_v0 = vmul.f32 %v8382_v11, %v8268_v60 }
  0x83   : > { %v2704_v54 = vadd.f32 %v2676_v62, %v2626_v48  ;;  %v2751_v52 = vsel %vm512_vm1, %v2749_v49, %v2750_v3  ;;  %v1691_v35 = vmul.f32 %v8446_v61, %v7942_v6  ;;  %v1692_v59 = vmul.f32 %v8446_v61, %v7946_v8  ;;  %v8492_v62 = vld [vmem:[%s12305_s2 + $0xc] ss:$0 sm:$0xff] }
  0x84   : > { %v2754_v60 = vsel %vm512_vm1, %v2752_v56, %v2753_v42  ;;  %v2781_v5 = vadd.f32 %v2751_v52, %v2703_v45  ;;  %v1705_v36 = vmul.f32 %v8452_v25, %v7942_v6  ;;  %v1706_v41 = vmul.f32 %v8452_v25, %v7944_v7 }
  0x85   : > { %v2782_v4 = vadd.f32 %v2754_v60, %v2704_v54  ;;  %v1707_v18 = vmul.f32 %v8452_v25, %v7946_v8  ;;  %v1708_v12 = vmul.f32 %v8452_v25, %v7948_v9  ;;  %v1783_v63 = vmul.f32 %v8461_v44, %v7942_v6 }
  0x86   : > { %v2795_v51 = vmul.f32 %v7061_v58, %v2781_v5  ;;  %v1737_v53 = vrot.slane %v1705_v36, 1  ;;  %v1738_v46 = vrot.slane %v1706_v41, 1  ;;  %v1784_v37 = vmul.f32 %v8461_v44, %v7944_v7 }
  0x87   : > { %v2796_v39 = vmul.f32 %v7061_v58, %v2782_v4  ;;  %v1740_v1 = vrot.slane %v1707_v18, 1  ;;  %v1741_v24 = vrot.slane %v1708_v12, 1  ;;  %v1785_v49 = vmul.f32 %v8461_v44, %v7946_v8  ;;  %v8500_v58 = vld [vmem:[%s12305_s2 + $0xd] ss:$0 sm:$0xff]  ;;  %v8506_v12 = vld [vmem:[%s12305_s2 + $0xe] ss:$0 sm:$0xff] }
  0x88   : > { %v2809_v48 = vadd.f32 %v7062_v19, %v2795_v51  ;;  %v1739_v3 = vsel %vm471_vm0, %v1737_v53, %v1738_v46  ;;  %v1786_v56 = vmul.f32 %v8461_v44, %v7948_v9  ;;  %v1815_v45 = vrot.slane %v1783_v63, 2 }
  0x89   : > { %v2810_v42 = vadd.f32 %v7062_v19, %v2796_v39  ;;  %v1742_v54 = vsel %vm471_vm0, %v1740_v1, %v1741_v24  ;;  %v1769_v52 = vadd.f32 %v1739_v3, %v1691_v35  ;;  %v1816_v60 = vrot.slane %v1784_v37, 2 }
  0x8a   : > { %v2817_v5 = vmax.f32 %v2809_v48, 0.0  ;;  %v1770_v36 = vadd.f32 %v1742_v54, %v1692_v59  ;;  %v1818_v41 = vrot.slane %v1785_v49, 2  ;;  %v1819_v4 = vrot.slane %v1786_v56, 2  ;;  %v8523_v49 = vld [vmem:[%s12305_s2 + $0xf] ss:$0 sm:$0xff] }
  0x8b   : > { %v2818_v18 = vmax.f32 %v2810_v42, 0.0  ;;  %v1817_v19 = vsel %vm512_vm1, %v1815_v45, %v1816_v60  ;;  %v1861_v63 = vmul.f32 %v8492_v62, %v7946_v8  ;;  %v1862_v51 = vmul.f32 %v8492_v62, %v7953_v13 }
  0x8c   : > { %v2833_v35 = vmul.f32 %v2825_v17, %v2817_v5  ;;  %v1820_v53 = vsel %vm512_vm1, %v1818_v41, %v1819_v4  ;;  %v1847_v59 = vadd.f32 %v1817_v19, %v1769_v52  ;;  %v1883_v46 = vmul.f32 %v8500_v58, %v7946_v8  ;;  %v8532_v52 = vld [vmem:[%s12305_s2 + $0x10] ss:$0 sm:$0xff]  ;;  %v8544_v4 = vld [vmem:[%s12305_s2 + $0x11] ss:$0 sm:$0xff] }
  0x8d   : > { %v2834_v37 = vmul.f32 %v2826_v0, %v2818_v18  ;;  %v1848_v39 = vadd.f32 %v1820_v53, %v1770_v36  ;;  %v1884_v1 = vmul.f32 %v8500_v58, %v7948_v9  ;;  %v1885_v24 = vmul.f32 %v8500_v58, %v7953_v13 }
  0x8e   : > { %v1869_v17 = vadd.f32 %v1861_v63, %v1847_v59  ;;  %v1886_v48 = vmul.f32 %v8500_v58, %v7955_v14  ;;  %v1915_v3 = vrot.slane %v1883_v46, 1  ;;  %v1961_v0 = vmul.f32 %v8506_v12, %v7946_v8 }
  0x8f   : > { %v7280_v56 = vpack.i.bf16 %v2834_v37, %v2833_v35  ;;  %v1870_v45 = vadd.f32 %v1862_v51, %v1848_v39  ;;  %v1916_v42 = vrot.slane %v1884_v1, 1  ;;  %v1918_v54 = vrot.slane %v1885_v24, 1 }
  0x90   : > { %v1919_v60 = vrot.slane %v1886_v48, 1  ;;  %v1962_v5 = vmul.f32 %v8506_v12, %v7948_v9  ;;  %v1963_v36 = vmul.f32 %v8506_v12, %v7953_v13  ;;  %v1964_v41 = vmul.f32 %v8506_v12, %v7955_v14 }
  0x91   : > { %7281 = vrot.lane.b32.xlu1 %v7280_v56, %s7867_s11  ;;  %v1917_v18 = vsel %vm471_vm0, %v1915_v3, %v1916_v42  ;;  %v1993_v19 = vrot.slane %v1961_v0, 2  ;;  %v2039_v63 = vmul.f32 %v8523_v49, %v7953_v13  ;;  %v2040_v51 = vmul.f32 %v8523_v49, %v7957_v15 }
  0x92   : > { %v1920_v35 = vsel %vm471_vm0, %v1918_v54, %v1919_v60  ;;  %v1947_v53 = vadd.f32 %v1917_v18, %v1869_v17  ;;  %v1994_v59 = vrot.slane %v1962_v5, 2  ;;  %v1996_v46 = vrot.slane %v1963_v36, 2 }
  0x93   : > { %v1948_v37 = vadd.f32 %v1920_v35, %v1870_v45  ;;  %v1997_v39 = vrot.slane %v1964_v41, 2  ;;  %v2061_v1 = vmul.f32 %v8532_v52, %v7953_v13  ;;  %v2062_v24 = vmul.f32 %v8532_v52, %v7955_v14 }
  0x94   : > { %v1995_v48 = vsel %vm512_vm1, %v1993_v19, %v1994_v59  ;;  %v2063_v3 = vmul.f32 %v8532_v52, %v7957_v15  ;;  %v2064_v0 = vmul.f32 %v8532_v52, %v7959_v16  ;;  %v2139_v17 = vmul.f32 %v8544_v4, %v7953_v13 }
  0x95   : > { %v1998_v56 = vsel %vm512_vm1, %v1996_v46, %v1997_v39  ;;  %v2025_v45 = vadd.f32 %v1995_v48, %v1947_v53  ;;  %v2093_v42 = vrot.slane %v2061_v1, 1  ;;  %v2094_v54 = vrot.slane %v2062_v24, 1  ;;  %v7063_v53 = vld [vmem:[%s12305_s2 + $0x1b] ss:$0 sm:$0xff] }
  0x96   : > { %v2026_v60 = vadd.f32 %v1998_v56, %v1948_v37  ;;  %v2096_v5 = vrot.slane %v2063_v3, 1  ;;  %v2097_v36 = vrot.slane %v2064_v0, 1  ;;  %v2140_v41 = vmul.f32 %v8544_v4, %v7955_v14  ;;  %v8583_v56 = vld [vmem:[%s12306_s3 + $0x1] ss:$0 sm:$0xff] }
  0x97   : > { %v2047_v18 = vadd.f32 %v2039_v63, %v2025_v45  ;;  %v2095_v19 = vsel %vm471_vm0, %v2093_v42, %v2094_v54  ;;  %v2141_v35 = vmul.f32 %v8544_v4, %v7957_v15  ;;  %v2142_v59 = vmul.f32 %v8544_v4, %v7959_v16  ;;  %v7064_v63 = vld [vmem:[%s12305_s2 + $0x1c] ss:$0 sm:$0xff]  ;;  %v7065_v42 = vld [vmem:[%s12305_s2 + $0x1d] ss:$0 sm:$0xff] }
  0x98   : > { %v2048_v46 = vadd.f32 %v2040_v51, %v2026_v60  ;;  %v2098_v37 = vsel %vm471_vm0, %v2096_v5, %v2097_v36  ;;  %v2171_v39 = vrot.slane %v2139_v17, 2  ;;  %v2172_v1 = vrot.slane %v2140_v41, 2  ;;  %v8598_v41 = vld [vmem:[%s12307_s4 + $0x1] ss:$0 sm:$0xff] }
  0x99   : > { %v2125_v24 = vadd.f32 %v2095_v19, %v2047_v18  ;;  %v2174_v48 = vrot.slane %v2141_v35, 2  ;;  %v2175_v3 = vrot.slane %v2142_v59, 2  ;;  %v2247_v0 = vmul.f32 %v8378_v50, %v8250_v55 }
  0x9a   : > { %v2126_v51 = vadd.f32 %v2098_v37, %v2048_v46  ;;  %v2173_v45 = vsel %vm512_vm1, %v2171_v39, %v2172_v1  ;;  %v2248_v17 = vmul.f32 %v8382_v11, %v8255_v57  ;;  %v2847_v54 = vmul.f32 %v7063_v53, %v7942_v6 }
  0x9b   : > { %v2176_v60 = vsel %vm512_vm1, %v2174_v48, %v2175_v3  ;;  %v2203_v55 = vadd.f32 %v2173_v45, %v2125_v24  ;;  %v2848_v5 = vmul.f32 %v7063_v53, %v7946_v8  ;;  %v2861_v36 = vmul.f32 %v7064_v63, %v7942_v6 }
  0x9c   : > { %v2204_v18 = vadd.f32 %v2176_v60, %v2126_v51  ;;  %v2862_v57 = vmul.f32 %v7064_v63, %v7944_v7  ;;  %v2863_v19 = vmul.f32 %v7064_v63, %v7946_v8  ;;  %v2864_v35 = vmul.f32 %v7064_v63, %v7948_v9  ;;  %v7066_v51 = vld [vmem:[%s12305_s2 + $0x1e] ss:$0 sm:$0xff] }
  0x9d   : > { %v2217_v59 = vmul.f32 %v8583_v56, %v2203_v55  ;;  %v2893_v46 = vrot.slane %v2861_v36, 1  ;;  %v2939_v37 = vmul.f32 %v7065_v42, %v7942_v6  ;;  %v2940_v53 = vmul.f32 %v7065_v42, %v7944_v7  ;;  %v7067_v36 = vld [vmem:[%s12305_s2 + $0x1f] ss:$0 sm:$0xff] }
  0x9e   : > { %v2218_v39 = vmul.f32 %v8583_v56, %v2204_v18  ;;  %v2894_v1 = vrot.slane %v2862_v57, 1  ;;  %v2896_v24 = vrot.slane %v2863_v19, 1  ;;  %v2897_v48 = vrot.slane %v2864_v35, 1 }
  0x9f   : > { %v2231_v3 = vadd.f32 %v8598_v41, %v2217_v59  ;;  %v2941_v63 = vmul.f32 %v7065_v42, %v7946_v8  ;;  %v2942_v45 = vmul.f32 %v7065_v42, %v7948_v9  ;;  %v2971_v60 = vrot.slane %v2939_v37, 2 }
  0xa0   : > { %v2232_v55 = vadd.f32 %v8598_v41, %v2218_v39  ;;  %v2895_v18 = vsel %vm471_vm0, %v2893_v46, %v2894_v1  ;;  %v2898_v57 = vsel %vm471_vm0, %v2896_v24, %v2897_v48  ;;  %v2972_v19 = vrot.slane %v2940_v53, 2 }
  0xa1   : > { %v2239_v35 = vmax.f32 %v2231_v3, 0.0  ;;  %v2925_v59 = vadd.f32 %v2895_v18, %v2847_v54  ;;  %v2926_v34 = vadd.f32 %v2898_v57, %v2848_v5  ;;  %v2974_v38 = vrot.slane %v2941_v63, 2 }
  0xa2   : > { %v2240_v43 = vmax.f32 %v2232_v55, 0.0  ;;  %v2973_v33 = vsel %vm512_vm1, %v2971_v60, %v2972_v19  ;;  %v2975_v42 = vrot.slane %v2942_v45, 2  ;;  %v3017_v37 = vmul.f32 %v7066_v51, %v7946_v8 }
  0xa3   : > { %v2255_v39 = vmul.f32 %v2247_v0, %v2239_v35  ;;  %v3003_v22 = vadd.f32 %v2973_v33, %v2925_v59  ;;  %v3018_v46 = vmul.f32 %v7066_v51, %v7953_v13  ;;  %v3039_v53 = vmul.f32 %v7067_v36, %v7946_v8  ;;  %v7069_v0 = vld [vmem:[%s12305_s2 + $0x21] ss:$0 sm:$0xff]  ;;  %v7071_v35 = vld [vmem:[%s12305_s2 + $0x23] ss:$0 sm:$0xff] }
  0xa4   : > { %v2256_v1 = vmul.f32 %v2248_v17, %v2240_v43  ;;  %v2976_v54 = vsel %vm512_vm1, %v2974_v38, %v2975_v42  ;;  %v3040_v5 = vmul.f32 %v7067_v36, %v7948_v9  ;;  %v3041_v24 = vmul.f32 %v7067_v36, %v7953_v13  ;;  %v7070_v38 = vld [vmem:[%s12305_s2 + $0x22] ss:$0 sm:$0xff] }
  0xa5   : > { %v3004_v48 = vadd.f32 %v2976_v54, %v2926_v34  ;;  %v3025_v3 = vadd.f32 %v3017_v37, %v3003_v22  ;;  %v3042_v63 = vmul.f32 %v7067_v36, %v7955_v14  ;;  %v3071_v33 = vrot.slane %v3039_v53, 1 }
  0xa6   : > { %v7270_v45 = vpack.i.bf16 %v2256_v1, %v2255_v39  ;;  %v3072_v51 = vrot.slane %v3040_v5, 1  ;;  %v3074_v60 = vrot.slane %v3041_v24, 1  ;;  %v3117_v43 = vmul.f32 %v7068_v23, %v7946_v8 }
  0xa7   : > { %v3026_v17 = vadd.f32 %v3018_v46, %v3004_v48  ;;  %v3075_v55 = vrot.slane %v3042_v63, 1  ;;  %v3118_v18 = vmul.f32 %v7068_v23, %v7948_v9  ;;  %v3119_v57 = vmul.f32 %v7068_v23, %v7953_v13 }
  0xa8   : > { %7271 = vrot.lane.b32.xlu0 %v7270_v45, %s7868_s14  ;;  %v3073_v22 = vsel %vm471_vm0, %v3071_v33, %v3072_v51  ;;  %v3120_v34 = vmul.f32 %v7068_v23, %v7955_v14  ;;  %v3149_v36 = vrot.slane %v3117_v43, 2  ;;  %v3195_v19 = vmul.f32 %v7069_v0, %v7953_v13 }
  0xa9   : > { %v3076_v59 = vsel %vm471_vm0, %v3074_v60, %v3075_v55  ;;  %v3103_v42 = vadd.f32 %v3073_v22, %v3025_v3  ;;  %v3150_v37 = vrot.slane %v3118_v18, 2  ;;  %v3152_v39 = vrot.slane %v3119_v57, 2 }
  0xaa   : > { %v3104_v46 = vadd.f32 %v3076_v59, %v3026_v17  ;;  %v3153_v53 = vrot.slane %v3120_v34, 2  ;;  %v3196_v1 = vmul.f32 %v7069_v0, %v7957_v15  ;;  %v3217_v54 = vmul.f32 %v7070_v38, %v7953_v13 }
  0xab   : > { %v3151_v23 = vsel %vm512_vm1, %v3149_v36, %v3150_v37  ;;  %v3218_v5 = vmul.f32 %v7070_v38, %v7955_v14  ;;  %v3219_v24 = vmul.f32 %v7070_v38, %v7957_v15  ;;  %v3220_v48 = vmul.f32 %v7070_v38, %v7959_v16  ;;  %v7107_v38 = vld [vmem:[%s12305_s2 + $0x3f] ss:$0 sm:$0xff] }
  0xac   : > { %v3154_v63 = vsel %vm512_vm1, %v3152_v39, %v3153_v53  ;;  %v3181_v33 = vadd.f32 %v3151_v23, %v3103_v42  ;;  %v3249_v3 = vrot.slane %v3217_v54, 1  ;;  %v3295_v45 = vmul.f32 %v7071_v35, %v7953_v13  ;;  %v7109_v54 = vld [vmem:[%s12305_s2 + $0x41] ss:$0 sm:$0xff] }
  0xad   : > { %v3182_v51 = vadd.f32 %v3154_v63, %v3104_v46  ;;  %v3250_v60 = vrot.slane %v3218_v5, 1  ;;  %v3252_v43 = vrot.slane %v3219_v24, 1  ;;  %v3253_v0 = vrot.slane %v3220_v48, 1  ;;  %v7072_v5 = vld [vmem:[%s12306_s3 + $0x3] ss:$0 sm:$0xff] }
  0xae   : > { %v3203_v17 = vadd.f32 %v3195_v19, %v3181_v33  ;;  %v3296_v55 = vmul.f32 %v7071_v35, %v7955_v14  ;;  %v3297_v18 = vmul.f32 %v7071_v35, %v7957_v15  ;;  %v3298_v57 = vmul.f32 %v7071_v35, %v7959_v16  ;;  %v7108_v19 = vld [vmem:[%s12305_s2 + $0x40] ss:$0 sm:$0xff] }
  0xaf   : > { %v3204_v22 = vadd.f32 %v3196_v1, %v3182_v51  ;;  %v3251_v34 = vsel %vm471_vm0, %v3249_v3, %v3250_v60  ;;  %v3254_v36 = vsel %vm471_vm0, %v3252_v43, %v3253_v0  ;;  %v3327_v59 = vrot.slane %v3295_v45, 2  ;;  %v7073_v51 = vld [vmem:[%s12307_s4 + $0x3] ss:$0 sm:$0xff] }
  0xb0   : > { %v3281_v42 = vadd.f32 %v3251_v34, %v3203_v17  ;;  %v3328_v37 = vrot.slane %v3296_v55, 2  ;;  %v3330_v39 = vrot.slane %v3297_v18, 2  ;;  %v3331_v46 = vrot.slane %v3298_v57, 2 }
  0xb1   : > { %v3282_v53 = vadd.f32 %v3254_v36, %v3204_v22  ;;  %v3403_v35 = vmul.f32 %v8378_v50, %v8274_v2  ;;  %v3404_v1 = vmul.f32 %v8382_v11, %v8279_v10  ;;  %v5159_v23 = vmul.f32 %v7107_v38, %v7942_v6 }
  0xb2   : > { %v3329_v24 = vsel %vm512_vm1, %v3327_v59, %v3328_v37  ;;  %v3332_v48 = vsel %vm512_vm1, %v3330_v39, %v3331_v46  ;;  %v5160_v63 = vmul.f32 %v7107_v38, %v7946_v8  ;;  %v5173_v2 = vmul.f32 %v7108_v19, %v7942_v6 }
  0xb3   : > { %v3359_v33 = vadd.f32 %v3329_v24, %v3281_v42  ;;  %v3360_v10 = vadd.f32 %v3332_v48, %v3282_v53  ;;  %v5174_v3 = vmul.f32 %v7108_v19, %v7944_v7  ;;  %v5175_v45 = vmul.f32 %v7108_v19, %v7946_v8  ;;  %v7111_v53 = vld [vmem:[%s12305_s2 + $0x43] ss:$0 sm:$0xff] }
  0xb4   : > { %v5176_v60 = vmul.f32 %v7108_v19, %v7948_v9  ;;  %v5205_v43 = vrot.slane %v5173_v2, 1  ;;  %v5251_v0 = vmul.f32 %v7109_v54, %v7942_v6  ;;  %v5252_v17 = vmul.f32 %v7109_v54, %v7944_v7  ;;  %v7110_v19 = vld [vmem:[%s12305_s2 + $0x42] ss:$0 sm:$0xff] }
  0xb5   : > { %v3373_v55 = vmul.f32 %v7072_v5, %v3359_v33  ;;  %v3374_v18 = vmul.f32 %v7072_v5, %v3360_v10  ;;  %v5206_v57 = vrot.slane %v5174_v3, 1  ;;  %v5208_v38 = vrot.slane %v5175_v45, 1  ;;  %v7112_v45 = vld [vmem:[%s12305_s2 + $0x44] ss:$0 sm:$0xff] }
  0xb6   : > { %v5209_v22 = vrot.slane %v5176_v60, 1  ;;  %v5253_v34 = vmul.f32 %v7109_v54, %v7946_v8  ;;  %v5254_v36 = vmul.f32 %v7109_v54, %v7948_v9  ;;  %v5283_v59 = vrot.slane %v5251_v0, 2 }
  0xb7   : > { %v3387_v42 = vadd.f32 %v7073_v51, %v3373_v55  ;;  %v3388_v37 = vadd.f32 %v7073_v51, %v3374_v18  ;;  %v5207_v39 = vsel %vm471_vm0, %v5205_v43, %v5206_v57  ;;  %v5284_v46 = vrot.slane %v5252_v17, 2 }
  0xb8   : > { %v5210_v5 = vsel %vm471_vm0, %v5208_v38, %v5209_v22  ;;  %v5237_v24 = vadd.f32 %v5207_v39, %v5159_v23  ;;  %v5286_v48 = vrot.slane %v5253_v34, 2  ;;  %v5287_v2 = vrot.slane %v5254_v36, 2 }
  0xb9   : > { %v3395_v54 = vmax.f32 %v3387_v42, 0.0  ;;  %v3396_v33 = vmax.f32 %v3388_v37, 0.0  ;;  %v5238_v10 = vadd.f32 %v5210_v5, %v5160_v63  ;;  %v5285_v3 = vsel %vm512_vm1, %v5283_v59, %v5284_v46  ;;  %v7113_v63 = vld [vmem:[%s12305_s2 + $0x45] ss:$0 sm:$0xff]  ;;  %v7114_v46 = vld [vmem:[%s12305_s2 + $0x46] ss:$0 sm:$0xff] }
  0xba   : > { %v5288_v51 = vsel %vm512_vm1, %v5286_v48, %v5287_v2  ;;  %v5315_v60 = vadd.f32 %v5285_v3, %v5237_v24  ;;  %v5329_v43 = vmul.f32 %v7110_v19, %v7946_v8  ;;  %v5330_v0 = vmul.f32 %v7110_v19, %v7953_v13  ;;  %v7115_v2 = vld [vmem:[%s12305_s2 + $0x47] ss:$0 sm:$0xff] }
  0xbb   : > { %v3411_v17 = vmul.f32 %v3403_v35, %v3395_v54  ;;  %v3412_v23 = vmul.f32 %v3404_v1, %v3396_v33  ;;  %v5316_v55 = vadd.f32 %v5288_v51, %v5238_v10  ;;  %v5351_v18 = vmul.f32 %v7111_v53, %v7946_v8 }
  0xbc   : > { %v5337_v57 = vadd.f32 %v5329_v43, %v5315_v60  ;;  %v5352_v38 = vmul.f32 %v7111_v53, %v7948_v9  ;;  %v5353_v22 = vmul.f32 %v7111_v53, %v7953_v13  ;;  %v5354_v34 = vmul.f32 %v7111_v53, %v7955_v14 }
  0xbd   : > { %v7290_v36 = vpack.i.bf16 %v3412_v23, %v3411_v17  ;;  %v5338_v59 = vadd.f32 %v5330_v0, %v5316_v55  ;;  %v5383_v42 = vrot.slane %v5351_v18, 1  ;;  %v5429_v35 = vmul.f32 %v7112_v45, %v7946_v8 }
  0xbe   : > { %v5384_v1 = vrot.slane %v5352_v38, 1  ;;  %v5386_v37 = vrot.slane %v5353_v22, 1  ;;  %v5387_v19 = vrot.slane %v5354_v34, 1  ;;  %v5430_v39 = vmul.f32 %v7112_v45, %v7948_v9 }
  0xbf   : > { %7291 = vrot.lane.b32.xlu1 %v7290_v36, %s7869_s17  ;;  %v5431_v5 = vmul.f32 %v7112_v45, %v7953_v13  ;;  %v5432_v53 = vmul.f32 %v7112_v45, %v7955_v14  ;;  %v5461_v24 = vrot.slane %v5429_v35, 2  ;;  %v5507_v48 = vmul.f32 %v7113_v63, %v7953_v13 }
  0xc0   : > { %v5385_v54 = vsel %vm471_vm0, %v5383_v42, %v5384_v1  ;;  %v5388_v33 = vsel %vm471_vm0, %v5386_v37, %v5387_v19  ;;  %v5462_v10 = vrot.slane %v5430_v39, 2  ;;  %v5508_v3 = vmul.f32 %v7113_v63, %v7957_v15 }
  0xc1   : > { %v5415_v51 = vadd.f32 %v5385_v54, %v5337_v57  ;;  %v5416_v60 = vadd.f32 %v5388_v33, %v5338_v59  ;;  %v5464_v43 = vrot.slane %v5431_v5, 2  ;;  %v5465_v0 = vrot.slane %v5432_v53, 2 }
  0xc2   : > { %v5463_v45 = vsel %vm512_vm1, %v5461_v24, %v5462_v10  ;;  %v5529_v17 = vmul.f32 %v7114_v46, %v7953_v13  ;;  %v5530_v23 = vmul.f32 %v7114_v46, %v7955_v14  ;;  %v5531_v55 = vmul.f32 %v7114_v46, %v7957_v15  ;;  %v326_v24 = vld [vmem:[%s7934_s8 + $0x4c] sm:$0x1] }
  0xc3   : > { %v5466_v18 = vsel %vm512_vm1, %v5464_v43, %v5465_v0  ;;  %v5493_v38 = vadd.f32 %v5463_v45, %v5415_v51  ;;  %v5532_v22 = vmul.f32 %v7114_v46, %v7959_v16  ;;  %v5607_v63 = vmul.f32 %v7115_v2, %v7953_v13 }
  0xc4   : > { %v5494_v57 = vadd.f32 %v5466_v18, %v5416_v60  ;;  %v5561_v34 = vrot.slane %v5529_v17, 1  ;;  %v5562_v36 = vrot.slane %v5530_v23, 1  ;;  %v5564_v59 = vrot.slane %v5531_v55, 1 }
  0xc5   : > { %v5515_v42 = vadd.f32 %v5507_v48, %v5493_v38  ;;  %v5565_v35 = vrot.slane %v5532_v22, 1  ;;  %v5608_v1 = vmul.f32 %v7115_v2, %v7955_v14  ;;  %v5609_v37 = vmul.f32 %v7115_v2, %v7957_v15 }
  0xc6   : > { %v5516_v19 = vadd.f32 %v5508_v3, %v5494_v57  ;;  %v5563_v39 = vsel %vm471_vm0, %v5561_v34, %v5562_v36  ;;  %v5610_v5 = vmul.f32 %v7115_v2, %v7959_v16  ;;  %v5639_v53 = vrot.slane %v5607_v63, 2  ;;  %v7116_v3 = vld [vmem:[%s12306_s3 + $0x7] ss:$0 sm:$0xff] }
  0xc7   : > { %v5566_v46 = vsel %vm471_vm0, %v5564_v59, %v5565_v35  ;;  %v5593_v54 = vadd.f32 %v5563_v39, %v5515_v42  ;;  %v5640_v33 = vrot.slane %v5608_v1, 2  ;;  %v5642_v10 = vrot.slane %v5609_v37, 2 }
  0xc8   : > { %v5594_v51 = vadd.f32 %v5566_v46, %v5516_v19  ;;  %v5643_v60 = vrot.slane %v5610_v5, 2  ;;  %v5715_v48 = vmul.f32 %v8378_v50, %v8317_v47  ;;  %v5716_v43 = vmul.f32 %v8382_v11, %v8324_v40  ;;  %v7117_v40 = vld [vmem:[%s12307_s4 + $0x7] ss:$0 sm:$0xff] }
  0xc9   : > { %v5641_v2 = vsel %vm512_vm1, %v5639_v53, %v5640_v33  ;;  %v8749_v0 = vunpack.c.l.bf16 %v326_v24  ;;  %v490_v45 = vrot.slane %v7974_v26, 1  ;;  %v491_v17 = vrot.slane %v7976_v27, 1 }
  0xca   : > { %v5644_v23 = vsel %vm512_vm1, %v5642_v10, %v5643_v60  ;;  %v5671_v55 = vadd.f32 %v5641_v2, %v5593_v54  ;;  %v493_v47 = vrot.slane %v7978_v28, 1  ;;  %v494_v18 = vrot.slane %v7980_v29, 1 }
  0xcb   : > { %12411 = vst [vmem:[#allocation25_spill] sm:$0xff] %v8749_v0  ;;  %v5672_v38 = vadd.f32 %v5644_v23, %v5594_v51  ;;  %v8760_v22 = vsel %vm471_vm0, %v490_v45, %v491_v17  ;;  %v531_v63 = vrot.slane %v7974_v26, 2  ;;  %v532_v57 = vrot.slane %v7976_v27, 2 }
  0xcc   : > { %v5685_v34 = vmul.f32 %v7116_v3, %v5671_v55  ;;  %v8765_v36 = vsel %vm471_vm0, %v493_v47, %v494_v18  ;;  %v510_v59 = vadd.f32 %v8760_v22, %v7974_v26  ;;  %v534_v42 = vrot.slane %v7978_v28, 2 }
  0xcd   : > { %v5686_v35 = vmul.f32 %v7116_v3, %v5672_v38  ;;  %v511_v1 = vadd.f32 %v8765_v36, %v7978_v28  ;;  %v8773_v37 = vsel %vm512_vm1, %v531_v63, %v532_v57  ;;  %v535_v19 = vrot.slane %v7980_v29, 2 }
  0xce   : > { %v5699_v39 = vadd.f32 %v7117_v40, %v5685_v34  ;;  %v551_v5 = vadd.f32 %v8773_v37, %v510_v59  ;;  %v563_v53 = vrot.slane %v7982_v30, 1  ;;  %v564_v24 = vrot.slane %v7984_v31, 1 }
  0xcf   : > { %v5700_v46 = vadd.f32 %v7117_v40, %v5686_v35  ;;  %v8780_v54 = vsel %vm512_vm1, %v534_v42, %v535_v19  ;;  %v575_v33 = vrot.slane %v7982_v30, 2  ;;  %v576_v10 = vrot.slane %v7984_v31, 2 }
  0xd0   : > { %v5707_v51 = vmax.f32 %v5699_v39, 0.0  ;;  %v552_v60 = vadd.f32 %v8780_v54, %v511_v1  ;;  %v559_v3 = vadd.f32 %v551_v5, %v7978_v28  ;;  %v565_v2 = vsel %vm471_vm0, %v563_v53, %v564_v24 }
  0xd1   : > { %v5708_v45 = vmax.f32 %v5700_v46, 0.0  ;;  %v577_v17 = vsel %vm512_vm1, %v575_v33, %v576_v10  ;;  %v597_v23 = vrot.slane %v7986_v32, 1  ;;  %v598_v55 = vrot.slane %v8749_v0, 1 }
  0xd2   : > { %v5723_v47 = vmul.f32 %v5715_v48, %v5707_v51  ;;  %v560_v18 = vadd.f32 %v552_v60, %v7982_v30  ;;  %v573_v40 = vadd.f32 %v559_v3, %v8765_v36  ;;  %v609_v38 = vrot.slane %v7986_v32, 2 }
  0xd3   : > { %v5724_v63 = vmul.f32 %v5716_v43, %v5708_v45  ;;  %v599_v57 = vsel %vm471_vm0, %v597_v23, %v598_v55  ;;  %v610_v34 = vrot.slane %v8749_v0, 2  ;;  %v1697_v59 = vmul.f32 %v8446_v61, %v7974_v26 }
  0xd4   : > { %v574_v42 = vadd.f32 %v565_v2, %v560_v18  ;;  %v585_v35 = vadd.f32 %v573_v40, %v8780_v54  ;;  %v1698_v48 = vmul.f32 %v8446_v61, %v7978_v28  ;;  %v1717_v1 = vmul.f32 %v8452_v25, %v7974_v26 }
  0xd5   : > { %v7285_v19 = vpack.i.bf16 %v5724_v63, %v5723_v47  ;;  %v611_v39 = vsel %vm512_vm1, %v609_v38, %v610_v34  ;;  %v1718_v43 = vmul.f32 %v8452_v25, %v7976_v27  ;;  %v1719_v5 = vmul.f32 %v8452_v25, %v7978_v28 }
  0xd6   : > { %v586_v53 = vadd.f32 %v577_v17, %v574_v42  ;;  %v593_v24 = vadd.f32 %v585_v35, %v7982_v30  ;;  %v1720_v46 = vmul.f32 %v8452_v25, %v7980_v29  ;;  %v1755_v33 = vrot.slane %v1717_v1, 1 }
  0xd7   : > { %7286 = vrot.lane.b32.xlu0 %v7285_v19, %s7869_s17  ;;  %v1756_v61 = vrot.slane %v1718_v43, 1  ;;  %v1758_v10 = vrot.slane %v1719_v5, 1  ;;  %v1795_v51 = vmul.f32 %v8461_v44, %v7974_v26  ;;  %v1796_v60 = vmul.f32 %v8461_v44, %v7976_v27 }
  0xd8   : > { %v594_v3 = vadd.f32 %v586_v53, %v7986_v32  ;;  %v607_v45 = vadd.f32 %v593_v24, %v565_v2  ;;  %v1759_v23 = vrot.slane %v1720_v46, 1  ;;  %v1797_v55 = vmul.f32 %v8461_v44, %v7978_v28 }
  0xd9   : > { %v1757_v25 = vsel %vm471_vm0, %v1755_v33, %v1756_v61  ;;  %v1798_v47 = vmul.f32 %v8461_v44, %v7980_v29  ;;  %v1833_v18 = vrot.slane %v1795_v51, 2  ;;  %v1834_v40 = vrot.slane %v1796_v60, 2  ;;  %v7596_v33 = vld [vmem:[%s12304_s1 + $0x1] ss:$0 sm:$0xff]  ;;  %v7598_v51 = vld [vmem:[%s12304_s1 + $0x3] ss:$0 sm:$0xff] }
  0xda   : > { %v608_v38 = vadd.f32 %v599_v57, %v594_v3  ;;  %v619_v63 = vadd.f32 %v607_v45, %v577_v17  ;;  %v1760_v34 = vsel %vm471_vm0, %v1758_v10, %v1759_v23  ;;  %v1775_v42 = vadd.f32 %v1757_v25, %v1697_v59  ;;  %v7599_v3 = vld [vmem:[%s12304_s1 + $0x4] ss:$0 sm:$0xff]  ;;  %v7600_v23 = vld [vmem:[%s12304_s1 + $0x5] ss:$0 sm:$0xff]  ;;  %v7601_v25 = vld [vmem:[%s12304_s1 + $0x6] ss:$0 sm:$0xff] }
  0xdb   : > { %v1776_v35 = vadd.f32 %v1760_v34, %v1698_v48  ;;  %v1835_v1 = vsel %vm512_vm1, %v1833_v18, %v1834_v40  ;;  %v1836_v2 = vrot.slane %v1797_v55, 2  ;;  %v1837_v19 = vrot.slane %v1798_v47, 2 }
  0xdc   : > { %v620_v43 = vadd.f32 %v611_v39, %v608_v38  ;;  %v627_v5 = vmul.f32 0.11111111, %v619_v63  ;;  %v1853_v53 = vadd.f32 %v1835_v1, %v1775_v42  ;;  %v1867_v24 = vmul.f32 %v8492_v62, %v7978_v28  ;;  %v7595_v39 = vld [vmem:[%s12304_s1] ss:$0 sm:$0xff] }
  0xdd   : > { %v1838_v44 = vsel %vm512_vm1, %v1836_v2, %v1837_v19  ;;  %v1868_v57 = vmul.f32 %v8492_v62, %v7982_v30  ;;  %v1895_v17 = vmul.f32 %v8500_v58, %v7978_v28  ;;  %v1896_v59 = vmul.f32 %v8500_v58, %v7980_v29  ;;  %v7597_v62 = vld [vmem:[%s12304_s1 + $0x2] ss:$0 sm:$0xff]  ;;  %v7602_v2 = vld [vmem:[%s12304_s1 + $0x7] ss:$0 sm:$0xff] }
  0xde   : > { %v628_v48 = vmul.f32 0.11111111, %v620_v43  ;;  %v8835_v46 = vmul.f32 %v7595_v39, %v627_v5  ;;  %v8840_v61 = vmul.f32 %v7596_v33, %v627_v5  ;;  %v8845_v10 = vmul.f32 %v7597_v62, %v627_v5 }
  0xdf   : > { %v8850_v60 = vmul.f32 %v7598_v51, %v627_v5  ;;  %v8855_v45 = vmul.f32 %v7599_v3, %v627_v5  ;;  %v8860_v55 = vmul.f32 %v7600_v23, %v627_v5  ;;  %v8865_v47 = vmul.f32 %v7601_v25, %v627_v5 }
  0xe0   : > { %v8867_v18 = vmul.f32 %v7595_v39, %v628_v48  ;;  %v8869_v40 = vmul.f32 %v7596_v33, %v628_v48  ;;  %v8871_v38 = vmul.f32 %v7597_v62, %v628_v48  ;;  %v8873_v63 = vmul.f32 %v7598_v51, %v628_v48  ;;  %v7603_v39 = vld [vmem:[%s12304_s1 + $0x8] ss:$0 sm:$0xff] }
  0xe1   : > { %v8875_v34 = vmul.f32 %v7599_v3, %v628_v48  ;;  %v8877_v42 = vmul.f32 %v7600_v23, %v628_v48  ;;  %v8879_v1 = vmul.f32 %v7601_v25, %v628_v48  ;;  %v8884_v19 = vmul.f32 %v7602_v2, %v627_v5 }
  0xe2   : > { %v8886_v43 = vmul.f32 %v7602_v2, %v628_v48  ;;  %v8891_v33 = vmul.f32 %v7603_v39, %v627_v5  ;;  %v8893_v62 = vmul.f32 %v7603_v39, %v628_v48  ;;  %v761_v51 = vmax.f32 %v8835_v46, %v8840_v61 }
  0xe3   : > { %v762_v3 = vmax.f32 %v8867_v18, %v8869_v40  ;;  %v1854_v23 = vadd.f32 %v1838_v44, %v1776_v35  ;;  %v1875_v25 = vadd.f32 %v1867_v24, %v1853_v53  ;;  %v1897_v2 = vmul.f32 %v8500_v58, %v7982_v30 }
  0xe4   : > { %v769_v50 = vmax.f32 %v761_v51, %v8845_v10  ;;  %v1898_v11 = vmul.f32 %v8500_v58, %v7984_v31  ;;  %v1933_v5 = vrot.slane %v1895_v17, 1  ;;  %v1934_v9 = vrot.slane %v1896_v59, 1 }
  0xe5   : > { %v770_v48 = vmax.f32 %v762_v3, %v8871_v38  ;;  %v1876_v39 = vadd.f32 %v1868_v57, %v1854_v23  ;;  %v1936_v7 = vrot.slane %v1897_v2, 1  ;;  %v1973_v8 = vmul.f32 %v8506_v12, %v7978_v28 }
  0xe6   : > { %v777_v35 = vmax.f32 %v769_v50, %v8850_v60  ;;  %v1935_v53 = vsel %vm471_vm0, %v1933_v5, %v1934_v9  ;;  %v1937_v24 = vrot.slane %v1898_v11, 1  ;;  %v1974_v44 = vmul.f32 %v8506_v12, %v7980_v29 }
  0xe7   : > { %v778_v51 = vmax.f32 %v770_v48, %v8873_v63  ;;  %v1953_v58 = vadd.f32 %v1935_v53, %v1875_v25  ;;  %v1975_v17 = vmul.f32 %v8506_v12, %v7982_v30  ;;  %v1976_v57 = vmul.f32 %v8506_v12, %v7984_v31 }
  0xe8   : > { %v785_v59 = vmax.f32 %v777_v35, %v8855_v45  ;;  %v1938_v3 = vsel %vm471_vm0, %v1936_v7, %v1937_v24  ;;  %v2011_v50 = vrot.slane %v1973_v8, 2  ;;  %v2012_v23 = vrot.slane %v1974_v44, 2 }
  0xe9   : > { %v786_v9 = vmax.f32 %v778_v51, %v8875_v34  ;;  %v1954_v11 = vadd.f32 %v1938_v3, %v1876_v39  ;;  %v2014_v2 = vrot.slane %v1975_v17, 2  ;;  %v2015_v5 = vrot.slane %v1976_v57, 2 }
  0xea   : > { %v793_v48 = vmax.f32 %v785_v59, %v8860_v55  ;;  %v2013_v25 = vsel %vm512_vm1, %v2011_v50, %v2012_v23  ;;  %v2045_v53 = vmul.f32 %v8523_v49, %v7982_v30  ;;  %v2046_v12 = vmul.f32 %v8523_v49, %v7986_v32 }
  0xeb   : > { %v794_v35 = vmax.f32 %v786_v9, %v8877_v42  ;;  %v2016_v7 = vsel %vm512_vm1, %v2014_v2, %v2015_v5  ;;  %v2031_v8 = vadd.f32 %v2013_v25, %v1953_v58  ;;  %v2073_v39 = vmul.f32 %v8532_v52, %v7982_v30 }
  0xec   : > { %v801_v24 = vmax.f32 %v793_v48, %v8865_v47  ;;  %v2032_v44 = vadd.f32 %v2016_v7, %v1954_v11  ;;  %v2074_v51 = vmul.f32 %v8532_v52, %v7984_v31  ;;  %v2075_v17 = vmul.f32 %v8532_v52, %v7986_v32 }
  0xed   : > { %v802_v57 = vmax.f32 %v794_v35, %v8879_v1  ;;  %v2053_v49 = vadd.f32 %v2045_v53, %v2031_v8  ;;  %v2076_v59 = vmul.f32 %v8532_v52, %v8749_v0  ;;  %v2111_v3 = vrot.slane %v2073_v39, 1 }
  0xee   : > { %v809_v58 = vmax.f32 %v801_v24, %v8884_v19  ;;  %v2054_v50 = vadd.f32 %v2046_v12, %v2032_v44  ;;  %v2112_v23 = vrot.slane %v2074_v51, 1  ;;  %v2114_v9 = vrot.slane %v2075_v17, 1 }
  0xef   : > { %v810_v11 = vmax.f32 %v802_v57, %v8886_v43  ;;  %v2115_v2 = vrot.slane %v2076_v59, 1  ;;  %v2151_v5 = vmul.f32 %v8544_v4, %v7982_v30  ;;  %v2152_v48 = vmul.f32 %v8544_v4, %v7984_v31 }
  0xf0   : > { %v817_v25 = vmax.f32 %v809_v58, %v8891_v33  ;;  %v2113_v53 = vsel %vm471_vm0, %v2111_v3, %v2112_v23  ;;  %v2153_v52 = vmul.f32 %v8544_v4, %v7986_v32  ;;  %v2154_v12 = vmul.f32 %v8544_v4, %v8749_v0 }
  0xf1   : > { %v818_v35 = vmax.f32 %v810_v11, %v8893_v62  ;;  %v2116_v7 = vsel %vm471_vm0, %v2114_v9, %v2115_v2  ;;  %v2131_v8 = vadd.f32 %v2113_v53, %v2053_v49  ;;  %v2189_v39 = vrot.slane %v2151_v5, 2 }
  0xf2   : > { %v825_v24 = vsub.f32 %v8835_v46, %v817_v25  ;;  %v849_v44 = vsub.f32 %v8840_v61, %v817_v25  ;;  %v873_v51 = vsub.f32 %v8845_v10, %v817_v25  ;;  %v897_v17 = vsub.f32 %v8850_v60, %v817_v25 }
  0xf3   : > { %v826_v57 = vsub.f32 %v8867_v18, %v818_v35  ;;  %v850_v59 = vsub.f32 %v8869_v40, %v818_v35  ;;  %v874_v4 = vsub.f32 %v8871_v38, %v818_v35  ;;  %v898_v3 = vsub.f32 %v8873_v63, %v818_v35 }
  0xf4   : > { %v839_v58 = vmul.f32 1.442695, %v825_v24  ;;  %v863_v23 = vmul.f32 1.442695, %v849_v44  ;;  %v887_v49 = vmul.f32 1.442695, %v873_v51  ;;  %v921_v9 = vsub.f32 %v8855_v45, %v817_v25 }
  0xf5   : > { %v841_v46 = vmul.f32 1.442695, %v826_v57  ;;  %v865_v11 = vmul.f32 1.442695, %v850_v59  ;;  %v889_v61 = vmul.f32 1.442695, %v874_v4  ;;  %v922_v10 = vsub.f32 %v8875_v34, %v818_v35 }
  0xf6   : > { %7443 = vpow2.f32 %v839_v58  ;;  %v911_v60 = vmul.f32 1.442695, %v897_v17  ;;  %v913_v2 = vmul.f32 1.442695, %v898_v3  ;;  %v935_v18 = vmul.f32 1.442695, %v921_v9 }
  0xf7   : > { %7445 = vpow2.f32 %v841_v46  ;;  %v937_v40 = vmul.f32 1.442695, %v922_v10  ;;  %v945_v38 = vsub.f32 %v8860_v55, %v817_v25  ;;  %v946_v63 = vsub.f32 %v8877_v42, %v818_v35 }
  0xf8   : > { %7447 = vpow2.f32 %v863_v23  ;;  %v969_v5 = vsub.f32 %v8865_v47, %v817_v25  ;;  %v970_v45 = vsub.f32 %v8879_v1, %v818_v35  ;;  %v993_v53 = vsub.f32 %v8884_v19, %v817_v25  ;;  %v7604_v23 = vld [vmem:[%s12305_s2 + $0x2d] ss:$0 sm:$0xff] }
  0xf9   : > { %7449 = vpow2.f32 %v865_v11  ;;  %v959_v24 = vmul.f32 1.442695, %v945_v38  ;;  %v961_v34 = vmul.f32 1.442695, %v946_v63  ;;  %v994_v44 = vsub.f32 %v8886_v43, %v818_v35 }
  0xfa   : > { %7451 = vpow2.f32 %v887_v49  ;;  %v983_v51 = vmul.f32 1.442695, %v969_v5  ;;  %v985_v17 = vmul.f32 1.442695, %v970_v45  ;;  %v1007_v57 = vmul.f32 1.442695, %v993_v53 }
  0xfb   : > { %7453 = vpow2.f32 %v889_v61  ;;  %v1009_v55 = vmul.f32 1.442695, %v994_v44  ;;  %v1017_v42 = vsub.f32 %v8891_v33, %v817_v25  ;;  %v1018_v59 = vsub.f32 %v8893_v62, %v818_v35 }
  0xfc   : > { %7455 = vpow2.f32 %v911_v60  ;;  %v2132_v47 = vadd.f32 %v2116_v7, %v2054_v50  ;;  %v2190_v1 = vrot.slane %v2152_v48, 2  ;;  %v2192_v4 = vrot.slane %v2153_v52, 2  ;;  %v7605_v48 = vld [vmem:[%s12305_s2 + $0x2e] ss:$0 sm:$0xff] }
  0xfd   : > { %7457 = vpow2.f32 %v913_v2  ;;  %v1031_v19 = vmul.f32 1.442695, %v1017_v42  ;;  %v1033_v3 = vmul.f32 1.442695, %v1018_v59  ;;  %v2193_v58 = vrot.slane %v2154_v12, 2 }
  0xfe   : > { %7459 = vpow2.f32 %v935_v18  ;;  %v2191_v43 = vsel %vm512_vm1, %v2189_v39, %v2190_v1  ;;  %v4009_v49 = vmul.f32 %v7604_v23, %v7974_v26  ;;  %v4010_v33 = vmul.f32 %v7604_v23, %v7978_v28 }
  0xff   : > { %7461 = vpow2.f32 %v937_v40  ;;  %v2194_v62 = vsel %vm512_vm1, %v2192_v4, %v2193_v58  ;;  %v2209_v50 = vadd.f32 %v2191_v43, %v2131_v8  ;;  %v4029_v25 = vmul.f32 %v7605_v48, %v7974_v26 }
 0x100   : > { %v8980_v52 = vpop.eup %7443  ;;  %7463 = vpow2.f32 %v959_v24  ;;  %v2210_v12 = vadd.f32 %v2194_v62, %v2132_v47  ;;  %v4030_v35 = vmul.f32 %v7605_v48, %v7976_v27  ;;  %v4031_v7 = vmul.f32 %v7605_v48, %v7978_v28  ;;  %v7606_v47 = vld [vmem:[%s12305_s2 + $0x2f] ss:$0 sm:$0xff]  ;;  %v7607_v62 = vld [vmem:[%s12305_s2 + $0x30] ss:$0 sm:$0xff] }
 0x101   : > { %12412 = vst [vmem:[#allocation26_spill] sm:$0xff] %v8980_v52  ;;  %v8984_v39 = vpop.eup %7445  ;;  %7465 = vpow2.f32 %v961_v34  ;;  %v2223_v9 = vmul.f32 %v8583_v56, %v2209_v50  ;;  %v4032_v8 = vmul.f32 %v7605_v48, %v7980_v29  ;;  %v4067_v46 = vrot.slane %v4029_v25, 1 }
 0x102   : > { %12413 = vst [vmem:[#allocation27_spill] sm:$0xff] %v8984_v39  ;;  %v8988_v11 = vpop.eup %7447  ;;  %7467 = vpow2.f32 %v983_v51  ;;  %v2224_v61 = vmul.f32 %v8583_v56, %v2210_v12  ;;  %v4068_v10 = vrot.slane %v4030_v35, 1  ;;  %v4070_v60 = vrot.slane %v4031_v7, 1 }
 0x103   : > { %v8991_v2 = vpop.eup %7449  ;;  %7469 = vpow2.f32 %v985_v17  ;;  %v1041_v18 = vadd.f32 %v8988_v11, %v8980_v52  ;;  %v8996_v40 = vadd.f32 %v8598_v41, %v2223_v9  ;;  %v4071_v38 = vrot.slane %v4032_v8, 1 }
 0x104   : > { %v8998_v63 = vpop.eup %7451  ;;  %7471 = vpow2.f32 %v1007_v57  ;;  %v1042_v5 = vadd.f32 %v8991_v2, %v8984_v39  ;;  %v9003_v56 = vadd.f32 %v8598_v41, %v2224_v61  ;;  %v4069_v45 = vsel %vm471_vm0, %v4067_v46, %v4068_v10  ;;  %v7608_v61 = vld [vmem:[%s12305_s2 + $0x31] ss:$0 sm:$0xff]  ;;  %v7613_v57 = vld [vmem:[%s12305_s2 + $0x12] ss:$0 sm:$0xff] }
 0x105   : > { %v9006_v53 = vpop.eup %7453  ;;  %7473 = vpow2.f32 %v1009_v55  ;;  %v1049_v24 = vadd.f32 %v8998_v63, %v1041_v18  ;;  %v4072_v44 = vsel %vm471_vm0, %v4070_v60, %v4071_v38  ;;  %v4087_v41 = vadd.f32 %v4069_v45, %v4009_v49 }
 0x106   : > { %v9011_v51 = vpop.eup %7455  ;;  %7475 = vpow2.f32 %v1031_v19  ;;  %v1050_v17 = vadd.f32 %v9006_v53, %v1042_v5  ;;  %v4088_v55 = vadd.f32 %v4072_v44, %v4010_v33  ;;  %v4107_v1 = vmul.f32 %v7606_v47, %v7974_v26 }
 0x107   : > { %v9015_v42 = vpop.eup %7457  ;;  %7477 = vpow2.f32 %v1033_v3  ;;  %v1057_v59 = vadd.f32 %v9011_v51, %v1049_v24  ;;  %v4108_v58 = vmul.f32 %v7606_v47, %v7976_v27  ;;  %v4109_v43 = vmul.f32 %v7606_v47, %v7978_v28 }
 0x108   : > { %v9022_v4 = vpop.eup %7459  ;;  %v1058_v19 = vadd.f32 %v9015_v42, %v1050_v17  ;;  %v4110_v23 = vmul.f32 %v7606_v47, %v7980_v29  ;;  %v4145_v33 = vrot.slane %v4107_v1, 2  ;;  %v4179_v50 = vmul.f32 %v7607_v62, %v7978_v28 }
 0x109   : > { %12414 = vst [vmem:[#allocation28_spill] sm:$0xff] %v9022_v4  ;;  %v9028_v3 = vpop.eup %7461  ;;  %v1065_v49 = vadd.f32 %v9022_v4, %v1057_v59  ;;  %v4180_v48 = vmul.f32 %v7607_v62, %v7982_v30  ;;  %v4146_v35 = vrot.slane %v4108_v58, 2  ;;  %v4148_v7 = vrot.slane %v4109_v43, 2 }
 0x10a   : > { %12415 = vst [vmem:[#allocation29_spill] sm:$0xff] %v9028_v3  ;;  %v9036_v25 = vpop.eup %7463  ;;  %v1066_v12 = vadd.f32 %v9028_v3, %v1058_v19  ;;  %v4149_v9 = vrot.slane %v4110_v23, 2  ;;  %v4207_v10 = vmul.f32 %v7608_v61, %v7978_v28  ;;  %v4208_v60 = vmul.f32 %v7608_v61, %v7980_v29 }
 0x10b   : > { %v9039_v8 = vpop.eup %7465  ;;  %v1073_v46 = vadd.f32 %v9036_v25, %v1065_v49  ;;  %v4209_v18 = vmul.f32 %v7608_v61, %v7982_v30  ;;  %v4147_v45 = vsel %vm512_vm1, %v4145_v33, %v4146_v35  ;;  %v4210_v44 = vmul.f32 %v7608_v61, %v7984_v31 }
 0x10c   : > { %v9048_v38 = vpop.eup %7467  ;;  %v1074_v5 = vadd.f32 %v9039_v8, %v1066_v12  ;;  %v4150_v24 = vsel %vm512_vm1, %v4148_v7, %v4149_v9  ;;  %v4165_v47 = vadd.f32 %v4147_v45, %v4087_v41  ;;  %v4245_v19 = vrot.slane %v4207_v10, 1  ;;  %v7609_v9 = vld [vmem:[%s12305_s2 + $0x32] ss:$0 sm:$0xff] }
 0x10d   : > { %v9054_v17 = vpop.eup %7469  ;;  %v1081_v59 = vadd.f32 %v9048_v38, %v1073_v46  ;;  %v4166_v1 = vadd.f32 %v4150_v24, %v4088_v55  ;;  %v4246_v23 = vrot.slane %v4208_v60, 1  ;;  %v4248_v49 = vrot.slane %v4209_v18, 1 }
 0x10e   : > { %v9057_v58 = vpop.eup %7471  ;;  %v1082_v43 = vadd.f32 %v9054_v17, %v1074_v5  ;;  %v4249_v62 = vrot.slane %v4210_v44, 1  ;;  %v4187_v35 = vadd.f32 %v4179_v50, %v4165_v47  ;;  %v4285_v41 = vmul.f32 %v7609_v9, %v7978_v28 }
 0x10f   : > { %v9060_v12 = vpop.eup %7473  ;;  %v1089_v33 = vadd.f32 %v9057_v58, %v1081_v59  ;;  %v4188_v7 = vadd.f32 %v4180_v48, %v4166_v1  ;;  %v4247_v61 = vsel %vm471_vm0, %v4245_v19, %v4246_v23  ;;  %v4286_v60 = vmul.f32 %v7609_v9, %v7980_v29  ;;  %v7610_v19 = vld [vmem:[%s12305_s2 + $0x33] ss:$0 sm:$0xff] }
 0x110   : > { %v9067_v55 = vpop.eup %7475  ;;  %v1090_v46 = vadd.f32 %v9060_v12, %v1082_v43  ;;  %v4250_v10 = vsel %vm471_vm0, %v4248_v49, %v4249_v62  ;;  %v4265_v48 = vadd.f32 %v4247_v61, %v4187_v35  ;;  %v4287_v45 = vmul.f32 %v7609_v9, %v7982_v30 }
 0x111   : > { %12416 = vst [vmem:[#allocation30_spill] sm:$0xff] %v9067_v55  ;;  %v9073_v18 = vpop.eup %7477  ;;  %v1097_v50 = vadd.f32 %v9067_v55, %v1089_v33  ;;  %v4266_v5 = vadd.f32 %v4250_v10, %v4188_v7  ;;  %v4288_v44 = vmul.f32 %v7609_v9, %v7984_v31  ;;  %v4323_v59 = vrot.slane %v4285_v41, 2  ;;  %v7611_v33 = vld [vmem:[%s12305_s2 + $0x34] ss:$0 sm:$0xff] }
 0x112   : > { %12417 = vst [vmem:[#allocation31_spill] sm:$0xff] %v9073_v18  ;;  %v1098_v24 = vadd.f32 %v9073_v18, %v1090_v46  ;;  %v4324_v47 = vrot.slane %v4286_v60, 2  ;;  %v4326_v1 = vrot.slane %v4287_v45, 2  ;;  %v4357_v43 = vmul.f32 %v7610_v19, %v7982_v30  ;;  %v7612_v60 = vld [vmem:[%s12305_s2 + $0x35] ss:$0 sm:$0xff] }
 0x113   : > { %7479 = vrcp.f32 %v1097_v50  ;;  %v4358_v23 = vmul.f32 %v7610_v19, %v7986_v32  ;;  %v4327_v62 = vrot.slane %v4288_v44, 2  ;;  %v4385_v35 = vmul.f32 %v7611_v33, %v7982_v30 }
 0x114   : > { %7481 = vrcp.f32 %v1098_v24  ;;  %v4325_v49 = vsel %vm512_vm1, %v4323_v59, %v4324_v47  ;;  %v4386_v9 = vmul.f32 %v7611_v33, %v7984_v31  ;;  %v4387_v41 = vmul.f32 %v7611_v33, %v7986_v32 }
 0x115   : > { %v4343_v7 = vadd.f32 %v4325_v49, %v4265_v48  ;;  %v4388_v46 = vmul.f32 %v7611_v33, %v8749_v0  ;;  %v4328_v61 = vsel %vm512_vm1, %v4326_v1, %v4327_v62  ;;  %v4423_v10 = vrot.slane %v4385_v35, 1 }
 0x116   : > { %v4463_v50 = vmul.f32 %v7612_v60, %v7982_v30  ;;  %v4464_v45 = vmul.f32 %v7612_v60, %v7984_v31  ;;  %v4344_v24 = vadd.f32 %v4328_v61, %v4266_v5  ;;  %v4424_v48 = vrot.slane %v4386_v9, 1 }
 0x117   : > { %v4365_v44 = vadd.f32 %v4357_v43, %v4343_v7  ;;  %v4426_v59 = vrot.slane %v4387_v41, 1  ;;  %v4427_v47 = vrot.slane %v4388_v46, 1  ;;  %v4465_v19 = vmul.f32 %v7612_v60, %v7986_v32 }
 0x118   : > { %v4466_v49 = vmul.f32 %v7612_v60, %v8749_v0  ;;  %v4501_v33 = vrot.slane %v4463_v50, 2  ;;  %v4366_v1 = vadd.f32 %v4358_v23, %v4344_v24  ;;  %v4425_v62 = vsel %vm471_vm0, %v4423_v10, %v4424_v48  ;;  %v7614_v23 = vld [vmem:[%s12305_s2 + $0x13] ss:$0 sm:$0xff] }
 0x119   : > { %v4502_v35 = vrot.slane %v4464_v45, 2  ;;  %v2275_v34 = vmul.f32 %v7613_v57, %v7974_v26  ;;  %v4428_v5 = vsel %vm471_vm0, %v4426_v59, %v4427_v47  ;;  %v4443_v43 = vadd.f32 %v4425_v62, %v4365_v44 }
 0x11a   : > { %v4504_v7 = vrot.slane %v4465_v19, 2  ;;  %v4505_v9 = vrot.slane %v4466_v49, 2  ;;  %v4444_v41 = vadd.f32 %v4428_v5, %v4366_v1  ;;  %v2276_v61 = vmul.f32 %v7613_v57, %v7978_v28  ;;  %v7615_v57 = vld [vmem:[%s12305_s2 + $0x14] ss:$0 sm:$0xff]  ;;  %v7616_v1 = vld [vmem:[%s12306_s3 + $0x5] ss:$0 sm:$0xff] }
 0x11b   : > { %v4503_v46 = vsel %vm512_vm1, %v4501_v33, %v4502_v35  ;;  %v2295_v10 = vmul.f32 %v7614_v23, %v7974_v26  ;;  %v2296_v45 = vmul.f32 %v7614_v23, %v7976_v27  ;;  %v2297_v24 = vmul.f32 %v7614_v23, %v7978_v28 }
 0x11c   : > { %v4506_v60 = vsel %vm512_vm1, %v4504_v7, %v4505_v9  ;;  %v4521_v50 = vadd.f32 %v4503_v46, %v4443_v43  ;;  %v2298_v59 = vmul.f32 %v7614_v23, %v7980_v29  ;;  %v2373_v19 = vmul.f32 %v7615_v57, %v7974_v26  ;;  %v7617_v23 = vld [vmem:[%s12307_s4 + $0x5] ss:$0 sm:$0xff] }
 0x11d   : > { %v9115_v44 = vpop.eup %7479  ;;  %v4522_v48 = vadd.f32 %v4506_v60, %v4444_v41  ;;  %v2333_v47 = vrot.slane %v2295_v10, 1  ;;  %v2334_v5 = vrot.slane %v2296_v45, 1  ;;  %v2336_v41 = vrot.slane %v2297_v24, 1 }
 0x11e   : > { %12418 = vst [vmem:[#allocation32_spill] sm:$0xff] %v9115_v44  ;;  %v9122_v49 = vpop.eup %7481  ;;  %v2253_v33 = vmul.f32 %v9115_v44, %v8988_v11  ;;  %v4535_v62 = vmul.f32 %v7616_v1, %v4521_v50  ;;  %v4565_v35 = vmul.f32 %v9115_v44, %v9036_v25  ;;  %v12420_v46 = vmax.f32 %v8996_v40, 0.0 }
 0x11f   : > { %12419 = vst [vmem:[#allocation33_spill] sm:$0xff] %v9122_v49  ;;  %v2254_v43 = vmul.f32 %v9122_v49, %v8991_v2  ;;  %v4536_v7 = vmul.f32 %v7616_v1, %v4522_v48  ;;  %v4566_v9 = vmul.f32 %v9122_v49, %v9039_v8  ;;  %v2335_v60 = vsel %vm471_vm0, %v2333_v47, %v2334_v5 }
 0x120   : > { %v2261_v11 = vmul.f32 %v2253_v33, %v12420_v46  ;;  %v4549_v10 = vadd.f32 %v7617_v23, %v4535_v62  ;;  %v2337_v25 = vrot.slane %v2298_v59, 1  ;;  %v12421_v50 = vmax.f32 %v9003_v56, 0.0 }
 0x121   : > { %v4550_v2 = vadd.f32 %v7617_v23, %v4536_v7  ;;  %v2353_v48 = vadd.f32 %v2335_v60, %v2275_v34  ;;  %v2374_v1 = vmul.f32 %v7615_v57, %v7976_v27  ;;  %v2375_v40 = vmul.f32 %v7615_v57, %v7978_v28 }
 0x122   : > { %v2262_v45 = vmul.f32 %v2254_v43, %v12421_v50  ;;  %v4557_v8 = vmax.f32 %v4549_v10, 0.0  ;;  %v2338_v24 = vsel %vm471_vm0, %v2336_v41, %v2337_v25  ;;  %v2376_v33 = vmul.f32 %v7615_v57, %v7980_v29  ;;  %v7618_v43 = vld [vmem:[%s12305_s2 + $0x15] ss:$0 sm:$0xff] }
 0x123   : > { %v4558_v18 = vmax.f32 %v4550_v2, 0.0  ;;  %v2354_v62 = vadd.f32 %v2338_v24, %v2276_v61  ;;  %v2411_v55 = vrot.slane %v2373_v19, 2  ;;  %v2412_v59 = vrot.slane %v2374_v1, 2  ;;  %v7619_v61 = vld [vmem:[%s12305_s2 + $0x16] ss:$0 sm:$0xff] }
 0x124   : > { %v7300_v46 = vpack.i.bf16 %v2262_v45, %v2261_v11  ;;  %v4573_v47 = vmul.f32 %v4565_v35, %v4557_v8  ;;  %v2414_v5 = vrot.slane %v2375_v40, 2  ;;  %v2415_v56 = vrot.slane %v2376_v33, 2  ;;  %v7620_v2 = vld [vmem:[%s12305_s2 + $0x17] ss:$0 sm:$0xff] }
 0x125   : > { %v4574_v34 = vmul.f32 %v4566_v9, %v4558_v18  ;;  %v2445_v7 = vmul.f32 %v7618_v43, %v7978_v28  ;;  %v2446_v41 = vmul.f32 %v7618_v43, %v7982_v30  ;;  %v2473_v57 = vmul.f32 %v7619_v61, %v7978_v28 }
 0x126   : > { %7301 = vrot.lane.b32.xlu1 %v7300_v46, %s7868_s14  ;;  %v2413_v19 = vsel %vm512_vm1, %v2411_v55, %v2412_v59  ;;  %v2416_v35 = vsel %vm512_vm1, %v2414_v5, %v2415_v56  ;;  %v2474_v18 = vmul.f32 %v7619_v61, %v7980_v29  ;;  %v2475_v9 = vmul.f32 %v7619_v61, %v7982_v30  ;;  %v7621_v56 = vld [vmem:[%s12305_s2 + $0x18] ss:$0 sm:$0xff] }
 0x127   : > { %v7295_v11 = vpack.i.bf16 %v4574_v34, %v4573_v47  ;;  %v2431_v23 = vadd.f32 %v2413_v19, %v2353_v48  ;;  %v2432_v10 = vadd.f32 %v2416_v35, %v2354_v62  ;;  %v2476_v60 = vmul.f32 %v7619_v61, %v7984_v31  ;;  %v7622_v19 = vld [vmem:[%s12305_s2 + $0x19] ss:$0 sm:$0xff] }
 0x128   : > { %v2511_v25 = vrot.slane %v2473_v57, 1  ;;  %v2512_v50 = vrot.slane %v2474_v18, 1  ;;  %v2514_v45 = vrot.slane %v2475_v9, 1  ;;  %v2551_v55 = vmul.f32 %v7620_v2, %v7978_v28 }
 0x129   : > { %7296 = vrot.lane.b32.xlu0 %v7295_v11, %s7868_s14  ;;  %v2453_v1 = vadd.f32 %v2445_v7, %v2431_v23  ;;  %v2454_v8 = vadd.f32 %v2446_v41, %v2432_v10  ;;  %v2515_v24 = vrot.slane %v2476_v60, 1  ;;  %v2552_v40 = vmul.f32 %v7620_v2, %v7980_v29  ;;  %v7623_v60 = vld [vmem:[%s12305_s2 + $0x1a] ss:$0 sm:$0xff] }
 0x12a   : > { %v2513_v48 = vsel %vm471_vm0, %v2511_v25, %v2512_v50  ;;  %v2553_v33 = vmul.f32 %v7620_v2, %v7982_v30  ;;  %v2554_v46 = vmul.f32 %v7620_v2, %v7984_v31  ;;  %v2589_v62 = vrot.slane %v2551_v55, 2 }
 0x12b   : > { %v2516_v47 = vsel %vm471_vm0, %v2514_v45, %v2515_v24  ;;  %v2531_v59 = vadd.f32 %v2513_v48, %v2453_v1  ;;  %v2590_v5 = vrot.slane %v2552_v40, 2  ;;  %v2623_v34 = vmul.f32 %v7621_v56, %v7982_v30 }
 0x12c   : > { %v2532_v43 = vadd.f32 %v2516_v47, %v2454_v8  ;;  %v2592_v7 = vrot.slane %v2553_v33, 2  ;;  %v2593_v41 = vrot.slane %v2554_v46, 2  ;;  %v2624_v61 = vmul.f32 %v7621_v56, %v7986_v32 }
 0x12d   : > { %v2591_v57 = vsel %vm512_vm1, %v2589_v62, %v2590_v5  ;;  %v2651_v35 = vmul.f32 %v7622_v19, %v7982_v30  ;;  %v2652_v18 = vmul.f32 %v7622_v19, %v7984_v31  ;;  %v2653_v9 = vmul.f32 %v7622_v19, %v7986_v32 }
 0x12e   : > { %v2594_v11 = vsel %vm512_vm1, %v2592_v7, %v2593_v41  ;;  %v2609_v23 = vadd.f32 %v2591_v57, %v2531_v59  ;;  %v2654_v10 = vmul.f32 %v7622_v19, %v8749_v0  ;;  %v2729_v25 = vmul.f32 %v7623_v60, %v7982_v30  ;;  %v7624_v57 = vld [vmem:[%s12305_s2 + $0x36] ss:$0 sm:$0xff] }
 0x12f   : > { %v2610_v50 = vadd.f32 %v2594_v11, %v2532_v43  ;;  %v2689_v45 = vrot.slane %v2651_v35, 1  ;;  %v2690_v2 = vrot.slane %v2652_v18, 1  ;;  %v2692_v55 = vrot.slane %v2653_v9, 1  ;;  %v7625_v18 = vld [vmem:[%s12305_s2 + $0x37] ss:$0 sm:$0xff] }
 0x130   : > { %v2631_v1 = vadd.f32 %v2623_v34, %v2609_v23  ;;  %v2693_v8 = vrot.slane %v2654_v10, 1  ;;  %v2730_v24 = vmul.f32 %v7623_v60, %v7984_v31  ;;  %v2731_v40 = vmul.f32 %v7623_v60, %v7986_v32 }
 0x131   : > { %v2632_v48 = vadd.f32 %v2624_v61, %v2610_v50  ;;  %v2691_v33 = vsel %vm471_vm0, %v2689_v45, %v2690_v2  ;;  %v2732_v46 = vmul.f32 %v7623_v60, %v8749_v0  ;;  %v2767_v62 = vrot.slane %v2729_v25, 2  ;;  %v7626_v50 = vld [vmem:[%s12305_s2 + $0x38] ss:$0 sm:$0xff]  ;;  %v7627_v2 = vld [vmem:[%s12306_s3 + $0x2] ss:$0 sm:$0xff] }
 0x132   : > { %v2694_v47 = vsel %vm471_vm0, %v2692_v55, %v2693_v8  ;;  %v2709_v59 = vadd.f32 %v2691_v33, %v2631_v1  ;;  %v2768_v5 = vrot.slane %v2730_v24, 2  ;;  %v2770_v56 = vrot.slane %v2731_v40, 2 }
 0x133   : > { %v2710_v43 = vadd.f32 %v2694_v47, %v2632_v48  ;;  %v2771_v7 = vrot.slane %v2732_v46, 2  ;;  %v2831_v34 = vmul.f32 %v9115_v44, %v8998_v63  ;;  %v2832_v41 = vmul.f32 %v9122_v49, %v9006_v53 }
 0x134   : > { %v2769_v61 = vsel %vm512_vm1, %v2767_v62, %v2768_v5  ;;  %v4587_v19 = vmul.f32 %v7624_v57, %v7974_v26  ;;  %v4588_v35 = vmul.f32 %v7624_v57, %v7978_v28  ;;  %v4607_v9 = vmul.f32 %v7625_v18, %v7974_v26  ;;  %v7628_v62 = vld [vmem:[%s12307_s4 + $0x2] ss:$0 sm:$0xff] }
 0x135   : > { %v2772_v63 = vsel %vm512_vm1, %v2770_v56, %v2771_v7  ;;  %v2787_v11 = vadd.f32 %v2769_v61, %v2709_v59  ;;  %v4608_v53 = vmul.f32 %v7625_v18, %v7976_v27  ;;  %v4609_v23 = vmul.f32 %v7625_v18, %v7978_v28 }
 0x136   : > { %v2788_v10 = vadd.f32 %v2772_v63, %v2710_v43  ;;  %v4610_v60 = vmul.f32 %v7625_v18, %v7980_v29  ;;  %v4645_v25 = vrot.slane %v4607_v9, 1  ;;  %v4685_v45 = vmul.f32 %v7626_v50, %v7974_v26 }
 0x137   : > { %v2801_v55 = vmul.f32 %v7627_v2, %v2787_v11  ;;  %v4646_v1 = vrot.slane %v4608_v53, 1  ;;  %v4648_v8 = vrot.slane %v4609_v23, 1  ;;  %v4686_v24 = vmul.f32 %v7626_v50, %v7976_v27 }
 0x138   : > { %v2802_v40 = vmul.f32 %v7627_v2, %v2788_v10  ;;  %v4649_v48 = vrot.slane %v4610_v60, 1  ;;  %v4687_v33 = vmul.f32 %v7626_v50, %v7978_v28  ;;  %v4688_v46 = vmul.f32 %v7626_v50, %v7980_v29  ;;  %v7629_v10 = vld [vmem:[%s12305_s2 + $0x39] ss:$0 sm:$0xff] }
 0x139   : > { %v2815_v47 = vadd.f32 %v7628_v62, %v2801_v55  ;;  %v4647_v59 = vsel %vm471_vm0, %v4645_v25, %v4646_v1  ;;  %v4723_v5 = vrot.slane %v4685_v45, 2  ;;  %v4724_v56 = vrot.slane %v4686_v24, 2 }
 0x13a   : > { %v2816_v43 = vadd.f32 %v7628_v62, %v2802_v40  ;;  %v4650_v7 = vsel %vm471_vm0, %v4648_v8, %v4649_v48  ;;  %v4665_v61 = vadd.f32 %v4647_v59, %v4587_v19  ;;  %v4726_v57 = vrot.slane %v4687_v33, 2  ;;  %v7630_v19 = vld [vmem:[%s12305_s2 + $0x3a] ss:$0 sm:$0xff] }
 0x13b   : > { %v2823_v18 = vmax.f32 %v2815_v47, 0.0  ;;  %v4666_v9 = vadd.f32 %v4650_v7, %v4588_v35  ;;  %v4725_v63 = vsel %vm512_vm1, %v4723_v5, %v4724_v56  ;;  %v4727_v11 = vrot.slane %v4688_v46, 2 }
 0x13c   : > { %v2824_v53 = vmax.f32 %v2816_v43, 0.0  ;;  %v4743_v23 = vadd.f32 %v4725_v63, %v4665_v61  ;;  %v4757_v60 = vmul.f32 %v7629_v10, %v7978_v28  ;;  %v4758_v25 = vmul.f32 %v7629_v10, %v7982_v30 }
 0x13d   : > { %v2839_v50 = vmul.f32 %v2831_v34, %v2823_v18  ;;  %v4728_v45 = vsel %vm512_vm1, %v4726_v57, %v4727_v11  ;;  %v4785_v35 = vmul.f32 %v7630_v19, %v7978_v28  ;;  %v4786_v2 = vmul.f32 %v7630_v19, %v7980_v29  ;;  %v7631_v34 = vld [vmem:[%s12305_s2 + $0x3b] ss:$0 sm:$0xff] }
 0x13e   : > { %v2840_v55 = vmul.f32 %v2832_v41, %v2824_v53  ;;  %v4744_v1 = vadd.f32 %v4728_v45, %v4666_v9  ;;  %v4765_v8 = vadd.f32 %v4757_v60, %v4743_v23  ;;  %v4787_v24 = vmul.f32 %v7630_v19, %v7982_v30  ;;  %v7632_v9 = vld [vmem:[%s12305_s2 + $0x3c] ss:$0 sm:$0xff] }
 0x13f   : > { %v4788_v40 = vmul.f32 %v7630_v19, %v7984_v31  ;;  %v4823_v48 = vrot.slane %v4785_v35, 1  ;;  %v4824_v33 = vrot.slane %v4786_v2, 1  ;;  %v4863_v46 = vmul.f32 %v7631_v34, %v7978_v28 }
 0x140   : > { %v7310_v62 = vpack.i.bf16 %v2840_v55, %v2839_v50  ;;  %v4766_v47 = vadd.f32 %v4758_v25, %v4744_v1  ;;  %v4826_v59 = vrot.slane %v4787_v24, 1  ;;  %v4864_v5 = vmul.f32 %v7631_v34, %v7980_v29  ;;  %v7633_v50 = vld [vmem:[%s12305_s2 + $0x3d] ss:$0 sm:$0xff] }
 0x141   : > { %v4825_v41 = vsel %vm471_vm0, %v4823_v48, %v4824_v33  ;;  %v4827_v56 = vrot.slane %v4788_v40, 1  ;;  %v4865_v43 = vmul.f32 %v7631_v34, %v7982_v30  ;;  %v4866_v7 = vmul.f32 %v7631_v34, %v7984_v31  ;;  %v7634_v48 = vld [vmem:[%s12305_s2 + $0x3e] ss:$0 sm:$0xff] }
 0x142   : > { %7311 = vrot.lane.b32.xlu1 %v7310_v62, %s7867_s11  ;;  %v4843_v61 = vadd.f32 %v4825_v41, %v4765_v8  ;;  %v4901_v57 = vrot.slane %v4863_v46, 2  ;;  %v4902_v18 = vrot.slane %v4864_v5, 2  ;;  %v4935_v63 = vmul.f32 %v7632_v9, %v7982_v30 }
 0x143   : > { %v4828_v11 = vsel %vm471_vm0, %v4826_v59, %v4827_v56  ;;  %v4904_v53 = vrot.slane %v4865_v43, 2  ;;  %v4905_v23 = vrot.slane %v4866_v7, 2  ;;  %v4936_v10 = vmul.f32 %v7632_v9, %v7986_v32 }
 0x144   : > { %v4844_v60 = vadd.f32 %v4828_v11, %v4766_v47  ;;  %v4903_v25 = vsel %vm512_vm1, %v4901_v57, %v4902_v18  ;;  %v4963_v45 = vmul.f32 %v7633_v50, %v7982_v30  ;;  %v4964_v19 = vmul.f32 %v7633_v50, %v7984_v31 }
 0x145   : > { %v4906_v35 = vsel %vm512_vm1, %v4904_v53, %v4905_v23  ;;  %v4921_v2 = vadd.f32 %v4903_v25, %v4843_v61  ;;  %v4965_v55 = vmul.f32 %v7633_v50, %v7986_v32  ;;  %v4966_v1 = vmul.f32 %v7633_v50, %v8749_v0 }
 0x146   : > { %v4922_v8 = vadd.f32 %v4906_v35, %v4844_v60  ;;  %v5001_v24 = vrot.slane %v4963_v45, 1  ;;  %v5002_v40 = vrot.slane %v4964_v19, 1  ;;  %v5041_v33 = vmul.f32 %v7634_v48, %v7982_v30 }
 0x147   : > { %v4943_v34 = vadd.f32 %v4935_v63, %v4921_v2  ;;  %v5004_v46 = vrot.slane %v4965_v55, 1  ;;  %v5005_v62 = vrot.slane %v4966_v1, 1  ;;  %v5042_v47 = vmul.f32 %v7634_v48, %v7984_v31  ;;  %v7637_v1 = vld [vmem:[%s12305_s2 + $0x1d] ss:$0 sm:$0xff] }
 0x148   : > { %v4944_v59 = vadd.f32 %v4936_v10, %v4922_v8  ;;  %v5003_v5 = vsel %vm471_vm0, %v5001_v24, %v5002_v40  ;;  %v5043_v41 = vmul.f32 %v7634_v48, %v7986_v32  ;;  %v5044_v56 = vmul.f32 %v7634_v48, %v8749_v0  ;;  %v7635_v10 = vld [vmem:[%s12305_s2 + $0x1b] ss:$0 sm:$0xff]  ;;  %v7638_v24 = vld [vmem:[%s12306_s3 + $0x6] ss:$0 sm:$0xff] }
 0x149   : > { %v5006_v43 = vsel %vm471_vm0, %v5004_v46, %v5005_v62  ;;  %v5021_v7 = vadd.f32 %v5003_v5, %v4943_v34  ;;  %v5079_v61 = vrot.slane %v5041_v33, 2  ;;  %v5080_v57 = vrot.slane %v5042_v47, 2  ;;  %v7639_v5 = vld [vmem:[%s12307_s4 + $0x6] ss:$0 sm:$0xff] }
 0x14a   : > { %v5022_v18 = vadd.f32 %v5006_v43, %v4944_v59  ;;  %v5082_v9 = vrot.slane %v5043_v41, 2  ;;  %v5083_v11 = vrot.slane %v5044_v56, 2  ;;  %v5143_v63 = vmul.f32 %v9115_v44, %v9048_v38  ;;  %v7636_v38 = vld [vmem:[%s12305_s2 + $0x1c] ss:$0 sm:$0xff] }
 0x14b   : > { %v5081_v53 = vsel %vm512_vm1, %v5079_v61, %v5080_v57  ;;  %v5144_v23 = vmul.f32 %v9122_v49, %v9054_v17  ;;  %v2853_v60 = vmul.f32 %v7635_v10, %v7974_v26  ;;  %v2854_v25 = vmul.f32 %v7635_v10, %v7978_v28 }
 0x14c   : > { %v5084_v50 = vsel %vm512_vm1, %v5082_v9, %v5083_v11  ;;  %v5099_v45 = vadd.f32 %v5081_v53, %v5021_v7  ;;  %v2873_v19 = vmul.f32 %v7636_v38, %v7974_v26  ;;  %v2874_v35 = vmul.f32 %v7636_v38, %v7976_v27 }
 0x14d   : > { %v5100_v17 = vadd.f32 %v5084_v50, %v5022_v18  ;;  %v2875_v2 = vmul.f32 %v7636_v38, %v7978_v28  ;;  %v2876_v55 = vmul.f32 %v7636_v38, %v7980_v29  ;;  %v2951_v8 = vmul.f32 %v7637_v1, %v7974_v26 }
 0x14e   : > { %v5113_v40 = vmul.f32 %v7638_v24, %v5099_v45  ;;  %v2911_v48 = vrot.slane %v2873_v19, 1  ;;  %v2912_v33 = vrot.slane %v2874_v35, 1  ;;  %v2952_v34 = vmul.f32 %v7637_v1, %v7976_v27  ;;  %v7640_v19 = vld [vmem:[%s12305_s2 + $0x1e] ss:$0 sm:$0xff] }
 0x14f   : > { %v5114_v46 = vmul.f32 %v7638_v24, %v5100_v17  ;;  %v2914_v62 = vrot.slane %v2875_v2, 1  ;;  %v2915_v47 = vrot.slane %v2876_v55, 1  ;;  %v2953_v59 = vmul.f32 %v7637_v1, %v7978_v28 }
 0x150   : > { %v5127_v41 = vadd.f32 %v7639_v5, %v5113_v40  ;;  %v2913_v56 = vsel %vm471_vm0, %v2911_v48, %v2912_v33  ;;  %v2954_v43 = vmul.f32 %v7637_v1, %v7980_v29  ;;  %v2989_v7 = vrot.slane %v2951_v8, 2 }
 0x151   : > { %v5128_v61 = vadd.f32 %v7639_v5, %v5114_v46  ;;  %v2916_v57 = vsel %vm471_vm0, %v2914_v62, %v2915_v47  ;;  %v2931_v18 = vadd.f32 %v2913_v56, %v2853_v60  ;;  %v2990_v9 = vrot.slane %v2952_v34, 2 }
 0x152   : > { %v5135_v11 = vmax.f32 %v5127_v41, 0.0  ;;  %v2932_v53 = vadd.f32 %v2916_v57, %v2854_v25  ;;  %v2992_v10 = vrot.slane %v2953_v59, 2  ;;  %v2993_v50 = vrot.slane %v2954_v43, 2  ;;  %v7641_v25 = vld [vmem:[%s12305_s2 + $0x1f] ss:$0 sm:$0xff] }
 0x153   : > { %v5136_v45 = vmax.f32 %v5128_v61, 0.0  ;;  %v2991_v38 = vsel %vm512_vm1, %v2989_v7, %v2990_v9  ;;  %v3023_v35 = vmul.f32 %v7640_v19, %v7978_v28  ;;  %v3024_v17 = vmul.f32 %v7640_v19, %v7982_v30 }
 0x154   : > { %v5151_v2 = vmul.f32 %v5143_v63, %v5135_v11  ;;  %v2994_v55 = vsel %vm512_vm1, %v2992_v10, %v2993_v50  ;;  %v3009_v60 = vadd.f32 %v2991_v38, %v2931_v18  ;;  %v3051_v1 = vmul.f32 %v7641_v25, %v7978_v28  ;;  %v7642_v63 = vld [vmem:[%s12305_s2 + $0x20] ss:$0 sm:$0xff]  ;;  %v7643_v18 = vld [vmem:[%s12305_s2 + $0x21] ss:$0 sm:$0xff] }
 0x155   : > { %v5152_v8 = vmul.f32 %v5144_v23, %v5136_v45  ;;  %v3010_v24 = vadd.f32 %v2994_v55, %v2932_v53  ;;  %v3052_v40 = vmul.f32 %v7641_v25, %v7980_v29  ;;  %v3053_v48 = vmul.f32 %v7641_v25, %v7982_v30 }
 0x156   : > { %v3031_v33 = vadd.f32 %v3023_v35, %v3009_v60  ;;  %v3054_v34 = vmul.f32 %v7641_v25, %v7984_v31  ;;  %v3089_v46 = vrot.slane %v3051_v1, 1  ;;  %v3129_v62 = vmul.f32 %v7642_v63, %v7978_v28  ;;  %v7644_v35 = vld [vmem:[%s12305_s2 + $0x22] ss:$0 sm:$0xff]  ;;  %v7645_v1 = vld [vmem:[%s12305_s2 + $0x23] ss:$0 sm:$0xff] }
 0x157   : > { %v7305_v47 = vpack.i.bf16 %v5152_v8, %v5151_v2  ;;  %v3032_v59 = vadd.f32 %v3024_v17, %v3010_v24  ;;  %v3090_v5 = vrot.slane %v3052_v40, 1  ;;  %v3092_v41 = vrot.slane %v3053_v48, 1 }
 0x158   : > { %v3093_v23 = vrot.slane %v3054_v34, 1  ;;  %v3130_v56 = vmul.f32 %v7642_v63, %v7980_v29  ;;  %v3131_v43 = vmul.f32 %v7642_v63, %v7982_v30  ;;  %v3132_v7 = vmul.f32 %v7642_v63, %v7984_v31 }
 0x159   : > { %7306 = vrot.lane.b32.xlu0 %v7305_v47, %s7867_s11  ;;  %v3091_v61 = vsel %vm471_vm0, %v3089_v46, %v3090_v5  ;;  %v3167_v57 = vrot.slane %v3129_v62, 2  ;;  %v3201_v9 = vmul.f32 %v7643_v18, %v7982_v30  ;;  %v3202_v11 = vmul.f32 %v7643_v18, %v7986_v32 }
 0x15a   : > { %v3094_v53 = vsel %vm471_vm0, %v3092_v41, %v3093_v23  ;;  %v3109_v10 = vadd.f32 %v3091_v61, %v3031_v33  ;;  %v3168_v50 = vrot.slane %v3130_v56, 2  ;;  %v3170_v45 = vrot.slane %v3131_v43, 2 }
 0x15b   : > { %v3110_v38 = vadd.f32 %v3094_v53, %v3032_v59  ;;  %v3171_v19 = vrot.slane %v3132_v7, 2  ;;  %v3229_v17 = vmul.f32 %v7644_v35, %v7982_v30  ;;  %v3230_v2 = vmul.f32 %v7644_v35, %v7984_v31 }
 0x15c   : > { %v3169_v55 = vsel %vm512_vm1, %v3167_v57, %v3168_v50  ;;  %v3231_v60 = vmul.f32 %v7644_v35, %v7986_v32  ;;  %v3232_v25 = vmul.f32 %v7644_v35, %v8749_v0  ;;  %v3307_v8 = vmul.f32 %v7645_v1, %v7982_v30 }
 0x15d   : > { %v3172_v24 = vsel %vm512_vm1, %v3170_v45, %v3171_v19  ;;  %v3187_v40 = vadd.f32 %v3169_v55, %v3109_v10  ;;  %v3267_v48 = vrot.slane %v3229_v17, 1  ;;  %v3268_v33 = vrot.slane %v3230_v2, 1 }
 0x15e   : > { %v3188_v34 = vadd.f32 %v3172_v24, %v3110_v38  ;;  %v3270_v46 = vrot.slane %v3231_v60, 1  ;;  %v3271_v63 = vrot.slane %v3232_v25, 1  ;;  %v3308_v62 = vmul.f32 %v7645_v1, %v7984_v31  ;;  %v7648_v25 = vld [vmem:[%s12306_s3 + $0x3] ss:$0 sm:$0xff]  ;;  %v7649_v24 = vld [vmem:[%s12305_s2 + $0x41] ss:$0 sm:$0xff] }
 0x15f   : > { %v3209_v47 = vadd.f32 %v3201_v9, %v3187_v40  ;;  %v3269_v59 = vsel %vm471_vm0, %v3267_v48, %v3268_v33  ;;  %v3309_v5 = vmul.f32 %v7645_v1, %v7986_v32  ;;  %v3310_v41 = vmul.f32 %v7645_v1, %v8749_v0 }
 0x160   : > { %v3210_v23 = vadd.f32 %v3202_v11, %v3188_v34  ;;  %v3272_v56 = vsel %vm471_vm0, %v3270_v46, %v3271_v63  ;;  %v3345_v43 = vrot.slane %v3307_v8, 2  ;;  %v3346_v7 = vrot.slane %v3308_v62, 2  ;;  %v7646_v11 = vld [vmem:[%s12305_s2 + $0x3f] ss:$0 sm:$0xff]  ;;  %v7650_v62 = vld [vmem:[%s12307_s4 + $0x3] ss:$0 sm:$0xff] }
 0x161   : > { %v3287_v61 = vadd.f32 %v3269_v59, %v3209_v47  ;;  %v3348_v57 = vrot.slane %v3309_v5, 2  ;;  %v3349_v18 = vrot.slane %v3310_v41, 2  ;;  %v3409_v53 = vmul.f32 %v9115_v44, %v9011_v51  ;;  %v7647_v51 = vld [vmem:[%s12305_s2 + $0x40] ss:$0 sm:$0xff] }
 0x162   : > { %v3288_v10 = vadd.f32 %v3272_v56, %v3210_v23  ;;  %v3347_v9 = vsel %vm512_vm1, %v3345_v43, %v3346_v7  ;;  %v3410_v50 = vmul.f32 %v9122_v49, %v9015_v42  ;;  %v5165_v45 = vmul.f32 %v7646_v11, %v7974_v26 }
 0x163   : > { %v3350_v38 = vsel %vm512_vm1, %v3348_v57, %v3349_v18  ;;  %v3365_v19 = vadd.f32 %v3347_v9, %v3287_v61  ;;  %v5166_v35 = vmul.f32 %v7646_v11, %v7978_v28  ;;  %v5185_v17 = vmul.f32 %v7647_v51, %v7974_v26 }
 0x164   : > { %v3366_v2 = vadd.f32 %v3350_v38, %v3288_v10  ;;  %v5186_v42 = vmul.f32 %v7647_v51, %v7976_v27  ;;  %v5187_v55 = vmul.f32 %v7647_v51, %v7978_v28  ;;  %v5188_v60 = vmul.f32 %v7647_v51, %v7980_v29 }
 0x165   : > { %v3379_v1 = vmul.f32 %v7648_v25, %v3365_v19  ;;  %v5223_v8 = vrot.slane %v5185_v17, 1  ;;  %v5263_v40 = vmul.f32 %v7649_v24, %v7974_v26  ;;  %v5264_v48 = vmul.f32 %v7649_v24, %v7976_v27  ;;  %v7651_v19 = vld [vmem:[%s12305_s2 + $0x42] ss:$0 sm:$0xff] }
 0x166   : > { %v3380_v33 = vmul.f32 %v7648_v25, %v3366_v2  ;;  %v5224_v34 = vrot.slane %v5186_v42, 1  ;;  %v5226_v46 = vrot.slane %v5187_v55, 1  ;;  %v5227_v63 = vrot.slane %v5188_v60, 1 }
 0x167   : > { %v3393_v47 = vadd.f32 %v7650_v62, %v3379_v1  ;;  %v5265_v59 = vmul.f32 %v7649_v24, %v7978_v28  ;;  %v5266_v5 = vmul.f32 %v7649_v24, %v7980_v29  ;;  %v5301_v41 = vrot.slane %v5263_v40, 2 }
 0x168   : > { %v3394_v23 = vadd.f32 %v7650_v62, %v3380_v33  ;;  %v5225_v56 = vsel %vm471_vm0, %v5223_v8, %v5224_v34  ;;  %v5228_v43 = vsel %vm471_vm0, %v5226_v46, %v5227_v63  ;;  %v5302_v7 = vrot.slane %v5264_v48, 2  ;;  %v7653_v46 = vld [vmem:[%s12305_s2 + $0x44] ss:$0 sm:$0xff] }
 0x169   : > { %v3401_v61 = vmax.f32 %v3393_v47, 0.0  ;;  %v5243_v57 = vadd.f32 %v5225_v56, %v5165_v45  ;;  %v5244_v18 = vadd.f32 %v5228_v43, %v5166_v35  ;;  %v5304_v10 = vrot.slane %v5265_v59, 2  ;;  %v7652_v45 = vld [vmem:[%s12305_s2 + $0x43] ss:$0 sm:$0xff]  ;;  %v7654_v56 = vld [vmem:[%s12305_s2 + $0x45] ss:$0 sm:$0xff] }
 0x16a   : > { %v3402_v9 = vmax.f32 %v3394_v23, 0.0  ;;  %v5303_v11 = vsel %vm512_vm1, %v5301_v41, %v5302_v7  ;;  %v5305_v38 = vrot.slane %v5266_v5, 2  ;;  %v5335_v51 = vmul.f32 %v7651_v19, %v7978_v28 }
 0x16b   : > { %v3417_v17 = vmul.f32 %v3409_v53, %v3401_v61  ;;  %v5321_v2 = vadd.f32 %v5303_v11, %v5243_v57  ;;  %v5336_v42 = vmul.f32 %v7651_v19, %v7982_v30  ;;  %v5363_v35 = vmul.f32 %v7652_v45, %v7978_v28 }
 0x16c   : > { %v3418_v55 = vmul.f32 %v3410_v50, %v3402_v9  ;;  %v5306_v60 = vsel %vm512_vm1, %v5304_v10, %v5305_v38  ;;  %v5364_v25 = vmul.f32 %v7652_v45, %v7980_v29  ;;  %v5365_v1 = vmul.f32 %v7652_v45, %v7982_v30  ;;  %v7655_v38 = vld [vmem:[%s12305_s2 + $0x46] ss:$0 sm:$0xff] }
 0x16d   : > { %v5322_v8 = vadd.f32 %v5306_v60, %v5244_v18  ;;  %v5343_v24 = vadd.f32 %v5335_v51, %v5321_v2  ;;  %v5366_v53 = vmul.f32 %v7652_v45, %v7984_v31  ;;  %v5401_v40 = vrot.slane %v5363_v35, 1  ;;  %v7656_v60 = vld [vmem:[%s12305_s2 + $0x47] ss:$0 sm:$0xff] }
 0x16e   : > { %v7320_v48 = vpack.i.bf16 %v3418_v55, %v3417_v17  ;;  %v5402_v33 = vrot.slane %v5364_v25, 1  ;;  %v5404_v34 = vrot.slane %v5365_v1, 1  ;;  %v5441_v50 = vmul.f32 %v7653_v46, %v7978_v28 }
 0x16f   : > { %v5344_v63 = vadd.f32 %v5336_v42, %v5322_v8  ;;  %v5405_v62 = vrot.slane %v5366_v53, 1  ;;  %v5442_v47 = vmul.f32 %v7653_v46, %v7980_v29  ;;  %v5443_v59 = vmul.f32 %v7653_v46, %v7982_v30 }
 0x170   : > { %7321 = vrot.lane.b32.xlu1 %v7320_v48, %s7869_s17  ;;  %v5403_v5 = vsel %vm471_vm0, %v5401_v40, %v5402_v33  ;;  %v5444_v41 = vmul.f32 %v7653_v46, %v7984_v31  ;;  %v5479_v23 = vrot.slane %v5441_v50, 2  ;;  %v5513_v43 = vmul.f32 %v7654_v56, %v7982_v30 }
 0x171   : > { %v5406_v7 = vsel %vm471_vm0, %v5404_v34, %v5405_v62  ;;  %v5421_v61 = vadd.f32 %v5403_v5, %v5343_v24  ;;  %v5480_v57 = vrot.slane %v5442_v47, 2  ;;  %v5482_v18 = vrot.slane %v5443_v59, 2 }
 0x172   : > { %v5422_v10 = vadd.f32 %v5406_v7, %v5344_v63  ;;  %v5483_v9 = vrot.slane %v5444_v41, 2  ;;  %v5514_v11 = vmul.f32 %v7654_v56, %v7986_v32  ;;  %v5541_v19 = vmul.f32 %v7655_v38, %v7982_v30 }
 0x173   : > { %v5481_v51 = vsel %vm512_vm1, %v5479_v23, %v5480_v57  ;;  %v5542_v17 = vmul.f32 %v7655_v38, %v7984_v31  ;;  %v5543_v2 = vmul.f32 %v7655_v38, %v7986_v32  ;;  %v5544_v42 = vmul.f32 %v7655_v38, %v8749_v0 }
 0x174   : > { %v5484_v45 = vsel %vm512_vm1, %v5482_v18, %v5483_v9  ;;  %v5499_v35 = vadd.f32 %v5481_v51, %v5421_v61  ;;  %v5579_v55 = vrot.slane %v5541_v19, 1  ;;  %v5619_v25 = vmul.f32 %v7656_v60, %v7982_v30  ;;  %v12423_v19 = vld [vmem:[#allocation7_spill] sm:$0xff] }
 0x175   : > { %v5500_v1 = vadd.f32 %v5484_v45, %v5422_v10  ;;  %v5580_v8 = vrot.slane %v5542_v17, 1  ;;  %v5582_v24 = vrot.slane %v5543_v2, 1  ;;  %v5583_v53 = vrot.slane %v5544_v42, 1  ;;  %v12422_v10 = vld [vmem:[#allocation6_spill] sm:$0xff] }
 0x176   : > { %v5521_v40 = vadd.f32 %v5513_v43, %v5499_v35  ;;  %v5620_v48 = vmul.f32 %v7656_v60, %v7984_v31  ;;  %v5621_v33 = vmul.f32 %v7656_v60, %v7986_v32  ;;  %v5622_v34 = vmul.f32 %v7656_v60, %v8749_v0  ;;  %v7657_v45 = vld [vmem:[%s12306_s3 + $0x7] ss:$0 sm:$0xff] }
 0x177   : > { %v5522_v46 = vadd.f32 %v5514_v11, %v5500_v1  ;;  %v5581_v50 = vsel %vm471_vm0, %v5579_v55, %v5580_v8  ;;  %v5584_v63 = vsel %vm471_vm0, %v5582_v24, %v5583_v53  ;;  %v5657_v62 = vrot.slane %v5619_v25, 2  ;;  %v12424_v53 = vld [vmem:[#allocation15_spill] sm:$0xff] }
 0x178   : > { %v5599_v47 = vadd.f32 %v5581_v50, %v5521_v40  ;;  %v5658_v59 = vrot.slane %v5620_v48, 2  ;;  %v5660_v5 = vrot.slane %v5621_v33, 2  ;;  %v5661_v41 = vrot.slane %v5622_v34, 2  ;;  %v7658_v48 = vld [vmem:[%s12307_s4 + $0x7] ss:$0 sm:$0xff]  ;;  %v12425_v50 = vld [vmem:[#allocation16_spill] sm:$0xff] }
 0x179   : > { %v5600_v23 = vadd.f32 %v5584_v63, %v5522_v46  ;;  %v5721_v56 = vmul.f32 %v9115_v44, %v9057_v58  ;;  %v5722_v43 = vmul.f32 %v9122_v49, %v9060_v12  ;;  %v484_v7 = vrot.slane %v7964_v20, 1 }
 0x17a   : > { %v5659_v61 = vsel %vm512_vm1, %v5657_v62, %v5658_v59  ;;  %v5662_v57 = vsel %vm512_vm1, %v5660_v5, %v5661_v41  ;;  %v485_v18 = vrot.slane %v7966_v21, 1  ;;  %v487_v9 = vrot.slane %v12422_v10, 1  ;;  %v7659_v59 = vld [vmem:[%s12305_s2 + $0x9] ss:$0 sm:$0xff] }
 0x17b   : > { %v5677_v11 = vadd.f32 %v5659_v61, %v5599_v47  ;;  %v5678_v38 = vadd.f32 %v5662_v57, %v5600_v23  ;;  %v488_v51 = vrot.slane %v12423_v19, 1  ;;  %v525_v17 = vrot.slane %v7964_v20, 2 }
 0x17c   : > { %v486_v58 = vsel %vm471_vm0, %v484_v7, %v485_v18  ;;  %v526_v12 = vrot.slane %v7966_v21, 2  ;;  %v528_v2 = vrot.slane %v12422_v10, 2  ;;  %v529_v42 = vrot.slane %v12423_v19, 2 }
 0x17d   : > { %v5691_v35 = vmul.f32 %v7657_v45, %v5677_v11  ;;  %v5692_v55 = vmul.f32 %v7657_v45, %v5678_v38  ;;  %v489_v60 = vsel %vm471_vm0, %v487_v9, %v488_v51  ;;  %v508_v25 = vadd.f32 %v486_v58, %v7964_v20  ;;  %v7660_v11 = vld [vmem:[%s12305_s2 + $0xa] ss:$0 sm:$0xff] }
 0x17e   : > { %v509_v1 = vadd.f32 %v489_v60, %v12422_v10  ;;  %v527_v8 = vsel %vm512_vm1, %v525_v17, %v526_v12  ;;  %v530_v24 = vsel %vm512_vm1, %v528_v2, %v529_v42  ;;  %v570_v40 = vadd.f32 %v12424_v53, %v486_v58 }
 0x17f   : > { %v5705_v33 = vadd.f32 %v7658_v48, %v5691_v35  ;;  %v5706_v34 = vadd.f32 %v7658_v48, %v5692_v55  ;;  %v549_v46 = vadd.f32 %v527_v8, %v508_v25  ;;  %v589_v63 = vadd.f32 %v12425_v50, %v7964_v20  ;;  %v7664_v50 = vld [vmem:[%s12304_s1 + $0x2] ss:$0 sm:$0xff] }
 0x180   : > { %v550_v62 = vadd.f32 %v530_v24, %v509_v1  ;;  %v582_v47 = vadd.f32 %v570_v40, %v527_v8  ;;  %v9468_v5 = vmul.f32 %v7659_v59, %v7953_v13  ;;  %v1694_v41 = vmul.f32 %v7659_v59, %v7957_v15 }
 0x181   : > { %v5713_v23 = vmax.f32 %v5705_v33, 0.0  ;;  %v5714_v7 = vmax.f32 %v5706_v34, 0.0  ;;  %v557_v61 = vadd.f32 %v549_v46, %v12422_v10  ;;  %v603_v57 = vadd.f32 %v589_v63, %v486_v58 }
 0x182   : > { %v9473_v18 = vadd.f32 %v550_v62, %v7974_v26  ;;  %v590_v9 = vadd.f32 %v582_v47, %v12422_v10  ;;  %v1709_v38 = vmul.f32 %v7660_v11, %v7953_v13  ;;  %v1710_v51 = vmul.f32 %v7660_v11, %v7955_v14  ;;  %v7665_v62 = vld [vmem:[%s12304_s1 + $0x3] ss:$0 sm:$0xff] }
 0x183   : > { %v5729_v17 = vmul.f32 %v5721_v56, %v5713_v23  ;;  %v5730_v12 = vmul.f32 %v5722_v43, %v5714_v7  ;;  %v571_v2 = vadd.f32 %v557_v61, %v489_v60  ;;  %v615_v42 = vadd.f32 %v603_v57, %v527_v8  ;;  %v7661_v56 = vld [vmem:[%s12305_s2 + $0xb] ss:$0 sm:$0xff]  ;;  %v7666_v23 = vld [vmem:[%s12304_s1 + $0x4] ss:$0 sm:$0xff]  ;;  %v7667_v61 = vld [vmem:[%s12304_s1 + $0x5] ss:$0 sm:$0xff] }
 0x184   : > { %v604_v45 = vadd.f32 %v590_v9, %v489_v60  ;;  %v1711_v58 = vmul.f32 %v7660_v11, %v7957_v15  ;;  %v1712_v35 = vmul.f32 %v7660_v11, %v7959_v16  ;;  %v1743_v55 = vrot.slane %v1709_v38, 1  ;;  %v7662_v60 = vld [vmem:[%s12304_s1] ss:$0 sm:$0xff]  ;;  %v7668_v9 = vld [vmem:[%s12304_s1 + $0x6] ss:$0 sm:$0xff] }
 0x185   : > { %v7315_v25 = vpack.i.bf16 %v5730_v12, %v5729_v17  ;;  %v9483_v1 = vadd.f32 %v571_v2, %v530_v24  ;;  %v623_v53 = vmul.f32 0.11111111, %v615_v42  ;;  %v1744_v40 = vrot.slane %v1710_v51, 1  ;;  %v7669_v38 = vld [vmem:[%s12304_s1 + $0x7] ss:$0 sm:$0xff] }
 0x186   : > { %v616_v48 = vadd.f32 %v604_v45, %v530_v24  ;;  %v1746_v33 = vrot.slane %v1711_v58, 1  ;;  %v1747_v34 = vrot.slane %v1712_v35, 1  ;;  %v1787_v43 = vmul.f32 %v7661_v56, %v7953_v13  ;;  %v7663_v24 = vld [vmem:[%s12304_s1 + $0x1] ss:$0 sm:$0xff]  ;;  %v7670_v17 = vld [vmem:[%s12304_s1 + $0x8] ss:$0 sm:$0xff] }
 0x187   : > { %7316 = vrot.lane.b32.xlu0 %v7315_v25, %s7869_s17  ;;  %v9493_v8 = vmul.f32 %v7662_v60, %v623_v53  ;;  %v9498_v46 = vmul.f32 %v7663_v24, %v623_v53  ;;  %v9503_v63 = vmul.f32 %v7664_v50, %v623_v53  ;;  %v9508_v47 = vmul.f32 %v7665_v62, %v623_v53 }
 0x188   : > { %v624_v59 = vmul.f32 0.11111111, %v616_v48  ;;  %v9513_v7 = vmul.f32 %v7666_v23, %v623_v53  ;;  %v9518_v57 = vmul.f32 %v7667_v61, %v623_v53  ;;  %v9523_v11 = vmul.f32 %v7668_v9, %v623_v53 }
 0x189   : > { %v9528_v51 = vmul.f32 %v7669_v38, %v623_v53  ;;  %v9533_v12 = vmul.f32 %v7670_v17, %v623_v53  ;;  %v757_v2 = vmax.f32 %v9493_v8, %v9498_v46  ;;  %v1745_v42 = vsel %vm471_vm0, %v1743_v55, %v1744_v40 }
 0x18a   : > { %v9538_v45 = vmul.f32 %v7662_v60, %v624_v59  ;;  %v9540_v58 = vmul.f32 %v7663_v24, %v624_v59  ;;  %v9542_v35 = vmul.f32 %v7664_v50, %v624_v59  ;;  %v9544_v25 = vmul.f32 %v7665_v62, %v624_v59 }
 0x18b   : > { %v9546_v48 = vmul.f32 %v7666_v23, %v624_v59  ;;  %v9548_v3 = vmul.f32 %v7667_v61, %v624_v59  ;;  %v9550_v4 = vmul.f32 %v7668_v9, %v624_v59  ;;  %v9552_v53 = vmul.f32 %v7669_v38, %v624_v59 }
 0x18c   : > { %v9554_v49 = vmul.f32 %v7670_v17, %v624_v59  ;;  %v758_v55 = vmax.f32 %v9538_v45, %v9540_v58  ;;  %v765_v40 = vmax.f32 %v757_v2, %v9503_v63  ;;  %v1748_v60 = vsel %vm471_vm0, %v1746_v33, %v1747_v34  ;;  %v7671_v33 = vld [vmem:[%s12305_s2 + $0xc] ss:$0 sm:$0xff] }
 0x18d   : > { %v1771_v24 = vadd.f32 %v1745_v42, %v9468_v5  ;;  %v1772_v50 = vadd.f32 %v1748_v60, %v1694_v41  ;;  %v1788_v62 = vmul.f32 %v7661_v56, %v7955_v14  ;;  %v1789_v23 = vmul.f32 %v7661_v56, %v7957_v15 }
 0x18e   : > { %v766_v61 = vmax.f32 %v758_v55, %v9542_v35  ;;  %v773_v9 = vmax.f32 %v765_v40, %v9508_v47  ;;  %v1790_v59 = vmul.f32 %v7661_v56, %v7959_v16  ;;  %v1821_v38 = vrot.slane %v1787_v43, 2  ;;  %v7672_v56 = vld [vmem:[%s12305_s2 + $0xd] ss:$0 sm:$0xff] }
 0x18f   : > { %v1822_v17 = vrot.slane %v1788_v62, 2  ;;  %v1824_v39 = vrot.slane %v1789_v23, 2  ;;  %v1863_v5 = vmul.f32 %v7671_v33, %v7957_v15  ;;  %v1864_v41 = vmul.f32 %v7671_v33, %v7964_v20 }
 0x190   : > { %v774_v34 = vmax.f32 %v766_v61, %v9544_v25  ;;  %v781_v2 = vmax.f32 %v773_v9, %v9513_v7  ;;  %v1825_v42 = vrot.slane %v1790_v59, 2  ;;  %v1887_v43 = vmul.f32 %v7672_v56, %v7957_v15 }
 0x191   : > { %v1823_v55 = vsel %vm512_vm1, %v1821_v38, %v1822_v17  ;;  %v1888_v40 = vmul.f32 %v7672_v56, %v7959_v16  ;;  %v1889_v60 = vmul.f32 %v7672_v56, %v7964_v20  ;;  %v1890_v62 = vmul.f32 %v7672_v56, %v7966_v21 }
 0x192   : > { %v782_v23 = vmax.f32 %v774_v34, %v9546_v48  ;;  %v789_v61 = vmax.f32 %v781_v2, %v9518_v57  ;;  %v1826_v9 = vsel %vm512_vm1, %v1824_v39, %v1825_v42  ;;  %v1849_v59 = vadd.f32 %v1823_v55, %v1771_v24  ;;  %v7673_v34 = vld [vmem:[%s12305_s2 + $0xe] ss:$0 sm:$0xff] }
 0x193   : > { %v1850_v33 = vadd.f32 %v1826_v9, %v1772_v50  ;;  %v1921_v44 = vrot.slane %v1887_v43, 1  ;;  %v1922_v52 = vrot.slane %v1888_v40, 1  ;;  %v1924_v0 = vrot.slane %v1889_v60, 1 }
 0x194   : > { %v790_v32 = vmax.f32 %v782_v23, %v9548_v3  ;;  %v797_v38 = vmax.f32 %v789_v61, %v9523_v11  ;;  %v1871_v17 = vadd.f32 %v1863_v5, %v1849_v59  ;;  %v1925_v31 = vrot.slane %v1890_v62, 1  ;;  %v7675_v23 = vld [vmem:[%s12305_s2 + $0x10] ss:$0 sm:$0xff] }
 0x195   : > { %v1872_v30 = vadd.f32 %v1864_v41, %v1850_v33  ;;  %v1923_v56 = vsel %vm471_vm0, %v1921_v44, %v1922_v52  ;;  %v9591_v39 = vmul.f32 %v7673_v34, %v7957_v15  ;;  %v9594_v24 = vmul.f32 %v7673_v34, %v7959_v16 }
 0x196   : > { %v798_v50 = vmax.f32 %v790_v32, %v9550_v4  ;;  %v805_v2 = vmax.f32 %v797_v38, %v9528_v51  ;;  %v1926_v5 = vsel %vm471_vm0, %v1924_v0, %v1925_v31  ;;  %v9599_v42 = vadd.f32 %v1923_v56, %v1871_v17  ;;  %v7674_v31 = vld [vmem:[%s12305_s2 + $0xf] ss:$0 sm:$0xff] }
 0x197   : > { %v9601_v41 = vadd.f32 %v1926_v5, %v1872_v30  ;;  %v1967_v52 = vmul.f32 %v7673_v34, %v7964_v20  ;;  %v1968_v44 = vmul.f32 %v7673_v34, %v7966_v21  ;;  %v1999_v43 = vrot.slane %v9591_v39, 2 }
 0x198   : > { %v806_v55 = vmax.f32 %v798_v50, %v9552_v53  ;;  %v813_v40 = vmax.f32 %v805_v2, %v9533_v12  ;;  %v2000_v32 = vrot.slane %v9594_v24, 2  ;;  %v2041_v0 = vmul.f32 %v7674_v31, %v7964_v20 }
 0x199   : > { %v2002_v30 = vrot.slane %v1967_v52, 2  ;;  %v2003_v60 = vrot.slane %v1968_v44, 2  ;;  %v2042_v62 = vmul.f32 %v7674_v31, %v12422_v10  ;;  %v9618_v61 = vmul.f32 %v7675_v23, %v7964_v20 }
 0x19a   : > { %v814_v9 = vmax.f32 %v806_v55, %v9554_v49  ;;  %v821_v59 = vsub.f32 %v9493_v8, %v813_v40  ;;  %v845_v33 = vsub.f32 %v9498_v46, %v813_v40  ;;  %v869_v38 = vsub.f32 %v9503_v63, %v813_v40 }
 0x19b   : > { %v893_v17 = vsub.f32 %v9508_v47, %v813_v40  ;;  %v917_v56 = vsub.f32 %v9513_v7, %v813_v40  ;;  %v941_v34 = vsub.f32 %v9518_v57, %v813_v40  ;;  %v965_v39 = vsub.f32 %v9523_v11, %v813_v40 }
 0x19c   : > { %v822_v24 = vsub.f32 %v9538_v45, %v814_v9  ;;  %v831_v50 = vmul.f32 1.442695, %v821_v59  ;;  %v846_v2 = vsub.f32 %v9540_v58, %v814_v9  ;;  %v855_v5 = vmul.f32 1.442695, %v845_v33 }
 0x19d   : > { %v870_v8 = vsub.f32 %v9542_v35, %v814_v9  ;;  %v879_v52 = vmul.f32 1.442695, %v869_v38  ;;  %v894_v46 = vsub.f32 %v9544_v25, %v814_v9  ;;  %v903_v63 = vmul.f32 1.442695, %v893_v17 }
 0x19e   : > { %7483 = vpow2.f32 %v831_v50  ;;  %v833_v47 = vmul.f32 1.442695, %v822_v24  ;;  %v857_v44 = vmul.f32 1.442695, %v846_v2  ;;  %v918_v7 = vsub.f32 %v9546_v48, %v814_v9 }
 0x19f   : > { %7485 = vpow2.f32 %v855_v5  ;;  %v881_v57 = vmul.f32 1.442695, %v870_v8  ;;  %v905_v11 = vmul.f32 1.442695, %v894_v46  ;;  %v927_v55 = vmul.f32 1.442695, %v917_v56 }
 0x1a0   : > { %7487 = vpow2.f32 %v833_v47  ;;  %v929_v45 = vmul.f32 1.442695, %v918_v7  ;;  %v942_v58 = vsub.f32 %v9548_v3, %v814_v9  ;;  %v951_v31 = vmul.f32 1.442695, %v941_v34  ;;  %v7676_v5 = vld [vmem:[%s12305_s2 + $0x11] ss:$0 sm:$0xff] }
 0x1a1   : > { %7489 = vpow2.f32 %v857_v44  ;;  %v966_v35 = vsub.f32 %v9550_v4, %v814_v9  ;;  %v975_v59 = vmul.f32 1.442695, %v965_v39  ;;  %v989_v25 = vsub.f32 %v9528_v51, %v813_v40 }
 0x1a2   : > { %7491 = vpow2.f32 %v879_v52  ;;  %v953_v33 = vmul.f32 1.442695, %v942_v58  ;;  %v990_v38 = vsub.f32 %v9552_v53, %v814_v9  ;;  %v1013_v48 = vsub.f32 %v9533_v12, %v813_v40 }
 0x1a3   : > { %7493 = vpow2.f32 %v881_v57  ;;  %v977_v17 = vmul.f32 1.442695, %v966_v35  ;;  %v999_v56 = vmul.f32 1.442695, %v989_v25  ;;  %v1014_v24 = vsub.f32 %v9554_v49, %v814_v9 }
 0x1a4   : > { %7495 = vpow2.f32 %v903_v63  ;;  %v1001_v3 = vmul.f32 1.442695, %v990_v38  ;;  %v1023_v34 = vmul.f32 1.442695, %v1013_v48  ;;  %v2001_v50 = vsel %vm512_vm1, %v1999_v43, %v2000_v32  ;;  %v7677_v38 = vld [vmem:[%s12305_s2 + $0x2d] ss:$0 sm:$0xff] }
 0x1a5   : > { %7497 = vpow2.f32 %v905_v11  ;;  %v1025_v4 = vmul.f32 1.442695, %v1014_v24  ;;  %v2004_v51 = vsel %vm512_vm1, %v2002_v30, %v2003_v60  ;;  %v2027_v39 = vadd.f32 %v2001_v50, %v9599_v42 }
 0x1a6   : > { %7499 = vpow2.f32 %v927_v55  ;;  %v2028_v53 = vadd.f32 %v2004_v51, %v9601_v41  ;;  %v2066_v12 = vmul.f32 %v7675_v23, %v7966_v21  ;;  %v2067_v40 = vmul.f32 %v7675_v23, %v12422_v10 }
 0x1a7   : > { %7501 = vpow2.f32 %v929_v45  ;;  %v2049_v49 = vadd.f32 %v2041_v0, %v2027_v39  ;;  %v2068_v9 = vmul.f32 %v7675_v23, %v12423_v19  ;;  %v2099_v2 = vrot.slane %v9618_v61, 1 }
 0x1a8   : > { %v9647_v43 = vpop.eup %7483  ;;  %7503 = vpow2.f32 %v951_v31  ;;  %v2050_v32 = vadd.f32 %v2042_v62, %v2028_v53  ;;  %v2100_v30 = vrot.slane %v2066_v12, 1  ;;  %v2102_v60 = vrot.slane %v2067_v40, 1  ;;  %v7678_v53 = vld [vmem:[%s12305_s2 + $0x2e] ss:$0 sm:$0xff] }
 0x1a9   : > { %v9649_v42 = vpop.eup %7485  ;;  %7505 = vpow2.f32 %v953_v33  ;;  %v2103_v41 = vrot.slane %v2068_v9, 1  ;;  %v2143_v0 = vmul.f32 %v7676_v5, %v7964_v20  ;;  %v2144_v23 = vmul.f32 %v7676_v5, %v7966_v21 }
 0x1aa   : > { %v9656_v8 = vpop.eup %7487  ;;  %7507 = vpow2.f32 %v975_v59  ;;  %v1037_v62 = vadd.f32 %v9649_v42, %v9647_v43  ;;  %v2101_v61 = vsel %vm471_vm0, %v2099_v2, %v2100_v30  ;;  %v2145_v52 = vmul.f32 %v7676_v5, %v12422_v10 }
 0x1ab   : > { %v9662_v46 = vpop.eup %7489  ;;  %7509 = vpow2.f32 %v977_v17  ;;  %v2104_v63 = vsel %vm471_vm0, %v2102_v60, %v2103_v41  ;;  %v2127_v47 = vadd.f32 %v2101_v61, %v2049_v49  ;;  %v2146_v44 = vmul.f32 %v7676_v5, %v12423_v19  ;;  %v7679_v60 = vld [vmem:[%s12306_s3 + $0x1] ss:$0 sm:$0xff] }
 0x1ac   : > { %v9666_v7 = vpop.eup %7491  ;;  %7511 = vpow2.f32 %v999_v56  ;;  %v1038_v57 = vadd.f32 %v9662_v46, %v9656_v8  ;;  %v2128_v11 = vadd.f32 %v2104_v63, %v2050_v32  ;;  %v2177_v55 = vrot.slane %v2143_v0, 2 }
 0x1ad   : > { %v9670_v45 = vpop.eup %7493  ;;  %7513 = vpow2.f32 %v1001_v3  ;;  %v1045_v58 = vadd.f32 %v9666_v7, %v1037_v62  ;;  %v2178_v31 = vrot.slane %v2144_v23, 2  ;;  %v2180_v35 = vrot.slane %v2145_v52, 2 }
 0x1ae   : > { %v9673_v59 = vpop.eup %7495  ;;  %7515 = vpow2.f32 %v1023_v34  ;;  %v1046_v25 = vadd.f32 %v9670_v45, %v1038_v57  ;;  %v2181_v33 = vrot.slane %v2146_v44, 2  ;;  %v4005_v48 = vmul.f32 %v7677_v38, %v7953_v13  ;;  %v7680_v57 = vld [vmem:[%s12307_s4 + $0x1] ss:$0 sm:$0xff] }
 0x1af   : > { %v9680_v17 = vpop.eup %7497  ;;  %7517 = vpow2.f32 %v1025_v4  ;;  %v1053_v56 = vadd.f32 %v9673_v59, %v1045_v58  ;;  %v2179_v24 = vsel %vm512_vm1, %v2177_v55, %v2178_v31  ;;  %v4006_v3 = vmul.f32 %v7677_v38, %v7957_v15  ;;  %v7681_v58 = vld [vmem:[%s12305_s2 + $0x2f] ss:$0 sm:$0xff] }
 0x1b0   : > { %v9685_v50 = vpop.eup %7499  ;;  %v1054_v34 = vadd.f32 %v9680_v17, %v1046_v25  ;;  %v2182_v51 = vsel %vm512_vm1, %v2180_v35, %v2181_v33  ;;  %v2205_v39 = vadd.f32 %v2179_v24, %v2127_v47  ;;  %v4021_v12 = vmul.f32 %v7678_v53, %v7953_v13 }
 0x1b1   : > { %12426 = vst [vmem:[#allocation6_spill] sm:$0xff] %v9685_v50  ;;  %v9693_v4 = vpop.eup %7501  ;;  %v1061_v40 = vadd.f32 %v9685_v50, %v1053_v56  ;;  %v2206_v49 = vadd.f32 %v2182_v51, %v2128_v11  ;;  %v4022_v9 = vmul.f32 %v7678_v53, %v7955_v14  ;;  %v4023_v2 = vmul.f32 %v7678_v53, %v7957_v15 }
 0x1b2   : > { %12427 = vst [vmem:[#allocation7_spill] sm:$0xff] %v9693_v4  ;;  %v9698_v32 = vpop.eup %7503  ;;  %v1062_v30 = vadd.f32 %v9693_v4, %v1054_v34  ;;  %v2219_v41 = vmul.f32 %v7679_v60, %v2205_v39  ;;  %v4024_v5 = vmul.f32 %v7678_v53, %v7959_v16  ;;  %v4055_v0 = vrot.slane %v4021_v12, 1 }
 0x1b3   : > { %v9705_v23 = vpop.eup %7505  ;;  %v1069_v62 = vadd.f32 %v9698_v32, %v1061_v40  ;;  %v2220_v61 = vmul.f32 %v7679_v60, %v2206_v49  ;;  %v4056_v52 = vrot.slane %v4022_v9, 1  ;;  %v4058_v63 = vrot.slane %v4023_v2, 1 }
 0x1b4   : > { %v9708_v47 = vpop.eup %7507  ;;  %v1070_v44 = vadd.f32 %v9705_v23, %v1062_v30  ;;  %v9714_v11 = vadd.f32 %v7680_v57, %v2219_v41  ;;  %v4059_v55 = vrot.slane %v4024_v5, 1  ;;  %v4099_v31 = vmul.f32 %v7681_v58, %v7953_v13 }
 0x1b5   : > { %v9720_v35 = vpop.eup %7509  ;;  %v1077_v25 = vadd.f32 %v9708_v47, %v1069_v62  ;;  %v9723_v33 = vadd.f32 %v7680_v57, %v2220_v61  ;;  %v4057_v38 = vsel %vm471_vm0, %v4055_v0, %v4056_v52  ;;  %v4100_v56 = vmul.f32 %v7681_v58, %v7955_v14  ;;  %v7682_v52 = vld [vmem:[%s12305_s2 + $0x30] ss:$0 sm:$0xff] }
 0x1b6   : > { %v9727_v24 = vpop.eup %7511  ;;  %v1078_v34 = vadd.f32 %v9720_v35, %v1070_v44  ;;  %v2241_v51 = vmax.f32 %v9714_v11, 0.0  ;;  %v4060_v39 = vsel %vm471_vm0, %v4058_v63, %v4059_v55  ;;  %v4083_v53 = vadd.f32 %v4057_v38, %v4005_v48  ;;  %v7688_v11 = vld [vmem:[%s12305_s2 + $0x12] ss:$0 sm:$0xff] }
 0x1b7   : > { %v9732_v12 = vpop.eup %7513  ;;  %v1085_v40 = vadd.f32 %v9727_v24, %v1077_v25  ;;  %v4084_v9 = vadd.f32 %v4060_v39, %v4006_v3  ;;  %v4101_v2 = vmul.f32 %v7681_v58, %v7957_v15  ;;  %v4102_v41 = vmul.f32 %v7681_v58, %v7959_v16  ;;  %v7683_v58 = vld [vmem:[%s12305_s2 + $0x31] ss:$0 sm:$0xff] }
 0x1b8   : > { %v9737_v30 = vpop.eup %7515  ;;  %v1086_v60 = vadd.f32 %v9732_v12, %v1078_v34  ;;  %v4133_v5 = vrot.slane %v4099_v31, 2  ;;  %v4134_v0 = vrot.slane %v4100_v56, 2  ;;  %v4175_v3 = vmul.f32 %v7682_v52, %v7957_v15 }
 0x1b9   : > { %12428 = vst [vmem:[#allocation15_spill] sm:$0xff] %v9737_v30  ;;  %v9741_v62 = vpop.eup %7517  ;;  %v1093_v48 = vadd.f32 %v9737_v30, %v1085_v40  ;;  %v4136_v61 = vrot.slane %v4101_v2, 2  ;;  %v4176_v63 = vmul.f32 %v7682_v52, %v7964_v20  ;;  %v4137_v55 = vrot.slane %v4102_v41, 2 }
 0x1ba   : > { %12429 = vst [vmem:[#allocation16_spill] sm:$0xff] %v9741_v62  ;;  %v1094_v44 = vadd.f32 %v9741_v62, %v1086_v60  ;;  %v4135_v57 = vsel %vm512_vm1, %v4133_v5, %v4134_v0  ;;  %v4199_v31 = vmul.f32 %v7683_v58, %v7957_v15  ;;  %v4200_v38 = vmul.f32 %v7683_v58, %v7959_v16 }
 0x1bb   : > { %7519 = vrcp.f32 %v1093_v48  ;;  %v4161_v25 = vadd.f32 %v4135_v57, %v4083_v53  ;;  %v4201_v56 = vmul.f32 %v7683_v58, %v7964_v20  ;;  %v4138_v34 = vsel %vm512_vm1, %v4136_v61, %v4137_v55  ;;  %v7684_v48 = vld [vmem:[%s12305_s2 + $0x32] ss:$0 sm:$0xff] }
 0x1bc   : > { %7521 = vrcp.f32 %v1094_v44  ;;  %v4202_v39 = vmul.f32 %v7683_v58, %v7966_v21  ;;  %v4233_v40 = vrot.slane %v4199_v31, 1  ;;  %v4162_v2 = vadd.f32 %v4138_v34, %v4084_v9  ;;  %v7685_v9 = vld [vmem:[%s12305_s2 + $0x33] ss:$0 sm:$0xff] }
 0x1bd   : > { %v4183_v60 = vadd.f32 %v4175_v3, %v4161_v25  ;;  %v4234_v41 = vrot.slane %v4200_v38, 1  ;;  %v4236_v5 = vrot.slane %v4201_v56, 1  ;;  %v4277_v53 = vmul.f32 %v7684_v48, %v7957_v15 }
 0x1be   : > { %v4237_v0 = vrot.slane %v4202_v39, 1  ;;  %v4278_v52 = vmul.f32 %v7684_v48, %v7959_v16  ;;  %v4279_v44 = vmul.f32 %v7684_v48, %v7964_v20  ;;  %v4184_v57 = vadd.f32 %v4176_v63, %v4162_v2  ;;  %v7686_v2 = vld [vmem:[%s12305_s2 + $0x34] ss:$0 sm:$0xff] }
 0x1bf   : > { %v4235_v61 = vsel %vm471_vm0, %v4233_v40, %v4234_v41  ;;  %v4280_v55 = vmul.f32 %v7684_v48, %v7966_v21  ;;  %v4353_v3 = vmul.f32 %v7685_v9, %v7964_v20  ;;  %v4311_v25 = vrot.slane %v4277_v53, 2 }
 0x1c0   : > { %v4238_v58 = vsel %vm471_vm0, %v4236_v5, %v4237_v0  ;;  %v4261_v31 = vadd.f32 %v4235_v61, %v4183_v60  ;;  %v4312_v38 = vrot.slane %v4278_v52, 2  ;;  %v4314_v34 = vrot.slane %v4279_v44, 2  ;;  %v7687_v52 = vld [vmem:[%s12305_s2 + $0x35] ss:$0 sm:$0xff] }
 0x1c1   : > { %v4262_v56 = vadd.f32 %v4238_v58, %v4184_v57  ;;  %v4315_v39 = vrot.slane %v4280_v55, 2  ;;  %v4354_v63 = vmul.f32 %v7685_v9, %v12422_v10  ;;  %v4377_v41 = vmul.f32 %v7686_v2, %v7964_v20 }
 0x1c2   : > { %v4313_v40 = vsel %vm512_vm1, %v4311_v25, %v4312_v38  ;;  %v4378_v48 = vmul.f32 %v7686_v2, %v7966_v21  ;;  %v4379_v5 = vmul.f32 %v7686_v2, %v12422_v10  ;;  %v4380_v53 = vmul.f32 %v7686_v2, %v12423_v19 }
 0x1c3   : > { %v4316_v60 = vsel %vm512_vm1, %v4314_v34, %v4315_v39  ;;  %v4339_v0 = vadd.f32 %v4313_v40, %v4261_v31  ;;  %v4455_v44 = vmul.f32 %v7687_v52, %v7964_v20  ;;  %v4411_v61 = vrot.slane %v4377_v41, 1 }
 0x1c4   : > { %v4340_v57 = vadd.f32 %v4316_v60, %v4262_v56  ;;  %v4412_v55 = vrot.slane %v4378_v48, 1  ;;  %v4414_v9 = vrot.slane %v4379_v5, 1  ;;  %v4415_v38 = vrot.slane %v4380_v53, 1 }
 0x1c5   : > { %v9786_v58 = vpop.eup %7519  ;;  %v4361_v25 = vadd.f32 %v4353_v3, %v4339_v0  ;;  %v4456_v49 = vmul.f32 %v7687_v52, %v7966_v21  ;;  %v4457_v31 = vmul.f32 %v7687_v52, %v12422_v10  ;;  %v4458_v56 = vmul.f32 %v7687_v52, %v12423_v19 }
 0x1c6   : > { %v9790_v34 = vpop.eup %7521  ;;  %v2249_v39 = vmul.f32 %v9786_v58, %v9649_v42  ;;  %v4362_v40 = vadd.f32 %v4354_v63, %v4340_v57  ;;  %v4413_v2 = vsel %vm471_vm0, %v4411_v61, %v4412_v55  ;;  %v4416_v3 = vsel %vm471_vm0, %v4414_v9, %v4415_v38 }
 0x1c7   : > { %12430 = vst [vmem:[#allocation34_spill] sm:$0xff] %v9790_v34  ;;  %v2250_v41 = vmul.f32 %v9790_v34, %v9662_v46  ;;  %v4439_v48 = vadd.f32 %v4413_v2, %v4361_v25  ;;  %v4489_v5 = vrot.slane %v4455_v44, 2  ;;  %v4490_v53 = vrot.slane %v4456_v49, 2 }
 0x1c8   : > { %v2257_v60 = vmul.f32 %v2249_v39, %v2241_v51  ;;  %v4440_v0 = vadd.f32 %v4416_v3, %v4362_v40  ;;  %v4492_v62 = vrot.slane %v4457_v31, 2  ;;  %v12431_v42 = vmax.f32 %v9723_v33, 0.0  ;;  %v7689_v33 = vld [vmem:[%s12305_s2 + $0x13] ss:$0 sm:$0xff]  ;;  %v7690_v40 = vld [vmem:[%s12306_s3 + $0x5] ss:$0 sm:$0xff] }
 0x1c9   : > { %v4493_v57 = vrot.slane %v4458_v56, 2  ;;  %v4561_v52 = vmul.f32 %v9786_v58, %v9698_v32  ;;  %v4562_v46 = vmul.f32 %v9790_v34, %v9705_v23  ;;  %v4491_v61 = vsel %vm512_vm1, %v4489_v5, %v4490_v53  ;;  %v7692_v53 = vld [vmem:[%s12307_s4 + $0x5] ss:$0 sm:$0xff] }
 0x1ca   : > { %v2258_v63 = vmul.f32 %v2250_v41, %v12431_v42  ;;  %v2271_v51 = vmul.f32 %v7688_v11, %v7953_v13  ;;  %v2272_v49 = vmul.f32 %v7688_v11, %v7957_v15  ;;  %v2287_v44 = vmul.f32 %v7689_v33, %v7953_v13 }
 0x1cb   : > { %v4494_v55 = vsel %vm512_vm1, %v4492_v62, %v4493_v57  ;;  %v4517_v23 = vadd.f32 %v4491_v61, %v4439_v48  ;;  %v2288_v9 = vmul.f32 %v7689_v33, %v7955_v14  ;;  %v2289_v38 = vmul.f32 %v7689_v33, %v7957_v15  ;;  %v7691_v62 = vld [vmem:[%s12305_s2 + $0x14] ss:$0 sm:$0xff] }
 0x1cc   : > { %v7330_v32 = vpack.i.bf16 %v2258_v63, %v2257_v60  ;;  %v4518_v25 = vadd.f32 %v4494_v55, %v4440_v0  ;;  %v2290_v31 = vmul.f32 %v7689_v33, %v7959_v16  ;;  %v2321_v39 = vrot.slane %v2287_v44, 1 }
 0x1cd   : > { %v4531_v2 = vmul.f32 %v7690_v40, %v4517_v23  ;;  %v2322_v56 = vrot.slane %v2288_v9, 1  ;;  %v2365_v41 = vmul.f32 %v7691_v62, %v7953_v13  ;;  %v2366_v3 = vmul.f32 %v7691_v62, %v7955_v14 }
 0x1ce   : > { %7331 = vrot.lane.b32.xlu1 %v7330_v32, %s7868_s14  ;;  %v4532_v48 = vmul.f32 %v7690_v40, %v4518_v25  ;;  %v2324_v5 = vrot.slane %v2289_v38, 1  ;;  %v2325_v60 = vrot.slane %v2290_v31, 1  ;;  %v2367_v0 = vmul.f32 %v7691_v62, %v7957_v15  ;;  %v7693_v40 = vld [vmem:[%s12305_s2 + $0x15] ss:$0 sm:$0xff] }
 0x1cf   : > { %v4545_v42 = vadd.f32 %v7692_v53, %v4531_v2  ;;  %v2323_v63 = vsel %vm471_vm0, %v2321_v39, %v2322_v56  ;;  %v2368_v57 = vmul.f32 %v7691_v62, %v7959_v16  ;;  %v2399_v61 = vrot.slane %v2365_v41, 2 }
 0x1d0   : > { %v4546_v11 = vadd.f32 %v7692_v53, %v4532_v48  ;;  %v2326_v33 = vsel %vm471_vm0, %v2324_v5, %v2325_v60  ;;  %v2349_v44 = vadd.f32 %v2323_v63, %v2271_v51  ;;  %v2400_v32 = vrot.slane %v2366_v3, 2 }
 0x1d1   : > { %v4553_v55 = vmax.f32 %v4545_v42, 0.0  ;;  %v2350_v23 = vadd.f32 %v2326_v33, %v2272_v49  ;;  %v2402_v9 = vrot.slane %v2367_v0, 2  ;;  %v2403_v25 = vrot.slane %v2368_v57, 2  ;;  %v7694_v49 = vld [vmem:[%s12305_s2 + $0x16] ss:$0 sm:$0xff] }
 0x1d2   : > { %v4554_v38 = vmax.f32 %v4546_v11, 0.0  ;;  %v2401_v31 = vsel %vm512_vm1, %v2399_v61, %v2400_v32  ;;  %v2441_v39 = vmul.f32 %v7693_v40, %v7957_v15  ;;  %v2442_v2 = vmul.f32 %v7693_v40, %v7964_v20 }
 0x1d3   : > { %v4569_v56 = vmul.f32 %v4561_v52, %v4553_v55  ;;  %v2404_v62 = vsel %vm512_vm1, %v2402_v9, %v2403_v25  ;;  %v2427_v51 = vadd.f32 %v2401_v31, %v2349_v44  ;;  %v2465_v41 = vmul.f32 %v7694_v49, %v7957_v15  ;;  %v7695_v52 = vld [vmem:[%s12305_s2 + $0x17] ss:$0 sm:$0xff]  ;;  %v7696_v25 = vld [vmem:[%s12305_s2 + $0x18] ss:$0 sm:$0xff] }
 0x1d4   : > { %v4570_v3 = vmul.f32 %v4562_v46, %v4554_v38  ;;  %v2428_v48 = vadd.f32 %v2404_v62, %v2350_v23  ;;  %v2466_v5 = vmul.f32 %v7694_v49, %v7959_v16  ;;  %v2467_v60 = vmul.f32 %v7694_v49, %v7964_v20 }
 0x1d5   : > { %v2449_v0 = vadd.f32 %v2441_v39, %v2427_v51  ;;  %v2468_v53 = vmul.f32 %v7694_v49, %v7966_v21  ;;  %v2499_v42 = vrot.slane %v2465_v41, 1  ;;  %v2543_v63 = vmul.f32 %v7695_v52, %v7957_v15  ;;  %v7697_v49 = vld [vmem:[%s12305_s2 + $0x19] ss:$0 sm:$0xff] }
 0x1d6   : > { %v7325_v57 = vpack.i.bf16 %v4570_v3, %v4569_v56  ;;  %v2450_v61 = vadd.f32 %v2442_v2, %v2428_v48  ;;  %v2500_v11 = vrot.slane %v2466_v5, 1  ;;  %v2502_v33 = vrot.slane %v2467_v60, 1 }
 0x1d7   : > { %v2503_v46 = vrot.slane %v2468_v53, 1  ;;  %v2544_v44 = vmul.f32 %v7695_v52, %v7959_v16  ;;  %v2545_v32 = vmul.f32 %v7695_v52, %v7964_v20  ;;  %v2546_v55 = vmul.f32 %v7695_v52, %v7966_v21 }
 0x1d8   : > { %7326 = vrot.lane.b32.xlu0 %v7325_v57, %s7868_s14  ;;  %v2501_v23 = vsel %vm471_vm0, %v2499_v42, %v2500_v11  ;;  %v2577_v9 = vrot.slane %v2543_v63, 2  ;;  %v2619_v38 = vmul.f32 %v7696_v25, %v7964_v20  ;;  %v2620_v31 = vmul.f32 %v7696_v25, %v12422_v10 }
 0x1d9   : > { %v2504_v40 = vsel %vm471_vm0, %v2502_v33, %v2503_v46  ;;  %v2527_v39 = vadd.f32 %v2501_v23, %v2449_v0  ;;  %v2578_v2 = vrot.slane %v2544_v44, 2  ;;  %v2580_v56 = vrot.slane %v2545_v32, 2  ;;  %v7698_v0 = vld [vmem:[%s12305_s2 + $0x1a] ss:$0 sm:$0xff] }
 0x1da   : > { %v2528_v62 = vadd.f32 %v2504_v40, %v2450_v61  ;;  %v2581_v51 = vrot.slane %v2546_v55, 2  ;;  %v2643_v41 = vmul.f32 %v7697_v49, %v7964_v20  ;;  %v2644_v3 = vmul.f32 %v7697_v49, %v7966_v21 }
 0x1db   : > { %v2579_v48 = vsel %vm512_vm1, %v2577_v9, %v2578_v2  ;;  %v2645_v5 = vmul.f32 %v7697_v49, %v12422_v10  ;;  %v2646_v60 = vmul.f32 %v7697_v49, %v12423_v19  ;;  %v2721_v53 = vmul.f32 %v7698_v0, %v7964_v20 }
 0x1dc   : > { %v2582_v42 = vsel %vm512_vm1, %v2580_v56, %v2581_v51  ;;  %v2605_v52 = vadd.f32 %v2579_v48, %v2527_v39  ;;  %v2677_v63 = vrot.slane %v2643_v41, 1  ;;  %v2678_v57 = vrot.slane %v2644_v3, 1 }
 0x1dd   : > { %v2606_v61 = vadd.f32 %v2582_v42, %v2528_v62  ;;  %v2680_v11 = vrot.slane %v2645_v5, 1  ;;  %v2681_v33 = vrot.slane %v2646_v60, 1  ;;  %v2722_v46 = vmul.f32 %v7698_v0, %v7966_v21 }
 0x1de   : > { %v2627_v44 = vadd.f32 %v2619_v38, %v2605_v52  ;;  %v2679_v32 = vsel %vm471_vm0, %v2677_v63, %v2678_v57  ;;  %v2723_v55 = vmul.f32 %v7698_v0, %v12422_v10  ;;  %v2724_v23 = vmul.f32 %v7698_v0, %v12423_v19  ;;  %v7701_v63 = vld [vmem:[%s12306_s3 + $0x2] ss:$0 sm:$0xff] }
 0x1df   : > { %v2628_v9 = vadd.f32 %v2620_v31, %v2606_v61  ;;  %v2682_v25 = vsel %vm471_vm0, %v2680_v11, %v2681_v33  ;;  %v2755_v40 = vrot.slane %v2721_v53, 2  ;;  %v2756_v2 = vrot.slane %v2722_v46, 2  ;;  %v7699_v31 = vld [vmem:[%s12305_s2 + $0x36] ss:$0 sm:$0xff]  ;;  %v7702_v11 = vld [vmem:[%s12305_s2 + $0x38] ss:$0 sm:$0xff] }
 0x1e0   : > { %v2705_v39 = vadd.f32 %v2679_v32, %v2627_v44  ;;  %v2758_v56 = vrot.slane %v2723_v55, 2  ;;  %v2759_v51 = vrot.slane %v2724_v23, 2  ;;  %v2827_v62 = vmul.f32 %v9786_v58, %v9666_v7  ;;  %v7700_v7 = vld [vmem:[%s12305_s2 + $0x37] ss:$0 sm:$0xff] }
 0x1e1   : > { %v2706_v49 = vadd.f32 %v2682_v25, %v2628_v9  ;;  %v2757_v38 = vsel %vm512_vm1, %v2755_v40, %v2756_v2  ;;  %v2828_v41 = vmul.f32 %v9790_v34, %v9670_v45  ;;  %v4583_v3 = vmul.f32 %v7699_v31, %v7953_v13  ;;  %v7703_v9 = vld [vmem:[%s12307_s4 + $0x2] ss:$0 sm:$0xff] }
 0x1e2   : > { %v2760_v48 = vsel %vm512_vm1, %v2758_v56, %v2759_v51  ;;  %v2783_v5 = vadd.f32 %v2757_v38, %v2705_v39  ;;  %v4584_v60 = vmul.f32 %v7699_v31, %v7957_v15  ;;  %v4599_v0 = vmul.f32 %v7700_v7, %v7953_v13 }
 0x1e3   : > { %v2784_v53 = vadd.f32 %v2760_v48, %v2706_v49  ;;  %v4600_v45 = vmul.f32 %v7700_v7, %v7955_v14  ;;  %v4601_v42 = vmul.f32 %v7700_v7, %v7957_v15  ;;  %v4602_v52 = vmul.f32 %v7700_v7, %v7959_v16 }
 0x1e4   : > { %v2797_v57 = vmul.f32 %v7701_v63, %v2783_v5  ;;  %v4633_v61 = vrot.slane %v4599_v0, 1  ;;  %v4677_v33 = vmul.f32 %v7702_v11, %v7953_v13  ;;  %v4678_v46 = vmul.f32 %v7702_v11, %v7955_v14 }
 0x1e5   : > { %v2798_v44 = vmul.f32 %v7701_v63, %v2784_v53  ;;  %v4634_v32 = vrot.slane %v4600_v45, 1  ;;  %v4636_v55 = vrot.slane %v4601_v42, 1  ;;  %v4637_v23 = vrot.slane %v4602_v52, 1  ;;  %v7704_v42 = vld [vmem:[%s12305_s2 + $0x39] ss:$0 sm:$0xff] }
 0x1e6   : > { %v2811_v25 = vadd.f32 %v7703_v9, %v2797_v57  ;;  %v4679_v40 = vmul.f32 %v7702_v11, %v7957_v15  ;;  %v4680_v2 = vmul.f32 %v7702_v11, %v7959_v16  ;;  %v4711_v39 = vrot.slane %v4677_v33, 2 }
 0x1e7   : > { %v2812_v56 = vadd.f32 %v7703_v9, %v2798_v44  ;;  %v4635_v51 = vsel %vm471_vm0, %v4633_v61, %v4634_v32  ;;  %v4638_v49 = vsel %vm471_vm0, %v4636_v55, %v4637_v23  ;;  %v4712_v38 = vrot.slane %v4678_v46, 2 }
 0x1e8   : > { %v2819_v31 = vmax.f32 %v2811_v25, 0.0  ;;  %v4661_v48 = vadd.f32 %v4635_v51, %v4583_v3  ;;  %v4662_v5 = vadd.f32 %v4638_v49, %v4584_v60  ;;  %v4714_v7 = vrot.slane %v4679_v40, 2  ;;  %v7705_v3 = vld [vmem:[%s12305_s2 + $0x3a] ss:$0 sm:$0xff] }
 0x1e9   : > { %v2820_v0 = vmax.f32 %v2812_v56, 0.0  ;;  %v4713_v53 = vsel %vm512_vm1, %v4711_v39, %v4712_v38  ;;  %v4715_v45 = vrot.slane %v4680_v2, 2  ;;  %v4753_v52 = vmul.f32 %v7704_v42, %v7957_v15  ;;  %v7706_v2 = vld [vmem:[%s12305_s2 + $0x3b] ss:$0 sm:$0xff] }
 0x1ea   : > { %v2835_v63 = vmul.f32 %v2827_v62, %v2819_v31  ;;  %v4739_v57 = vadd.f32 %v4713_v53, %v4661_v48  ;;  %v4754_v61 = vmul.f32 %v7704_v42, %v7964_v20  ;;  %v4777_v60 = vmul.f32 %v7705_v3, %v7957_v15 }
 0x1eb   : > { %v2836_v11 = vmul.f32 %v2828_v41, %v2820_v0  ;;  %v4716_v33 = vsel %vm512_vm1, %v4714_v7, %v4715_v45  ;;  %v4778_v46 = vmul.f32 %v7705_v3, %v7959_v16  ;;  %v4779_v44 = vmul.f32 %v7705_v3, %v7964_v20 }
 0x1ec   : > { %v4740_v32 = vadd.f32 %v4716_v33, %v4662_v5  ;;  %v4761_v55 = vadd.f32 %v4753_v52, %v4739_v57  ;;  %v4780_v62 = vmul.f32 %v7705_v3, %v7966_v21  ;;  %v4811_v23 = vrot.slane %v4777_v60, 1  ;;  %v7707_v5 = vld [vmem:[%s12305_s2 + $0x3c] ss:$0 sm:$0xff] }
 0x1ed   : > { %v7340_v9 = vpack.i.bf16 %v2836_v11, %v2835_v63  ;;  %v4812_v25 = vrot.slane %v4778_v46, 1  ;;  %v4814_v40 = vrot.slane %v4779_v44, 1  ;;  %v4855_v41 = vmul.f32 %v7706_v2, %v7957_v15 }
 0x1ee   : > { %v4762_v39 = vadd.f32 %v4754_v61, %v4740_v32  ;;  %v4815_v56 = vrot.slane %v4780_v62, 1  ;;  %v4856_v51 = vmul.f32 %v7706_v2, %v7959_v16  ;;  %v4857_v49 = vmul.f32 %v7706_v2, %v7964_v20  ;;  %v7708_v61 = vld [vmem:[%s12305_s2 + $0x3d] ss:$0 sm:$0xff]  ;;  %v7709_v62 = vld [vmem:[%s12305_s2 + $0x3e] ss:$0 sm:$0xff] }
 0x1ef   : > { %7341 = vrot.lane.b32.xlu1 %v7340_v9, %s7867_s11  ;;  %v4813_v38 = vsel %vm471_vm0, %v4811_v23, %v4812_v25  ;;  %v4858_v31 = vmul.f32 %v7706_v2, %v7966_v21  ;;  %v4889_v48 = vrot.slane %v4855_v41, 2  ;;  %v4931_v7 = vmul.f32 %v7707_v5, %v7964_v20 }
 0x1f0   : > { %v4816_v0 = vsel %vm471_vm0, %v4814_v40, %v4815_v56  ;;  %v4839_v53 = vadd.f32 %v4813_v38, %v4761_v55  ;;  %v4890_v45 = vrot.slane %v4856_v51, 2  ;;  %v4892_v42 = vrot.slane %v4857_v49, 2 }
 0x1f1   : > { %v4840_v52 = vadd.f32 %v4816_v0, %v4762_v39  ;;  %v4893_v63 = vrot.slane %v4858_v31, 2  ;;  %v4932_v57 = vmul.f32 %v7707_v5, %v12422_v10  ;;  %v4955_v3 = vmul.f32 %v7708_v61, %v7964_v20 }
 0x1f2   : > { %v4891_v60 = vsel %vm512_vm1, %v4889_v48, %v4890_v45  ;;  %v4956_v11 = vmul.f32 %v7708_v61, %v7966_v21  ;;  %v4957_v33 = vmul.f32 %v7708_v61, %v12422_v10  ;;  %v4958_v46 = vmul.f32 %v7708_v61, %v12423_v19 }
 0x1f3   : > { %v4894_v44 = vsel %vm512_vm1, %v4892_v42, %v4893_v63  ;;  %v4917_v32 = vadd.f32 %v4891_v60, %v4839_v53  ;;  %v4989_v55 = vrot.slane %v4955_v3, 1  ;;  %v5033_v23 = vmul.f32 %v7709_v62, %v7964_v20  ;;  %v7710_v63 = vld [vmem:[%s12305_s2 + $0x1b] ss:$0 sm:$0xff] }
 0x1f4   : > { %v4918_v9 = vadd.f32 %v4894_v44, %v4840_v52  ;;  %v4990_v25 = vrot.slane %v4956_v11, 1  ;;  %v4992_v40 = vrot.slane %v4957_v33, 1  ;;  %v4993_v2 = vrot.slane %v4958_v46, 1  ;;  %v7711_v11 = vld [vmem:[%s12305_s2 + $0x1c] ss:$0 sm:$0xff] }
 0x1f5   : > { %v4939_v41 = vadd.f32 %v4931_v7, %v4917_v32  ;;  %v5034_v39 = vmul.f32 %v7709_v62, %v7966_v21  ;;  %v5035_v56 = vmul.f32 %v7709_v62, %v12422_v10  ;;  %v5036_v51 = vmul.f32 %v7709_v62, %v12423_v19  ;;  %v7712_v62 = vld [vmem:[%s12305_s2 + $0x1d] ss:$0 sm:$0xff] }
 0x1f6   : > { %v4940_v49 = vadd.f32 %v4932_v57, %v4918_v9  ;;  %v4991_v38 = vsel %vm471_vm0, %v4989_v55, %v4990_v25  ;;  %v4994_v31 = vsel %vm471_vm0, %v4992_v40, %v4993_v2  ;;  %v5067_v48 = vrot.slane %v5033_v23, 2  ;;  %v7713_v25 = vld [vmem:[%s12306_s3 + $0x6] ss:$0 sm:$0xff] }
 0x1f7   : > { %v5017_v5 = vadd.f32 %v4991_v38, %v4939_v41  ;;  %v5068_v0 = vrot.slane %v5034_v39, 2  ;;  %v5070_v53 = vrot.slane %v5035_v56, 2  ;;  %v5071_v45 = vrot.slane %v5036_v51, 2 }
 0x1f8   : > { %v5018_v42 = vadd.f32 %v4994_v31, %v4940_v49  ;;  %v5139_v7 = vmul.f32 %v9786_v58, %v9708_v47  ;;  %v5140_v52 = vmul.f32 %v9790_v34, %v9720_v35  ;;  %v2849_v57 = vmul.f32 %v7710_v63, %v7953_v13  ;;  %v7714_v31 = vld [vmem:[%s12307_s4 + $0x6] ss:$0 sm:$0xff] }
 0x1f9   : > { %v5069_v61 = vsel %vm512_vm1, %v5067_v48, %v5068_v0  ;;  %v5072_v3 = vsel %vm512_vm1, %v5070_v53, %v5071_v45  ;;  %v2850_v60 = vmul.f32 %v7710_v63, %v7957_v15  ;;  %v2865_v47 = vmul.f32 %v7711_v11, %v7953_v13 }
 0x1fa   : > { %v5095_v33 = vadd.f32 %v5069_v61, %v5017_v5  ;;  %v5096_v35 = vadd.f32 %v5072_v3, %v5018_v42  ;;  %v2866_v46 = vmul.f32 %v7711_v11, %v7955_v14  ;;  %v2867_v44 = vmul.f32 %v7711_v11, %v7957_v15 }
 0x1fb   : > { %v2868_v32 = vmul.f32 %v7711_v11, %v7959_v16  ;;  %v2899_v55 = vrot.slane %v2865_v47, 1  ;;  %v2943_v23 = vmul.f32 %v7712_v62, %v7953_v13  ;;  %v2944_v9 = vmul.f32 %v7712_v62, %v7955_v14 }
 0x1fc   : > { %v5109_v40 = vmul.f32 %v7713_v25, %v5095_v33  ;;  %v5110_v2 = vmul.f32 %v7713_v25, %v5096_v35  ;;  %v2900_v41 = vrot.slane %v2866_v46, 1  ;;  %v2902_v39 = vrot.slane %v2867_v44, 1  ;;  %v7715_v44 = vld [vmem:[%s12305_s2 + $0x1e] ss:$0 sm:$0xff] }
 0x1fd   : > { %v2903_v56 = vrot.slane %v2868_v32, 1  ;;  %v2945_v51 = vmul.f32 %v7712_v62, %v7957_v15  ;;  %v2946_v49 = vmul.f32 %v7712_v62, %v7959_v16  ;;  %v2977_v38 = vrot.slane %v2943_v23, 2 }
 0x1fe   : > { %v5123_v48 = vadd.f32 %v7714_v31, %v5109_v40  ;;  %v5124_v5 = vadd.f32 %v7714_v31, %v5110_v2  ;;  %v2901_v0 = vsel %vm471_vm0, %v2899_v55, %v2900_v41  ;;  %v2978_v53 = vrot.slane %v2944_v9, 2 }
 0x1ff   : > { %v2904_v45 = vsel %vm471_vm0, %v2902_v39, %v2903_v56  ;;  %v2927_v42 = vadd.f32 %v2901_v0, %v2849_v57  ;;  %v2980_v63 = vrot.slane %v2945_v51, 2  ;;  %v2981_v61 = vrot.slane %v2946_v49, 2 }
 0x200   : > { %v5131_v3 = vmax.f32 %v5123_v48, 0.0  ;;  %v5132_v11 = vmax.f32 %v5124_v5, 0.0  ;;  %v2928_v47 = vadd.f32 %v2904_v45, %v2850_v60  ;;  %v2979_v33 = vsel %vm512_vm1, %v2977_v38, %v2978_v53  ;;  %v7716_v60 = vld [vmem:[%s12305_s2 + $0x1f] ss:$0 sm:$0xff]  ;;  %v7718_v45 = vld [vmem:[%s12305_s2 + $0x21] ss:$0 sm:$0xff] }
 0x201   : > { %v2982_v35 = vsel %vm512_vm1, %v2980_v63, %v2981_v61  ;;  %v3005_v46 = vadd.f32 %v2979_v33, %v2927_v42  ;;  %v3019_v32 = vmul.f32 %v7715_v44, %v7957_v15  ;;  %v3020_v55 = vmul.f32 %v7715_v44, %v7964_v20 }
 0x202   : > { %v5147_v62 = vmul.f32 %v5139_v7, %v5131_v3  ;;  %v5148_v57 = vmul.f32 %v5140_v52, %v5132_v11  ;;  %v3006_v23 = vadd.f32 %v2982_v35, %v2928_v47  ;;  %v3043_v9 = vmul.f32 %v7716_v60, %v7957_v15  ;;  %v7717_v7 = vld [vmem:[%s12305_s2 + $0x20] ss:$0 sm:$0xff] }
 0x203   : > { %v3027_v25 = vadd.f32 %v3019_v32, %v3005_v46  ;;  %v3044_v40 = vmul.f32 %v7716_v60, %v7959_v16  ;;  %v3045_v2 = vmul.f32 %v7716_v60, %v7964_v20  ;;  %v3046_v41 = vmul.f32 %v7716_v60, %v7966_v21  ;;  %v7719_v32 = vld [vmem:[%s12305_s2 + $0x22] ss:$0 sm:$0xff] }
 0x204   : > { %v7335_v39 = vpack.i.bf16 %v5148_v57, %v5147_v62  ;;  %v3028_v56 = vadd.f32 %v3020_v55, %v3006_v23  ;;  %v3077_v51 = vrot.slane %v3043_v9, 1  ;;  %v3121_v52 = vmul.f32 %v7717_v7, %v7957_v15 }
 0x205   : > { %v3078_v49 = vrot.slane %v3044_v40, 1  ;;  %v3080_v38 = vrot.slane %v3045_v2, 1  ;;  %v3081_v31 = vrot.slane %v3046_v41, 1  ;;  %v3122_v48 = vmul.f32 %v7717_v7, %v7959_v16 }
 0x206   : > { %7336 = vrot.lane.b32.xlu0 %v7335_v39, %s7867_s11  ;;  %v3123_v5 = vmul.f32 %v7717_v7, %v7964_v20  ;;  %v3124_v0 = vmul.f32 %v7717_v7, %v7966_v21  ;;  %v3155_v53 = vrot.slane %v3121_v52, 2  ;;  %v3197_v42 = vmul.f32 %v7718_v45, %v7964_v20 }
 0x207   : > { %v3079_v63 = vsel %vm471_vm0, %v3077_v51, %v3078_v49  ;;  %v3082_v61 = vsel %vm471_vm0, %v3080_v38, %v3081_v31  ;;  %v3156_v3 = vrot.slane %v3122_v48, 2  ;;  %v3198_v11 = vmul.f32 %v7718_v45, %v12422_v10 }
 0x208   : > { %v3105_v47 = vadd.f32 %v3079_v63, %v3027_v25  ;;  %v3106_v33 = vadd.f32 %v3082_v61, %v3028_v56  ;;  %v3158_v35 = vrot.slane %v3123_v5, 2  ;;  %v3159_v46 = vrot.slane %v3124_v0, 2  ;;  %v7720_v25 = vld [vmem:[%s12305_s2 + $0x23] ss:$0 sm:$0xff] }
 0x209   : > { %v3157_v44 = vsel %vm512_vm1, %v3155_v53, %v3156_v3  ;;  %v3221_v55 = vmul.f32 %v7719_v32, %v7964_v20  ;;  %v3222_v62 = vmul.f32 %v7719_v32, %v7966_v21  ;;  %v3223_v57 = vmul.f32 %v7719_v32, %v12422_v10 }
 0x20a   : > { %v3160_v23 = vsel %vm512_vm1, %v3158_v35, %v3159_v46  ;;  %v3183_v60 = vadd.f32 %v3157_v44, %v3105_v47  ;;  %v3224_v9 = vmul.f32 %v7719_v32, %v12423_v19  ;;  %v3299_v40 = vmul.f32 %v7720_v25, %v7964_v20  ;;  %v7722_v44 = vld [vmem:[%s12305_s2 + $0x40] ss:$0 sm:$0xff] }
 0x20b   : > { %v3184_v2 = vadd.f32 %v3160_v23, %v3106_v33  ;;  %v3255_v41 = vrot.slane %v3221_v55, 1  ;;  %v3256_v39 = vrot.slane %v3222_v62, 1  ;;  %v3258_v56 = vrot.slane %v3223_v57, 1  ;;  %v7721_v33 = vld [vmem:[%s12305_s2 + $0x3f] ss:$0 sm:$0xff] }
 0x20c   : > { %v3205_v51 = vadd.f32 %v3197_v42, %v3183_v60  ;;  %v3259_v7 = vrot.slane %v3224_v9, 1  ;;  %v3300_v52 = vmul.f32 %v7720_v25, %v7966_v21  ;;  %v3301_v49 = vmul.f32 %v7720_v25, %v12422_v10  ;;  %v7723_v9 = vld [vmem:[%s12305_s2 + $0x41] ss:$0 sm:$0xff] }
 0x20d   : > { %v3206_v38 = vadd.f32 %v3198_v11, %v3184_v2  ;;  %v3257_v31 = vsel %vm471_vm0, %v3255_v41, %v3256_v39  ;;  %v3302_v48 = vmul.f32 %v7720_v25, %v12423_v19  ;;  %v3333_v5 = vrot.slane %v3299_v40, 2  ;;  %v7724_v40 = vld [vmem:[%s12306_s3 + $0x3] ss:$0 sm:$0xff] }
 0x20e   : > { %v3260_v0 = vsel %vm471_vm0, %v3258_v56, %v3259_v7  ;;  %v3283_v53 = vadd.f32 %v3257_v31, %v3205_v51  ;;  %v3334_v45 = vrot.slane %v3300_v52, 2  ;;  %v3336_v63 = vrot.slane %v3301_v49, 2 }
 0x20f   : > { %v3284_v61 = vadd.f32 %v3260_v0, %v3206_v38  ;;  %v3337_v3 = vrot.slane %v3302_v48, 2  ;;  %v3405_v42 = vmul.f32 %v9786_v58, %v9673_v59  ;;  %v3406_v47 = vmul.f32 %v9790_v34, %v9680_v17  ;;  %v7725_v38 = vld [vmem:[%s12307_s4 + $0x3] ss:$0 sm:$0xff] }
 0x210   : > { %v3335_v11 = vsel %vm512_vm1, %v3333_v5, %v3334_v45  ;;  %v5161_v35 = vmul.f32 %v7721_v33, %v7953_v13  ;;  %v5162_v46 = vmul.f32 %v7721_v33, %v7957_v15  ;;  %v5177_v32 = vmul.f32 %v7722_v44, %v7953_v13 }
 0x211   : > { %v3338_v59 = vsel %vm512_vm1, %v3336_v63, %v3337_v3  ;;  %v3361_v55 = vadd.f32 %v3335_v11, %v3283_v53  ;;  %v5178_v17 = vmul.f32 %v7722_v44, %v7955_v14  ;;  %v5179_v62 = vmul.f32 %v7722_v44, %v7957_v15 }
 0x212   : > { %v3362_v57 = vadd.f32 %v3338_v59, %v3284_v61  ;;  %v5180_v23 = vmul.f32 %v7722_v44, %v7959_v16  ;;  %v5211_v60 = vrot.slane %v5177_v32, 1  ;;  %v5255_v25 = vmul.f32 %v7723_v9, %v7953_v13 }
 0x213   : > { %v3375_v2 = vmul.f32 %v7724_v40, %v3361_v55  ;;  %v5212_v41 = vrot.slane %v5178_v17, 1  ;;  %v5214_v39 = vrot.slane %v5179_v62, 1  ;;  %v5256_v56 = vmul.f32 %v7723_v9, %v7955_v14  ;;  %v7726_v55 = vld [vmem:[%s12305_s2 + $0x42] ss:$0 sm:$0xff] }
 0x214   : > { %v3376_v51 = vmul.f32 %v7724_v40, %v3362_v57  ;;  %v5215_v7 = vrot.slane %v5180_v23, 1  ;;  %v5257_v52 = vmul.f32 %v7723_v9, %v7957_v15  ;;  %v5258_v49 = vmul.f32 %v7723_v9, %v7959_v16 }
 0x215   : > { %v3389_v31 = vadd.f32 %v7725_v38, %v3375_v2  ;;  %v5213_v48 = vsel %vm471_vm0, %v5211_v60, %v5212_v41  ;;  %v5289_v5 = vrot.slane %v5255_v25, 2  ;;  %v5290_v0 = vrot.slane %v5256_v56, 2 }
 0x216   : > { %v3390_v53 = vadd.f32 %v7725_v38, %v3376_v51  ;;  %v5216_v45 = vsel %vm471_vm0, %v5214_v39, %v5215_v7  ;;  %v5239_v63 = vadd.f32 %v5213_v48, %v5161_v35  ;;  %v5292_v61 = vrot.slane %v5257_v52, 2  ;;  %v7727_v35 = vld [vmem:[%s12305_s2 + $0x43] ss:$0 sm:$0xff] }
 0x217   : > { %v3397_v3 = vmax.f32 %v3389_v31, 0.0  ;;  %v5240_v11 = vadd.f32 %v5216_v45, %v5162_v46  ;;  %v5291_v33 = vsel %vm512_vm1, %v5289_v5, %v5290_v0  ;;  %v5293_v44 = vrot.slane %v5258_v49, 2 }
 0x218   : > { %v3398_v32 = vmax.f32 %v3390_v53, 0.0  ;;  %v5317_v59 = vadd.f32 %v5291_v33, %v5239_v63  ;;  %v5331_v17 = vmul.f32 %v7726_v55, %v7957_v15  ;;  %v5332_v62 = vmul.f32 %v7726_v55, %v7964_v20  ;;  %v7729_v63 = vld [vmem:[%s12305_s2 + $0x45] ss:$0 sm:$0xff]  ;;  %v7730_v55 = vld [vmem:[%s12305_s2 + $0x46] ss:$0 sm:$0xff] }
 0x219   : > { %v3413_v57 = vmul.f32 %v3405_v42, %v3397_v3  ;;  %v5294_v23 = vsel %vm512_vm1, %v5292_v61, %v5293_v44  ;;  %v5355_v46 = vmul.f32 %v7727_v35, %v7957_v15  ;;  %v5356_v60 = vmul.f32 %v7727_v35, %v7959_v16  ;;  %v7728_v42 = vld [vmem:[%s12305_s2 + $0x44] ss:$0 sm:$0xff] }
 0x21a   : > { %v3414_v9 = vmul.f32 %v3406_v47, %v3398_v32  ;;  %v5318_v25 = vadd.f32 %v5294_v23, %v5240_v11  ;;  %v5339_v40 = vadd.f32 %v5331_v17, %v5317_v59  ;;  %v5357_v2 = vmul.f32 %v7727_v35, %v7964_v20 }
 0x21b   : > { %v5358_v41 = vmul.f32 %v7727_v35, %v7966_v21  ;;  %v5389_v39 = vrot.slane %v5355_v46, 1  ;;  %v5390_v56 = vrot.slane %v5356_v60, 1  ;;  %v5433_v51 = vmul.f32 %v7728_v42, %v7957_v15 }
 0x21c   : > { %v7350_v7 = vpack.i.bf16 %v3414_v9, %v3413_v57  ;;  %v5340_v52 = vadd.f32 %v5332_v62, %v5318_v25  ;;  %v5392_v49 = vrot.slane %v5357_v2, 1  ;;  %v5434_v38 = vmul.f32 %v7728_v42, %v7959_v16 }
 0x21d   : > { %v5391_v47 = vsel %vm471_vm0, %v5389_v39, %v5390_v56  ;;  %v5393_v31 = vrot.slane %v5358_v41, 1  ;;  %v5435_v48 = vmul.f32 %v7728_v42, %v7964_v20  ;;  %v5436_v5 = vmul.f32 %v7728_v42, %v7966_v21 }
 0x21e   : > { %7351 = vrot.lane.b32.xlu1 %v7350_v7, %s7869_s17  ;;  %v5417_v0 = vadd.f32 %v5391_v47, %v5339_v40  ;;  %v5467_v53 = vrot.slane %v5433_v51, 2  ;;  %v5468_v45 = vrot.slane %v5434_v38, 2  ;;  %v5509_v61 = vmul.f32 %v7729_v63, %v7964_v20  ;;  %v7731_v40 = vld [vmem:[%s12305_s2 + $0x47] ss:$0 sm:$0xff] }
 0x21f   : > { %v5394_v3 = vsel %vm471_vm0, %v5392_v49, %v5393_v31  ;;  %v5470_v11 = vrot.slane %v5435_v48, 2  ;;  %v5471_v33 = vrot.slane %v5436_v5, 2  ;;  %v5510_v44 = vmul.f32 %v7729_v63, %v12422_v10 }
 0x220   : > { %v5418_v32 = vadd.f32 %v5394_v3, %v5340_v52  ;;  %v5469_v59 = vsel %vm512_vm1, %v5467_v53, %v5468_v45  ;;  %v5533_v17 = vmul.f32 %v7730_v55, %v7964_v20  ;;  %v5534_v62 = vmul.f32 %v7730_v55, %v7966_v21 }
 0x221   : > { %v5472_v57 = vsel %vm512_vm1, %v5470_v11, %v5471_v33  ;;  %v5495_v23 = vadd.f32 %v5469_v59, %v5417_v0  ;;  %v5535_v35 = vmul.f32 %v7730_v55, %v12422_v10  ;;  %v5536_v46 = vmul.f32 %v7730_v55, %v12423_v19 }
 0x222   : > { %v5496_v60 = vadd.f32 %v5472_v57, %v5418_v32  ;;  %v5567_v9 = vrot.slane %v5533_v17, 1  ;;  %v5568_v25 = vrot.slane %v5534_v62, 1  ;;  %v5611_v2 = vmul.f32 %v7731_v40, %v7964_v20  ;;  %v7732_v32 = vld [vmem:[%s12305_s2 + $0x9] ss:$0 sm:$0xff]  ;;  %v7734_v62 = vld [vmem:[%s12306_s3 + $0x7] ss:$0 sm:$0xff] }
 0x223   : > { %v5517_v41 = vadd.f32 %v5509_v61, %v5495_v23  ;;  %v5570_v39 = vrot.slane %v5535_v35, 1  ;;  %v5571_v56 = vrot.slane %v5536_v46, 1  ;;  %v5612_v42 = vmul.f32 %v7731_v40, %v7966_v21 }
 0x224   : > { %v5518_v51 = vadd.f32 %v5510_v44, %v5496_v60  ;;  %v5569_v7 = vsel %vm471_vm0, %v5567_v9, %v5568_v25  ;;  %v5613_v52 = vmul.f32 %v7731_v40, %v12422_v10  ;;  %v5614_v49 = vmul.f32 %v7731_v40, %v12423_v19  ;;  %v7735_v40 = vld [vmem:[%s12307_s4 + $0x7] ss:$0 sm:$0xff] }
 0x225   : > { %v5572_v38 = vsel %vm471_vm0, %v5570_v39, %v5571_v56  ;;  %v5595_v47 = vadd.f32 %v5569_v7, %v5517_v41  ;;  %v5645_v31 = vrot.slane %v5611_v2, 2  ;;  %v5646_v48 = vrot.slane %v5612_v42, 2 }
 0x226   : > { %v5596_v5 = vadd.f32 %v5572_v38, %v5518_v51  ;;  %v5648_v0 = vrot.slane %v5613_v52, 2  ;;  %v5649_v53 = vrot.slane %v5614_v49, 2  ;;  %v5717_v45 = vmul.f32 %v9786_v58, %v9727_v24  ;;  %v7736_v52 = vld [vmem:[%s12305_s2 + $0xb] ss:$0 sm:$0xff] }
 0x227   : > { %v5647_v63 = vsel %vm512_vm1, %v5645_v31, %v5646_v48  ;;  %v5718_v61 = vmul.f32 %v9790_v34, %v9732_v12  ;;  %v572_v3 = vadd.f32 %v9473_v18, %v8760_v22  ;;  %v591_v11 = vadd.f32 %v9483_v1, %v7974_v26  ;;  %v7733_v1 = vld [vmem:[%s12305_s2 + $0xa] ss:$0 sm:$0xff] }
 0x228   : > { %v5650_v33 = vsel %vm512_vm1, %v5648_v0, %v5649_v53  ;;  %v5673_v44 = vadd.f32 %v5647_v63, %v5595_v47  ;;  %v1695_v24 = vmul.f32 %v7732_v32, %v7964_v20  ;;  %v10139_v59 = vmul.f32 %v7732_v32, %v12422_v10  ;;  %v7738_v53 = vld [vmem:[%s12304_s1 + $0x1] ss:$0 sm:$0xff]  ;;  %v7741_v32 = vld [vmem:[%s12304_s1 + $0x4] ss:$0 sm:$0xff] }
 0x229   : > { %v5674_v55 = vadd.f32 %v5650_v33, %v5596_v5  ;;  %v584_v12 = vadd.f32 %v572_v3, %v8773_v37  ;;  %v605_v18 = vadd.f32 %v591_v11, %v8760_v22  ;;  %v1713_v17 = vmul.f32 %v7733_v1, %v7964_v20  ;;  %v7739_v11 = vld [vmem:[%s12304_s1 + $0x2] ss:$0 sm:$0xff] }
 0x22a   : > { %v5687_v57 = vmul.f32 %v7734_v62, %v5673_v44  ;;  %v1714_v23 = vmul.f32 %v7733_v1, %v7966_v21  ;;  %v1715_v35 = vmul.f32 %v7733_v1, %v12422_v10  ;;  %v1716_v46 = vmul.f32 %v7733_v1, %v12423_v19 }
 0x22b   : > { %v5688_v60 = vmul.f32 %v7734_v62, %v5674_v55  ;;  %v592_v22 = vadd.f32 %v584_v12, %v7978_v28  ;;  %v617_v9 = vadd.f32 %v605_v18, %v8773_v37  ;;  %v1749_v25 = vrot.slane %v1713_v17, 1  ;;  %v7742_v18 = vld [vmem:[%s12304_s1 + $0x5] ss:$0 sm:$0xff]  ;;  %v7743_v17 = vld [vmem:[%s12304_s1 + $0x6] ss:$0 sm:$0xff] }
 0x22c   : > { %v5701_v2 = vadd.f32 %v7735_v40, %v5687_v57  ;;  %v1750_v41 = vrot.slane %v1714_v23, 1  ;;  %v1752_v39 = vrot.slane %v1715_v35, 1  ;;  %v1753_v56 = vrot.slane %v1716_v46, 1  ;;  %v7744_v57 = vld [vmem:[%s12304_s1 + $0x7] ss:$0 sm:$0xff] }
 0x22d   : > { %v5702_v42 = vadd.f32 %v7735_v40, %v5688_v60  ;;  %v606_v51 = vadd.f32 %v592_v22, %v8765_v36  ;;  %v625_v7 = vmul.f32 0.11111111, %v617_v9  ;;  %v1791_v49 = vmul.f32 %v7736_v52, %v7964_v20  ;;  %v7737_v36 = vld [vmem:[%s12304_s1] ss:$0 sm:$0xff] }
 0x22e   : > { %v5709_v37 = vmax.f32 %v5701_v2, 0.0  ;;  %v1751_v38 = vsel %vm471_vm0, %v1749_v25, %v1750_v41  ;;  %v1754_v47 = vsel %vm471_vm0, %v1752_v39, %v1753_v56  ;;  %v1792_v31 = vmul.f32 %v7736_v52, %v7966_v21 }
 0x22f   : > { %v5710_v48 = vmax.f32 %v5702_v42, 0.0  ;;  %v618_v5 = vadd.f32 %v606_v51, %v8780_v54  ;;  %v10170_v0 = vmul.f32 %v7737_v36, %v625_v7  ;;  %v10175_v63 = vmul.f32 %v7738_v53, %v625_v7  ;;  %v7740_v54 = vld [vmem:[%s12304_s1 + $0x3] ss:$0 sm:$0xff] }
 0x230   : > { %v5725_v3 = vmul.f32 %v5717_v45, %v5709_v37  ;;  %v10180_v33 = vmul.f32 %v7739_v11, %v625_v7  ;;  %v10185_v44 = vmul.f32 %v7740_v54, %v625_v7  ;;  %v10190_v55 = vmul.f32 %v7741_v32, %v625_v7 }
 0x231   : > { %v5726_v12 = vmul.f32 %v5718_v61, %v5710_v48  ;;  %v626_v45 = vmul.f32 0.11111111, %v618_v5  ;;  %v10195_v1 = vmul.f32 %v7742_v18, %v625_v7  ;;  %v10200_v62 = vmul.f32 %v7743_v17, %v625_v7  ;;  %v7745_v61 = vld [vmem:[%s12304_s1 + $0x8] ss:$0 sm:$0xff] }
 0x232   : > { %v10205_v23 = vmul.f32 %v7744_v57, %v625_v7  ;;  %v10210_v35 = vmul.f32 %v7745_v61, %v625_v7  ;;  %v759_v46 = vmax.f32 %v10170_v0, %v10175_v63  ;;  %v1773_v60 = vadd.f32 %v1751_v38, %v1695_v24 }
 0x233   : > { %v7345_v22 = vpack.i.bf16 %v5726_v12, %v5725_v3  ;;  %v10214_v9 = vmul.f32 %v7737_v36, %v626_v45  ;;  %v10216_v25 = vmul.f32 %v7738_v53, %v626_v45  ;;  %v10218_v40 = vmul.f32 %v7739_v11, %v626_v45  ;;  %v7746_v11 = vld [vmem:[%s12305_s2 + $0xc] ss:$0 sm:$0xff] }
 0x234   : > { %v10220_v2 = vmul.f32 %v7740_v54, %v626_v45  ;;  %v10222_v41 = vmul.f32 %v7741_v32, %v626_v45  ;;  %v10224_v39 = vmul.f32 %v7742_v18, %v626_v45  ;;  %v10226_v56 = vmul.f32 %v7743_v17, %v626_v45 }
 0x235   : > { %7346 = vrot.lane.b32.xlu0 %v7345_v22, %s7869_s17  ;;  %v10229_v42 = vmul.f32 %v7744_v57, %v626_v45  ;;  %v10231_v24 = vmul.f32 %v7745_v61, %v626_v45  ;;  %v760_v51 = vmax.f32 %v10214_v9, %v10216_v25  ;;  %v767_v7 = vmax.f32 %v759_v46, %v10180_v33 }
 0x236   : > { %v1774_v37 = vadd.f32 %v1754_v47, %v10139_v59  ;;  %v1793_v38 = vmul.f32 %v7736_v52, %v12422_v10  ;;  %v1794_v48 = vmul.f32 %v7736_v52, %v12423_v19  ;;  %v1827_v5 = vrot.slane %v1791_v49, 2  ;;  %v7747_v52 = vld [vmem:[%s12305_s2 + $0xd] ss:$0 sm:$0xff] }
 0x237   : > { %v768_v36 = vmax.f32 %v760_v51, %v10218_v40  ;;  %v775_v53 = vmax.f32 %v767_v7, %v10185_v44  ;;  %v1828_v3 = vrot.slane %v1792_v31, 2  ;;  %v1865_v54 = vmul.f32 %v7746_v11, %v12422_v10 }
 0x238   : > { %v1830_v32 = vrot.slane %v1793_v38, 2  ;;  %v1831_v12 = vrot.slane %v1794_v48, 2  ;;  %v1866_v59 = vmul.f32 %v7746_v11, %v7974_v26  ;;  %v1891_v49 = vmul.f32 %v7747_v52, %v12422_v10 }
 0x239   : > { %v776_v47 = vmax.f32 %v768_v36, %v10220_v2  ;;  %v783_v31 = vmax.f32 %v775_v53, %v10190_v55  ;;  %v1829_v45 = vsel %vm512_vm1, %v1827_v5, %v1828_v3  ;;  %v1892_v18 = vmul.f32 %v7747_v52, %v12423_v19 }
 0x23a   : > { %v1832_v17 = vsel %vm512_vm1, %v1830_v32, %v1831_v12  ;;  %v1851_v57 = vadd.f32 %v1829_v45, %v1773_v60  ;;  %v1893_v61 = vmul.f32 %v7747_v52, %v7974_v26  ;;  %v1894_v46 = vmul.f32 %v7747_v52, %v7976_v27  ;;  %v7748_v60 = vld [vmem:[%s12305_s2 + $0xe] ss:$0 sm:$0xff] }
 0x23b   : > { %v784_v22 = vmax.f32 %v776_v47, %v10222_v41  ;;  %v791_v51 = vmax.f32 %v783_v31, %v10195_v1  ;;  %v1852_v7 = vadd.f32 %v1832_v17, %v1774_v37  ;;  %v1927_v38 = vrot.slane %v1891_v49, 1 }
 0x23c   : > { %v1873_v48 = vadd.f32 %v1865_v54, %v1851_v57  ;;  %v1928_v36 = vrot.slane %v1892_v18, 1  ;;  %v1930_v53 = vrot.slane %v1893_v61, 1  ;;  %v1931_v11 = vrot.slane %v1894_v46, 1 }
 0x23d   : > { %v792_v5 = vmax.f32 %v784_v22, %v10224_v39  ;;  %v799_v3 = vmax.f32 %v791_v51, %v10200_v62  ;;  %v1874_v32 = vadd.f32 %v1866_v59, %v1852_v7  ;;  %v1969_v12 = vmul.f32 %v7748_v60, %v12422_v10  ;;  %v7749_v51 = vld [vmem:[%s12305_s2 + $0xf] ss:$0 sm:$0xff] }
 0x23e   : > { %v1929_v52 = vsel %vm471_vm0, %v1927_v38, %v1928_v36  ;;  %v1932_v37 = vsel %vm471_vm0, %v1930_v53, %v1931_v11  ;;  %v1970_v54 = vmul.f32 %v7748_v60, %v12423_v19  ;;  %v10269_v49 = vmul.f32 %v7748_v60, %v7974_v26  ;;  %v7750_v53 = vld [vmem:[%s12305_s2 + $0x10] ss:$0 sm:$0xff] }
 0x23f   : > { %v800_v47 = vmax.f32 %v792_v5, %v10226_v56  ;;  %v807_v31 = vmax.f32 %v799_v3, %v10205_v23  ;;  %v1951_v59 = vadd.f32 %v1929_v52, %v1873_v48  ;;  %v1952_v45 = vadd.f32 %v1932_v37, %v1874_v32 }
 0x240   : > { %v1972_v18 = vmul.f32 %v7748_v60, %v7976_v27  ;;  %v2005_v17 = vrot.slane %v1969_v12, 2  ;;  %v2006_v57 = vrot.slane %v1970_v54, 2  ;;  %v2008_v61 = vrot.slane %v10269_v49, 2 }
 0x241   : > { %v808_v46 = vmax.f32 %v800_v47, %v10229_v42  ;;  %v815_v22 = vmax.f32 %v807_v31, %v10210_v35  ;;  %v2043_v7 = vmul.f32 %v7749_v51, %v7974_v26  ;;  %v2044_v38 = vmul.f32 %v7749_v51, %v7978_v28 }
 0x242   : > { %v2007_v48 = vsel %vm512_vm1, %v2005_v17, %v2006_v57  ;;  %v2009_v36 = vrot.slane %v1972_v18, 2  ;;  %v10287_v11 = vmul.f32 %v7750_v53, %v7974_v26  ;;  %v10290_v5 = vmul.f32 %v7750_v53, %v7976_v27 }
 0x243   : > { %v816_v3 = vmax.f32 %v808_v46, %v10231_v24  ;;  %v823_v32 = vsub.f32 %v10170_v0, %v815_v22  ;;  %v847_v60 = vsub.f32 %v10175_v63, %v815_v22  ;;  %v871_v12 = vsub.f32 %v10180_v33, %v815_v22 }
 0x244   : > { %v895_v52 = vsub.f32 %v10185_v44, %v815_v22  ;;  %v919_v37 = vsub.f32 %v10190_v55, %v815_v22  ;;  %v943_v54 = vsub.f32 %v10195_v1, %v815_v22  ;;  %v967_v49 = vsub.f32 %v10200_v62, %v815_v22 }
 0x245   : > { %v824_v47 = vsub.f32 %v10214_v9, %v816_v3  ;;  %v835_v31 = vmul.f32 1.442695, %v823_v32  ;;  %v848_v18 = vsub.f32 %v10216_v25, %v816_v3  ;;  %v859_v17 = vmul.f32 1.442695, %v847_v60 }
 0x246   : > { %v872_v0 = vsub.f32 %v10218_v40, %v816_v3  ;;  %v883_v57 = vmul.f32 1.442695, %v871_v12  ;;  %v896_v63 = vsub.f32 %v10220_v2, %v816_v3  ;;  %v907_v33 = vmul.f32 1.442695, %v895_v52 }
 0x247   : > { %7523 = vpow2.f32 %v835_v31  ;;  %v837_v44 = vmul.f32 1.442695, %v824_v47  ;;  %v861_v46 = vmul.f32 1.442695, %v848_v18  ;;  %v920_v55 = vsub.f32 %v10222_v41, %v816_v3 }
 0x248   : > { %7525 = vpow2.f32 %v859_v17  ;;  %v885_v1 = vmul.f32 1.442695, %v872_v0  ;;  %v909_v62 = vmul.f32 1.442695, %v896_v63  ;;  %v931_v51 = vmul.f32 1.442695, %v919_v37 }
 0x249   : > { %7527 = vpow2.f32 %v837_v44  ;;  %v933_v9 = vmul.f32 1.442695, %v920_v55  ;;  %v944_v25 = vsub.f32 %v10224_v39, %v816_v3  ;;  %v955_v32 = vmul.f32 1.442695, %v943_v54 }
 0x24a   : > { %7529 = vpow2.f32 %v861_v46  ;;  %v968_v40 = vsub.f32 %v10226_v56, %v816_v3  ;;  %v979_v60 = vmul.f32 1.442695, %v967_v49  ;;  %v991_v2 = vsub.f32 %v10205_v23, %v815_v22 }
 0x24b   : > { %7531 = vpow2.f32 %v883_v57  ;;  %v957_v12 = vmul.f32 1.442695, %v944_v25  ;;  %v992_v52 = vsub.f32 %v10229_v42, %v816_v3  ;;  %v1015_v41 = vsub.f32 %v10210_v35, %v815_v22 }
 0x24c   : > { %7533 = vpow2.f32 %v885_v1  ;;  %v981_v47 = vmul.f32 1.442695, %v968_v40  ;;  %v1003_v37 = vmul.f32 1.442695, %v991_v2  ;;  %v1016_v31 = vsub.f32 %v10231_v24, %v816_v3 }
 0x24d   : > { %7535 = vpow2.f32 %v907_v33  ;;  %v1005_v39 = vmul.f32 1.442695, %v992_v52  ;;  %v1027_v54 = vmul.f32 1.442695, %v1015_v41  ;;  %v2010_v18 = vsel %vm512_vm1, %v2008_v61, %v2009_v36 }
 0x24e   : > { %7537 = vpow2.f32 %v909_v62  ;;  %v1029_v56 = vmul.f32 1.442695, %v1016_v31  ;;  %v2029_v49 = vadd.f32 %v2007_v48, %v1951_v59  ;;  %v2030_v23 = vadd.f32 %v2010_v18, %v1952_v45  ;;  %v7751_v59 = vld [vmem:[%s12305_s2 + $0x11] ss:$0 sm:$0xff] }
 0x24f   : > { %7539 = vpow2.f32 %v931_v51  ;;  %v2071_v17 = vmul.f32 %v7750_v53, %v7978_v28  ;;  %v2072_v42 = vmul.f32 %v7750_v53, %v7980_v29  ;;  %v2105_v35 = vrot.slane %v10287_v11, 1 }
 0x250   : > { %7541 = vpow2.f32 %v933_v9  ;;  %v2051_v22 = vadd.f32 %v2043_v7, %v2029_v49  ;;  %v2052_v0 = vadd.f32 %v2044_v38, %v2030_v23  ;;  %v2106_v24 = vrot.slane %v10290_v5, 1 }
 0x251   : > { %v10316_v3 = vpop.eup %7523  ;;  %7543 = vpow2.f32 %v955_v32  ;;  %v2108_v61 = vrot.slane %v2071_v17, 1  ;;  %v2109_v36 = vrot.slane %v2072_v42, 1  ;;  %v2147_v45 = vmul.f32 %v7751_v59, %v7974_v26 }
 0x252   : > { %12432 = vst [vmem:[#allocation35_spill] sm:$0xff] %v10316_v3  ;;  %v10322_v48 = vpop.eup %7525  ;;  %7545 = vpow2.f32 %v957_v12  ;;  %v2107_v53 = vsel %vm471_vm0, %v2105_v35, %v2106_v24  ;;  %v2148_v7 = vmul.f32 %v7751_v59, %v7976_v27  ;;  %v2149_v38 = vmul.f32 %v7751_v59, %v7978_v28 }
 0x253   : > { %v10327_v11 = vpop.eup %7527  ;;  %7547 = vpow2.f32 %v979_v60  ;;  %v1039_v5 = vadd.f32 %v10322_v48, %v10316_v3  ;;  %v2110_v57 = vsel %vm471_vm0, %v2108_v61, %v2109_v36  ;;  %v2129_v63 = vadd.f32 %v2107_v53, %v2051_v22  ;;  %v7752_v60 = vld [vmem:[%s12305_s2 + $0x2d] ss:$0 sm:$0xff] }
 0x254   : > { %12433 = vst [vmem:[#allocation36_spill] sm:$0xff] %v10327_v11  ;;  %v10332_v33 = vpop.eup %7529  ;;  %7549 = vpow2.f32 %v981_v47  ;;  %v2130_v44 = vadd.f32 %v2110_v57, %v2052_v0  ;;  %v2150_v46 = vmul.f32 %v7751_v59, %v7980_v29  ;;  %v2183_v55 = vrot.slane %v2147_v45, 2  ;;  %v7754_v0 = vld [vmem:[%s12306_s3 + $0x1] ss:$0 sm:$0xff] }
 0x255   : > { %v10335_v1 = vpop.eup %7531  ;;  %7551 = vpow2.f32 %v1003_v37  ;;  %v1040_v62 = vadd.f32 %v10332_v33, %v10327_v11  ;;  %v2184_v51 = vrot.slane %v2148_v7, 2  ;;  %v2186_v9 = vrot.slane %v2149_v38, 2 }
 0x256   : > { %v10339_v25 = vpop.eup %7533  ;;  %7553 = vpow2.f32 %v1005_v39  ;;  %v1047_v32 = vadd.f32 %v10335_v1, %v1039_v5  ;;  %v2187_v40 = vrot.slane %v2150_v46, 2  ;;  %v4007_v2 = vmul.f32 %v7752_v60, %v7964_v20 }
 0x257   : > { %v10346_v12 = vpop.eup %7535  ;;  %7555 = vpow2.f32 %v1027_v54  ;;  %v1048_v52 = vadd.f32 %v10339_v25, %v1040_v62  ;;  %v2185_v41 = vsel %vm512_vm1, %v2183_v55, %v2184_v51  ;;  %v4008_v47 = vmul.f32 %v7752_v60, %v12422_v10  ;;  %v7753_v54 = vld [vmem:[%s12305_s2 + $0x2e] ss:$0 sm:$0xff] }
 0x258   : > { %v10351_v37 = vpop.eup %7537  ;;  %7557 = vpow2.f32 %v1029_v56  ;;  %v1055_v31 = vadd.f32 %v10346_v12, %v1047_v32  ;;  %v2188_v39 = vsel %vm512_vm1, %v2186_v9, %v2187_v40  ;;  %v2207_v18 = vadd.f32 %v2185_v41, %v2129_v63  ;;  %v7755_v63 = vld [vmem:[%s12307_s4 + $0x1] ss:$0 sm:$0xff]  ;;  %v7756_v40 = vld [vmem:[%s12305_s2 + $0x2f] ss:$0 sm:$0xff] }
 0x259   : > { %v10355_v49 = vpop.eup %7539  ;;  %v1056_v23 = vadd.f32 %v10351_v37, %v1048_v52  ;;  %v2208_v17 = vadd.f32 %v2188_v39, %v2130_v44  ;;  %v4025_v42 = vmul.f32 %v7753_v54, %v7964_v20  ;;  %v4026_v35 = vmul.f32 %v7753_v54, %v7966_v21  ;;  %v7385_v52 = vld [vmem:[%s12308_s5 + $0x40] sm:$0xff]  }
 0x25a   : > { %12434 = vst [vmem:[#allocation37_spill] sm:$0xff] %v10355_v49  ;;  %v10363_v22 = vpop.eup %7541  ;;  %v1063_v56 = vadd.f32 %v10355_v49, %v1055_v31  ;;  %v2221_v24 = vmul.f32 %v7754_v0, %v2207_v18  ;;  %v4027_v61 = vmul.f32 %v7753_v54, %v12422_v10  ;;  %v4028_v36 = vmul.f32 %v7753_v54, %v12423_v19  ;;  %v7386_v41 = vld [vmem:[%s12308_s5] sm:$0xff]   ;;  %v7387_v31 = vld [vmem:[%s12308_s5 + $0x48] sm:$0xff]  }
 0x25b   : > { %12435 = vst [vmem:[#allocation38_spill] sm:$0xff] %v10363_v22  ;;  %v10371_v59 = vpop.eup %7543  ;;  %v1064_v45 = vadd.f32 %v10363_v22, %v1056_v23  ;;  %v2222_v53 = vmul.f32 %v7754_v0, %v2208_v17  ;;  %v4061_v7 = vrot.slane %v4025_v42, 1  ;;  %v4062_v38 = vrot.slane %v4026_v35, 1  ;;  %7163 = vmatprep.subr.bf16.mxu0 %v7385_v52  ;;  %7221 = vmatprep.subr.bf16.mxu1 %v7385_v52 }
 0x25c   : > { %v10374_v5 = vpop.eup %7545  ;;  %v1071_v57 = vadd.f32 %v10371_v59, %v1063_v56  ;;  %v10380_v44 = vadd.f32 %v7755_v63, %v2221_v24  ;;  %v4064_v46 = vrot.slane %v4027_v61, 1  ;;  %v4065_v55 = vrot.slane %v4028_v36, 1  ;;  %7164 = vmatpush3.bf16.msra.mxu0 %v7386_v41  ;;  %7229 = vmatpush3.bf16.msra.mxu1 %v7386_v41  ;;  %v7758_v41 = vld [vmem:[%s12305_s2 + $0x31] ss:$0 sm:$0xff] }
 0x25d   : > { %v10382_v62 = vpop.eup %7547  ;;  %v1072_v51 = vadd.f32 %v10374_v5, %v1064_v45  ;;  %v10385_v9 = vadd.f32 %v7755_v63, %v2222_v53  ;;  %v4063_v32 = vsel %vm471_vm0, %v4061_v7, %v4062_v38  ;;  %v4103_v60 = vmul.f32 %v7756_v40, %v7964_v20  ;;  %v7388_v7 = vld [vmem:[%s12308_s5 + $0x8] sm:$0xff]   ;;  %v7757_v63 = vld [vmem:[%s12305_s2 + $0x30] ss:$0 sm:$0xff]  ;;  %7165 = vmatprep.subr.bf16.mxu0 %v7387_v31 }
 0x25e   : > { %v10401_v39 = vpop.eup %7549  ;;  %v1079_v18 = vadd.f32 %v10382_v62, %v1071_v57  ;;  %v4066_v17 = vsel %vm471_vm0, %v4064_v46, %v4065_v55  ;;  %v4085_v54 = vadd.f32 %v4063_v32, %v4007_v2  ;;  %v4104_v24 = vmul.f32 %v7756_v40, %v7966_v21  ;;  %7222 = vmatprep.subr.bf16.mxu1 %v7387_v31 }
 0x25f   : > { %v10406_v42 = vpop.eup %7551  ;;  %v1080_v35 = vadd.f32 %v10401_v39, %v1072_v51  ;;  %v4086_v0 = vadd.f32 %v4066_v17, %v4008_v47  ;;  %v4105_v45 = vmul.f32 %v7756_v40, %v12422_v10  ;;  %v4106_v53 = vmul.f32 %v7756_v40, %v12423_v19  ;;  %v7389_v51 = vld [vmem:[%s12308_s5 + $0x50] sm:$0xff]  }
 0x260   : > { %v10411_v61 = vpop.eup %7553  ;;  %v1087_v36 = vadd.f32 %v10406_v42, %v1079_v18  ;;  %v4139_v2 = vrot.slane %v4103_v60, 2  ;;  %v4140_v57 = vrot.slane %v4104_v24, 2  ;;  %v4177_v46 = vmul.f32 %v7757_v63, %v12422_v10  ;;  %7166 = vmatpush3.bf16.msra.mxu0 %v7388_v7  ;;  %7230 = vmatpush3.bf16.msra.mxu1 %v7388_v7 }
 0x261   : > { %v10419_v47 = vpop.eup %7555  ;;  %v1088_v38 = vadd.f32 %v10411_v61, %v1080_v35  ;;  %v4178_v55 = vmul.f32 %v7757_v63, %v7974_v26  ;;  %v4142_v60 = vrot.slane %v4105_v45, 2  ;;  %v4143_v52 = vrot.slane %v4106_v53, 2  ;;  %v7390_v53 = vld [vmem:[%s12308_s5 + $0x10] sm:$0xff]   ;;  %7167 = vmatprep.subr.bf16.mxu0 %v7389_v51  ;;  %7223 = vmatprep.subr.bf16.mxu1 %v7389_v51 }
 0x262   : > { %12436 = vst [vmem:[#allocation39_spill] sm:$0xff] %v10419_v47  ;;  %v10430_v32 = vpop.eup %7557  ;;  %v1095_v40 = vadd.f32 %v10419_v47, %v1087_v36  ;;  %v4203_v18 = vmul.f32 %v7758_v41, %v12422_v10  ;;  %v4141_v35 = vsel %vm512_vm1, %v4139_v2, %v4140_v57  ;;  %v4204_v24 = vmul.f32 %v7758_v41, %v12423_v19  ;;  %v7391_v57 = vld [vmem:[%s12308_s5 + $0x58] sm:$0xff]  }
 0x263   : > { %12437 = vst [vmem:[#allocation40_spill] sm:$0xff] %v10430_v32  ;;  %v1096_v17 = vadd.f32 %v10430_v32, %v1088_v38  ;;  %v4205_v31 = vmul.f32 %v7758_v41, %v7974_v26  ;;  %v4144_v63 = vsel %vm512_vm1, %v4142_v60, %v4143_v52  ;;  %v4163_v36 = vadd.f32 %v4141_v35, %v4085_v54  ;;  %v7759_v52 = vld [vmem:[%s12305_s2 + $0x32] ss:$0 sm:$0xff]  ;;  %v7395_v32 = vld [vmem:[%s12308_s5 + $0x68] sm:$0xff]  }
 0x264   : > { %7559 = vrcp.f32 %v1095_v40  ;;  %v4206_v45 = vmul.f32 %v7758_v41, %v7976_v27  ;;  %v4164_v38 = vadd.f32 %v4144_v63, %v4086_v0  ;;  %v4239_v56 = vrot.slane %v4203_v18, 1  ;;  %7168 = vmatpush3.bf16.msra.mxu0 %v7390_v53  ;;  %7231 = vmatpush3.bf16.msra.mxu1 %v7390_v53  ;;  %v7761_v53 = vld [vmem:[%s12305_s2 + $0x34] ss:$0 sm:$0xff] }
 0x265   : > { %7561 = vrcp.f32 %v1096_v17  ;;  %v4240_v2 = vrot.slane %v4204_v24, 1  ;;  %v4185_v40 = vadd.f32 %v4177_v46, %v4163_v36  ;;  %v4242_v54 = vrot.slane %v4205_v31, 1  ;;  %v7392_v31 = vld [vmem:[%s12308_s5 + $0x18] sm:$0xff]   ;;  %7169 = vmatprep.subr.bf16.mxu0 %v7391_v57  ;;  %7224 = vmatprep.subr.bf16.mxu1 %v7391_v57  ;;  %v7762_v57 = vld [vmem:[%s12305_s2 + $0x35] ss:$0 sm:$0xff] }
 0x266   : > { %v4243_v60 = vrot.slane %v4206_v45, 1  ;;  %v4281_v41 = vmul.f32 %v7759_v52, %v12422_v10  ;;  %v4186_v7 = vadd.f32 %v4178_v55, %v4164_v38  ;;  %v4282_v18 = vmul.f32 %v7759_v52, %v12423_v19  ;;  %v7393_v38 = vld [vmem:[%s12308_s5 + $0x60] sm:$0xff]  }
 0x267   : > { %v4241_v0 = vsel %vm471_vm0, %v4239_v56, %v4240_v2  ;;  %v4283_v17 = vmul.f32 %v7759_v52, %v7974_v26  ;;  %v4284_v46 = vmul.f32 %v7759_v52, %v7976_v27  ;;  %v7760_v56 = vld [vmem:[%s12305_s2 + $0x33] ss:$0 sm:$0xff]  ;;  %v4460_v23 = vmul.f32 %v7762_v57, %v7976_v27 }
 0x268   : > { %v4244_v35 = vsel %vm471_vm0, %v4242_v54, %v4243_v60  ;;  %v4263_v24 = vadd.f32 %v4241_v0, %v4185_v40  ;;  %v4317_v51 = vrot.slane %v4281_v41, 2  ;;  %v4318_v55 = vrot.slane %v4282_v18, 2  ;;  %7170 = vmatpush3.bf16.msra.mxu0 %v7392_v31  ;;  %7232 = vmatpush3.bf16.msra.mxu1 %v7392_v31 }
 0x269   : > { %v4264_v63 = vadd.f32 %v4244_v35, %v4186_v7  ;;  %v4320_v36 = vrot.slane %v4283_v17, 2  ;;  %v4355_v45 = vmul.f32 %v7760_v56, %v7974_v26  ;;  %v4321_v2 = vrot.slane %v4284_v46, 2  ;;  %7171 = vmatprep.subr.bf16.mxu0 %v7393_v38  ;;  %7225 = vmatprep.subr.bf16.mxu1 %v7393_v38 }
 0x26a   : > { %v4356_v40 = vmul.f32 %v7760_v56, %v7978_v28  ;;  %v4381_v54 = vmul.f32 %v7761_v53, %v7974_v26  ;;  %v4382_v60 = vmul.f32 %v7761_v53, %v7976_v27  ;;  %v4319_v52 = vsel %vm512_vm1, %v4317_v51, %v4318_v55  ;;  %v7394_v51 = vld [vmem:[%s12308_s5 + $0x20] sm:$0xff]  }
 0x26b   : > { %v4383_v41 = vmul.f32 %v7761_v53, %v7978_v28  ;;  %v4384_v7 = vmul.f32 %v7761_v53, %v7980_v29  ;;  %v4459_v0 = vmul.f32 %v7762_v57, %v7974_v26  ;;  %v4322_v18 = vsel %vm512_vm1, %v4320_v36, %v4321_v2 }
 0x26c   : > { %v4341_v17 = vadd.f32 %v4319_v52, %v4263_v24  ;;  %v4417_v35 = vrot.slane %v4381_v54, 1  ;;  %v4418_v46 = vrot.slane %v4382_v60, 1  ;;  %v4342_v55 = vadd.f32 %v4322_v18, %v4264_v63  ;;  %7172 = vmatpush3.bf16.msra.mxu0 %v7394_v51  ;;  %7233 = vmatpush3.bf16.msra.mxu1 %v7394_v51 }
 0x26d   : > { %v4420_v56 = vrot.slane %v4383_v41, 1  ;;  %v4421_v53 = vrot.slane %v4384_v7, 1  ;;  %v4461_v54 = vmul.f32 %v7762_v57, %v7978_v28  ;;  %v4462_v31 = vmul.f32 %v7762_v57, %v7980_v29  ;;  %v7396_v57 = vld [vmem:[%s12308_s5 + $0x28] sm:$0xff]   ;;  %7173 = vmatprep.subr.bf16.mxu0 %v7395_v32  ;;  %7226 = vmatprep.subr.bf16.mxu1 %v7395_v32 }
 0x26e   : > { %v10489_v24 = vpop.eup %7559  ;;  %v4363_v36 = vadd.f32 %v4355_v45, %v4341_v17  ;;  %v4419_v2 = vsel %vm471_vm0, %v4417_v35, %v4418_v46  ;;  %v4364_v52 = vadd.f32 %v4356_v40, %v4342_v55  ;;  %v4495_v7 = vrot.slane %v4459_v0, 2 }
 0x26f   : > { %12438 = vst [vmem:[#allocation41_spill] sm:$0xff] %v10489_v24  ;;  %v10494_v63 = vpop.eup %7561  ;;  %v2251_v60 = vmul.f32 %v10489_v24, %v10322_v48  ;;  %v4422_v41 = vsel %vm471_vm0, %v4420_v56, %v4421_v53  ;;  %v4496_v45 = vrot.slane %v4460_v23, 2  ;;  %v4498_v17 = vrot.slane %v4461_v54, 2 }
 0x270   : > { %12439 = vst [vmem:[#allocation42_spill] sm:$0xff] %v10494_v63  ;;  %v2252_v38 = vmul.f32 %v10494_v63, %v10332_v33  ;;  %v4441_v18 = vadd.f32 %v4419_v2, %v4363_v36  ;;  %v12440_v35 = vmax.f32 %v10380_v44, 0.0  ;;  %v4442_v48 = vadd.f32 %v4422_v41, %v4364_v52  ;;  %v7763_v44 = vld [vmem:[%s12305_s2 + $0x12] ss:$0 sm:$0xff]  ;;  %7174 = vmatpush3.bf16.msra.mxu0 %v7396_v57  ;;  %v7765_v41 = vld [vmem:[%s12306_s3 + $0x5] ss:$0 sm:$0xff] }
 0x271   : > { %v4499_v40 = vrot.slane %v4462_v31, 2  ;;  %v4563_v0 = vmul.f32 %v10489_v24, %v10371_v59  ;;  %v12441_v33 = vmax.f32 %v10385_v9, 0.0  ;;  %v4497_v55 = vsel %vm512_vm1, %v4495_v7, %v4496_v45  ;;  %v7764_v9 = vld [vmem:[%s12305_s2 + $0x13] ss:$0 sm:$0xff]  ;;  %v7766_v45 = vld [vmem:[%s12305_s2 + $0x14] ss:$0 sm:$0xff]  ;;  %7234 = vmatpush3.bf16.msra.mxu1 %v7396_v57 }
 0x272   : > { %v2259_v46 = vmul.f32 %v2251_v60, %v12440_v35  ;;  %v4564_v56 = vmul.f32 %v10494_v63, %v10374_v5  ;;  %v2273_v51 = vmul.f32 %v7763_v44, %v7964_v20  ;;  %v4519_v36 = vadd.f32 %v4497_v55, %v4441_v18  ;;  %v7397_v60 = vld [vmem:[%s12308_s5 + $0x70] sm:$0xff]   ;;  %v7399_v35 = vld [vmem:[%s12308_s5 + $0x78] sm:$0xff]  }
 0x273   : > { %v2260_v23 = vmul.f32 %v2252_v38, %v12441_v33  ;;  %v4500_v53 = vsel %vm512_vm1, %v4498_v17, %v4499_v40  ;;  %v2274_v59 = vmul.f32 %v7763_v44, %v12422_v10  ;;  %v2291_v32 = vmul.f32 %v7764_v9, %v7964_v20  ;;  %v7398_v52 = vld [vmem:[%s12308_s5 + $0x30] sm:$0xff]   ;;  %7175 = vmatprep.subr.bf16.mxu0 %v7397_v60 }
 0x274   : > { %v4520_v54 = vadd.f32 %v4500_v53, %v4442_v48  ;;  %v2292_v5 = vmul.f32 %v7764_v9, %v7966_v21  ;;  %v2293_v31 = vmul.f32 %v7764_v9, %v12422_v10  ;;  %v4533_v7 = vmul.f32 %v7765_v41, %v4519_v36  ;;  %7227 = vmatprep.subr.bf16.mxu1 %v7397_v60 }
 0x275   : > { %v7360_v2 = vpack.i.bf16 %v2260_v23, %v2259_v46  ;;  %v2294_v38 = vmul.f32 %v7764_v9, %v12423_v19  ;;  %v2327_v18 = vrot.slane %v2291_v32, 1  ;;  %v2369_v17 = vmul.f32 %v7766_v45, %v7964_v20  ;;  %v7767_v23 = vld [vmem:[%s12307_s4 + $0x5] ss:$0 sm:$0xff]  ;;  %7176 = vmatpush3.bf16.msra.mxu0 %v7398_v52  ;;  %7235 = vmatpush3.bf16.msra.mxu1 %v7398_v52 }
 0x276   : > { %v4534_v46 = vmul.f32 %v7765_v41, %v4520_v54  ;;  %v2328_v48 = vrot.slane %v2292_v5, 1  ;;  %v2330_v40 = vrot.slane %v2293_v31, 1  ;;  %v2370_v33 = vmul.f32 %v7766_v45, %v7966_v21  ;;  %v7400_v54 = vld [vmem:[%s12308_s5 + $0x38] sm:$0xff]   ;;  %7177 = vmatprep.subr.bf16.mxu0 %v7399_v35  ;;  %7228 = vmatprep.subr.bf16.mxu1 %v7399_v35 }
 0x277   : > { %7361 = vrot.lane.b32.xlu1 %v7360_v2, %s7868_s14  ;;  %v4547_v55 = vadd.f32 %v7767_v23, %v4533_v7  ;;  %v2331_v44 = vrot.slane %v2294_v38, 1  ;;  %v2371_v53 = vmul.f32 %v7766_v45, %v12422_v10  ;;  %v2372_v36 = vmul.f32 %v7766_v45, %v12423_v19 }
 0x278   : > { %v4548_v57 = vadd.f32 %v7767_v23, %v4534_v46  ;;  %v2329_v9 = vsel %vm471_vm0, %v2327_v18, %v2328_v48  ;;  %v2405_v32 = vrot.slane %v2369_v17, 2  ;;  %v2406_v2 = vrot.slane %v2370_v33, 2  ;;  %v7768_v48 = vld [vmem:[%s12305_s2 + $0x15] ss:$0 sm:$0xff] }
 0x279   : > { %v4555_v5 = vmax.f32 %v4547_v55, 0.0  ;;  %v2332_v31 = vsel %vm471_vm0, %v2330_v40, %v2331_v44  ;;  %v2351_v41 = vadd.f32 %v2329_v9, %v2273_v51  ;;  %v2408_v7 = vrot.slane %v2371_v53, 2  ;;  %7178 = vmatpush3.bf16.msra.mxu0 %v7400_v54  ;;  %7236 = vmatpush3.bf16.msra.mxu1 %v7400_v54  ;;  %v7770_v9 = vld [vmem:[%s12305_s2 + $0x17] ss:$0 sm:$0xff] }
 0x27a   : > { %v4556_v38 = vmax.f32 %v4548_v57, 0.0  ;;  %v2352_v45 = vadd.f32 %v2332_v31, %v2274_v59  ;;  %v2407_v60 = vsel %vm512_vm1, %v2405_v32, %v2406_v2  ;;  %v2409_v46 = vrot.slane %v2372_v36, 2  ;;  %v7769_v59 = vld [vmem:[%s12305_s2 + $0x16] ss:$0 sm:$0xff] }
 0x27b   : > { %v4571_v18 = vmul.f32 %v4563_v0, %v4555_v5  ;;  %v2429_v17 = vadd.f32 %v2407_v60, %v2351_v41  ;;  %v2443_v33 = vmul.f32 %v7768_v48, %v12422_v10  ;;  %v2444_v40 = vmul.f32 %v7768_v48, %v7974_v26 }
 0x27c   : > { %v4572_v51 = vmul.f32 %v4564_v56, %v4556_v38  ;;  %v2410_v23 = vsel %vm512_vm1, %v2408_v7, %v2409_v46  ;;  %v2469_v52 = vmul.f32 %v7769_v59, %v12422_v10  ;;  %v2470_v0 = vmul.f32 %v7769_v59, %v12423_v19 }
 0x27d   : > { %v2430_v35 = vadd.f32 %v2410_v23, %v2352_v45  ;;  %v2451_v55 = vadd.f32 %v2443_v33, %v2429_v17  ;;  %v2471_v44 = vmul.f32 %v7769_v59, %v7974_v26  ;;  %v2472_v53 = vmul.f32 %v7769_v59, %v7976_v27  ;;  %v7771_v17 = vld [vmem:[%s12305_s2 + $0x18] ss:$0 sm:$0xff] }
 0x27e   : > { %v7355_v36 = vpack.i.bf16 %v4572_v51, %v4571_v18  ;;  %v2505_v56 = vrot.slane %v2469_v52, 1  ;;  %v2506_v57 = vrot.slane %v2470_v0, 1  ;;  %v2547_v32 = vmul.f32 %v7770_v9, %v12422_v10  ;;  %v7772_v52 = vld [vmem:[%s12305_s2 + $0x19] ss:$0 sm:$0xff] }
 0x27f   : > { %v2452_v2 = vadd.f32 %v2444_v40, %v2430_v35  ;;  %v2508_v5 = vrot.slane %v2471_v44, 1  ;;  %v2509_v31 = vrot.slane %v2472_v53, 1  ;;  %v2548_v41 = vmul.f32 %v7770_v9, %v12423_v19 }
 0x280   : > { %7356 = vrot.lane.b32.xlu0 %v7355_v36, %s7868_s14  ;;  %v2507_v7 = vsel %vm471_vm0, %v2505_v56, %v2506_v57  ;;  %v2549_v54 = vmul.f32 %v7770_v9, %v7974_v26  ;;  %v2550_v38 = vmul.f32 %v7770_v9, %v7976_v27  ;;  %v2583_v45 = vrot.slane %v2547_v32, 2  ;;  %v7773_v56 = vld [vmem:[%s12305_s2 + $0x1a] ss:$0 sm:$0xff] }
 0x281   : > { %v2510_v60 = vsel %vm471_vm0, %v2508_v5, %v2509_v31  ;;  %v2529_v46 = vadd.f32 %v2507_v7, %v2451_v55  ;;  %v2584_v18 = vrot.slane %v2548_v41, 2  ;;  %v2621_v48 = vmul.f32 %v7771_v17, %v7974_v26 }
 0x282   : > { %v2530_v33 = vadd.f32 %v2510_v60, %v2452_v2  ;;  %v2586_v40 = vrot.slane %v2549_v54, 2  ;;  %v2587_v51 = vrot.slane %v2550_v38, 2  ;;  %v2622_v23 = vmul.f32 %v7771_v17, %v7978_v28 }
 0x283   : > { %v2585_v59 = vsel %vm512_vm1, %v2583_v45, %v2584_v18  ;;  %v2647_v0 = vmul.f32 %v7772_v52, %v7974_v26  ;;  %v2648_v35 = vmul.f32 %v7772_v52, %v7976_v27  ;;  %v2649_v55 = vmul.f32 %v7772_v52, %v7978_v28 }
 0x284   : > { %v2588_v44 = vsel %vm512_vm1, %v2586_v40, %v2587_v51  ;;  %v2607_v53 = vadd.f32 %v2585_v59, %v2529_v46  ;;  %v2650_v36 = vmul.f32 %v7772_v52, %v7980_v29  ;;  %v2725_v57 = vmul.f32 %v7773_v56, %v7974_v26 }
 0x285   : > { %v2608_v9 = vadd.f32 %v2588_v44, %v2530_v33  ;;  %v2683_v32 = vrot.slane %v2647_v0, 1  ;;  %v2684_v2 = vrot.slane %v2648_v35, 1  ;;  %v2686_v5 = vrot.slane %v2649_v55, 1  ;;  %v7774_v0 = vld [vmem:[%s12305_s2 + $0x36] ss:$0 sm:$0xff] }
 0x286   : > { %v2629_v31 = vadd.f32 %v2621_v48, %v2607_v53  ;;  %v2687_v41 = vrot.slane %v2650_v36, 1  ;;  %v2726_v7 = vmul.f32 %v7773_v56, %v7976_v27  ;;  %v2727_v54 = vmul.f32 %v7773_v56, %v7978_v28  ;;  %v7775_v44 = vld [vmem:[%s12305_s2 + $0x37] ss:$0 sm:$0xff] }
 0x287   : > { %v2630_v38 = vadd.f32 %v2622_v23, %v2608_v9  ;;  %v2685_v45 = vsel %vm471_vm0, %v2683_v32, %v2684_v2  ;;  %v2728_v60 = vmul.f32 %v7773_v56, %v7980_v29  ;;  %v2761_v46 = vrot.slane %v2725_v57, 2  ;;  %v7776_v2 = vld [vmem:[%s12305_s2 + $0x38] ss:$0 sm:$0xff] }
 0x288   : > { %v2688_v18 = vsel %vm471_vm0, %v2686_v5, %v2687_v41  ;;  %v2707_v17 = vadd.f32 %v2685_v45, %v2629_v31  ;;  %v2762_v40 = vrot.slane %v2726_v7, 2  ;;  %v2764_v33 = vrot.slane %v2727_v54, 2  ;;  %v7777_v31 = vld [vmem:[%s12306_s3 + $0x2] ss:$0 sm:$0xff] }
 0x289   : > { %v2708_v51 = vadd.f32 %v2688_v18, %v2630_v38  ;;  %v2765_v59 = vrot.slane %v2728_v60, 2  ;;  %v2829_v48 = vmul.f32 %v10489_v24, %v10335_v1  ;;  %v2830_v52 = vmul.f32 %v10494_v63, %v10339_v25 }
 0x28a   : > { %v2763_v23 = vsel %vm512_vm1, %v2761_v46, %v2762_v40  ;;  %v4585_v35 = vmul.f32 %v7774_v0, %v7964_v20  ;;  %v4586_v55 = vmul.f32 %v7774_v0, %v12422_v10  ;;  %v4603_v53 = vmul.f32 %v7775_v44, %v7964_v20 }
 0x28b   : > { %v2766_v1 = vsel %vm512_vm1, %v2764_v33, %v2765_v59  ;;  %v2785_v36 = vadd.f32 %v2763_v23, %v2707_v17  ;;  %v4604_v25 = vmul.f32 %v7775_v44, %v7966_v21  ;;  %v4605_v56 = vmul.f32 %v7775_v44, %v12422_v10  ;;  %v7778_v17 = vld [vmem:[%s12307_s4 + $0x2] ss:$0 sm:$0xff] }
 0x28c   : > { %v2786_v57 = vadd.f32 %v2766_v1, %v2708_v51  ;;  %v4606_v9 = vmul.f32 %v7775_v44, %v12423_v19  ;;  %v4639_v32 = vrot.slane %v4603_v53, 1  ;;  %v4681_v5 = vmul.f32 %v7776_v2, %v7964_v20 }
 0x28d   : > { %v2799_v41 = vmul.f32 %v7777_v31, %v2785_v36  ;;  %v4640_v7 = vrot.slane %v4604_v25, 1  ;;  %v4642_v54 = vrot.slane %v4605_v56, 1  ;;  %v4682_v38 = vmul.f32 %v7776_v2, %v7966_v21 }
 0x28e   : > { %v2800_v45 = vmul.f32 %v7777_v31, %v2786_v57  ;;  %v4643_v60 = vrot.slane %v4606_v9, 1  ;;  %v4683_v46 = vmul.f32 %v7776_v2, %v12422_v10  ;;  %v4684_v18 = vmul.f32 %v7776_v2, %v12423_v19  ;;  %v7779_v2 = vld [vmem:[%s12305_s2 + $0x39] ss:$0 sm:$0xff] }
 0x28f   : > { %v2813_v40 = vadd.f32 %v7778_v17, %v2799_v41  ;;  %v4641_v33 = vsel %vm471_vm0, %v4639_v32, %v4640_v7  ;;  %v4717_v51 = vrot.slane %v4681_v5, 2  ;;  %v4718_v59 = vrot.slane %v4682_v38, 2 }
 0x290   : > { %v2814_v23 = vadd.f32 %v7778_v17, %v2800_v45  ;;  %v4644_v0 = vsel %vm471_vm0, %v4642_v54, %v4643_v60  ;;  %v4663_v44 = vadd.f32 %v4641_v33, %v4585_v35  ;;  %v4720_v53 = vrot.slane %v4683_v46, 2  ;;  %v7780_v35 = vld [vmem:[%s12305_s2 + $0x3a] ss:$0 sm:$0xff] }
 0x291   : > { %v2821_v1 = vmax.f32 %v2813_v40, 0.0  ;;  %v4664_v36 = vadd.f32 %v4644_v0, %v4586_v55  ;;  %v4719_v25 = vsel %vm512_vm1, %v4717_v51, %v4718_v59  ;;  %v4721_v56 = vrot.slane %v4684_v18, 2 }
 0x292   : > { %v2822_v57 = vmax.f32 %v2814_v23, 0.0  ;;  %v4741_v9 = vadd.f32 %v4719_v25, %v4663_v44  ;;  %v4755_v32 = vmul.f32 %v7779_v2, %v12422_v10  ;;  %v4756_v5 = vmul.f32 %v7779_v2, %v7974_v26 }
 0x293   : > { %v2837_v31 = vmul.f32 %v2829_v48, %v2821_v1  ;;  %v4722_v41 = vsel %vm512_vm1, %v4720_v53, %v4721_v56  ;;  %v4781_v55 = vmul.f32 %v7780_v35, %v12422_v10  ;;  %v4782_v7 = vmul.f32 %v7780_v35, %v12423_v19  ;;  %v7781_v48 = vld [vmem:[%s12305_s2 + $0x3b] ss:$0 sm:$0xff]  ;;  %v7782_v56 = vld [vmem:[%s12305_s2 + $0x3c] ss:$0 sm:$0xff] }
 0x294   : > { %v2838_v54 = vmul.f32 %v2830_v52, %v2822_v57  ;;  %v4742_v38 = vadd.f32 %v4722_v41, %v4664_v36  ;;  %v4763_v45 = vadd.f32 %v4755_v32, %v4741_v9  ;;  %v4783_v60 = vmul.f32 %v7780_v35, %v7974_v26 }
 0x295   : > { %v4784_v46 = vmul.f32 %v7780_v35, %v7976_v27  ;;  %v4817_v18 = vrot.slane %v4781_v55, 1  ;;  %v4818_v17 = vrot.slane %v4782_v7, 1  ;;  %v4859_v40 = vmul.f32 %v7781_v48, %v12422_v10  ;;  %v7783_v35 = vld [vmem:[%s12305_s2 + $0x3d] ss:$0 sm:$0xff] }
 0x296   : > { %v7370_v33 = vpack.i.bf16 %v2838_v54, %v2837_v31  ;;  %v4764_v51 = vadd.f32 %v4756_v5, %v4742_v38  ;;  %v4820_v59 = vrot.slane %v4783_v60, 1  ;;  %v4860_v23 = vmul.f32 %v7781_v48, %v12423_v19 }
 0x297   : > { %v4819_v52 = vsel %vm471_vm0, %v4817_v18, %v4818_v17  ;;  %v4821_v0 = vrot.slane %v4784_v46, 1  ;;  %v4861_v44 = vmul.f32 %v7781_v48, %v7974_v26  ;;  %v4862_v53 = vmul.f32 %v7781_v48, %v7976_v27  ;;  %v7784_v48 = vld [vmem:[%s12305_s2 + $0x3e] ss:$0 sm:$0xff] }
 0x298   : > { %7371 = vrot.lane.b32.xlu1 %v7370_v33, %s7867_s11  ;;  %v4841_v1 = vadd.f32 %v4819_v52, %v4763_v45  ;;  %v4895_v36 = vrot.slane %v4859_v40, 2  ;;  %v4896_v25 = vrot.slane %v4860_v23, 2  ;;  %v4933_v57 = vmul.f32 %v7782_v56, %v7974_v26 }
 0x299   : > { %v4822_v9 = vsel %vm471_vm0, %v4820_v59, %v4821_v0  ;;  %v4898_v2 = vrot.slane %v4861_v44, 2  ;;  %v4899_v32 = vrot.slane %v4862_v53, 2  ;;  %v4934_v5 = vmul.f32 %v7782_v56, %v7978_v28 }
 0x29a   : > { %v4842_v31 = vadd.f32 %v4822_v9, %v4764_v51  ;;  %v4897_v41 = vsel %vm512_vm1, %v4895_v36, %v4896_v25  ;;  %v4959_v55 = vmul.f32 %v7783_v35, %v7974_v26  ;;  %v4960_v7 = vmul.f32 %v7783_v35, %v7976_v27 }
 0x29b   : > { %v4900_v54 = vsel %vm512_vm1, %v4898_v2, %v4899_v32  ;;  %v4919_v38 = vadd.f32 %v4897_v41, %v4841_v1  ;;  %v4961_v45 = vmul.f32 %v7783_v35, %v7978_v28  ;;  %v4962_v60 = vmul.f32 %v7783_v35, %v7980_v29  ;;  %v7785_v41 = vld [vmem:[%s12305_s2 + $0x1b] ss:$0 sm:$0xff] }
 0x29c   : > { %v4920_v46 = vadd.f32 %v4900_v54, %v4842_v31  ;;  %v4995_v18 = vrot.slane %v4959_v55, 1  ;;  %v4996_v17 = vrot.slane %v4960_v7, 1  ;;  %v5037_v40 = vmul.f32 %v7784_v48, %v7974_v26 }
 0x29d   : > { %v4941_v33 = vadd.f32 %v4933_v57, %v4919_v38  ;;  %v4998_v51 = vrot.slane %v4961_v45, 1  ;;  %v4999_v59 = vrot.slane %v4962_v60, 1  ;;  %v5038_v23 = vmul.f32 %v7784_v48, %v7976_v27 }
 0x29e   : > { %v4942_v52 = vadd.f32 %v4934_v5, %v4920_v46  ;;  %v4997_v0 = vsel %vm471_vm0, %v4995_v18, %v4996_v17  ;;  %v5039_v44 = vmul.f32 %v7784_v48, %v7978_v28  ;;  %v5040_v53 = vmul.f32 %v7784_v48, %v7980_v29  ;;  %v7787_v18 = vld [vmem:[%s12305_s2 + $0x1d] ss:$0 sm:$0xff]  ;;  %v7788_v48 = vld [vmem:[%s12306_s3 + $0x6] ss:$0 sm:$0xff] }
 0x29f   : > { %v5000_v1 = vsel %vm471_vm0, %v4998_v51, %v4999_v59  ;;  %v5019_v36 = vadd.f32 %v4997_v0, %v4941_v33  ;;  %v5073_v25 = vrot.slane %v5037_v40, 2  ;;  %v5074_v56 = vrot.slane %v5038_v23, 2 }
 0x2a0   : > { %v5020_v9 = vadd.f32 %v5000_v1, %v4942_v52  ;;  %v5076_v2 = vrot.slane %v5039_v44, 2  ;;  %v5077_v32 = vrot.slane %v5040_v53, 2  ;;  %v5141_v57 = vmul.f32 %v10489_v24, %v10382_v62  ;;  %v7786_v62 = vld [vmem:[%s12305_s2 + $0x1c] ss:$0 sm:$0xff]  ;;  %v7789_v53 = vld [vmem:[%s12307_s4 + $0x6] ss:$0 sm:$0xff] }
 0x2a1   : > { %v5075_v31 = vsel %vm512_vm1, %v5073_v25, %v5074_v56  ;;  %v5142_v5 = vmul.f32 %v10494_v63, %v10401_v39  ;;  %v2851_v35 = vmul.f32 %v7785_v41, %v7964_v20  ;;  %v2852_v55 = vmul.f32 %v7785_v41, %v12422_v10 }
 0x2a2   : > { %v5078_v7 = vsel %vm512_vm1, %v5076_v2, %v5077_v32  ;;  %v5097_v54 = vadd.f32 %v5075_v31, %v5019_v36  ;;  %v2869_v38 = vmul.f32 %v7786_v62, %v7964_v20  ;;  %v2870_v45 = vmul.f32 %v7786_v62, %v7966_v21 }
 0x2a3   : > { %v5098_v39 = vadd.f32 %v5078_v7, %v5020_v9  ;;  %v2871_v60 = vmul.f32 %v7786_v62, %v12422_v10  ;;  %v2872_v46 = vmul.f32 %v7786_v62, %v12423_v19  ;;  %v2947_v17 = vmul.f32 %v7787_v18, %v7964_v20 }
 0x2a4   : > { %v5111_v40 = vmul.f32 %v7788_v48, %v5097_v54  ;;  %v2905_v33 = vrot.slane %v2869_v38, 1  ;;  %v2906_v51 = vrot.slane %v2870_v45, 1  ;;  %v2948_v59 = vmul.f32 %v7787_v18, %v7966_v21 }
 0x2a5   : > { %v5112_v23 = vmul.f32 %v7788_v48, %v5098_v39  ;;  %v2908_v52 = vrot.slane %v2871_v60, 1  ;;  %v2909_v0 = vrot.slane %v2872_v46, 1  ;;  %v2949_v44 = vmul.f32 %v7787_v18, %v12422_v10  ;;  %v7790_v39 = vld [vmem:[%s12305_s2 + $0x1e] ss:$0 sm:$0xff] }
 0x2a6   : > { %v5125_v1 = vadd.f32 %v7789_v53, %v5111_v40  ;;  %v2907_v36 = vsel %vm471_vm0, %v2905_v33, %v2906_v51  ;;  %v2950_v25 = vmul.f32 %v7787_v18, %v12423_v19  ;;  %v2983_v56 = vrot.slane %v2947_v17, 2 }
 0x2a7   : > { %v5126_v9 = vadd.f32 %v7789_v53, %v5112_v23  ;;  %v2910_v2 = vsel %vm471_vm0, %v2908_v52, %v2909_v0  ;;  %v2929_v32 = vadd.f32 %v2907_v36, %v2851_v35  ;;  %v2984_v31 = vrot.slane %v2948_v59, 2 }
 0x2a8   : > { %v5133_v41 = vmax.f32 %v5125_v1, 0.0  ;;  %v2930_v7 = vadd.f32 %v2910_v2, %v2852_v55  ;;  %v2986_v54 = vrot.slane %v2949_v44, 2  ;;  %v2987_v62 = vrot.slane %v2950_v25, 2  ;;  %v7791_v55 = vld [vmem:[%s12305_s2 + $0x1f] ss:$0 sm:$0xff] }
 0x2a9   : > { %v5134_v38 = vmax.f32 %v5126_v9, 0.0  ;;  %v2985_v45 = vsel %vm512_vm1, %v2983_v56, %v2984_v31  ;;  %v3021_v60 = vmul.f32 %v7790_v39, %v12422_v10  ;;  %v3022_v46 = vmul.f32 %v7790_v39, %v7974_v26 }
 0x2aa   : > { %v5149_v18 = vmul.f32 %v5141_v57, %v5133_v41  ;;  %v2988_v17 = vsel %vm512_vm1, %v2986_v54, %v2987_v62  ;;  %v3007_v35 = vadd.f32 %v2985_v45, %v2929_v32  ;;  %v3047_v48 = vmul.f32 %v7791_v55, %v12422_v10  ;;  %v7792_v57 = vld [vmem:[%s12305_s2 + $0x20] ss:$0 sm:$0xff]  ;;  %v7793_v41 = vld [vmem:[%s12305_s2 + $0x21] ss:$0 sm:$0xff] }
 0x2ab   : > { %v5150_v40 = vmul.f32 %v5142_v5, %v5134_v38  ;;  %v3008_v33 = vadd.f32 %v2988_v17, %v2930_v7  ;;  %v3048_v51 = vmul.f32 %v7791_v55, %v12423_v19  ;;  %v3049_v59 = vmul.f32 %v7791_v55, %v7974_v26 }
 0x2ac   : > { %v3029_v23 = vadd.f32 %v3021_v60, %v3007_v35  ;;  %v3050_v52 = vmul.f32 %v7791_v55, %v7976_v27  ;;  %v3083_v0 = vrot.slane %v3047_v48, 1  ;;  %v3125_v44 = vmul.f32 %v7792_v57, %v12422_v10 }
 0x2ad   : > { %v7365_v53 = vpack.i.bf16 %v5150_v40, %v5149_v18  ;;  %v3030_v1 = vadd.f32 %v3022_v46, %v3008_v33  ;;  %v3084_v36 = vrot.slane %v3048_v51, 1  ;;  %v3086_v25 = vrot.slane %v3049_v59, 1  ;;  %v7794_v18 = vld [vmem:[%s12305_s2 + $0x22] ss:$0 sm:$0xff]  ;;  %v7795_v33 = vld [vmem:[%s12305_s2 + $0x23] ss:$0 sm:$0xff] }
 0x2ae   : > { %v3087_v5 = vrot.slane %v3050_v52, 1  ;;  %v3126_v56 = vmul.f32 %v7792_v57, %v12423_v19  ;;  %v3127_v9 = vmul.f32 %v7792_v57, %v7974_v26  ;;  %v3128_v2 = vmul.f32 %v7792_v57, %v7976_v27 }
 0x2af   : > { %7366 = vrot.lane.b32.xlu0 %v7365_v53, %s7867_s11  ;;  %v3085_v32 = vsel %vm471_vm0, %v3083_v0, %v3084_v36  ;;  %v3161_v31 = vrot.slane %v3125_v44, 2  ;;  %v3199_v7 = vmul.f32 %v7793_v41, %v7974_v26  ;;  %v3200_v54 = vmul.f32 %v7793_v41, %v7978_v28  ;;  %s7162_s11 = sshll.u32 %s12529_s24, 5 }
 0x2b0   : > { %v3088_v62 = vsel %vm471_vm0, %v3086_v25, %v3087_v5  ;;  %v3107_v38 = vadd.f32 %v3085_v32, %v3029_v23  ;;  %v3162_v45 = vrot.slane %v3126_v56, 2  ;;  %v3164_v39 = vrot.slane %v3127_v9, 2  ;;  %s12268_s8 = scalar_lea.vmem %s12310_s7, %s7162_s11 }
 0x2b1   : > { %v3108_v60 = vadd.f32 %v3088_v62, %v3030_v1  ;;  %v3165_v46 = vrot.slane %v3128_v2, 2  ;;  %v3225_v17 = vmul.f32 %v7794_v18, %v7974_v26  ;;  %v3226_v35 = vmul.f32 %v7794_v18, %v7976_v27 }
 0x2b2   : > { %v3163_v55 = vsel %vm512_vm1, %v3161_v31, %v3162_v45  ;;  %v3227_v48 = vmul.f32 %v7794_v18, %v7978_v28  ;;  %v3228_v40 = vmul.f32 %v7794_v18, %v7980_v29  ;;  %v3303_v51 = vmul.f32 %v7795_v33, %v7974_v26 }
 0x2b3   : > { %v3166_v59 = vsel %vm512_vm1, %v3164_v39, %v3165_v46  ;;  %v3185_v23 = vadd.f32 %v3163_v55, %v3107_v38  ;;  %v3261_v52 = vrot.slane %v3225_v17, 1  ;;  %v3262_v0 = vrot.slane %v3226_v35, 1 }
 0x2b4   : > { %v3186_v57 = vadd.f32 %v3166_v59, %v3108_v60  ;;  %v3264_v44 = vrot.slane %v3227_v48, 1  ;;  %v3265_v53 = vrot.slane %v3228_v40, 1  ;;  %v3304_v1 = vmul.f32 %v7795_v33, %v7976_v27 }
 0x2b5   : > { %v3207_v36 = vadd.f32 %v3199_v7, %v3185_v23  ;;  %v3263_v25 = vsel %vm471_vm0, %v3261_v52, %v3262_v0  ;;  %v3305_v5 = vmul.f32 %v7795_v33, %v7978_v28  ;;  %v3306_v56 = vmul.f32 %v7795_v33, %v7980_v29  ;;  %v7799_v52 = vld [vmem:[%s12305_s2 + $0x41] ss:$0 sm:$0xff] }
 0x2b6   : > { %v3208_v9 = vadd.f32 %v3200_v54, %v3186_v57  ;;  %v3266_v2 = vsel %vm471_vm0, %v3264_v44, %v3265_v53  ;;  %v3339_v32 = vrot.slane %v3303_v51, 2  ;;  %v3340_v31 = vrot.slane %v3304_v1, 2  ;;  %v7796_v54 = vld [vmem:[%s12305_s2 + $0x3f] ss:$0 sm:$0xff]  ;;  %v7798_v51 = vld [vmem:[%s12306_s3 + $0x3] ss:$0 sm:$0xff] }
 0x2b7   : > { %v3285_v41 = vadd.f32 %v3263_v25, %v3207_v36  ;;  %v3342_v62 = vrot.slane %v3305_v5, 2  ;;  %v3343_v38 = vrot.slane %v3306_v56, 2  ;;  %v3407_v45 = vmul.f32 %v10489_v24, %v10346_v12  ;;  %v7797_v12 = vld [vmem:[%s12305_s2 + $0x40] ss:$0 sm:$0xff]  ;;  %v7800_v25 = vld [vmem:[%s12307_s4 + $0x3] ss:$0 sm:$0xff] }
 0x2b8   : > { %v3286_v39 = vadd.f32 %v3266_v2, %v3208_v9  ;;  %v3341_v7 = vsel %vm512_vm1, %v3339_v32, %v3340_v31  ;;  %v3408_v60 = vmul.f32 %v10494_v63, %v10351_v37  ;;  %v5163_v46 = vmul.f32 %v7796_v54, %v7964_v20 }
 0x2b9   : > { %v3344_v18 = vsel %vm512_vm1, %v3342_v62, %v3343_v38  ;;  %v3363_v17 = vadd.f32 %v3341_v7, %v3285_v41  ;;  %v5164_v35 = vmul.f32 %v7796_v54, %v12422_v10  ;;  %v5181_v55 = vmul.f32 %v7797_v12, %v7964_v20 }
 0x2ba   : > { %v3364_v48 = vadd.f32 %v3344_v18, %v3286_v39  ;;  %v5182_v37 = vmul.f32 %v7797_v12, %v7966_v21  ;;  %v5183_v40 = vmul.f32 %v7797_v12, %v12422_v10  ;;  %v5184_v33 = vmul.f32 %v7797_v12, %v12423_v19 }
 0x2bb   : > { %v3377_v59 = vmul.f32 %v7798_v51, %v3363_v17  ;;  %v5217_v23 = vrot.slane %v5181_v55, 1  ;;  %v5259_v0 = vmul.f32 %v7799_v52, %v7964_v20  ;;  %v5260_v57 = vmul.f32 %v7799_v52, %v7966_v21  ;;  %v7801_v55 = vld [vmem:[%s12305_s2 + $0x42] ss:$0 sm:$0xff] }
 0x2bc   : > { %v3378_v44 = vmul.f32 %v7798_v51, %v3364_v48  ;;  %v5218_v53 = vrot.slane %v5182_v37, 1  ;;  %v5220_v1 = vrot.slane %v5183_v40, 1  ;;  %v5221_v36 = vrot.slane %v5184_v33, 1 }
 0x2bd   : > { %v3391_v5 = vadd.f32 %v7800_v25, %v3377_v59  ;;  %v5261_v56 = vmul.f32 %v7799_v52, %v12422_v10  ;;  %v5262_v9 = vmul.f32 %v7799_v52, %v12423_v19  ;;  %v5295_v2 = vrot.slane %v5259_v0, 2 }
 0x2be   : > { %v3392_v32 = vadd.f32 %v7800_v25, %v3378_v44  ;;  %v5219_v31 = vsel %vm471_vm0, %v5217_v23, %v5218_v53  ;;  %v5222_v41 = vsel %vm471_vm0, %v5220_v1, %v5221_v36  ;;  %v5296_v62 = vrot.slane %v5260_v57, 2  ;;  %v7803_v25 = vld [vmem:[%s12305_s2 + $0x44] ss:$0 sm:$0xff] }
 0x2bf   : > { %v3399_v38 = vmax.f32 %v3391_v5, 0.0  ;;  %v5241_v39 = vadd.f32 %v5219_v31, %v5163_v46  ;;  %v5242_v7 = vadd.f32 %v5222_v41, %v5164_v35  ;;  %v5298_v54 = vrot.slane %v5261_v56, 2  ;;  %v7802_v46 = vld [vmem:[%s12305_s2 + $0x43] ss:$0 sm:$0xff] }
 0x2c0   : > { %v3400_v18 = vmax.f32 %v3392_v32, 0.0  ;;  %v5297_v17 = vsel %vm512_vm1, %v5295_v2, %v5296_v62  ;;  %v5299_v12 = vrot.slane %v5262_v9, 2  ;;  %v5333_v48 = vmul.f32 %v7801_v55, %v12422_v10  ;;  %v7804_v62 = vld [vmem:[%s12305_s2 + $0x45] ss:$0 sm:$0xff] }
 0x2c1   : > { %v3415_v37 = vmul.f32 %v3407_v45, %v3399_v38  ;;  %v5319_v40 = vadd.f32 %v5297_v17, %v5241_v39  ;;  %v5334_v33 = vmul.f32 %v7801_v55, %v7974_v26  ;;  %v5359_v35 = vmul.f32 %v7802_v46, %v12422_v10 }
 0x2c2   : > { %v3416_v51 = vmul.f32 %v3408_v60, %v3400_v18  ;;  %v5300_v59 = vsel %vm512_vm1, %v5298_v54, %v5299_v12  ;;  %v5360_v23 = vmul.f32 %v7802_v46, %v12423_v19  ;;  %v5361_v52 = vmul.f32 %v7802_v46, %v7974_v26 }
 0x2c3   : > { %v5320_v0 = vadd.f32 %v5300_v59, %v5242_v7  ;;  %v5341_v57 = vadd.f32 %v5333_v48, %v5319_v40  ;;  %v5362_v45 = vmul.f32 %v7802_v46, %v7976_v27  ;;  %v5395_v44 = vrot.slane %v5359_v35, 1  ;;  %v7805_v48 = vld [vmem:[%s12305_s2 + $0x46] ss:$0 sm:$0xff] }
 0x2c4   : > { %v7380_v53 = vpack.i.bf16 %v3416_v51, %v3415_v37  ;;  %v5396_v1 = vrot.slane %v5360_v23, 1  ;;  %v5398_v36 = vrot.slane %v5361_v52, 1  ;;  %v5437_v60 = vmul.f32 %v7803_v25, %v12422_v10  ;;  %v7806_v52 = vld [vmem:[%s12305_s2 + $0x47] ss:$0 sm:$0xff] }
 0x2c5   : > { %v5342_v5 = vadd.f32 %v5334_v33, %v5320_v0  ;;  %v5399_v56 = vrot.slane %v5362_v45, 1  ;;  %v5438_v9 = vmul.f32 %v7803_v25, %v12423_v19  ;;  %v5439_v2 = vmul.f32 %v7803_v25, %v7974_v26 }
 0x2c6   : > { %7381 = vrot.lane.b32.xlu1 %v7380_v53, %s7869_s17  ;;  %v5397_v32 = vsel %vm471_vm0, %v5395_v44, %v5396_v1  ;;  %v5440_v31 = vmul.f32 %v7803_v25, %v7976_v27  ;;  %v5473_v41 = vrot.slane %v5437_v60, 2  ;;  %v5511_v38 = vmul.f32 %v7804_v62, %v7974_v26 }
 0x2c7   : > { %v5400_v39 = vsel %vm471_vm0, %v5398_v36, %v5399_v56  ;;  %v5419_v7 = vadd.f32 %v5397_v32, %v5341_v57  ;;  %v5474_v54 = vrot.slane %v5438_v9, 2  ;;  %v5476_v18 = vrot.slane %v5439_v2, 2 }
 0x2c8   : > { %v5420_v17 = vadd.f32 %v5400_v39, %v5342_v5  ;;  %v5477_v12 = vrot.slane %v5440_v31, 2  ;;  %v5512_v55 = vmul.f32 %v7804_v62, %v7978_v28  ;;  %v5537_v37 = vmul.f32 %v7805_v48, %v7974_v26  ;;  %v10841_v39 = vpop.permute.xlu1 %7276 }
 0x2c9   : > { %v5475_v40 = vsel %vm512_vm1, %v5473_v41, %v5474_v54  ;;  %v5538_v33 = vmul.f32 %v7805_v48, %v7976_v27  ;;  %v5539_v46 = vmul.f32 %v7805_v48, %v7978_v28  ;;  %v5540_v35 = vmul.f32 %v7805_v48, %v7980_v29  ;;  %v10851_v54 = vld [vmem:[%s12305_s2 + $0x1] ss:$0 sm:$0xff] }
 0x2ca   : > { %v5478_v51 = vsel %vm512_vm1, %v5476_v18, %v5477_v12  ;;  %v5497_v59 = vadd.f32 %v5475_v40, %v5419_v7  ;;  %v5573_v23 = vrot.slane %v5537_v37, 1  ;;  %v5615_v0 = vmul.f32 %v7806_v52, %v7974_v26 }
 0x2cb   : > { %v5498_v57 = vadd.f32 %v5478_v51, %v5420_v17  ;;  %v5574_v45 = vrot.slane %v5538_v33, 1  ;;  %v5576_v44 = vrot.slane %v5539_v46, 1  ;;  %v5577_v53 = vrot.slane %v5540_v35, 1  ;;  %v10863_v33 = vld [vmem:[%s12305_s2 + $0x2] ss:$0 sm:$0xff]  ;;  %v12442_v51 = vld [vmem:[#allocation4_spill] sm:$0xff] }
 0x2cc   : > { %v5519_v1 = vadd.f32 %v5511_v38, %v5497_v59  ;;  %v5616_v36 = vmul.f32 %v7806_v52, %v7976_v27  ;;  %v5617_v25 = vmul.f32 %v7806_v52, %v7978_v28  ;;  %v5618_v60 = vmul.f32 %v7806_v52, %v7980_v29  ;;  %v10846_v38 = vld [vmem:[%s12305_s2] ss:$0 sm:$0xff] }
 0x2cd   : > { %v5520_v5 = vadd.f32 %v5512_v55, %v5498_v57  ;;  %v5575_v56 = vsel %vm471_vm0, %v5573_v23, %v5574_v45  ;;  %v5578_v9 = vsel %vm471_vm0, %v5576_v44, %v5577_v53  ;;  %v5651_v2 = vrot.slane %v5615_v0, 2  ;;  %v12443_v0 = vld [vmem:[#allocation3_spill] sm:$0xff]  ;;  %v12444_v44 = vld [vmem:[#allocation5_spill] sm:$0xff] }
 0x2ce   : > { %v5597_v32 = vadd.f32 %v5575_v56, %v5519_v1  ;;  %v5652_v31 = vrot.slane %v5616_v36, 2  ;;  %v5654_v41 = vrot.slane %v5617_v25, 2  ;;  %v5655_v62 = vrot.slane %v5618_v60, 2  ;;  %v7808_v60 = vld [vmem:[%s12307_s4 + $0x7] ss:$0 sm:$0xff] }
 0x2cf   : > { %v5598_v7 = vadd.f32 %v5578_v9, %v5520_v5  ;;  %v5719_v12 = vmul.f32 %v10489_v24, %v10406_v42  ;;  %v5720_v37 = vmul.f32 %v10494_v63, %v10411_v61  ;;  %v1113_v35 = vmul.f32 %v10846_v38, %v7942_v6  ;;  %v7807_v61 = vld [vmem:[%s12306_s3 + $0x7] ss:$0 sm:$0xff] }
 0x2d0   : > { %v5653_v18 = vsel %vm512_vm1, %v5651_v2, %v5652_v31  ;;  %v5656_v17 = vsel %vm512_vm1, %v5654_v41, %v5655_v62  ;;  %v1114_v42 = vmul.f32 %v10846_v38, %v12442_v51  ;;  %v1127_v59 = vmul.f32 %v10851_v54, %v7942_v6 }
 0x2d1   : > { %v5675_v55 = vadd.f32 %v5653_v18, %v5597_v32  ;;  %v5676_v48 = vadd.f32 %v5656_v17, %v5598_v7  ;;  %v1128_v57 = vmul.f32 %v10851_v54, %v12443_v0  ;;  %v1129_v45 = vmul.f32 %v10851_v54, %v12442_v51  ;;  %v10895_v17 = vld [vmem:[%s12305_s2 + $0x3] ss:$0 sm:$0xff] }
 0x2d2   : > { %v1130_v53 = vmul.f32 %v10851_v54, %v12444_v44  ;;  %v1159_v1 = vrot.slane %v1127_v59, 1  ;;  %v1205_v36 = vmul.f32 %v10863_v33, %v7942_v6  ;;  %v1206_v25 = vmul.f32 %v10863_v33, %v12443_v0  ;;  %v10901_v59 = vld [vmem:[%s12305_s2 + $0x4] ss:$0 sm:$0xff] }
 0x2d3   : > { %v5689_v23 = vmul.f32 %v7807_v61, %v5675_v55  ;;  %v5690_v52 = vmul.f32 %v7807_v61, %v5676_v48  ;;  %v1160_v9 = vrot.slane %v1128_v57, 1  ;;  %v1162_v2 = vrot.slane %v1129_v45, 1 }
 0x2d4   : > { %v1163_v32 = vrot.slane %v1130_v53, 1  ;;  %v1207_v31 = vmul.f32 %v10863_v33, %v12442_v51  ;;  %v1208_v41 = vmul.f32 %v10863_v33, %v12444_v44  ;;  %v1237_v62 = vrot.slane %v1205_v36, 2  ;;  %v10907_v36 = vld [vmem:[%s12305_s2 + $0x5] ss:$0 sm:$0xff] }
 0x2d5   : > { %v5703_v5 = vadd.f32 %v7808_v60, %v5689_v23  ;;  %v5704_v56 = vadd.f32 %v7808_v60, %v5690_v52  ;;  %v1161_v55 = vsel %vm471_vm0, %v1159_v1, %v1160_v9  ;;  %v1238_v48 = vrot.slane %v1206_v25, 2 }
 0x2d6   : > { %v1164_v61 = vsel %vm471_vm0, %v1162_v2, %v1163_v32  ;;  %v1191_v23 = vadd.f32 %v1161_v55, %v1113_v35  ;;  %v1240_v52 = vrot.slane %v1207_v31, 2  ;;  %v1241_v57 = vrot.slane %v1208_v41, 2 }
 0x2d7   : > { %v5711_v7 = vmax.f32 %v5703_v5, 0.0  ;;  %v5712_v18 = vmax.f32 %v5704_v56, 0.0  ;;  %v1192_v60 = vadd.f32 %v1164_v61, %v1114_v42  ;;  %v1239_v1 = vsel %vm512_vm1, %v1237_v62, %v1238_v48  ;;  %v10922_v42 = vld [vmem:[%s12305_s2 + $0x6] ss:$0 sm:$0xff]  ;;  %v10936_v61 = vld [vmem:[%s12305_s2 + $0x7] ss:$0 sm:$0xff] }
 0x2d8   : > { %v1242_v25 = vsel %vm512_vm1, %v1240_v52, %v1241_v57  ;;  %v1269_v5 = vadd.f32 %v1239_v1, %v1191_v23  ;;  %v1283_v56 = vmul.f32 %v10895_v17, %v12442_v51  ;;  %v1284_v35 = vmul.f32 %v10895_v17, %v7953_v13 }
 0x2d9   : > { %v5727_v45 = vmul.f32 %v5719_v12, %v5711_v7  ;;  %v5728_v53 = vmul.f32 %v5720_v37, %v5712_v18  ;;  %v1270_v12 = vadd.f32 %v1242_v25, %v1192_v60  ;;  %v1305_v37 = vmul.f32 %v10901_v59, %v12442_v51 }
 0x2da   : > { %v1306_v2 = vmul.f32 %v10901_v59, %v12444_v44  ;;  %v1291_v32 = vadd.f32 %v1283_v56, %v1269_v5  ;;  %v1307_v31 = vmul.f32 %v10901_v59, %v7953_v13  ;;  %v1308_v41 = vmul.f32 %v10901_v59, %v7955_v14  ;;  %v10948_v5 = vld [vmem:[%s12305_s2 + $0x8] ss:$0 sm:$0xff] }
 0x2db   : > { %v7375_v9 = vpack.i.bf16 %v5728_v53, %v5727_v45  ;;  %v1383_v62 = vmul.f32 %v10907_v36, %v12442_v51  ;;  %v1292_v7 = vadd.f32 %v1284_v35, %v1270_v12  ;;  %v1337_v18 = vrot.slane %v1305_v37, 1  ;;  %v10951_v37 = vpop.permute.xlu0 %7266 }
 0x2dc   : > { %v1338_v55 = vrot.slane %v1306_v2, 1  ;;  %v1384_v48 = vmul.f32 %v10907_v36, %v12444_v44  ;;  %v1340_v23 = vrot.slane %v1307_v31, 1  ;;  %v1341_v52 = vrot.slane %v1308_v41, 1 }
 0x2dd   : > { %7376 = vrot.lane.b32.xlu0 %v7375_v9, %s7869_s17  ;;  %v1385_v57 = vmul.f32 %v10907_v36, %v7953_v13  ;;  %v1386_v45 = vmul.f32 %v10907_v36, %v7955_v14  ;;  %v1415_v60 = vrot.slane %v1383_v62, 2  ;;  %v1461_v25 = vmul.f32 %v10922_v42, %v7953_v13 }
 0x2de   : > { %v1339_v53 = vsel %vm471_vm0, %v1337_v18, %v1338_v55  ;;  %v1416_v1 = vrot.slane %v1384_v48, 2  ;;  %v1342_v56 = vsel %vm471_vm0, %v1340_v23, %v1341_v52  ;;  %v1462_v41 = vmul.f32 %v10922_v42, %v7957_v15  ;;  %v10958_v18 = vpop.permute.xlu1 %7281 }
 0x2df   : > { %v1369_v35 = vadd.f32 %v1339_v53, %v1291_v32  ;;  %v1418_v9 = vrot.slane %v1385_v57, 2  ;;  %v1419_v12 = vrot.slane %v1386_v45, 2  ;;  %v1370_v2 = vadd.f32 %v1342_v56, %v1292_v7  ;;  %v10978_v46 = vpop.permute.xlu0 %7271 }
 0x2e0   : > { %v1417_v31 = vsel %vm512_vm1, %v1415_v60, %v1416_v1  ;;  %v1483_v62 = vmul.f32 %v10936_v61, %v7953_v13  ;;  %v1484_v32 = vmul.f32 %v10936_v61, %v7955_v14  ;;  %v1485_v23 = vmul.f32 %v10936_v61, %v7957_v15 }
 0x2e1   : > { %v1420_v55 = vsel %vm512_vm1, %v1418_v9, %v1419_v12  ;;  %v1447_v48 = vadd.f32 %v1417_v31, %v1369_v35  ;;  %v1486_v52 = vmul.f32 %v10936_v61, %v7959_v16  ;;  %v1561_v45 = vmul.f32 %v10948_v5, %v7953_v13 }
 0x2e2   : > { %v1448_v7 = vadd.f32 %v1420_v55, %v1370_v2  ;;  %v1515_v57 = vrot.slane %v1483_v62, 1  ;;  %v1516_v60 = vrot.slane %v1484_v32, 1  ;;  %v1518_v1 = vrot.slane %v1485_v23, 1 }
 0x2e3   : > { %v1469_v53 = vadd.f32 %v1461_v25, %v1447_v48  ;;  %v1562_v56 = vmul.f32 %v10948_v5, %v7955_v14  ;;  %v1519_v9 = vrot.slane %v1486_v52, 1  ;;  %v1563_v12 = vmul.f32 %v10948_v5, %v7957_v15  ;;  %v10985_v52 = vld [vmem:[%s12306_s3] ss:$0 sm:$0xff]  ;;  %v11024_v49 = vpop.permute.xlu0 %7286 }
 0x2e4   : > { %v1470_v35 = vadd.f32 %v1462_v41, %v1448_v7  ;;  %v1564_v2 = vmul.f32 %v10948_v5, %v7959_v16  ;;  %v1517_v62 = vsel %vm471_vm0, %v1515_v57, %v1516_v60  ;;  %v1593_v55 = vrot.slane %v1561_v45, 2  ;;  %v10988_v45 = vpop.permute.xlu1 %7291 }
 0x2e5   : > { %v1594_v40 = vrot.slane %v1562_v56, 2  ;;  %v1520_v25 = vsel %vm471_vm0, %v1518_v1, %v1519_v9  ;;  %v1547_v48 = vadd.f32 %v1517_v62, %v1469_v53  ;;  %v1596_v32 = vrot.slane %v1563_v12, 2  ;;  %v12445_v56 = vld [vmem:[#allocation18_spill] sm:$0xff]  ;;  %v12446_v9 = vld [vmem:[#allocation24_spill] sm:$0xff] }
 0x2e6   : > { %v1597_v23 = vrot.slane %v1564_v2, 2  ;;  %v1548_v31 = vadd.f32 %v1520_v25, %v1470_v35  ;;  %v1670_v12 = vmul.f32 %v12446_v9, %v12445_v56  ;;  %v10997_v2 = vld [vmem:[%s12307_s4] ss:$0 sm:$0xff]  ;;  %v12448_v25 = vld [vmem:[#allocation23_spill] sm:$0xff]  ;;  %v1141_v56 = vmul.f32 %v10851_v54, %v7978_v28 }
 0x2e7   : > { %v1595_v57 = vsel %vm512_vm1, %v1593_v55, %v1594_v40  ;;  %v12447_v55 = vld [vmem:[#allocation17_spill] sm:$0xff]  ;;  %v1220_v11 = vmul.f32 %v10863_v33, %v7980_v29 }
 0x2e8   : > { %v1598_v60 = vsel %vm512_vm1, %v1596_v32, %v1597_v23  ;;  %v1625_v1 = vadd.f32 %v1595_v57, %v1547_v48  ;;  %v1669_v41 = vmul.f32 %v12448_v25, %v12447_v55  ;;  %v1119_v32 = vmul.f32 %v10846_v38, %v7974_v26 }
 0x2e9   : > { %v1626_v62 = vadd.f32 %v1598_v60, %v1548_v31  ;;  %v1120_v23 = vmul.f32 %v10846_v38, %v7978_v28  ;;  %v1139_v31 = vmul.f32 %v10851_v54, %v7974_v26  ;;  %v1140_v60 = vmul.f32 %v10851_v54, %v7976_v27 }
 0x2ea   : > { %v1639_v7 = vmul.f32 %v10985_v52, %v1625_v1  ;;  %v1142_v55 = vmul.f32 %v10851_v54, %v7980_v29  ;;  %v1217_v48 = vmul.f32 %v10863_v33, %v7974_v26  ;;  %v1180_v47 = vrot.slane %v1141_v56, 1 }
 0x2eb   : > { %v1640_v57 = vmul.f32 %v10985_v52, %v1626_v62  ;;  %v1218_v62 = vmul.f32 %v10863_v33, %v7976_v27  ;;  %v1177_v35 = vrot.slane %v1139_v31, 1  ;;  %v1178_v40 = vrot.slane %v1140_v60, 1 }
 0x2ec   : > { %v1653_v1 = vadd.f32 %v10997_v2, %v1639_v7  ;;  %v1181_v63 = vrot.slane %v1142_v55, 1  ;;  %v1219_v7 = vmul.f32 %v10863_v33, %v7978_v28  ;;  %v1255_v30 = vrot.slane %v1217_v48, 2 }
 0x2ed   : > { %v1654_v53 = vadd.f32 %v10997_v2, %v1640_v57  ;;  %v1179_v3 = vsel %vm471_vm0, %v1177_v35, %v1178_v40  ;;  %v1256_v27 = vrot.slane %v1218_v62, 2  ;;  %v1259_v4 = vrot.slane %v1220_v11, 2  ;;  %v12449_v35 = vld [vmem:[#allocation12_spill] sm:$0xff]  ;;  %v12450_v11 = vld [vmem:[#allocation13_spill] sm:$0xff] }
 0x2ee   : > { %v1661_v22 = vmax.f32 %v1653_v1, 0.0  ;;  %v1182_v31 = vsel %vm471_vm0, %v1180_v47, %v1181_v63  ;;  %v1197_v60 = vadd.f32 %v1179_v3, %v1119_v32  ;;  %v1258_v56 = vrot.slane %v1219_v7, 2 }
 0x2ef   : > { %v1662_v24 = vmax.f32 %v1654_v53, 0.0  ;;  %v1198_v55 = vadd.f32 %v1182_v31, %v1120_v23  ;;  %v1257_v26 = vsel %vm512_vm1, %v1255_v30, %v1256_v27  ;;  %v1289_v53 = vmul.f32 %v10895_v17, %v7978_v28 }
 0x2f0   : > { %v1677_v50 = vmul.f32 %v1669_v41, %v1661_v22  ;;  %v1275_v34 = vadd.f32 %v1257_v26, %v1197_v60  ;;  %v1290_v40 = vmul.f32 %v10895_v17, %v12449_v35  ;;  %v1260_v47 = vsel %vm512_vm1, %v1258_v56, %v1259_v4 }
 0x2f1   : > { %v11039_v48 = vmul.f32 %v1670_v12, %v1662_v24  ;;  %v1317_v3 = vmul.f32 %v10901_v59, %v7978_v28  ;;  %v1318_v63 = vmul.f32 %v10901_v59, %v7980_v29  ;;  %v1276_v27 = vadd.f32 %v1260_v47, %v1198_v55 }
 0x2f2   : > { %v1297_v30 = vadd.f32 %v1289_v53, %v1275_v34  ;;  %v1319_v26 = vmul.f32 %v10901_v59, %v12449_v35  ;;  %v1320_v22 = vmul.f32 %v10901_v59, %v12450_v11  ;;  %v1395_v24 = vmul.f32 %v10907_v36, %v7978_v28 }
 0x2f3   : > { %v1355_v41 = vrot.slane %v1317_v3, 1  ;;  %v1356_v32 = vrot.slane %v1318_v63, 1  ;;  %v1396_v4 = vmul.f32 %v10907_v36, %v7980_v29  ;;  %v1298_v12 = vadd.f32 %v1290_v40, %v1276_v27  ;;  %v7401_v3 = vld [vmem:[%s12308_s5 + $0x80] sm:$0xff]  }
 0x2f4   : > { %v1358_v23 = vrot.slane %v1319_v26, 1  ;;  %v1359_v62 = vrot.slane %v1320_v22, 1  ;;  %v1397_v34 = vmul.f32 %v10907_v36, %v12449_v35  ;;  %v1398_v31 = vmul.f32 %v10907_v36, %v12450_v11  ;;  %v12451_v22 = vld [vmem:[#allocation14_spill] sm:$0xff]  ;;  %7209 = vmatprep.subr.bf16.mxu1 %v7401_v3 }
 0x2f5   : > { %v1357_v7 = vsel %vm471_vm0, %v1355_v41, %v1356_v32  ;;  %v1433_v60 = vrot.slane %v1395_v24, 2  ;;  %v1434_v56 = vrot.slane %v1396_v4, 2  ;;  %v1467_v40 = vmul.f32 %v10922_v42, %v12449_v35 }
 0x2f6   : > { %v1360_v55 = vsel %vm471_vm0, %v1358_v23, %v1359_v62  ;;  %v1375_v53 = vadd.f32 %v1357_v7, %v1297_v30  ;;  %v1436_v47 = vrot.slane %v1397_v34, 2  ;;  %v1437_v26 = vrot.slane %v1398_v31, 2 }
 0x2f7   : > { %v1376_v63 = vadd.f32 %v1360_v55, %v1298_v12  ;;  %v1435_v27 = vsel %vm512_vm1, %v1433_v60, %v1434_v56  ;;  %v1468_v41 = vmul.f32 %v10922_v42, %v12451_v22  ;;  %v1495_v24 = vmul.f32 %v10936_v61, %v12449_v35  ;;  %v12452_v12 = vld [vmem:[#allocation25_spill] sm:$0xff] }
 0x2f8   : > { %v1453_v32 = vadd.f32 %v1435_v27, %v1375_v53  ;;  %v1496_v30 = vmul.f32 %v10936_v61, %v12450_v11  ;;  %v1497_v4 = vmul.f32 %v10936_v61, %v12451_v22  ;;  %v1438_v23 = vsel %vm512_vm1, %v1436_v47, %v1437_v26 }
 0x2f9   : > { %v1498_v62 = vmul.f32 %v10936_v61, %v12452_v12  ;;  %v1573_v34 = vmul.f32 %v10948_v5, %v12449_v35  ;;  %v1574_v7 = vmul.f32 %v10948_v5, %v12450_v11  ;;  %v1454_v31 = vadd.f32 %v1438_v23, %v1376_v63 }
 0x2fa   : > { %v1475_v60 = vadd.f32 %v1467_v40, %v1453_v32  ;;  %v1533_v56 = vrot.slane %v1495_v24, 1  ;;  %v1534_v55 = vrot.slane %v1496_v30, 1  ;;  %v1536_v53 = vrot.slane %v1497_v4, 1  ;;  %v11087_v32 = vpop.permute.xlu1 %7301  ;;  %v11092_v24 = vld [vmem:[%s12305_s2 + $0x24] ss:$0 sm:$0xff] }
 0x2fb   : > { %v1537_v27 = vrot.slane %v1498_v62, 1  ;;  %v1575_v3 = vmul.f32 %v10948_v5, %v12451_v22  ;;  %v1576_v47 = vmul.f32 %v10948_v5, %v12452_v12  ;;  %v1476_v26 = vadd.f32 %v1468_v41, %v1454_v31 }
 0x2fc   : > { %v1535_v1 = vsel %vm471_vm0, %v1533_v56, %v1534_v55  ;;  %v1611_v57 = vrot.slane %v1573_v34, 2  ;;  %v1612_v35 = vrot.slane %v1574_v7, 2  ;;  %v12453_v30 = vunpack.i.l.bf16 %v10978_v46  ;;  %v12456_v56 = vld [vmem:[#allocation32_spill] sm:$0xff] }
 0x2fd   : > { %v1538_v29 = vsel %vm471_vm0, %v1536_v53, %v1537_v27  ;;  %v1553_v11 = vadd.f32 %v1535_v1, %v1475_v60  ;;  %v1614_v63 = vrot.slane %v1575_v3, 2  ;;  %v1615_v40 = vrot.slane %v1576_v47, 2  ;;  %v11104_v1 = vld [vmem:[%s12305_s2 + $0x25] ss:$0 sm:$0xff]  ;;  %v12458_v53 = vld [vmem:[#allocation33_spill] sm:$0xff] }
 0x2fe   : > { %v11097_v41 = vsel %vm6501_vm2, %v1677_v50, %v12453_v30  ;;  %v1554_v23 = vadd.f32 %v1538_v29, %v1476_v26  ;;  %v1613_v62 = vsel %vm512_vm1, %v1611_v57, %v1612_v35  ;;  %v12454_v34 = vunpack.i.h.bf16 %v10978_v46  ;;  %v12455_v60 = vld [vmem:[#allocation26_spill] sm:$0xff]  ;;  %v12457_v35 = vld [vmem:[#allocation27_spill] sm:$0xff] }
 0x2ff   : > { %v1616_v31 = vsel %vm512_vm1, %v1614_v63, %v1615_v40  ;;  %v1631_v50 = vadd.f32 %v1613_v62, %v1553_v11  ;;  %v1675_v55 = vmul.f32 %v12456_v56, %v12455_v60  ;;  %v11118_v29 = vld [vmem:[%s12305_s2 + $0x26] ss:$0 sm:$0xff]  ;;  %v11122_v27 = vmul.f32 %v12458_v53, %v12457_v35  ;;  %v11145_v35 = vpop.permute.xlu0 %7296 }
 0x300   : > { %v11110_v7 = vsel %vm6501_vm2, %v11039_v48, %v12454_v34  ;;  %v1632_v57 = vadd.f32 %v1616_v31, %v1554_v23  ;;  %v3425_v48 = vmul.f32 %v11092_v24, %v7942_v6  ;;  %v3426_v3 = vmul.f32 %v11092_v24, %v12442_v51  ;;  %12459 = vst [vmem:[#allocation18_spill] sm:$0xff] %v11145_v35 }
 0x301   : > { %v1645_v11 = vmul.f32 %v10985_v52, %v1631_v50  ;;  %v3439_v47 = vmul.f32 %v11104_v1, %v7942_v6  ;;  %v3440_v26 = vmul.f32 %v11104_v1, %v12443_v0  ;;  %v3441_v40 = vmul.f32 %v11104_v1, %v12442_v51 }
 0x302   : > { %v1646_v63 = vmul.f32 %v10985_v52, %v1632_v57  ;;  %v3442_v30 = vmul.f32 %v11104_v1, %v12444_v44  ;;  %v3517_v23 = vmul.f32 %v11118_v29, %v7942_v6  ;;  %v3518_v50 = vmul.f32 %v11118_v29, %v12443_v0 }
 0x303   : > { %v1659_v62 = vadd.f32 %v10997_v2, %v1645_v11  ;;  %v3471_v34 = vrot.slane %v3439_v47, 1  ;;  %v3472_v31 = vrot.slane %v3440_v26, 1  ;;  %v3474_v57 = vrot.slane %v3441_v40, 1  ;;  %v11155_v11 = vld [vmem:[%s12305_s2 + $0x27] ss:$0 sm:$0xff] }
 0x304   : > { %v3475_v4 = vrot.slane %v3442_v30, 1  ;;  %v3519_v46 = vmul.f32 %v11118_v29, %v12442_v51  ;;  %v11150_v53 = vadd.f32 %v10997_v2, %v1646_v63  ;;  %v3520_v26 = vmul.f32 %v11118_v29, %v12444_v44  ;;  %v11163_v40 = vld [vmem:[%s12305_s2 + $0x28] ss:$0 sm:$0xff] }
 0x305   : > { %v3473_v47 = vsel %vm471_vm0, %v3471_v34, %v3472_v31  ;;  %v3549_v60 = vrot.slane %v3517_v23, 2  ;;  %v1667_v0 = vmax.f32 %v1659_v62, 0.0  ;;  %v3550_v6 = vrot.slane %v3518_v50, 2  ;;  %v11171_v23 = vld [vmem:[%s12305_s2 + $0x29] ss:$0 sm:$0xff] }
 0x306   : > { %v3476_v63 = vsel %vm471_vm0, %v3474_v57, %v3475_v4  ;;  %v3503_v30 = vadd.f32 %v3473_v47, %v3425_v48  ;;  %v3552_v22 = vrot.slane %v3519_v46, 2  ;;  %v3553_v28 = vrot.slane %v3520_v26, 2  ;;  %12460 = vst [vmem:[#allocation24_spill] sm:$0xff] %v11171_v23 }
 0x307   : > { %v3504_v12 = vadd.f32 %v3476_v63, %v3426_v3  ;;  %v3551_v62 = vsel %vm512_vm1, %v3549_v60, %v3550_v6  ;;  %v3595_v31 = vmul.f32 %v11155_v11, %v12442_v51  ;;  %v3596_v4 = vmul.f32 %v11155_v11, %v7953_v13  ;;  %v11189_v60 = vld [vmem:[%s12305_s2 + $0x2a] ss:$0 sm:$0xff] }
 0x308   : > { %v1668_v48 = vmax.f32 %v11150_v53, 0.0  ;;  %v3554_v46 = vsel %vm512_vm1, %v3552_v22, %v3553_v28  ;;  %v3581_v3 = vadd.f32 %v3551_v62, %v3503_v30  ;;  %v3617_v50 = vmul.f32 %v11163_v40, %v12442_v51  ;;  %12461 = vst [vmem:[#allocation17_spill] sm:$0xff] %v11189_v60  ;;  %v11200_v62 = vld [vmem:[%s12305_s2 + $0x2b] ss:$0 sm:$0xff] }
 0x309   : > { %v1683_v57 = vmul.f32 %v1675_v55, %v1667_v0  ;;  %v3582_v47 = vadd.f32 %v3554_v46, %v3504_v12  ;;  %v3618_v26 = vmul.f32 %v11163_v40, %v12444_v44  ;;  %v3619_v6 = vmul.f32 %v11163_v40, %v7953_v13 }
 0x30a   : > { %v3603_v53 = vadd.f32 %v3595_v31, %v3581_v3  ;;  %v3620_v28 = vmul.f32 %v11163_v40, %v7955_v14  ;;  %v3649_v22 = vrot.slane %v3617_v50, 1  ;;  %v3695_v0 = vmul.f32 %v11171_v23, %v12442_v51 }
 0x30b   : > { %v3604_v12 = vadd.f32 %v3596_v4, %v3582_v47  ;;  %v3650_v55 = vrot.slane %v3618_v26, 1  ;;  %v3652_v63 = vrot.slane %v3619_v6, 1  ;;  %v3696_v30 = vmul.f32 %v11171_v23, %v12444_v44 }
 0x30c   : > { %v3653_v46 = vrot.slane %v3620_v28, 1  ;;  %v3697_v31 = vmul.f32 %v11171_v23, %v7953_v13  ;;  %v3698_v3 = vmul.f32 %v11171_v23, %v7955_v14  ;;  %v3727_v50 = vrot.slane %v3695_v0, 2  ;;  %v11214_v28 = vld [vmem:[%s12305_s2 + $0x2c] ss:$0 sm:$0xff] }
 0x30d   : > { %v3651_v4 = vsel %vm471_vm0, %v3649_v22, %v3650_v55  ;;  %v3728_v47 = vrot.slane %v3696_v30, 2  ;;  %v3773_v26 = vmul.f32 %v11189_v60, %v7953_v13  ;;  %v3774_v6 = vmul.f32 %v11189_v60, %v7957_v15 }
 0x30e   : > { %v3654_v56 = vsel %vm471_vm0, %v3652_v63, %v3653_v46  ;;  %v3681_v34 = vadd.f32 %v3651_v4, %v3603_v53  ;;  %v3730_v35 = vrot.slane %v3697_v31, 2  ;;  %v3731_v44 = vrot.slane %v3698_v3, 2 }
 0x30f   : > { %v3682_v0 = vadd.f32 %v3654_v56, %v3604_v12  ;;  %v3729_v22 = vsel %vm512_vm1, %v3727_v50, %v3728_v47  ;;  %v3795_v55 = vmul.f32 %v11200_v62, %v7953_v13  ;;  %v3796_v30 = vmul.f32 %v11200_v62, %v7955_v14 }
 0x310   : > { %v3732_v51 = vsel %vm512_vm1, %v3730_v35, %v3731_v44  ;;  %v3759_v60 = vadd.f32 %v3729_v22, %v3681_v34  ;;  %v3797_v23 = vmul.f32 %v11200_v62, %v7957_v15  ;;  %v3798_v53 = vmul.f32 %v11200_v62, %v7959_v16  ;;  %v7312_v44 = vpop.permute.xlu1 %7311 }
 0x311   : > { %v3760_v63 = vadd.f32 %v3732_v51, %v3682_v0  ;;  %v3827_v46 = vrot.slane %v3795_v55, 1  ;;  %v3828_v56 = vrot.slane %v3796_v30, 1  ;;  %v3873_v12 = vmul.f32 %v11214_v28, %v7953_v13 }
 0x312   : > { %v3781_v31 = vadd.f32 %v3773_v26, %v3759_v60  ;;  %v3830_v3 = vrot.slane %v3797_v23, 1  ;;  %v3831_v50 = vrot.slane %v3798_v53, 1  ;;  %v3874_v4 = vmul.f32 %v11214_v28, %v7955_v14 }
 0x313   : > { %v3782_v35 = vadd.f32 %v3774_v6, %v3760_v63  ;;  %v3829_v34 = vsel %vm471_vm0, %v3827_v46, %v3828_v56  ;;  %v3875_v47 = vmul.f32 %v11214_v28, %v7957_v15  ;;  %v3876_v51 = vmul.f32 %v11214_v28, %v7959_v16  ;;  %v11244_v46 = vld [vmem:[%s12306_s3 + $0x4] ss:$0 sm:$0xff] }
 0x314   : > { %v3832_v0 = vsel %vm471_vm0, %v3830_v3, %v3831_v50  ;;  %v3859_v22 = vadd.f32 %v3829_v34, %v3781_v31  ;;  %v3905_v55 = vrot.slane %v3873_v12, 2  ;;  %v3906_v60 = vrot.slane %v3874_v4, 2  ;;  %v11256_v50 = vpop.permute.xlu0 %7306  ;;  %v11261_v4 = vld [vmem:[%s12307_s4 + $0x4] ss:$0 sm:$0xff] }
 0x315   : > { %v1684_v23 = vmul.f32 %v11122_v27, %v1668_v48  ;;  %v3860_v26 = vadd.f32 %v3832_v0, %v3782_v35  ;;  %v3908_v30 = vrot.slane %v3875_v47, 2  ;;  %v3909_v53 = vrot.slane %v3876_v51, 2 }
 0x316   : > { %v12462_v6 = vunpack.i.l.bf16 %v11087_v32  ;;  %v3907_v56 = vsel %vm512_vm1, %v3905_v55, %v3906_v60  ;;  %v12463_v27 = vunpack.i.l.bf16 %v10958_v18  ;;  %v12464_v3 = vunpack.i.h.bf16 %v10958_v18  ;;  %v12468_v60 = vld [vmem:[#allocation19_spill] sm:$0xff] }
 0x317   : > { %v3910_v12 = vsel %vm512_vm1, %v3908_v30, %v3909_v53  ;;  %v3937_v31 = vadd.f32 %v3907_v56, %v3859_v22  ;;  %v12465_v34 = vunpack.i.l.bf16 %v10988_v45  ;;  %v7314_v51 = vunpack.i.h.bf16 %v7312_v44 }
 0x318   : > { %v6508_v63 = vsel %vm6501_vm2, %v1683_v57, %v12462_v6  ;;  %v6511_v48 = vsel %vm6510_vm3, %v11097_v41, %v12463_v27  ;;  %v6512_v57 = vsel %vm6510_vm3, %v11110_v7, %v12464_v3  ;;  %v3938_v35 = vadd.f32 %v3910_v12, %v3860_v26  ;;  %v11273_v7 = vpop.permute.xlu1 %7321  ;;  %v12469_v6 = vld [vmem:[#allocation20_spill] sm:$0xff] }
 0x319   : > { %v11266_v47 = vsel %vm6519_vm4, %v6511_v48, %v12465_v34  ;;  %v12466_v41 = vunpack.i.h.bf16 %v10988_v45  ;;  %v12467_v0 = vunpack.i.h.bf16 %v11087_v32  ;;  %v3951_v55 = vmul.f32 %v11244_v46, %v3937_v31 }
 0x31a   : > { %v3981_v26 = vmul.f32 %v12448_v25, %v12468_v60  ;;  %v7313_v30 = vunpack.i.l.bf16 %v7312_v44  ;;  %v3952_v53 = vmul.f32 %v11244_v46, %v3938_v35  ;;  %v3982_v45 = vmul.f32 %v12446_v9, %v12469_v6 }
 0x31b   : > { %v11271_v18 = vsel %vm6519_vm4, %v6512_v57, %v12466_v41  ;;  %v6509_v22 = vsel %vm6501_vm2, %v1684_v23, %v12467_v0  ;;  %v3965_v32 = vadd.f32 %v11261_v4, %v3951_v55  ;;  %v1115_v3 = vmul.f32 %v10846_v38, %v7953_v13 }
 0x31c   : > { %v6552_v56 = vpack.c.bf16 %v11271_v18, %v11266_v47  ;;  %v11289_v23 = vsel %vm6510_vm3, %v6509_v22, %v7314_v51  ;;  %v3966_v44 = vadd.f32 %v11261_v4, %v3952_v53  ;;  %v11295_v48 = vsel %vm6510_vm3, %v6508_v63, %v7313_v30 }
 0x31d   : > { %v1116_v57 = vmul.f32 %v10846_v38, %v7957_v15  ;;  %v3973_v35 = vmax.f32 %v3965_v32, 0.0  ;;  %v1131_v34 = vmul.f32 %v10851_v54, %v7953_v13  ;;  %v1132_v47 = vmul.f32 %v10851_v54, %v7955_v14 }
 0x31e   : > { %v1133_v41 = vmul.f32 %v10851_v54, %v7957_v15  ;;  %v3974_v18 = vmax.f32 %v3966_v44, 0.0  ;;  %v1134_v63 = vmul.f32 %v10851_v54, %v7959_v16  ;;  %v1209_v51 = vmul.f32 %v10863_v33, %v7953_v13 }
 0x31f   : > { %v1210_v38 = vmul.f32 %v10863_v33, %v7955_v14  ;;  %v3989_v0 = vmul.f32 %v3981_v26, %v3973_v35  ;;  %v1165_v22 = vrot.slane %v1131_v34, 1  ;;  %v1166_v55 = vrot.slane %v1132_v47, 1 }
 0x320   : > { %v1168_v60 = vrot.slane %v1133_v41, 1  ;;  %v3990_v30 = vmul.f32 %v3982_v45, %v3974_v18  ;;  %v1169_v53 = vrot.slane %v1134_v63, 1  ;;  %v1211_v6 = vmul.f32 %v10863_v33, %v7957_v15 }
 0x321   : > { %v1212_v32 = vmul.f32 %v10863_v33, %v7959_v16  ;;  %v12470_v54 = vunpack.i.l.bf16 %v10951_v37  ;;  %v1167_v12 = vsel %vm471_vm0, %v1165_v22, %v1166_v55  ;;  %v1243_v31 = vrot.slane %v1209_v51, 2 }
 0x322   : > { %v1244_v27 = vrot.slane %v1210_v38, 2  ;;  %v12471_v26 = vunpack.i.h.bf16 %v10951_v37  ;;  %v12472_v45 = vunpack.i.l.bf16 %v10841_v39  ;;  %v1170_v47 = vsel %vm471_vm0, %v1168_v60, %v1169_v53 }
 0x323   : > { %v6528_v44 = vsel %vm6501_vm2, %v3989_v0, %v12470_v54  ;;  %v1193_v41 = vadd.f32 %v1167_v12, %v1115_v3  ;;  %v12473_v33 = vunpack.i.h.bf16 %v10841_v39  ;;  %v12474_v63 = vunpack.i.l.bf16 %v11024_v49 }
 0x324   : > { %v6529_v35 = vsel %vm6501_vm2, %v3990_v30, %v12471_v26  ;;  %v6536_v34 = vsel %vm6510_vm3, %v6528_v44, %v12472_v45  ;;  %v1194_v38 = vadd.f32 %v1170_v47, %v1116_v57  ;;  %v1245_v37 = vsel %vm512_vm1, %v1243_v31, %v1244_v27 }
 0x325   : > { %v6537_v18 = vsel %vm6510_vm3, %v6529_v35, %v12473_v33  ;;  %v6544_v51 = vsel %vm6519_vm4, %v6536_v34, %v12474_v63  ;;  %v12475_v0 = vunpack.i.h.bf16 %v11024_v49  ;;  %v1246_v55 = vrot.slane %v1211_v6, 2 }
 0x326   : > { %v1247_v30 = vrot.slane %v1212_v32, 2  ;;  %v1271_v54 = vadd.f32 %v1245_v37, %v1193_v41  ;;  %v1285_v39 = vmul.f32 %v10895_v17, %v7957_v15  ;;  %v1286_v12 = vmul.f32 %v10895_v17, %v7964_v20 }
 0x327   : > { %v6545_v22 = vsel %vm6519_vm4, %v6537_v18, %v12475_v0  ;;  %v1309_v3 = vmul.f32 %v10901_v59, %v7957_v15  ;;  %v1310_v49 = vmul.f32 %v10901_v59, %v7959_v16  ;;  %v1311_v31 = vmul.f32 %v10901_v59, %v7964_v20 }
 0x328   : > { %v6553_v60 = vpack.c.bf16 %v6545_v22, %v6544_v51  ;;  %v1248_v57 = vsel %vm512_vm1, %v1246_v55, %v1247_v30  ;;  %v1312_v27 = vmul.f32 %v10901_v59, %v7966_v21  ;;  %v1293_v6 = vadd.f32 %v1285_v39, %v1271_v54 }
 0x329   : > { %v1272_v53 = vadd.f32 %v1248_v57, %v1194_v38  ;;  %v1343_v32 = vrot.slane %v1309_v3, 1  ;;  %v1387_v17 = vmul.f32 %v10907_v36, %v7957_v15  ;;  %v1344_v44 = vrot.slane %v1310_v49, 1 }
 0x32a   : > { %6759 = vmatprep.mubr.bf16.mxu0 %v6553_v60  ;;  %v1346_v26 = vrot.slane %v1311_v31, 1  ;;  %v1347_v35 = vrot.slane %v1312_v27, 1  ;;  %v1388_v45 = vmul.f32 %v10907_v36, %v7959_v16  ;;  %v1389_v47 = vmul.f32 %v10907_v36, %v7964_v20 }
 0x32b   : > { %6760 = vmatmul.mubr.bf16.vlgmr.msra.gmra.mrb[0].mxu0 %v6552_v56  ;;  %v1294_v34 = vadd.f32 %v1286_v12, %v1272_v53  ;;  %v1390_v59 = vmul.f32 %v10907_v36, %v7966_v21  ;;  %v1421_v41 = vrot.slane %v1387_v17, 2  ;;  %v1345_v33 = vsel %vm471_vm0, %v1343_v32, %v1344_v44  ;;  %v11379_v32 = vpop.permute.xlu0 %7316 }
 0x32c   : > { %v1348_v18 = vsel %vm471_vm0, %v1346_v26, %v1347_v35  ;;  %v1422_v63 = vrot.slane %v1388_v45, 2  ;;  %v1463_v56 = vmul.f32 %v10922_v42, %v7964_v20  ;;  %v1371_v51 = vadd.f32 %v1345_v33, %v1293_v6 }
 0x32d   : > { %v1372_v38 = vadd.f32 %v1348_v18, %v1294_v34  ;;  %v1424_v37 = vrot.slane %v1389_v47, 2  ;;  %v1425_v0 = vrot.slane %v1390_v59, 2  ;;  %v1464_v55 = vmul.f32 %v10922_v42, %v12422_v10 }
 0x32e   : > { %v1423_v22 = vsel %vm512_vm1, %v1421_v41, %v1422_v63  ;;  %v1487_v36 = vmul.f32 %v10936_v61, %v7964_v20  ;;  %v1488_v30 = vmul.f32 %v10936_v61, %v7966_v21  ;;  %v1489_v39 = vmul.f32 %v10936_v61, %v12422_v10 }
 0x32f   : > { %v1426_v54 = vsel %vm512_vm1, %v1424_v37, %v1425_v0  ;;  %v1449_v60 = vadd.f32 %v1423_v22, %v1371_v51  ;;  %v1490_v12 = vmul.f32 %v10936_v61, %v12423_v19  ;;  %v1565_v42 = vmul.f32 %v10948_v5, %v7964_v20 }
 0x330   : > { %v1450_v3 = vadd.f32 %v1426_v54, %v1372_v38  ;;  %v1521_v57 = vrot.slane %v1487_v36, 1  ;;  %v1522_v49 = vrot.slane %v1488_v30, 1  ;;  %v1524_v27 = vrot.slane %v1489_v39, 1 }
 0x331   : > { %v1471_v31 = vadd.f32 %v1463_v56, %v1449_v60  ;;  %v1525_v53 = vrot.slane %v1490_v12, 1  ;;  %v1566_v6 = vmul.f32 %v10948_v5, %v7966_v21  ;;  %v1567_v61 = vmul.f32 %v10948_v5, %v12422_v10  ;;  %v12485_v56 = vld [vmem:[#allocation12_spill] sm:$0xff] }
 0x332   : > { %v1472_v17 = vadd.f32 %v1464_v55, %v1450_v3  ;;  %v1523_v44 = vsel %vm471_vm0, %v1521_v57, %v1522_v49  ;;  %v1568_v26 = vmul.f32 %v10948_v5, %v12423_v19  ;;  %v1599_v34 = vrot.slane %v1565_v42, 2 }
 0x333   : > { %v1526_v35 = vsel %vm471_vm0, %v1524_v27, %v1525_v53  ;;  %v1549_v45 = vadd.f32 %v1523_v44, %v1471_v31  ;;  %v1600_v47 = vrot.slane %v1566_v6, 2  ;;  %v7323_v59 = vunpack.i.l.bf16 %v11273_v7 }
 0x334   : > { %v1550_v41 = vadd.f32 %v1526_v35, %v1472_v17  ;;  %v1602_v33 = vrot.slane %v1567_v61, 2  ;;  %v1603_v18 = vrot.slane %v1568_v26, 2  ;;  %v1671_v38 = vmul.f32 %v9786_v58, %v9647_v43  ;;  %v12476_v17 = vld [vmem:[#allocation34_spill] sm:$0xff]  ;;  %v11421_v61 = vpop.permute.xlu1 %7331 }
 0x335   : > { %v1601_v51 = vsel %vm512_vm1, %v1599_v34, %v1600_v47  ;;  %v3427_v0 = vmul.f32 %v11092_v24, %v7953_v13  ;;  %v3428_v22 = vmul.f32 %v11092_v24, %v7957_v15  ;;  %v3443_v36 = vmul.f32 %v11104_v1, %v7953_v13 }
 0x336   : > { %v1604_v5 = vsel %vm512_vm1, %v1602_v33, %v1603_v18  ;;  %v1627_v37 = vadd.f32 %v1601_v51, %v1549_v45  ;;  %v3444_v30 = vmul.f32 %v11104_v1, %v7955_v14  ;;  %v3445_v54 = vmul.f32 %v11104_v1, %v7957_v15 }
 0x337   : > { %v1628_v55 = vadd.f32 %v1604_v5, %v1550_v41  ;;  %v3446_v60 = vmul.f32 %v11104_v1, %v7959_v16  ;;  %v3521_v39 = vmul.f32 %v11118_v29, %v7953_v13  ;;  %v3522_v12 = vmul.f32 %v11118_v29, %v7955_v14 }
 0x338   : > { %v1641_v43 = vmul.f32 %v10985_v52, %v1627_v37  ;;  %v3477_v57 = vrot.slane %v3443_v36, 1  ;;  %v3478_v49 = vrot.slane %v3444_v30, 1  ;;  %v3480_v42 = vrot.slane %v3445_v54, 1 }
 0x339   : > { %v1642_v3 = vmul.f32 %v10985_v52, %v1628_v55  ;;  %v3481_v27 = vrot.slane %v3446_v60, 1  ;;  %v3523_v53 = vmul.f32 %v11118_v29, %v7957_v15  ;;  %v3524_v6 = vmul.f32 %v11118_v29, %v7959_v16 }
 0x33a   : > { %v1655_v31 = vadd.f32 %v10997_v2, %v1641_v43  ;;  %v11419_v44 = vmul.f32 %v12476_v17, %v9656_v8  ;;  %v3479_v52 = vsel %vm471_vm0, %v3477_v57, %v3478_v49  ;;  %v3555_v26 = vrot.slane %v3521_v39, 2 }
 0x33b   : > { %v3556_v35 = vrot.slane %v3522_v12, 2  ;;  %v11425_v45 = vadd.f32 %v10997_v2, %v1642_v3  ;;  %v3482_v34 = vsel %vm471_vm0, %v3480_v42, %v3481_v27  ;;  %v3505_v47 = vadd.f32 %v3479_v52, %v3427_v0  ;;  %v12477_v27 = vld [vmem:[#allocation24_spill] sm:$0xff] }
 0x33c   : > { %v3558_v41 = vrot.slane %v3523_v53, 2  ;;  %v1663_v33 = vmax.f32 %v1655_v31, 0.0  ;;  %v3506_v18 = vadd.f32 %v3482_v34, %v3428_v22  ;;  %v3559_v5 = vrot.slane %v3524_v6, 2 }
 0x33d   : > { %v3557_v51 = vsel %vm512_vm1, %v3555_v26, %v3556_v35  ;;  %v7334_v8 = vunpack.i.h.bf16 %v11421_v61  ;;  %v3597_v55 = vmul.f32 %v11155_v11, %v7957_v15  ;;  %v3598_v36 = vmul.f32 %v11155_v11, %v7964_v20 }
 0x33e   : > { %v3583_v37 = vadd.f32 %v3557_v51, %v3505_v47  ;;  %v7333_v2 = vunpack.i.l.bf16 %v11421_v61  ;;  %v3560_v30 = vsel %vm512_vm1, %v3558_v41, %v3559_v5  ;;  %v3621_v0 = vmul.f32 %v11163_v40, %v7957_v15  ;;  %v12478_v41 = vld [vmem:[#allocation17_spill] sm:$0xff] }
 0x33f   : > { %v3622_v22 = vmul.f32 %v11163_v40, %v7959_v16  ;;  %v1664_v54 = vmax.f32 %v11425_v45, 0.0  ;;  %v3584_v43 = vadd.f32 %v3560_v30, %v3506_v18  ;;  %v3623_v39 = vmul.f32 %v11163_v40, %v7964_v20 }
 0x340   : > { %v3605_v60 = vadd.f32 %v3597_v55, %v3583_v37  ;;  %v1679_v12 = vmul.f32 %v1671_v38, %v1663_v33  ;;  %v3624_v3 = vmul.f32 %v11163_v40, %v7966_v21  ;;  %v3655_v57 = vrot.slane %v3621_v0, 1 }
 0x341   : > { %v3656_v49 = vrot.slane %v3622_v22, 1  ;;  %v3606_v42 = vadd.f32 %v3598_v36, %v3584_v43  ;;  %v3658_v31 = vrot.slane %v3623_v39, 1  ;;  %v3699_v53 = vmul.f32 %v12477_v27, %v7957_v15 }
 0x342   : > { %v3700_v6 = vmul.f32 %v12477_v27, %v7959_v16  ;;  %v3659_v26 = vrot.slane %v3624_v3, 1  ;;  %v3701_v35 = vmul.f32 %v12477_v27, %v7964_v20  ;;  %v3702_v38 = vmul.f32 %v12477_v27, %v7966_v21 }
 0x343   : > { %v3657_v52 = vsel %vm471_vm0, %v3655_v57, %v3656_v49  ;;  %v3733_v34 = vrot.slane %v3699_v53, 2  ;;  %v3775_v33 = vmul.f32 %v12478_v41, %v7964_v20  ;;  %v3776_v37 = vmul.f32 %v12478_v41, %v12422_v10 }
 0x344   : > { %v3683_v45 = vadd.f32 %v3657_v52, %v3605_v60  ;;  %v3734_v47 = vrot.slane %v3700_v6, 2  ;;  %v3660_v18 = vsel %vm471_vm0, %v3658_v31, %v3659_v26  ;;  %v3736_v51 = vrot.slane %v3701_v35, 2 }
 0x345   : > { %v3737_v5 = vrot.slane %v3702_v38, 2  ;;  %v3684_v55 = vadd.f32 %v3660_v18, %v3606_v42  ;;  %v3799_v30 = vmul.f32 %v11200_v62, %v7964_v20  ;;  %v3800_v0 = vmul.f32 %v11200_v62, %v7966_v21 }
 0x346   : > { %v3735_v36 = vsel %vm512_vm1, %v3733_v34, %v3734_v47  ;;  %v3801_v60 = vmul.f32 %v11200_v62, %v12422_v10  ;;  %v3802_v39 = vmul.f32 %v11200_v62, %v12423_v19  ;;  %v3877_v42 = vmul.f32 %v11214_v28, %v7964_v20 }
 0x347   : > { %v3738_v22 = vsel %vm512_vm1, %v3736_v51, %v3737_v5  ;;  %v3761_v43 = vadd.f32 %v3735_v36, %v3683_v45  ;;  %v3833_v57 = vrot.slane %v3799_v30, 1  ;;  %v3834_v49 = vrot.slane %v3800_v0, 1  ;;  %v12479_v0 = vld [vmem:[#allocation6_spill] sm:$0xff] }
 0x348   : > { %v3762_v3 = vadd.f32 %v3738_v22, %v3684_v55  ;;  %v3836_v53 = vrot.slane %v3801_v60, 1  ;;  %v3837_v6 = vrot.slane %v3802_v39, 1  ;;  %v3878_v52 = vmul.f32 %v11214_v28, %v7966_v21 }
 0x349   : > { %v3783_v31 = vadd.f32 %v3775_v33, %v3761_v43  ;;  %v3835_v35 = vsel %vm471_vm0, %v3833_v57, %v3834_v49  ;;  %v3879_v38 = vmul.f32 %v11214_v28, %v12422_v10  ;;  %v3880_v45 = vmul.f32 %v11214_v28, %v12423_v19  ;;  %v12480_v43 = vld [vmem:[#allocation7_spill] sm:$0xff]  ;;  %v12481_v57 = vld [vmem:[#allocation8_spill] sm:$0xff] }
 0x34a   : > { %v3784_v26 = vadd.f32 %v3776_v37, %v3762_v3  ;;  %v3838_v34 = vsel %vm471_vm0, %v3836_v53, %v3837_v6  ;;  %v3911_v18 = vrot.slane %v3877_v42, 2  ;;  %v3912_v51 = vrot.slane %v3878_v52, 2  ;;  %v12484_v52 = vld [vmem:[#allocation11_spill] sm:$0xff] }
 0x34b   : > { %v3861_v47 = vadd.f32 %v3835_v35, %v3783_v31  ;;  %v11480_v33 = vmul.f32 %v11419_v44, %v1664_v54  ;;  %v3914_v55 = vrot.slane %v3879_v38, 2  ;;  %v3915_v36 = vrot.slane %v3880_v45, 2  ;;  %v12482_v54 = vld [vmem:[#allocation10_spill] sm:$0xff] }
 0x34c   : > { %v3862_v5 = vadd.f32 %v3838_v34, %v3784_v26  ;;  %v11483_v37 = vsel %vm6501_vm2, %v1679_v12, %v7333_v2  ;;  %v3913_v30 = vsel %vm512_vm1, %v3911_v18, %v3912_v51  ;;  %v3983_v22 = vmul.f32 %v9786_v58, %v12479_v0  ;;  %v12483_v12 = vld [vmem:[#allocation9_spill] sm:$0xff] }
 0x34d   : > { %v3984_v60 = vmul.f32 %v12476_v17, %v12480_v43  ;;  %v3916_v39 = vsel %vm512_vm1, %v3914_v55, %v3915_v36  ;;  %v3939_v3 = vadd.f32 %v3913_v30, %v3861_v47  ;;  %v3431_v44 = vmul.f32 %v11092_v24, %v12481_v57  ;;  %v11515_v36 = vpop.permute.xlu0 %7326 }
 0x34e   : > { %v3432_v49 = vmul.f32 %v11092_v24, %v12482_v54  ;;  %v3940_v42 = vadd.f32 %v3916_v39, %v3862_v5  ;;  %v3451_v2 = vmul.f32 %v11104_v1, %v12481_v57  ;;  %v3452_v31 = vmul.f32 %v11104_v1, %v12483_v12 }
 0x34f   : > { %v3453_v53 = vmul.f32 %v11104_v1, %v12482_v54  ;;  %v3953_v6 = vmul.f32 %v11244_v46, %v3939_v3  ;;  %v3454_v26 = vmul.f32 %v11104_v1, %v12484_v52  ;;  %v3529_v35 = vmul.f32 %v11118_v29, %v12481_v57 }
 0x350   : > { %v3530_v24 = vmul.f32 %v11118_v29, %v12483_v12  ;;  %v3954_v38 = vmul.f32 %v11244_v46, %v3940_v42  ;;  %v3489_v45 = vrot.slane %v3451_v2, 1  ;;  %v3490_v34 = vrot.slane %v3452_v31, 1 }
 0x351   : > { %v3492_v47 = vrot.slane %v3453_v53, 1  ;;  %v3967_v18 = vadd.f32 %v11261_v4, %v3953_v6  ;;  %v3493_v51 = vrot.slane %v3454_v26, 1  ;;  %v3531_v5 = vmul.f32 %v11118_v29, %v12482_v54 }
 0x352   : > { %v3532_v1 = vmul.f32 %v11118_v29, %v12484_v52  ;;  %v3968_v55 = vadd.f32 %v11261_v4, %v3954_v38  ;;  %v3491_v30 = vsel %vm471_vm0, %v3489_v45, %v3490_v34  ;;  %v3567_v0 = vrot.slane %v3529_v35, 2 }
 0x353   : > { %v3568_v43 = vrot.slane %v3530_v24, 2  ;;  %v3975_v39 = vmax.f32 %v3967_v18, 0.0  ;;  %v3494_v3 = vsel %vm471_vm0, %v3492_v47, %v3493_v51  ;;  %v3509_v42 = vadd.f32 %v3491_v30, %v3431_v44 }
 0x354   : > { %v3570_v2 = vrot.slane %v3531_v5, 2  ;;  %v3976_v31 = vmax.f32 %v3968_v55, 0.0  ;;  %v3510_v53 = vadd.f32 %v3494_v3, %v3432_v49  ;;  %v3571_v26 = vrot.slane %v3532_v1, 2  ;;  %v12486_v1 = vld [vmem:[#allocation13_spill] sm:$0xff] }
 0x355   : > { %v3569_v6 = vsel %vm512_vm1, %v3567_v0, %v3568_v43  ;;  %v7329_v29 = vunpack.i.h.bf16 %v11515_v36  ;;  %v3601_v38 = vmul.f32 %v11155_v11, %v12482_v54  ;;  %v3602_v35 = vmul.f32 %v11155_v11, %v12485_v56 }
 0x356   : > { %v3587_v63 = vadd.f32 %v3569_v6, %v3509_v42  ;;  %v7328_v24 = vunpack.i.l.bf16 %v11515_v36  ;;  %v3572_v45 = vsel %vm512_vm1, %v3570_v2, %v3571_v26  ;;  %v3629_v44 = vmul.f32 %v11163_v40, %v12482_v54 }
 0x357   : > { %v3630_v49 = vmul.f32 %v11163_v40, %v12484_v52  ;;  %v3991_v34 = vmul.f32 %v3983_v22, %v3975_v39  ;;  %v3588_v47 = vadd.f32 %v3572_v45, %v3510_v53  ;;  %v3631_v51 = vmul.f32 %v11163_v40, %v12485_v56 }
 0x358   : > { %v3609_v18 = vadd.f32 %v3601_v38, %v3587_v63  ;;  %v3992_v5 = vmul.f32 %v3984_v60, %v3976_v31  ;;  %v3632_v11 = vmul.f32 %v11163_v40, %v12486_v1  ;;  %v3667_v55 = vrot.slane %v3629_v44, 1 }
 0x359   : > { %v3668_v30 = vrot.slane %v3630_v49, 1  ;;  %v3610_v0 = vadd.f32 %v3602_v35, %v3588_v47  ;;  %v3670_v43 = vrot.slane %v3631_v51, 1  ;;  %v3707_v3 = vmul.f32 %v12477_v27, %v12482_v54  ;;  %v12487_v35 = vld [vmem:[#allocation14_spill] sm:$0xff] }
 0x35a   : > { %v3708_v42 = vmul.f32 %v12477_v27, %v12484_v52  ;;  %v3671_v63 = vrot.slane %v3632_v11, 1  ;;  %v3709_v39 = vmul.f32 %v12477_v27, %v12485_v56  ;;  %v3710_v60 = vmul.f32 %v12477_v27, %v12486_v1 }
 0x35b   : > { %v3669_v22 = vsel %vm471_vm0, %v3667_v55, %v3668_v30  ;;  %v3745_v2 = vrot.slane %v3707_v3, 2  ;;  %v3779_v53 = vmul.f32 %v12478_v41, %v12485_v56  ;;  %v3780_v45 = vmul.f32 %v12478_v41, %v12487_v35  ;;  %v12488_v55 = vld [vmem:[#allocation25_spill] sm:$0xff] }
 0x35c   : > { %v3687_v40 = vadd.f32 %v3669_v22, %v3609_v18  ;;  %v3746_v31 = vrot.slane %v3708_v42, 2  ;;  %v3672_v6 = vsel %vm471_vm0, %v3670_v43, %v3671_v63  ;;  %v3748_v26 = vrot.slane %v3709_v39, 2  ;;  %v7342_v42 = vpop.permute.xlu1 %7341 }
 0x35d   : > { %v3749_v38 = vrot.slane %v3710_v60, 2  ;;  %v3688_v44 = vadd.f32 %v3672_v6, %v3610_v0  ;;  %v3807_v47 = vmul.f32 %v11200_v62, %v12485_v56  ;;  %v3808_v27 = vmul.f32 %v11200_v62, %v12486_v1 }
 0x35e   : > { %v3747_v49 = vsel %vm512_vm1, %v3745_v2, %v3746_v31  ;;  %v3809_v11 = vmul.f32 %v11200_v62, %v12487_v35  ;;  %v3810_v30 = vmul.f32 %v11200_v62, %v12488_v55  ;;  %v3885_v3 = vmul.f32 %v11214_v28, %v12485_v56 }
 0x35f   : > { %v3750_v18 = vsel %vm512_vm1, %v3748_v26, %v3749_v38  ;;  %v3765_v51 = vadd.f32 %v3747_v49, %v3687_v40  ;;  %v3845_v41 = vrot.slane %v3807_v47, 1  ;;  %v3846_v0 = vrot.slane %v3808_v27, 1  ;;  %v11573_v27 = vpop.permute.xlu0 %7336 }
 0x360   : > { %v3766_v43 = vadd.f32 %v3750_v18, %v3688_v44  ;;  %v3848_v63 = vrot.slane %v3809_v11, 1  ;;  %v3849_v39 = vrot.slane %v3810_v30, 1  ;;  %v3886_v60 = vmul.f32 %v11214_v28, %v12486_v1  ;;  %v11595_v30 = vpop.permute.xlu1 %7351 }
 0x361   : > { %v3787_v22 = vadd.f32 %v3779_v53, %v3765_v51  ;;  %v3847_v2 = vsel %vm471_vm0, %v3845_v41, %v3846_v0  ;;  %v3887_v31 = vmul.f32 %v11214_v28, %v12487_v35  ;;  %v3888_v62 = vmul.f32 %v11214_v28, %v12488_v55 }
 0x362   : > { %v3788_v40 = vadd.f32 %v3780_v45, %v3766_v43  ;;  %v3850_v6 = vsel %vm471_vm0, %v3848_v63, %v3849_v39  ;;  %v3923_v38 = vrot.slane %v3885_v3, 2  ;;  %v3924_v44 = vrot.slane %v3886_v60, 2 }
 0x363   : > { %v3865_v26 = vadd.f32 %v3847_v2, %v3787_v22  ;;  %v6505_v53 = vsel %vm6501_vm2, %v11480_v33, %v7334_v8  ;;  %v3926_v45 = vrot.slane %v3887_v31, 2  ;;  %v3927_v47 = vrot.slane %v3888_v62, 2  ;;  %v11625_v31 = vld [vmem:[%s12305_s2 + $0x4a] ss:$0 sm:$0xff] }
 0x364   : > { %v3866_v49 = vadd.f32 %v3850_v6, %v3788_v40  ;;  %v6530_v18 = vsel %vm6501_vm2, %v3991_v34, %v7328_v24  ;;  %v3925_v51 = vsel %vm512_vm1, %v3923_v38, %v3924_v44  ;;  %v11581_v28 = vsel %vm6519_vm4, %v11295_v48, %v7323_v59  ;;  %v12490_v48 = vld [vmem:[#allocation28_spill] sm:$0xff] }
 0x365   : > { %v12489_v61 = vunpack.i.h.bf16 %v11273_v7  ;;  %v11592_v33 = vsel %vm6501_vm2, %v3992_v5, %v7329_v29  ;;  %v3928_v24 = vsel %vm512_vm1, %v3926_v45, %v3927_v47  ;;  %v3943_v34 = vadd.f32 %v3925_v51, %v3865_v26  ;;  %v12491_v59 = vld [vmem:[#allocation32_spill] sm:$0xff]  ;;  %v12492_v29 = vld [vmem:[#allocation29_spill] sm:$0xff]  ;;  %v12494_v26 = vld [vmem:[#allocation2_spill] sm:$0xff] }
 0x366   : > { %v7344_v11 = vunpack.i.h.bf16 %v7342_v42  ;;  %v3944_v43 = vadd.f32 %v3928_v24, %v3866_v49  ;;  %v3987_v41 = vmul.f32 %v12491_v59, %v12490_v48  ;;  %v7343_v7 = vunpack.i.l.bf16 %v7342_v42  ;;  %v12493_v5 = vld [vmem:[#allocation33_spill] sm:$0xff]  ;;  %v11614_v42 = vld [vmem:[%s12305_s2 + $0x49] ss:$0 sm:$0xff] }
 0x367   : > { %v11587_v8 = vsel %vm6519_vm4, %v11289_v23, %v12489_v61  ;;  %v7338_v0 = vunpack.i.l.bf16 %v11573_v27  ;;  %v11603_v23 = vld [vmem:[%s12305_s2 + $0x48] ss:$0 sm:$0xff]  ;;  %v3957_v36 = vmul.f32 %v11244_v46, %v3943_v34  ;;  %v3988_v3 = vmul.f32 %v12493_v5, %v12492_v29 }
 0x368   : > { %v6561_v22 = vpack.c.bf16 %v11587_v8, %v11581_v28  ;;  %v3958_v39 = vmul.f32 %v11244_v46, %v3944_v43  ;;  %v11618_v60 = vsel %vm6510_vm3, %v6505_v53, %v7344_v11  ;;  %v11630_v6 = vsel %vm6510_vm3, %v11483_v37, %v7343_v7  ;;  %v12495_v53 = vld [vmem:[#allocation4_spill] sm:$0xff]  ;;  %v12496_v47 = vld [vmem:[#allocation3_spill] sm:$0xff] }
 0x369   : > { %v3971_v62 = vadd.f32 %v11261_v4, %v3957_v36  ;;  %v11633_v46 = vsel %vm6510_vm3, %v6530_v18, %v7338_v0  ;;  %v5737_v38 = vmul.f32 %v11603_v23, %v12494_v26  ;;  %v5738_v49 = vmul.f32 %v11603_v23, %v12495_v53  ;;  %v12497_v18 = vld [vmem:[#allocation5_spill] sm:$0xff] }
 0x36a   : > { %v3972_v44 = vadd.f32 %v11261_v4, %v3958_v39  ;;  %v5751_v45 = vmul.f32 %v11614_v42, %v12494_v26  ;;  %v5752_v51 = vmul.f32 %v11614_v42, %v12496_v47  ;;  %v5753_v37 = vmul.f32 %v11614_v42, %v12495_v53 }
 0x36b   : > { %v3979_v61 = vmax.f32 %v3971_v62, 0.0  ;;  %v5754_v24 = vmul.f32 %v11614_v42, %v12497_v18  ;;  %v5829_v34 = vmul.f32 %v11625_v31, %v12494_v26  ;;  %v5830_v48 = vmul.f32 %v11625_v31, %v12496_v47  ;;  %v12498_v26 = vld [vmem:[#allocation18_spill] sm:$0xff] }
 0x36c   : > { %v3980_v4 = vmax.f32 %v3972_v44, 0.0  ;;  %v5783_v11 = vrot.slane %v5751_v45, 1  ;;  %v5784_v43 = vrot.slane %v5752_v51, 1  ;;  %v5786_v0 = vrot.slane %v5753_v37, 1 }
 0x36d   : > { %v3995_v7 = vmul.f32 %v3987_v41, %v3979_v61  ;;  %v5787_v36 = vrot.slane %v5754_v24, 1  ;;  %v5831_v29 = vmul.f32 %v11625_v31, %v12495_v53  ;;  %v5832_v40 = vmul.f32 %v11625_v31, %v12497_v18  ;;  %v11663_v41 = vld [vmem:[%s12305_s2 + $0x4b] ss:$0 sm:$0xff] }
 0x36e   : > { %v3996_v39 = vmul.f32 %v3988_v3, %v3980_v4  ;;  %v5785_v62 = vsel %vm471_vm0, %v5783_v11, %v5784_v43  ;;  %v5861_v2 = vrot.slane %v5829_v34, 2  ;;  %v12499_v44 = vunpack.i.l.bf16 %v12498_v26  ;;  %v11675_v4 = vld [vmem:[%s12305_s2 + $0x4c] ss:$0 sm:$0xff] }
 0x36f   : > { %v5788_v47 = vsel %vm471_vm0, %v5786_v0, %v5787_v36  ;;  %v5815_v51 = vadd.f32 %v5785_v62, %v5737_v38  ;;  %v5862_v61 = vrot.slane %v5830_v48, 2  ;;  %v12500_v3 = vunpack.i.h.bf16 %v12498_v26 }
 0x370   : > { %v6534_v45 = vsel %vm6501_vm2, %v3995_v7, %v12499_v44  ;;  %v12501_v24 = vunpack.i.l.bf16 %v11256_v50  ;;  %v5816_v11 = vadd.f32 %v5788_v47, %v5738_v49  ;;  %v5864_v43 = vrot.slane %v5831_v29, 2  ;;  %v11690_v49 = vld [vmem:[%s12305_s2 + $0x4d] ss:$0 sm:$0xff] }
 0x371   : > { %v6535_v37 = vsel %vm6501_vm2, %v3996_v39, %v12500_v3  ;;  %v12502_v7 = vunpack.i.h.bf16 %v11256_v50  ;;  %v12503_v48 = vunpack.i.l.bf16 %v11379_v32  ;;  %v5863_v36 = vsel %vm512_vm1, %v5861_v2, %v5862_v61  ;;  %v7402_v47 = vld [vmem:[%s12308_s5 + $0x88] sm:$0xff]  }
 0x372   : > { %v6542_v34 = vsel %vm6510_vm3, %v6534_v45, %v12501_v24  ;;  %v5865_v39 = vrot.slane %v5832_v40, 2  ;;  %v12504_v62 = vunpack.i.h.bf16 %v11379_v32  ;;  %v5893_v29 = vadd.f32 %v5863_v36, %v5815_v51  ;;  %v11711_v24 = vld [vmem:[%s12305_s2 + $0x4e] ss:$0 sm:$0xff] }
 0x373   : > { %v6543_v38 = vsel %vm6510_vm3, %v6535_v37, %v12502_v7  ;;  %v6550_v0 = vsel %vm6519_vm4, %v6542_v34, %v12503_v48  ;;  %v5907_v50 = vmul.f32 %v11663_v41, %v12495_v53  ;;  %v5908_v44 = vmul.f32 %v11663_v41, %v7953_v13 }
 0x374   : > { %v6551_v26 = vsel %vm6519_vm4, %v6543_v38, %v12504_v62  ;;  %v5866_v2 = vsel %vm512_vm1, %v5864_v43, %v5865_v39  ;;  %v5929_v32 = vmul.f32 %v11675_v4, %v12495_v53  ;;  %v5930_v40 = vmul.f32 %v11675_v4, %v12497_v18  ;;  %v7809_v39 = vld [vmem:[%s12308_s5 + $0x80] sm:$0xff]   ;;  %v11736_v62 = vld [vmem:[%s12305_s2 + $0x50] ss:$0 sm:$0xff] }
 0x375   : > { %v6562_v45 = vpack.c.bf16 %v6551_v26, %v6550_v0  ;;  %v5894_v51 = vadd.f32 %v5866_v2, %v5816_v11  ;;  %v5915_v61 = vadd.f32 %v5907_v50, %v5893_v29  ;;  %v5931_v3 = vmul.f32 %v11675_v4, %v7953_v13 }
 0x376   : > { %v5932_v37 = vmul.f32 %v11675_v4, %v7955_v14  ;;  %v5961_v34 = vrot.slane %v5929_v32, 1  ;;  %v5962_v43 = vrot.slane %v5930_v40, 1  ;;  %v6007_v7 = vmul.f32 %v11690_v49, %v12495_v53  ;;  %v11728_v53 = vld [vmem:[%s12305_s2 + $0x4f] ss:$0 sm:$0xff] }
 0x377   : > { %6783 = vmatprep.mubr.bf16.mxu1 %v6562_v45  ;;  %v6008_v11 = vmul.f32 %v11690_v49, %v12497_v18  ;;  %v5916_v38 = vadd.f32 %v5908_v44, %v5894_v51  ;;  %v5964_v48 = vrot.slane %v5931_v3, 1  ;;  %v6009_v36 = vmul.f32 %v11690_v49, %v7953_v13 }
 0x378   : > { %6784 = vmatmul.mubr.bf16.vlgmr.msra.gmra.mrb[0].mxu1 %v6561_v22  ;;  %v5965_v0 = vrot.slane %v5932_v37, 1  ;;  %v5963_v18 = vsel %vm471_vm0, %v5961_v34, %v5962_v43  ;;  %v6010_v28 = vmul.f32 %v11690_v49, %v7955_v14  ;;  %v6039_v8 = vrot.slane %v6007_v7, 2 }
 0x379   : > { %7210 = vmatpush3.bf16.msra.mxu1 %v7809_v39  ;;  %v6040_v22 = vrot.slane %v6008_v11, 2  ;;  %v5993_v29 = vadd.f32 %v5963_v18, %v5915_v61  ;;  %v6042_v50 = vrot.slane %v6009_v36, 2  ;;  %v6085_v44 = vmul.f32 %v11711_v24, %v7953_v13 }
 0x37a   : > { %7211 = vmatprep.subr.bf16.mxu1 %v7402_v47  ;;  %v5966_v26 = vsel %vm471_vm0, %v5964_v48, %v5965_v0  ;;  %v6043_v32 = vrot.slane %v6010_v28, 2  ;;  %v6086_v40 = vmul.f32 %v11711_v24, %v7957_v15  ;;  %v6107_v3 = vmul.f32 %v11728_v53, %v7953_v13 }
 0x37b   : > { %v5994_v45 = vadd.f32 %v5966_v26, %v5916_v38  ;;  %v6041_v2 = vsel %vm512_vm1, %v6039_v8, %v6040_v22  ;;  %v6108_v37 = vmul.f32 %v11728_v53, %v7955_v14  ;;  %v6109_v61 = vmul.f32 %v11728_v53, %v7957_v15 }
 0x37c   : > { %v6071_v51 = vadd.f32 %v6041_v2, %v5993_v29  ;;  %v6044_v34 = vsel %vm512_vm1, %v6042_v50, %v6043_v32  ;;  %v6110_v43 = vmul.f32 %v11728_v53, %v7959_v16  ;;  %v6185_v7 = vmul.f32 %v11736_v62, %v7953_v13  ;;  %v11766_v32 = vld [vmem:[%s12306_s3 + $0x8] ss:$0 sm:$0xff] }
 0x37d   : > { %7212 = vmatpush3.bf16.msra.mxu1 %v7402_v47  ;;  %v6186_v11 = vmul.f32 %v11736_v62, %v7955_v14  ;;  %v6072_v38 = vadd.f32 %v6044_v34, %v5994_v45  ;;  %v6139_v0 = vrot.slane %v6107_v3, 1  ;;  %v6140_v36 = vrot.slane %v6108_v37, 1  ;;  %v12505_v37 = vld [vmem:[#allocation21_spill] sm:$0xff] }
 0x37e   : > { %v6093_v48 = vadd.f32 %v6085_v44, %v6071_v51  ;;  %v6142_v39 = vrot.slane %v6109_v61, 1  ;;  %v6143_v18 = vrot.slane %v6110_v43, 1  ;;  %v6187_v47 = vmul.f32 %v11736_v62, %v7957_v15  ;;  %v12506_v61 = vld [vmem:[#allocation22_spill] sm:$0xff] }
 0x37f   : > { %v6188_v28 = vmul.f32 %v11736_v62, %v7959_v16  ;;  %v6094_v8 = vadd.f32 %v6086_v40, %v6072_v38  ;;  %v6141_v22 = vsel %vm471_vm0, %v6139_v0, %v6140_v36  ;;  %v6217_v26 = vrot.slane %v6185_v7, 2 }
 0x380   : > { %v6218_v29 = vrot.slane %v6186_v11, 2  ;;  %v6144_v50 = vsel %vm471_vm0, %v6142_v39, %v6143_v18  ;;  %v6171_v2 = vadd.f32 %v6141_v22, %v6093_v48  ;;  %v6220_v45 = vrot.slane %v6187_v47, 2  ;;  %v11781_v48 = vld [vmem:[%s12307_s4 + $0x8] ss:$0 sm:$0xff] }
 0x381   : > { %v6221_v44 = vrot.slane %v6188_v28, 2  ;;  %v6172_v51 = vadd.f32 %v6144_v50, %v6094_v8  ;;  %v6293_v40 = vmul.f32 %v12448_v25, %v12505_v37  ;;  %v6294_v34 = vmul.f32 %v12446_v9, %v12506_v61 }
 0x382   : > { %v6219_v3 = vsel %vm512_vm1, %v6217_v26, %v6218_v29  ;;  %v5739_v11 = vmul.f32 %v11603_v23, %v7953_v13  ;;  %v5740_v38 = vmul.f32 %v11603_v23, %v7957_v15  ;;  %v5755_v25 = vmul.f32 %v11614_v42, %v7953_v13 }
 0x383   : > { %v6222_v43 = vsel %vm512_vm1, %v6220_v45, %v6221_v44  ;;  %v6249_v7 = vadd.f32 %v6219_v3, %v6171_v2  ;;  %v5756_v9 = vmul.f32 %v11614_v42, %v7955_v14  ;;  %v5757_v36 = vmul.f32 %v11614_v42, %v7957_v15 }
 0x384   : > { %v6250_v0 = vadd.f32 %v6222_v43, %v6172_v51  ;;  %v5758_v18 = vmul.f32 %v11614_v42, %v7959_v16  ;;  %v5833_v47 = vmul.f32 %v11625_v31, %v7953_v13  ;;  %v5834_v28 = vmul.f32 %v11625_v31, %v7955_v14 }
 0x385   : > { %v6263_v39 = vmul.f32 %v11766_v32, %v6249_v7  ;;  %v5789_v22 = vrot.slane %v5755_v25, 1  ;;  %v5790_v26 = vrot.slane %v5756_v9, 1  ;;  %v5792_v29 = vrot.slane %v5757_v36, 1 }
 0x386   : > { %v6264_v8 = vmul.f32 %v11766_v32, %v6250_v0  ;;  %v5793_v2 = vrot.slane %v5758_v18, 1  ;;  %v5835_v45 = vmul.f32 %v11625_v31, %v7957_v15  ;;  %v5836_v44 = vmul.f32 %v11625_v31, %v7959_v16 }
 0x387   : > { %v6277_v50 = vadd.f32 %v11781_v48, %v6263_v39  ;;  %v5791_v13 = vsel %vm471_vm0, %v5789_v22, %v5790_v26  ;;  %v5867_v3 = vrot.slane %v5833_v47, 2  ;;  %v5868_v14 = vrot.slane %v5834_v28, 2 }
 0x388   : > { %v6278_v51 = vadd.f32 %v11781_v48, %v6264_v8  ;;  %v5794_v61 = vsel %vm471_vm0, %v5792_v29, %v5793_v2  ;;  %v5817_v43 = vadd.f32 %v5791_v13, %v5739_v11  ;;  %v5870_v7 = vrot.slane %v5835_v45, 2 }
 0x389   : > { %v6285_v37 = vmax.f32 %v6277_v50, 0.0  ;;  %v5818_v25 = vadd.f32 %v5794_v61, %v5740_v38  ;;  %v5869_v9 = vsel %vm512_vm1, %v5867_v3, %v5868_v14  ;;  %v5871_v36 = vrot.slane %v5836_v44, 2 }
 0x38a   : > { %v6286_v0 = vmax.f32 %v6278_v51, 0.0  ;;  %v5895_v18 = vadd.f32 %v5869_v9, %v5817_v43  ;;  %v5909_v63 = vmul.f32 %v11663_v41, %v7957_v15  ;;  %v5910_v8 = vmul.f32 %v11663_v41, %v7964_v20 }
 0x38b   : > { %v6301_v39 = vmul.f32 %v6293_v40, %v6285_v37  ;;  %v5872_v28 = vsel %vm512_vm1, %v5870_v7, %v5871_v36  ;;  %v5933_v11 = vmul.f32 %v11675_v4, %v7957_v15  ;;  %v5934_v38 = vmul.f32 %v11675_v4, %v7959_v16 }
 0x38c   : > { %v6302_v47 = vmul.f32 %v6294_v34, %v6286_v0  ;;  %v5896_v22 = vadd.f32 %v5872_v28, %v5818_v25  ;;  %v5917_v26 = vadd.f32 %v5909_v63, %v5895_v18  ;;  %v5935_v40 = vmul.f32 %v11675_v4, %v7964_v20 }
 0x38d   : > { %v5936_v29 = vmul.f32 %v11675_v4, %v7966_v21  ;;  %v5967_v2 = vrot.slane %v5933_v11, 1  ;;  %v5968_v45 = vrot.slane %v5934_v38, 1  ;;  %v6011_v34 = vmul.f32 %v11690_v49, %v7957_v15 }
 0x38e   : > { %v6554_v50 = vpack.c.bf16 %v6302_v47, %v6301_v39  ;;  %v5918_v44 = vadd.f32 %v5910_v8, %v5896_v22  ;;  %v5970_v51 = vrot.slane %v5935_v40, 1  ;;  %v6012_v3 = vmul.f32 %v11690_v49, %v7959_v16 }
 0x38f   : > { %v5971_v13 = vrot.slane %v5936_v29, 1  ;;  %v5969_v63 = vsel %vm471_vm0, %v5967_v2, %v5968_v45  ;;  %v6013_v14 = vmul.f32 %v11690_v49, %v7964_v20  ;;  %v6014_v37 = vmul.f32 %v11690_v49, %v7966_v21 }
 0x390   : > { %7213 = vmatprep.mubr.msk.bf16.mxu1 %vm6501_vm2, %v6554_v50  ;;  %v6045_v61 = vrot.slane %v6011_v34, 2  ;;  %v5995_v15 = vadd.f32 %v5969_v63, %v5917_v26  ;;  %v6046_v7 = vrot.slane %v6012_v3, 2  ;;  %v6087_v0 = vmul.f32 %v11711_v24, %v7964_v20 }
 0x391   : > { %v5972_v43 = vsel %vm471_vm0, %v5970_v51, %v5971_v13  ;;  %v6048_v16 = vrot.slane %v6013_v14, 2  ;;  %v6049_v9 = vrot.slane %v6014_v37, 2  ;;  %v6088_v36 = vmul.f32 %v11711_v24, %v12422_v10 }
 0x392   : > { %v5996_v25 = vadd.f32 %v5972_v43, %v5918_v44  ;;  %v6047_v39 = vsel %vm512_vm1, %v6045_v61, %v6046_v7  ;;  %v6111_v18 = vmul.f32 %v11728_v53, %v7964_v20  ;;  %v6112_v8 = vmul.f32 %v11728_v53, %v7966_v21 }
 0x393   : > { %v6113_v47 = vmul.f32 %v11728_v53, %v12422_v10  ;;  %v6050_v28 = vsel %vm512_vm1, %v6048_v16, %v6049_v9  ;;  %v6073_v11 = vadd.f32 %v6047_v39, %v5995_v15  ;;  %v6114_v38 = vmul.f32 %v11728_v53, %v12423_v19  ;;  %v12508_v16 = vld [vmem:[#allocation16_spill] sm:$0xff]  ;;  %v7810_v39 = vld [vmem:[%s12305_s2] ss:$0 sm:$0xff] }
 0x394   : > { %v6189_v22 = vmul.f32 %v11736_v62, %v7964_v20  ;;  %v6074_v26 = vadd.f32 %v6050_v28, %v5996_v25  ;;  %v6145_v40 = vrot.slane %v6111_v18, 1  ;;  %v6146_v29 = vrot.slane %v6112_v8, 1 }
 0x395   : > { %v6148_v50 = vrot.slane %v6113_v47, 1  ;;  %v6095_v2 = vadd.f32 %v6087_v0, %v6073_v11  ;;  %v6149_v45 = vrot.slane %v6114_v38, 1  ;;  %v6190_v34 = vmul.f32 %v11736_v62, %v7966_v21  ;;  %v12507_v0 = vld [vmem:[#allocation15_spill] sm:$0xff]  ;;  %v7811_v47 = vld [vmem:[%s12305_s2 + $0x1] ss:$0 sm:$0xff] }
 0x396   : > { %v6191_v44 = vmul.f32 %v11736_v62, %v12422_v10  ;;  %v6096_v51 = vadd.f32 %v6088_v36, %v6074_v26  ;;  %v6147_v13 = vsel %vm471_vm0, %v6145_v40, %v6146_v29  ;;  %v6192_v3 = vmul.f32 %v11736_v62, %v12423_v19  ;;  %v7812_v29 = vld [vmem:[%s12305_s2 + $0x2] ss:$0 sm:$0xff] }
 0x397   : > { %v6223_v63 = vrot.slane %v6189_v22, 2  ;;  %v6150_v14 = vsel %vm471_vm0, %v6148_v50, %v6149_v45  ;;  %v6173_v37 = vadd.f32 %v6147_v13, %v6095_v2  ;;  %v6224_v61 = vrot.slane %v6190_v34, 2 }
 0x398   : > { %v6226_v43 = vrot.slane %v6191_v44, 2  ;;  %v6174_v15 = vadd.f32 %v6150_v14, %v6096_v51  ;;  %v6227_v7 = vrot.slane %v6192_v3, 2  ;;  %v6295_v25 = vmul.f32 %v9786_v58, %v12507_v0 }
 0x399   : > { %v6296_v9 = vmul.f32 %v12476_v17, %v12508_v16  ;;  %v6225_v36 = vsel %vm512_vm1, %v6223_v63, %v6224_v61  ;;  %v1117_v18 = vmul.f32 %v7810_v39, %v7964_v20  ;;  %v1118_v8 = vmul.f32 %v7810_v39, %v12422_v10 }
 0x39a   : > { %v1135_v28 = vmul.f32 %v7811_v47, %v7964_v20  ;;  %v6228_v58 = vsel %vm512_vm1, %v6226_v43, %v6227_v7  ;;  %v6251_v11 = vadd.f32 %v6225_v36, %v6173_v37  ;;  %v1136_v17 = vmul.f32 %v7811_v47, %v7966_v21 }
 0x39b   : > { %v1137_v38 = vmul.f32 %v7811_v47, %v12422_v10  ;;  %v6252_v22 = vadd.f32 %v6228_v58, %v6174_v15  ;;  %v1138_v26 = vmul.f32 %v7811_v47, %v12423_v19  ;;  %v1213_v50 = vmul.f32 %v7812_v29, %v7964_v20 }
 0x39c   : > { %v1171_v40 = vrot.slane %v1135_v28, 1  ;;  %v6265_v2 = vmul.f32 %v11766_v32, %v6251_v11  ;;  %v1172_v45 = vrot.slane %v1136_v17, 1  ;;  %v1214_v44 = vmul.f32 %v7812_v29, %v7966_v21  ;;  %v7813_v17 = vld [vmem:[%s12305_s2 + $0x3] ss:$0 sm:$0xff] }
 0x39d   : > { %v1174_v34 = vrot.slane %v1137_v38, 1  ;;  %v6266_v51 = vmul.f32 %v11766_v32, %v6252_v22  ;;  %v1175_v13 = vrot.slane %v1138_v26, 1  ;;  %v1215_v3 = vmul.f32 %v7812_v29, %v12422_v10 }
 0x39e   : > { %v1216_v63 = vmul.f32 %v7812_v29, %v12423_v19  ;;  %v6279_v14 = vadd.f32 %v11781_v48, %v6265_v2  ;;  %v1173_v37 = vsel %vm471_vm0, %v1171_v40, %v1172_v45  ;;  %v1249_v61 = vrot.slane %v1213_v50, 2 }
 0x39f   : > { %v1250_v43 = vrot.slane %v1214_v44, 2  ;;  %v6280_v15 = vadd.f32 %v11781_v48, %v6266_v51  ;;  %v1176_v7 = vsel %vm471_vm0, %v1174_v34, %v1175_v13  ;;  %v1195_v0 = vadd.f32 %v1173_v37, %v1117_v18  ;;  %v7814_v18 = vld [vmem:[%s12305_s2 + $0x4] ss:$0 sm:$0xff] }
 0x3a0   : > { %v1252_v16 = vrot.slane %v1215_v3, 2  ;;  %v6287_v36 = vmax.f32 %v6279_v14, 0.0  ;;  %v1196_v39 = vadd.f32 %v1176_v7, %v1118_v8  ;;  %v1253_v28 = vrot.slane %v1216_v63, 2 }
 0x3a1   : > { %v1251_v47 = vsel %vm512_vm1, %v1249_v61, %v1250_v43  ;;  %v6288_v58 = vmax.f32 %v6280_v15, 0.0  ;;  %v1287_v38 = vmul.f32 %v7813_v17, %v12422_v10  ;;  %v1288_v22 = vmul.f32 %v7813_v17, %v12481_v57 }
 0x3a2   : > { %v1273_v11 = vadd.f32 %v1251_v47, %v1195_v0  ;;  %v6303_v26 = vmul.f32 %v6295_v25, %v6287_v36  ;;  %v1254_v40 = vsel %vm512_vm1, %v1252_v16, %v1253_v28  ;;  %v1313_v8 = vmul.f32 %v7814_v18, %v12422_v10  ;;  %v7815_v25 = vld [vmem:[%s12305_s2 + $0x5] ss:$0 sm:$0xff] }
 0x3a3   : > { %v1314_v29 = vmul.f32 %v7814_v18, %v12423_v19  ;;  %v6304_v50 = vmul.f32 %v6296_v9, %v6288_v58  ;;  %v1274_v2 = vadd.f32 %v1254_v40, %v1196_v39  ;;  %v1315_v34 = vmul.f32 %v7814_v18, %v12481_v57  ;;  %v7816_v39 = vld [vmem:[%s12305_s2 + $0x6] ss:$0 sm:$0xff] }
 0x3a4   : > { %v1295_v45 = vadd.f32 %v1287_v38, %v1273_v11  ;;  %v1316_v44 = vmul.f32 %v7814_v18, %v12483_v12  ;;  %v1349_v51 = vrot.slane %v1313_v8, 1  ;;  %v1391_v3 = vmul.f32 %v7815_v25, %v12422_v10 }
 0x3a5   : > { %v1350_v13 = vrot.slane %v1314_v29, 1  ;;  %v6557_v63 = vpack.c.bf16 %v6304_v50, %v6303_v26  ;;  %v1296_v14 = vadd.f32 %v1288_v22, %v1274_v2  ;;  %v1352_v37 = vrot.slane %v1315_v34, 1  ;;  %v7817_v26 = vld [vmem:[%s12305_s2 + $0x7] ss:$0 sm:$0xff] }
 0x3a6   : > { %v1392_v61 = vmul.f32 %v7815_v25, %v12423_v19  ;;  %v1353_v43 = vrot.slane %v1316_v44, 1  ;;  %v1393_v15 = vmul.f32 %v7815_v25, %v12481_v57  ;;  %v1394_v7 = vmul.f32 %v7815_v25, %v12483_v12  ;;  %v11927_v25 = vpop.permute.xlu0 %7346 }
 0x3a7   : > { %v1351_v9 = vsel %vm471_vm0, %v1349_v51, %v1350_v13  ;;  %7214 = vmatmul.mubr.msk.bf16.vlgmr.msra.gmra.mrb[4].mxu1 %vm6501_vm2, %v6557_v63  ;;  %v1427_v16 = vrot.slane %v1391_v3, 2  ;;  %v1465_v47 = vmul.f32 %v7816_v39, %v12481_v57  ;;  %v1466_v17 = vmul.f32 %v7816_v39, %v12482_v54  ;;  %v7818_v51 = vld [vmem:[%s12305_s2 + $0x8] ss:$0 sm:$0xff] }
 0x3a8   : > { %v1373_v0 = vadd.f32 %v1351_v9, %v1295_v45  ;;  %v1428_v36 = vrot.slane %v1392_v61, 2  ;;  %v1354_v28 = vsel %vm471_vm0, %v1352_v37, %v1353_v43  ;;  %v1430_v58 = vrot.slane %v1393_v15, 2 }
 0x3a9   : > { %v1431_v11 = vrot.slane %v1394_v7, 2  ;;  %v1374_v38 = vadd.f32 %v1354_v28, %v1296_v14  ;;  %v1491_v40 = vmul.f32 %v7817_v26, %v12481_v57  ;;  %v1492_v18 = vmul.f32 %v7817_v26, %v12483_v12 }
 0x3aa   : > { %v1429_v22 = vsel %vm512_vm1, %v1427_v16, %v1428_v36  ;;  %v1493_v50 = vmul.f32 %v7817_v26, %v12482_v54  ;;  %v1494_v2 = vmul.f32 %v7817_v26, %v12484_v52  ;;  %v1569_v13 = vmul.f32 %v7818_v51, %v12481_v57 }
 0x3ab   : > { %v1432_v8 = vsel %vm512_vm1, %v1430_v58, %v1431_v11  ;;  %v1451_v29 = vadd.f32 %v1429_v22, %v1373_v0  ;;  %v1527_v34 = vrot.slane %v1491_v40, 1  ;;  %v1528_v44 = vrot.slane %v1492_v18, 1  ;;  %v12510_v22 = vld [vmem:[#allocation41_spill] sm:$0xff]  ;;  %v12511_v40 = vld [vmem:[#allocation36_spill] sm:$0xff]  ;;  %v12512_v18 = vld [vmem:[#allocation42_spill] sm:$0xff] }
 0x3ac   : > { %v1452_v45 = vadd.f32 %v1432_v8, %v1374_v38  ;;  %v1530_v63 = vrot.slane %v1493_v50, 1  ;;  %v1531_v14 = vrot.slane %v1494_v2, 1  ;;  %v1570_v37 = vmul.f32 %v7818_v51, %v12483_v12  ;;  %v12509_v38 = vld [vmem:[#allocation35_spill] sm:$0xff]  ;;  %v7819_v2 = vld [vmem:[%s12305_s2 + $0x24] ss:$0 sm:$0xff] }
 0x3ad   : > { %v1473_v3 = vadd.f32 %v1465_v47, %v1451_v29  ;;  %v1529_v9 = vsel %vm471_vm0, %v1527_v34, %v1528_v44  ;;  %v1571_v43 = vmul.f32 %v7818_v51, %v12482_v54  ;;  %v1572_v15 = vmul.f32 %v7818_v51, %v12484_v52  ;;  %v7820_v51 = vld [vmem:[%s12305_s2 + $0x25] ss:$0 sm:$0xff] }
 0x3ae   : > { %v1474_v61 = vadd.f32 %v1466_v17, %v1452_v45  ;;  %v1532_v7 = vsel %vm471_vm0, %v1530_v63, %v1531_v14  ;;  %v1605_v16 = vrot.slane %v1569_v13, 2  ;;  %v1606_v36 = vrot.slane %v1570_v37, 2  ;;  %v7821_v14 = vld [vmem:[%s12306_s3] ss:$0 sm:$0xff] }
 0x3af   : > { %v1551_v0 = vadd.f32 %v1529_v9, %v1473_v3  ;;  %v1608_v47 = vrot.slane %v1571_v43, 2  ;;  %v1609_v58 = vrot.slane %v1572_v15, 2  ;;  %v1673_v26 = vmul.f32 %v12510_v22, %v12509_v38  ;;  %v7822_v9 = vld [vmem:[%s12305_s2 + $0x26] ss:$0 sm:$0xff] }
 0x3b0   : > { %v1552_v28 = vadd.f32 %v1532_v7, %v1474_v61  ;;  %v1607_v17 = vsel %vm512_vm1, %v1605_v16, %v1606_v36  ;;  %v1674_v8 = vmul.f32 %v12512_v18, %v12511_v40  ;;  %v3429_v45 = vmul.f32 %v7819_v2, %v7964_v20 }
 0x3b1   : > { %v1610_v29 = vsel %vm512_vm1, %v1608_v47, %v1609_v58  ;;  %v1629_v50 = vadd.f32 %v1607_v17, %v1551_v0  ;;  %v3430_v34 = vmul.f32 %v7819_v2, %v12422_v10  ;;  %v3447_v13 = vmul.f32 %v7820_v51, %v7964_v20 }
 0x3b2   : > { %v1630_v44 = vadd.f32 %v1610_v29, %v1552_v28  ;;  %v3448_v3 = vmul.f32 %v7820_v51, %v7966_v21  ;;  %v3449_v63 = vmul.f32 %v7820_v51, %v12422_v10  ;;  %v3450_v61 = vmul.f32 %v7820_v51, %v12423_v19  ;;  %v7823_v28 = vld [vmem:[%s12307_s4] ss:$0 sm:$0xff]  ;;  %v11967_v29 = vpop.permute.xlu1 %7361 }
 0x3b3   : > { %v1643_v37 = vmul.f32 %v7821_v14, %v1629_v50  ;;  %v3525_v43 = vmul.f32 %v7822_v9, %v7964_v20  ;;  %v3526_v15 = vmul.f32 %v7822_v9, %v7966_v21  ;;  %v3483_v0 = vrot.slane %v3447_v13, 1 }
 0x3b4   : > { %v1644_v7 = vmul.f32 %v7821_v14, %v1630_v44  ;;  %v3484_v16 = vrot.slane %v3448_v3, 1  ;;  %v3486_v36 = vrot.slane %v3449_v63, 1  ;;  %v3487_v58 = vrot.slane %v3450_v61, 1 }
 0x3b5   : > { %v1657_v47 = vadd.f32 %v7823_v28, %v1643_v37  ;;  %v3527_v17 = vmul.f32 %v7822_v9, %v12422_v10  ;;  %v3528_v38 = vmul.f32 %v7822_v9, %v12423_v19  ;;  %v3561_v2 = vrot.slane %v3525_v43, 2 }
 0x3b6   : > { %v1658_v40 = vadd.f32 %v7823_v28, %v1644_v7  ;;  %v3485_v50 = vsel %vm471_vm0, %v3483_v0, %v3484_v16  ;;  %v3562_v44 = vrot.slane %v3526_v15, 2  ;;  %v3488_v13 = vsel %vm471_vm0, %v3486_v36, %v3487_v58  ;;  %v7824_v7 = vld [vmem:[%s12305_s2 + $0x27] ss:$0 sm:$0xff] }
 0x3b7   : > { %v1665_v51 = vmax.f32 %v1657_v47, 0.0  ;;  %v3507_v3 = vadd.f32 %v3485_v50, %v3429_v45  ;;  %v3564_v63 = vrot.slane %v3527_v17, 2  ;;  %v3508_v39 = vadd.f32 %v3488_v13, %v3430_v34  ;;  %v7825_v34 = vld [vmem:[%s12305_s2 + $0x28] ss:$0 sm:$0xff] }
 0x3b8   : > { %v1666_v14 = vmax.f32 %v1658_v40, 0.0  ;;  %v3563_v37 = vsel %vm512_vm1, %v3561_v2, %v3562_v44  ;;  %v3565_v61 = vrot.slane %v3528_v38, 2  ;;  %v7364_v11 = vunpack.i.h.bf16 %v11967_v29 }
 0x3b9   : > { %v3585_v9 = vadd.f32 %v3563_v37, %v3507_v3  ;;  %v3599_v43 = vmul.f32 %v7824_v7, %v12422_v10  ;;  %v3600_v15 = vmul.f32 %v7824_v7, %v12481_v57  ;;  %v7363_v0 = vunpack.i.l.bf16 %v11967_v29  ;;  %v7826_v3 = vld [vmem:[%s12305_s2 + $0x29] ss:$0 sm:$0xff]  ;;  %v7827_v7 = vld [vmem:[%s12305_s2 + $0x2a] ss:$0 sm:$0xff]  ;;  %v7372_v29 = vpop.permute.xlu1 %7371 }
 0x3ba   : > { %v3566_v45 = vsel %vm512_vm1, %v3564_v63, %v3565_v61  ;;  %v3625_v16 = vmul.f32 %v7825_v34, %v12422_v10  ;;  %v3626_v36 = vmul.f32 %v7825_v34, %v12423_v19  ;;  %v1681_v28 = vmul.f32 %v1673_v26, %v1665_v51 }
 0x3bb   : > { %v3586_v47 = vadd.f32 %v3566_v45, %v3508_v39  ;;  %v3607_v58 = vadd.f32 %v3599_v43, %v3585_v9  ;;  %v3627_v17 = vmul.f32 %v7825_v34, %v12481_v57  ;;  %v1682_v38 = vmul.f32 %v1674_v8, %v1666_v14 }
 0x3bc   : > { %v3628_v40 = vmul.f32 %v7825_v34, %v12483_v12  ;;  %v3661_v50 = vrot.slane %v3625_v16, 1  ;;  %v3662_v2 = vrot.slane %v3626_v36, 1  ;;  %v3703_v63 = vmul.f32 %v7826_v3, %v12422_v10 }
 0x3bd   : > { %v3608_v44 = vadd.f32 %v3600_v15, %v3586_v47  ;;  %v3664_v13 = vrot.slane %v3627_v17, 1  ;;  %v3704_v37 = vmul.f32 %v7826_v3, %v12423_v19  ;;  %v3705_v51 = vmul.f32 %v7826_v3, %v12481_v57 }
 0x3be   : > { %v3663_v39 = vsel %vm471_vm0, %v3661_v50, %v3662_v2  ;;  %v3665_v26 = vrot.slane %v3628_v40, 1  ;;  %v3706_v8 = vmul.f32 %v7826_v3, %v12483_v12  ;;  %v3739_v61 = vrot.slane %v3703_v63, 2 }
 0x3bf   : > { %v3685_v14 = vadd.f32 %v3663_v39, %v3607_v58  ;;  %v3740_v9 = vrot.slane %v3704_v37, 2  ;;  %v3777_v43 = vmul.f32 %v7827_v7, %v12481_v57  ;;  %v3742_v45 = vrot.slane %v3705_v51, 2  ;;  %v7828_v58 = vld [vmem:[%s12305_s2 + $0x2b] ss:$0 sm:$0xff]  ;;  %v7829_v39 = vld [vmem:[%s12305_s2 + $0x2c] ss:$0 sm:$0xff] }
 0x3c0   : > { %v3666_v15 = vsel %vm471_vm0, %v3664_v13, %v3665_v26  ;;  %v3743_v34 = vrot.slane %v3706_v8, 2  ;;  %v3778_v16 = vmul.f32 %v7827_v7, %v12482_v54  ;;  %v3803_v17 = vmul.f32 %v7828_v58, %v12481_v57  ;;  %v12015_v7 = vpop.permute.xlu0 %7356 }
 0x3c1   : > { %v3686_v36 = vadd.f32 %v3666_v15, %v3608_v44  ;;  %v3741_v47 = vsel %vm512_vm1, %v3739_v61, %v3740_v9  ;;  %v3804_v40 = vmul.f32 %v7828_v58, %v12483_v12  ;;  %v3805_v13 = vmul.f32 %v7828_v58, %v12482_v54 }
 0x3c2   : > { %v3744_v50 = vsel %vm512_vm1, %v3742_v45, %v3743_v34  ;;  %v3763_v2 = vadd.f32 %v3741_v47, %v3685_v14  ;;  %v3806_v3 = vmul.f32 %v7828_v58, %v12484_v52  ;;  %v3839_v37 = vrot.slane %v3803_v17, 1 }
 0x3c3   : > { %v3764_v63 = vadd.f32 %v3744_v50, %v3686_v36  ;;  %v3840_v44 = vrot.slane %v3804_v40, 1  ;;  %v3881_v26 = vmul.f32 %v7829_v39, %v12481_v57  ;;  %v3842_v8 = vrot.slane %v3805_v13, 1 }
 0x3c4   : > { %v3785_v51 = vadd.f32 %v3777_v43, %v3763_v2  ;;  %v3843_v61 = vrot.slane %v3806_v3, 1  ;;  %v3882_v9 = vmul.f32 %v7829_v39, %v12483_v12  ;;  %v3883_v45 = vmul.f32 %v7829_v39, %v12482_v54 }
 0x3c5   : > { %v3786_v14 = vadd.f32 %v3778_v16, %v3764_v63  ;;  %v3841_v15 = vsel %vm471_vm0, %v3839_v37, %v3840_v44  ;;  %v3884_v34 = vmul.f32 %v7829_v39, %v12484_v52  ;;  %v3917_v58 = vrot.slane %v3881_v26, 2  ;;  %v12514_v37 = vld [vmem:[#allocation37_spill] sm:$0xff] }
 0x3c6   : > { %v3844_v36 = vsel %vm471_vm0, %v3842_v8, %v3843_v61  ;;  %v3863_v47 = vadd.f32 %v3841_v15, %v3785_v51  ;;  %v3918_v17 = vrot.slane %v3882_v9, 2  ;;  %v12513_v43 = vunpack.i.h.bf16 %v11573_v27  ;;  %v12519_v15 = vld [vmem:[#allocation38_spill] sm:$0xff] }
 0x3c7   : > { %v3864_v50 = vadd.f32 %v3844_v36, %v3786_v14  ;;  %v3920_v2 = vrot.slane %v3883_v45, 2  ;;  %v3921_v13 = vrot.slane %v3884_v34, 2  ;;  %v6507_v16 = vsel %vm6501_vm2, %v1682_v38, %v7364_v11  ;;  %v12050_v14 = vpop.permute.xlu0 %7366 }
 0x3c8   : > { %v6539_v40 = vsel %vm6510_vm3, %v11592_v33, %v12513_v43  ;;  %v6506_v3 = vsel %vm6501_vm2, %v1681_v28, %v7363_v0  ;;  %v3919_v63 = vsel %vm512_vm1, %v3917_v58, %v3918_v17  ;;  %v3985_v44 = vmul.f32 %v12510_v22, %v12514_v37 }
 0x3c9   : > { %v3922_v27 = vsel %vm512_vm1, %v3920_v2, %v3921_v13  ;;  %v3941_v39 = vadd.f32 %v3919_v63, %v3863_v47  ;;  %v12515_v33 = vunpack.i.l.bf16 %v11927_v25  ;;  %v12516_v51 = vunpack.i.h.bf16 %v11927_v25 }
 0x3ca   : > { %v3942_v38 = vadd.f32 %v3922_v27, %v3864_v50  ;;  %v12517_v28 = vunpack.i.l.bf16 %v11595_v30  ;;  %v12518_v61 = vunpack.i.h.bf16 %v11595_v30  ;;  %v3986_v45 = vmul.f32 %v12512_v18, %v12519_v15 }
 0x3cb   : > { %v6546_v26 = vsel %vm6519_vm4, %v11633_v46, %v12515_v33  ;;  %v6547_v11 = vsel %vm6519_vm4, %v6539_v40, %v12516_v51  ;;  %v7830_v46 = vld [vmem:[%s12306_s3 + $0x4] ss:$0 sm:$0xff]  ;;  %v7359_v34 = vunpack.i.h.bf16 %v12015_v7  ;;  %v7374_v30 = vunpack.i.h.bf16 %v7372_v29 }
 0x3cc   : > { %v6556_v0 = vpack.c.bf16 %v6547_v11, %v6546_v26  ;;  %v6522_v8 = vsel %vm6519_vm4, %v11630_v6, %v12517_v28  ;;  %v6523_v9 = vsel %vm6519_vm4, %v11618_v60, %v12518_v61  ;;  %v3955_v25 = vmul.f32 %v7830_v46, %v3941_v39  ;;  %v7831_v60 = vld [vmem:[%s12307_s4 + $0x4] ss:$0 sm:$0xff] }
 0x3cd   : > { %v6555_v36 = vpack.c.bf16 %v6523_v9, %v6522_v8  ;;  %v3956_v47 = vmul.f32 %v7830_v46, %v3942_v38  ;;  %v7358_v6 = vunpack.i.l.bf16 %v12015_v7  ;;  %v7373_v58 = vunpack.i.l.bf16 %v7372_v29 }
 0x3ce   : > { %6767 = vmatprep.mubr.bf16.mxu0 %v6556_v0  ;;  %v3969_v17 = vadd.f32 %v7831_v60, %v3955_v25  ;;  %v7369_v43 = vunpack.i.h.bf16 %v12050_v14  ;;  %v5741_v40 = vmul.f32 %v11603_v23, %v7964_v20  ;;  %v5742_v50 = vmul.f32 %v11603_v23, %v12422_v10 }
 0x3cf   : > { %6768 = vmatmul.mubr.bf16.gmra.mrb[4].mxu0 %v6555_v36  ;;  %v3970_v2 = vadd.f32 %v7831_v60, %v3956_v47  ;;  %v5759_v13 = vmul.f32 %v11614_v42, %v7964_v20  ;;  %v5760_v63 = vmul.f32 %v11614_v42, %v7966_v21  ;;  %v5761_v37 = vmul.f32 %v11614_v42, %v12422_v10 }
 0x3d0   : > { %v3977_v27 = vmax.f32 %v3969_v17, 0.0  ;;  %v5762_v39 = vmul.f32 %v11614_v42, %v12423_v19  ;;  %v5837_v33 = vmul.f32 %v11625_v31, %v7964_v20  ;;  %v5838_v23 = vmul.f32 %v11625_v31, %v7966_v21 }
 0x3d1   : > { %v3978_v26 = vmax.f32 %v3970_v2, 0.0  ;;  %v5795_v51 = vrot.slane %v5759_v13, 1  ;;  %v5796_v11 = vrot.slane %v5760_v63, 1  ;;  %v5798_v29 = vrot.slane %v5761_v37, 1 }
 0x3d2   : > { %v3993_v38 = vmul.f32 %v3985_v44, %v3977_v27  ;;  %v5799_v0 = vrot.slane %v5762_v39, 1  ;;  %v5839_v28 = vmul.f32 %v11625_v31, %v12422_v10  ;;  %v5840_v8 = vmul.f32 %v11625_v31, %v12423_v19 }
 0x3d3   : > { %v7368_v42 = vunpack.i.l.bf16 %v12050_v14  ;;  %v5797_v61 = vsel %vm471_vm0, %v5795_v51, %v5796_v11  ;;  %v5873_v20 = vrot.slane %v5837_v33, 2  ;;  %v5874_v9 = vrot.slane %v5838_v23, 2  ;;  %v7841_v14 = vld [vmem:[%s12306_s3 + $0x8] ss:$0 sm:$0xff] }
 0x3d4   : > { %v12086_v21 = vsel %vm6510_vm3, %v6506_v3, %v7373_v58  ;;  %v5800_v46 = vsel %vm471_vm0, %v5798_v29, %v5799_v0  ;;  %v5819_v25 = vadd.f32 %v5797_v61, %v5741_v40  ;;  %v5876_v44 = vrot.slane %v5839_v28, 2 }
 0x3d5   : > { %v12089_v15 = vmul.f32 %v3986_v45, %v3978_v26  ;;  %v12092_v36 = vsel %vm6510_vm3, %v6507_v16, %v7374_v30  ;;  %v5820_v47 = vadd.f32 %v5800_v46, %v5742_v50  ;;  %v5875_v31 = vsel %vm512_vm1, %v5873_v20, %v5874_v9 }
 0x3d6   : > { %v12096_v60 = vsel %vm6501_vm2, %v3993_v38, %v7358_v6  ;;  %v5877_v17 = vrot.slane %v5840_v8, 2  ;;  %v5897_v2 = vadd.f32 %v5875_v31, %v5819_v25  ;;  %v5911_v3 = vmul.f32 %v11663_v41, %v12422_v10 }
 0x3d7   : > { %v5912_v58 = vmul.f32 %v11663_v41, %v12481_v57  ;;  %v5937_v45 = vmul.f32 %v11675_v4, %v12422_v10  ;;  %v5938_v16 = vmul.f32 %v11675_v4, %v12423_v19  ;;  %v5939_v30 = vmul.f32 %v11675_v4, %v12481_v57 }
 0x3d8   : > { %v5878_v6 = vsel %vm512_vm1, %v5876_v44, %v5877_v17  ;;  %v5919_v40 = vadd.f32 %v5911_v3, %v5897_v2  ;;  %v5940_v50 = vmul.f32 %v11675_v4, %v12483_v12  ;;  %v6015_v13 = vmul.f32 %v11690_v49, %v12422_v10 }
 0x3d9   : > { %v5898_v63 = vadd.f32 %v5878_v6, %v5820_v47  ;;  %v5973_v41 = vrot.slane %v5937_v45, 1  ;;  %v5974_v37 = vrot.slane %v5938_v16, 1  ;;  %v5976_v27 = vrot.slane %v5939_v30, 1 }
 0x3da   : > { %v5977_v39 = vrot.slane %v5940_v50, 1  ;;  %v6016_v33 = vmul.f32 %v11690_v49, %v12423_v19  ;;  %v6017_v23 = vmul.f32 %v11690_v49, %v12481_v57  ;;  %v6018_v26 = vmul.f32 %v11690_v49, %v12483_v12 }
 0x3db   : > { %v5920_v51 = vadd.f32 %v5912_v58, %v5898_v63  ;;  %v5975_v4 = vsel %vm471_vm0, %v5973_v41, %v5974_v37  ;;  %v6051_v11 = vrot.slane %v6015_v13, 2  ;;  %v6089_v10 = vmul.f32 %v11711_v24, %v12481_v57 }
 0x3dc   : > { %v5978_v29 = vsel %vm471_vm0, %v5976_v27, %v5977_v39  ;;  %v5997_v38 = vadd.f32 %v5975_v4, %v5919_v40  ;;  %v6052_v0 = vrot.slane %v6016_v33, 2  ;;  %v6054_v28 = vrot.slane %v6017_v23, 2  ;;  %v12520_v33 = vld [vmem:[#allocation39_spill] sm:$0xff] }
 0x3dd   : > { %v5998_v8 = vadd.f32 %v5978_v29, %v5920_v51  ;;  %v6055_v19 = vrot.slane %v6018_v26, 2  ;;  %v6090_v61 = vmul.f32 %v11711_v24, %v12482_v54  ;;  %v6115_v49 = vmul.f32 %v11728_v53, %v12481_v57  ;;  %v12521_v26 = vld [vmem:[#allocation40_spill] sm:$0xff] }
 0x3de   : > { %v6053_v20 = vsel %vm512_vm1, %v6051_v11, %v6052_v0  ;;  %v6116_v9 = vmul.f32 %v11728_v53, %v12483_v12  ;;  %v6117_v46 = vmul.f32 %v11728_v53, %v12482_v54  ;;  %v6118_v25 = vmul.f32 %v11728_v53, %v12484_v52 }
 0x3df   : > { %v6056_v44 = vsel %vm512_vm1, %v6054_v28, %v6055_v19  ;;  %v6075_v47 = vadd.f32 %v6053_v20, %v5997_v38  ;;  %v6151_v31 = vrot.slane %v6115_v49, 1  ;;  %v6193_v24 = vmul.f32 %v11736_v62, %v12481_v57  ;;  %v7833_v38 = vld [vmem:[%s12305_s2 + $0x49] ss:$0 sm:$0xff]  ;;  %v7834_v49 = vld [vmem:[%s12305_s2 + $0x4a] ss:$0 sm:$0xff] }
 0x3e0   : > { %v6076_v17 = vadd.f32 %v6056_v44, %v5998_v8  ;;  %v6152_v2 = vrot.slane %v6116_v9, 1  ;;  %v6154_v3 = vrot.slane %v6117_v46, 1  ;;  %v6155_v58 = vrot.slane %v6118_v25, 1 }
 0x3e1   : > { %v6097_v45 = vadd.f32 %v6089_v10, %v6075_v47  ;;  %v6194_v16 = vmul.f32 %v11736_v62, %v12483_v12  ;;  %v6195_v30 = vmul.f32 %v11736_v62, %v12482_v54  ;;  %v6196_v53 = vmul.f32 %v11736_v62, %v12484_v52  ;;  %v7832_v62 = vld [vmem:[%s12305_s2 + $0x48] ss:$0 sm:$0xff] }
 0x3e2   : > { %v6098_v6 = vadd.f32 %v6090_v61, %v6076_v17  ;;  %v6153_v40 = vsel %vm471_vm0, %v6151_v31, %v6152_v2  ;;  %v6156_v50 = vsel %vm471_vm0, %v6154_v3, %v6155_v58  ;;  %v6229_v13 = vrot.slane %v6193_v24, 2 }
 0x3e3   : > { %v6175_v63 = vadd.f32 %v6153_v40, %v6097_v45  ;;  %v6230_v41 = vrot.slane %v6194_v16, 2  ;;  %v6232_v37 = vrot.slane %v6195_v30, 2  ;;  %v6233_v27 = vrot.slane %v6196_v53, 2 }
 0x3e4   : > { %v6176_v39 = vadd.f32 %v6156_v50, %v6098_v6  ;;  %v6297_v23 = vmul.f32 %v12510_v22, %v12520_v33  ;;  %v6298_v51 = vmul.f32 %v12512_v18, %v12521_v26  ;;  %v5743_v4 = vmul.f32 %v7832_v62, %v12481_v57  ;;  %v7836_v26 = vld [vmem:[%s12305_s2 + $0x4c] ss:$0 sm:$0xff] }
 0x3e5   : > { %v6231_v11 = vsel %vm512_vm1, %v6229_v13, %v6230_v41  ;;  %v6234_v10 = vsel %vm512_vm1, %v6232_v37, %v6233_v27  ;;  %v5744_v29 = vmul.f32 %v7832_v62, %v12482_v54  ;;  %v5763_v22 = vmul.f32 %v7833_v38, %v12481_v57 }
 0x3e6   : > { %v6253_v0 = vadd.f32 %v6231_v11, %v6175_v63  ;;  %v6254_v18 = vadd.f32 %v6234_v10, %v6176_v39  ;;  %v5764_v28 = vmul.f32 %v7833_v38, %v12483_v12  ;;  %v5765_v8 = vmul.f32 %v7833_v38, %v12482_v54 }
 0x3e7   : > { %v5766_v19 = vmul.f32 %v7833_v38, %v12484_v52  ;;  %v5801_v61 = vrot.slane %v5763_v22, 1  ;;  %v5841_v20 = vmul.f32 %v7834_v49, %v12481_v57  ;;  %v5842_v9 = vmul.f32 %v7834_v49, %v12483_v12 }
 0x3e8   : > { %v6267_v46 = vmul.f32 %v11766_v32, %v6253_v0  ;;  %v6268_v25 = vmul.f32 %v11766_v32, %v6254_v18  ;;  %v5802_v44 = vrot.slane %v5764_v28, 1  ;;  %v5804_v47 = vrot.slane %v5765_v8, 1 }
 0x3e9   : > { %v5805_v31 = vrot.slane %v5766_v19, 1  ;;  %v5843_v24 = vmul.f32 %v7834_v49, %v12482_v54  ;;  %v5844_v17 = vmul.f32 %v7834_v49, %v12484_v52  ;;  %v5879_v2 = vrot.slane %v5841_v20, 2 }
 0x3ea   : > { %v6281_v3 = vadd.f32 %v11781_v48, %v6267_v46  ;;  %v6282_v58 = vadd.f32 %v11781_v48, %v6268_v25  ;;  %v5803_v57 = vsel %vm471_vm0, %v5801_v61, %v5802_v44  ;;  %v5880_v45 = vrot.slane %v5842_v9, 2  ;;  %v7835_v48 = vld [vmem:[%s12305_s2 + $0x4b] ss:$0 sm:$0xff]  ;;  %v7838_v9 = vld [vmem:[%s12305_s2 + $0x4e] ss:$0 sm:$0xff] }
 0x3eb   : > { %v5806_v12 = vsel %vm471_vm0, %v5804_v47, %v5805_v31  ;;  %v5821_v16 = vadd.f32 %v5803_v57, %v5743_v4  ;;  %v5882_v30 = vrot.slane %v5843_v24, 2  ;;  %v5883_v32 = vrot.slane %v5844_v17, 2 }
 0x3ec   : > { %v6289_v53 = vmax.f32 %v6281_v3, 0.0  ;;  %v6290_v6 = vmax.f32 %v6282_v58, 0.0  ;;  %v5822_v40 = vadd.f32 %v5806_v12, %v5744_v29  ;;  %v5881_v50 = vsel %vm512_vm1, %v5879_v2, %v5880_v45  ;;  %v7839_v3 = vld [vmem:[%s12305_s2 + $0x4f] ss:$0 sm:$0xff] }
 0x3ed   : > { %v5884_v13 = vsel %vm512_vm1, %v5882_v30, %v5883_v32  ;;  %v5899_v63 = vadd.f32 %v5881_v50, %v5821_v16  ;;  %v5913_v41 = vmul.f32 %v7835_v48, %v12482_v54  ;;  %v5914_v37 = vmul.f32 %v7835_v48, %v12485_v56  ;;  %v7840_v32 = vld [vmem:[%s12305_s2 + $0x50] ss:$0 sm:$0xff] }
 0x3ee   : > { %v6305_v27 = vmul.f32 %v6297_v23, %v6289_v53  ;;  %v6306_v39 = vmul.f32 %v6298_v51, %v6290_v6  ;;  %v5900_v33 = vadd.f32 %v5884_v13, %v5822_v40  ;;  %v5941_v62 = vmul.f32 %v7836_v26, %v12482_v54  ;;  %v7837_v23 = vld [vmem:[%s12305_s2 + $0x4d] ss:$0 sm:$0xff] }
 0x3ef   : > { %v5921_v4 = vadd.f32 %v5913_v41, %v5899_v63  ;;  %v5942_v11 = vmul.f32 %v7836_v26, %v12484_v52  ;;  %v5943_v10 = vmul.f32 %v7836_v26, %v12485_v56  ;;  %v5944_v29 = vmul.f32 %v7836_v26, %v12486_v1 }
 0x3f0   : > { %v6560_v38 = vpack.c.bf16 %v6306_v39, %v6305_v27  ;;  %v5922_v22 = vadd.f32 %v5914_v37, %v5900_v33  ;;  %v5979_v0 = vrot.slane %v5941_v62, 1  ;;  %v6019_v51 = vmul.f32 %v7837_v23, %v12482_v54  ;;  %v7382_v62 = vpop.permute.xlu1 %7381 }
 0x3f1   : > { %v5980_v18 = vrot.slane %v5942_v11, 1  ;;  %v5982_v28 = vrot.slane %v5943_v10, 1  ;;  %v5983_v8 = vrot.slane %v5944_v29, 1  ;;  %v6020_v19 = vmul.f32 %v7837_v23, %v12484_v52 }
 0x3f2   : > { %7217 = vmatprep.mubr.msk.bf16.mxu1 %vm6501_vm2, %v6560_v38  ;;  %v6021_v61 = vmul.f32 %v7837_v23, %v12485_v56  ;;  %v6022_v49 = vmul.f32 %v7837_v23, %v12486_v1  ;;  %v6057_v20 = vrot.slane %v6019_v51, 2  ;;  %v6091_v46 = vmul.f32 %v7838_v9, %v12485_v56 }
 0x3f3   : > { %v5981_v54 = vsel %vm471_vm0, %v5979_v0, %v5980_v18  ;;  %v5984_v25 = vsel %vm471_vm0, %v5982_v28, %v5983_v8  ;;  %v6058_v44 = vrot.slane %v6020_v19, 2  ;;  %v6092_v52 = vmul.f32 %v7838_v9, %v12487_v35 }
 0x3f4   : > { %v5999_v47 = vadd.f32 %v5981_v54, %v5921_v4  ;;  %v6000_v31 = vadd.f32 %v5984_v25, %v5922_v22  ;;  %v6060_v24 = vrot.slane %v6021_v61, 2  ;;  %v6061_v17 = vrot.slane %v6022_v49, 2  ;;  %v7377_v4 = vpop.permute.xlu0 %7376 }
 0x3f5   : > { %v6059_v2 = vsel %vm512_vm1, %v6057_v20, %v6058_v44  ;;  %v6119_v58 = vmul.f32 %v7839_v3, %v12485_v56  ;;  %v6120_v57 = vmul.f32 %v7839_v3, %v12486_v1  ;;  %v6121_v45 = vmul.f32 %v7839_v3, %v12487_v35 }
 0x3f6   : > { %v6062_v12 = vsel %vm512_vm1, %v6060_v24, %v6061_v17  ;;  %v6077_v16 = vadd.f32 %v6059_v2, %v5999_v47  ;;  %v6122_v30 = vmul.f32 %v7839_v3, %v12488_v55  ;;  %v6197_v53 = vmul.f32 %v7840_v32, %v12485_v56  ;;  %v12523_v24 = vld [vmem:[#allocation31_spill] sm:$0xff] }
 0x3f7   : > { %v6078_v6 = vadd.f32 %v6062_v12, %v6000_v31  ;;  %v6157_v40 = vrot.slane %v6119_v58, 1  ;;  %v6158_v50 = vrot.slane %v6120_v57, 1  ;;  %v6160_v13 = vrot.slane %v6121_v45, 1 }
 0x3f8   : > { %v6099_v63 = vadd.f32 %v6091_v46, %v6077_v16  ;;  %v6161_v48 = vrot.slane %v6122_v30, 1  ;;  %v6198_v41 = vmul.f32 %v7840_v32, %v12486_v1  ;;  %v6199_v37 = vmul.f32 %v7840_v32, %v12487_v35 }
 0x3f9   : > { %v6100_v27 = vadd.f32 %v6092_v52, %v6078_v6  ;;  %v6159_v39 = vsel %vm471_vm0, %v6157_v40, %v6158_v50  ;;  %v6200_v33 = vmul.f32 %v7840_v32, %v12488_v55  ;;  %v6235_v26 = vrot.slane %v6197_v53, 2 }
 0x3fa   : > { %v6162_v56 = vsel %vm471_vm0, %v6160_v13, %v6161_v48  ;;  %v6177_v11 = vadd.f32 %v6159_v39, %v6099_v63  ;;  %v6236_v10 = vrot.slane %v6198_v41, 2  ;;  %v6238_v29 = vrot.slane %v6199_v37, 2 }
 0x3fb   : > { %v6533_v1 = vsel %vm6501_vm2, %v12089_v15, %v7359_v34  ;;  %v6540_v35 = vsel %vm6510_vm3, %v12096_v60, %v7368_v42  ;;  %v6178_v38 = vadd.f32 %v6162_v56, %v6100_v27  ;;  %v6239_v55 = vrot.slane %v6200_v33, 2 }
 0x3fc   : > { %v6237_v22 = vsel %vm512_vm1, %v6235_v26, %v6236_v10  ;;  %v7384_v0 = vunpack.i.h.bf16 %v7382_v62  ;;  %v7383_v23 = vunpack.i.l.bf16 %v7382_v62  ;;  %v7379_v51 = vunpack.i.h.bf16 %v7377_v4 }
 0x3fd   : > { %v6541_v18 = vsel %vm6510_vm3, %v6533_v1, %v7369_v43  ;;  %v6240_v7 = vsel %vm512_vm1, %v6238_v29, %v6239_v55  ;;  %v6255_v28 = vadd.f32 %v6237_v22, %v6177_v11  ;;  %v7378_v34 = vunpack.i.l.bf16 %v7377_v4 }
 0x3fe   : > { %v6256_v15 = vadd.f32 %v6240_v7, %v6178_v38  ;;  %v6549_v8 = vsel %vm6519_vm4, %v6541_v18, %v7379_v51  ;;  %v6524_v42 = vsel %vm6519_vm4, %v12086_v21, %v7383_v23  ;;  %v6525_v60 = vsel %vm6519_vm4, %v12092_v36, %v7384_v0  ;;  %v7179_v19 = vpop.f32.mrb[0].mxu0  ;;  %v7842_v21 = vld [vmem:[%s12307_s4 + $0x8] ss:$0 sm:$0xff]  ;;  %v12522_v36 = vld [vmem:[#allocation30_spill] sm:$0xff] }
 0x3ff   : > { %v6269_v61 = vmul.f32 %v7841_v14, %v6255_v28  ;;  %v6548_v43 = vsel %vm6519_vm4, %v6540_v35, %v7378_v34  ;;  %v6558_v49 = vpack.c.bf16 %v6525_v60, %v6524_v42  ;;  %v7180_v20 = vpop.f32.mrb[1].mxu0  ;;  %v6299_v52 = vmul.f32 %v12491_v59, %v12522_v36 }
 0x400   : > { %v6270_v9 = vmul.f32 %v7841_v14, %v6256_v15  ;;  %v6559_v46 = vpack.c.bf16 %v6549_v8, %v6548_v43  ;;  %v7181_v54 = vadd.f32 %v7180_v20, %v7179_v19  ;;  %v7182_v25 = vpop.f32.mrb[2].mxu0  ;;  %v6300_v17 = vmul.f32 %v12493_v5, %v12523_v24  ;;  %v12260_v5 = vld [vmem:[%s12309_s6] ss:$0 sm:$0xff] }
 0x401   : > { %v6283_v44 = vadd.f32 %v7842_v21, %v6269_v61  ;;  %v7183_v47 = vpop.f32.mrb[3].mxu0 }
 0x402   : > { %v6284_v31 = vadd.f32 %v7842_v21, %v6270_v9  ;;  %6775 = vmatprep.mubr.bf16.mxu0 %v6559_v46  ;;  %v7184_v2 = vadd.f32 %v7183_v47, %v7182_v25  ;;  %v6762_v50 = vadd.f32 %v7181_v54, %v12260_v5 }
 0x403   : > { %v6291_v3 = vmax.f32 %v6283_v44, 0.0  ;;  %6776 = vmatmul.mubr.bf16.gmra.mrb[8].mxu0 %v6558_v49 }
 0x404   : > { %v6292_v58 = vmax.f32 %v6284_v31, 0.0  ;;  %v6765_v41 = vadd.f32 %v7184_v2, %v12260_v5 }
 0x405   : > { %v6307_v57 = vmul.f32 %v6299_v52, %v6291_v3 }
 0x406   : > { %v6308_v45 = vmul.f32 %v6300_v17, %v6292_v58 }
 0x408   : > { %v6563_v12 = vpack.c.bf16 %v6308_v45, %v6307_v57 }
 0x40a   : > { %7218 = vmatmul.mubr.msk.bf16.gmra.mrb[8].mxu1 %vm6501_vm2, %v6563_v12 }
 0x44b   : > { %v7197_v16 = vpop.f32.mrb[0].mxu1 }
 0x44c   : > { %v7198_v30 = vpop.f32.mrb[1].mxu1 }
 0x44d   : > { %v12253_v32 = vadd.f32 %v7198_v30, %v7197_v16  ;;  %v7200_v59 = vpop.f32.mrb[2].mxu1 }
 0x44e   : > { %v7201_v53 = vpop.f32.mrb[3].mxu1 }
 0x44f   : > { %v12255_v6 = vadd.f32 %v7201_v53, %v7200_v59  ;;  %v6786_v24 = vadd.f32 %v12253_v32, %v12260_v5 }
 0x451   : > { %v6789_v57 = vadd.f32 %v12255_v6, %v12260_v5 }
 0x47a   : > { %v7215_v40 = vpop.f32.mrb[4].mxu1 }
 0x47b   : > { %v6826_v13 = vpop.f32.mrb[5].mxu1 }
 0x47c   : > { %v6827_v63 = vadd.f32 %v6826_v13, %v6762_v50  ;;  %v7216_v48 = vpop.f32.mrb[6].mxu1 }
 0x47d   : > { %v6829_v37 = vpop.f32.mrb[7].mxu1 }
 0x47e   : > { %v7152_v27 = vmul.f32 -1.442695, %v6827_v63  ;;  %v6830_v39 = vadd.f32 %v6829_v37, %v6765_v41 }
 0x480   : > { %7563 = vpow2.f32 %v7152_v27  ;;  %v7153_v33 = vmul.f32 -1.442695, %v6830_v39 }
 0x482   : > { %7565 = vpow2.f32 %v7153_v33 }
 0x48a   : > { %v7564_v26 = vpop.eup %7563 }
 0x48b   : > { %v6881_v62 = vadd.f32 1.0, %v7564_v26 }
 0x48c   : > { %v7566_v4 = vpop.eup %7565 }
 0x48d   : > { %7567 = vrcp.f32 %v6881_v62  ;;  %v6882_v56 = vadd.f32 1.0, %v7566_v4 }
 0x48f   : > { %7569 = vrcp.f32 %v6882_v56 }
 0x497   : > { %v7568_v11 = vpop.eup %7567 }
 0x498   : > { %v6905_v10 = vmul.f32 %v7568_v11, %v6827_v63 }
 0x499   : > { %v7570_v29 = vpop.eup %7569 }
 0x49a   : > { %v6913_v1 = vpack.c.bf16 %v6905_v10, %v6905_v10  ;;  %v6906_v35 = vmul.f32 %v7570_v29, %v6830_v39 }
 0x49c   : > { %6922 = vst.msk [vmem:[%s12268_s8] sm:$0xf] %vm6921_vm5, %v6913_v1  ;;  %v6914_v38 = vpack.c.bf16 %v6906_v35, %v6906_v35 }
 0x49e   : > { %6923 = vst.msk [vmem:[%s12268_s8 + $0x4] sm:$0xf] %vm6921_vm5, %v6914_v38 }
 0x4a2   : > { %v7185_v55 = vpop.f32.mrb[4].mxu0 }
 0x4a3   : > { %v7186_v22 = vpop.f32.mrb[5].mxu0 }
 0x4a4   : > { %v7187_v0 = vadd.f32 %v7186_v22, %v7185_v55  ;;  %v7188_v23 = vpop.f32.mrb[6].mxu0 }
 0x4a5   : > { %v7189_v51 = vpop.f32.mrb[7].mxu0 }
 0x4a6   : > { %v6770_v18 = vadd.f32 %v7187_v0, %v12260_v5  ;;  %v7190_v7 = vadd.f32 %v7189_v51, %v7188_v23 }
 0x4a8   : > { %v6835_v28 = vadd.f32 %v7215_v40, %v6770_v18  ;;  %v6773_v34 = vadd.f32 %v7190_v7, %v12260_v5 }
 0x4aa   : > { %v7154_v15 = vmul.f32 -1.442695, %v6835_v28  ;;  %v6838_v8 = vadd.f32 %v7216_v48, %v6773_v34 }
 0x4ac   : > { %7571 = vpow2.f32 %v7154_v15  ;;  %v7155_v42 = vmul.f32 -1.442695, %v6838_v8 }
 0x4ae   : > { %7573 = vpow2.f32 %v7155_v42 }
 0x4b6   : > { %v7572_v60 = vpop.eup %7571 }
 0x4b7   : > { %v6883_v19 = vadd.f32 1.0, %v7572_v60 }
 0x4b8   : > { %v7574_v14 = vpop.eup %7573 }
 0x4b9   : > { %7575 = vrcp.f32 %v6883_v19  ;;  %v6884_v61 = vadd.f32 1.0, %v7574_v14 }
 0x4bb   : > { %7577 = vrcp.f32 %v6884_v61 }
 0x4c3   : > { %v7576_v43 = vpop.eup %7575 }
 0x4c4   : > { %v6907_v49 = vmul.f32 %v7576_v43, %v6835_v28 }
 0x4c5   : > { %v7578_v20 = vpop.eup %7577 }
 0x4c6   : > { %v6915_v9 = vpack.c.bf16 %v6907_v49, %v6907_v49  ;;  %v6908_v46 = vmul.f32 %v7578_v20, %v6838_v8 }
 0x4c8   : > { %6924 = vst.msk [vmem:[%s12268_s8 + $0x8] sm:$0xf] %vm6921_vm5, %v6915_v9  ;;  %v6916_v54 = vpack.c.bf16 %v6908_v46, %v6908_v46 }
 0x4ca   : > { %6925 = vst.msk [vmem:[%s12268_s8 + $0xc] sm:$0xf] %vm6921_vm5, %v6916_v54 }
 0x4d6   : > { %v7191_v25 = vpop.f32.mrb[8].mxu0 }
 0x4d7   : > { %v7192_v21 = vpop.f32.mrb[9].mxu0 }
 0x4d8   : > { %v7193_v44 = vadd.f32 %v7192_v21, %v7191_v25  ;;  %v7194_v36 = vpop.f32.mrb[10].mxu0 }
 0x4d9   : > { %v7195_v52 = vpop.f32.mrb[11].mxu0 }
 0x4da   : > { %v7196_v47 = vadd.f32 %v7195_v52, %v7194_v36  ;;  %v6778_v31 = vadd.f32 %v7193_v44, %v12260_v5 }
 0x4dc   : > { %v6781_v2 = vadd.f32 %v7196_v47, %v12260_v5 }
 0x4dd   : > { %v7219_v17 = vpop.f32.mrb[8].mxu1 }
 0x4de   : > { %v6851_v3 = vadd.f32 %v7219_v17, %v6786_v24  ;;  %v6842_v58 = vpop.f32.mrb[9].mxu1 }
 0x4df   : > { %v7220_v45 = vpop.f32.mrb[10].mxu1  ;;  %v6843_v12 = vadd.f32 %v6842_v58, %v6778_v31 }
 0x4e0   : > { %v7158_v16 = vmul.f32 -1.442695, %v6851_v3  ;;  %v6854_v30 = vadd.f32 %v7220_v45, %v6789_v57  ;;  %v6845_v59 = vpop.f32.mrb[11].mxu1 }
 0x4e1   : > { %v7156_v53 = vmul.f32 -1.442695, %v6843_v12  ;;  %v6846_v40 = vadd.f32 %v6845_v59, %v6781_v2 }
 0x4e2   : > { %7579 = vpow2.f32 %v7158_v16  ;;  %v7159_v50 = vmul.f32 -1.442695, %v6854_v30 }
 0x4e3   : > { %7581 = vpow2.f32 %v7156_v53  ;;  %v7157_v13 = vmul.f32 -1.442695, %v6846_v40 }
 0x4e4   : > { %7583 = vpow2.f32 %v7159_v50 }
 0x4e5   : > { %7585 = vpow2.f32 %v7157_v13 }
 0x4ec   : > { %v7580_v32 = vpop.eup %7579 }
 0x4ed   : > { %v7582_v63 = vpop.eup %7581  ;;  %v6887_v48 = vadd.f32 1.0, %v7580_v32 }
 0x4ee   : > { %v7584_v41 = vpop.eup %7583  ;;  %v6885_v37 = vadd.f32 1.0, %v7582_v63 }
 0x4ef   : > { %v7586_v27 = vpop.eup %7585  ;;  %7587 = vrcp.f32 %v6887_v48  ;;  %v6888_v6 = vadd.f32 1.0, %v7584_v41 }
 0x4f0   : > { %7589 = vrcp.f32 %v6885_v37  ;;  %v6886_v5 = vadd.f32 1.0, %v7586_v27 }
 0x4f1   : > { %7591 = vrcp.f32 %v6888_v6 }
 0x4f2   : > { %7593 = vrcp.f32 %v6886_v5 }
 0x4f9   : > { %v7588_v39 = vpop.eup %7587 }
 0x4fa   : > { %v7590_v33 = vpop.eup %7589  ;;  %v6911_v26 = vmul.f32 %v7588_v39, %v6851_v3 }
 0x4fb   : > { %v7592_v62 = vpop.eup %7591  ;;  %v6909_v4 = vmul.f32 %v7590_v33, %v6843_v12 }
 0x4fc   : > { %v7594_v56 = vpop.eup %7593  ;;  %v6919_v11 = vpack.c.bf16 %v6911_v26, %v6911_v26  ;;  %v6912_v10 = vmul.f32 %v7592_v62, %v6854_v30 }
 0x4fd   : > { %v6917_v29 = vpack.c.bf16 %v6909_v4, %v6909_v4  ;;  %v6910_v1 = vmul.f32 %v7594_v56, %v6846_v40 }
 0x4fe   : > { %6928 = vst.msk [vmem:[%s12268_s8 + $0x18] sm:$0xf] %vm6921_vm5, %v6919_v11  ;;  %v6920_v35 = vpack.c.bf16 %v6912_v10, %v6912_v10 }
 0x4ff   : > { %6926 = vst.msk [vmem:[%s12268_s8 + $0x10] sm:$0xf] %vm6921_vm5, %v6917_v29  ;;  %v6918_v38 = vpack.c.bf16 %v6910_v1, %v6910_v1 }
 0x500   : > { %6929 = vst.msk [vmem:[%s12268_s8 + $0x1c] sm:$0xf] %vm6921_vm5, %v6920_v35 }
 0x501   : > { %6927 = vst.msk [vmem:[%s12268_s8 + $0x14] sm:$0xf] %vm6921_vm5, %v6918_v38 }
 0x502 PF: > { %s17_s26 = sadd.s32 1, %s7865_s26   ;;  %s12524_s24 = smov %s7861_s25 }
 0x503   : > { %p14_p5 = scmp.ge.s32.totalorder %s17_s26, 4   ;;  %s12525_s25 = smov %s12527_s27 }
 0x505   :  { %16 = sbr.rel (!%p14_p5) target bundleno = 2 (0x2), region = 79 }

</bundles_post_ra>
